<compile_context>
chip_gen: v6e
topology: v6e:2x2x1
jax: 0.10.0
libtpu: 0.0.40
codegen_flags: <defaults>
</compile_context>

<pallas_src>
import functools
import math

import jax
import jax.numpy as jnp
from jax.experimental import pallas as pl
from jax.experimental.pallas import tpu as pltpu


# ----------------------------------------------------------------------------
# Helpers
# ----------------------------------------------------------------------------
def _round_up(n, m):
    return ((n + m - 1) // m) * m


def _pick_tn(n, tn_max=1024):
    # Large row tiles (amortize ~0.35us/step pipeline overhead) but keep >=2 grid
    # steps when possible so v7x's 2 TensorCores both get work.  Rows multiple of 8.
    half = _round_up(max((n + 1) // 2, 8), 8)
    return min(tn_max, half)


def _pad_rows(x2d, n_padded):
    n = x2d.shape[0]
    if n_padded == n:
        return x2d
    return jnp.pad(x2d, ((0, n_padded - n), (0, 0)))


def _erf_approx(x):
    # Abramowitz & Stegun 7.1.26 (|err| < 1.5e-7, i.e. f32-level), uses only
    # ops guaranteed to lower in Mosaic (exp / mul / add / div / where).
    a1, a2, a3, a4, a5 = (0.254829592, -0.284496736, 1.421413741,
                          -1.453152027, 1.061405429)
    p = 0.3275911
    ax = jnp.abs(x)
    t = 1.0 / (1.0 + p * ax)
    poly = t * (a1 + t * (a2 + t * (a3 + t * (a4 + t * a5))))
    y = 1.0 - poly * jnp.exp(-ax * ax)
    return jnp.where(x >= 0.0, y, -y)


def _gelu_exact(x):
    # Matches F.gelu default (erf form), computed in f32.
    return 0.5 * x * (1.0 + _erf_approx(x * 0.7071067811865476))


# ----------------------------------------------------------------------------
# Kernel 1: fused 2-layer pointwise MLP  (conv1x1 -> exact GELU -> conv1x1)
#   The (tn, hidden) intermediate lives only in VMEM/vregs.
# ----------------------------------------------------------------------------
def _mlp2_kernel(x_ref, w0_ref, b0_ref, w1_ref, b1_ref, o_ref):
    x = x_ref[...].astype(jnp.bfloat16)
    h = jnp.dot(x, w0_ref[...], preferred_element_type=jnp.float32) + b0_ref[...]
    h = _gelu_exact(h)                                   # f32 on VPU/EUP
    y = jnp.dot(h.astype(jnp.bfloat16), w1_ref[...],
                preferred_element_type=jnp.float32) + b1_ref[...]
    o_ref[...] = y.astype(o_ref.dtype)


def mlp2(x2d, p, tn_max=1024):
    N, Cin = x2d.shape
    Ch = p["fc0"]["w"].shape[1]
    Cout = p["fc1"]["w"].shape[1]
    tn = _pick_tn(N, tn_max)
    Np = _round_up(N, tn)
    xp = _pad_rows(x2d, Np)
    out = pl.pallas_call(
        _mlp2_kernel,
        out_shape=jax.ShapeDtypeStruct((Np, Cout), jnp.float32),
        grid_spec=pltpu.PrefetchScalarGridSpec(
            num_scalar_prefetch=0,
            grid=(Np // tn,),
            in_specs=[
                pl.BlockSpec((tn, Cin), lambda i: (i, 0)),
                pl.BlockSpec((Cin, Ch), lambda i: (0, 0)),
                pl.BlockSpec((1, Ch), lambda i: (0, 0)),
                pl.BlockSpec((Ch, Cout), lambda i: (0, 0)),
                pl.BlockSpec((1, Cout), lambda i: (0, 0)),
            ],
            out_specs=pl.BlockSpec((tn, Cout), lambda i: (i, 0)),
        ),
        compiler_params=pltpu.CompilerParams(dimension_semantics=("parallel",)),
    )(xp, p["fc0"]["w"], p["fc0"]["b"], p["fc1"]["w"], p["fc1"]["b"])
    return out[:N] if Np != N else out


# ----------------------------------------------------------------------------
# Kernel 2: batched per-Fourier-mode complex channel mixing (Karatsuba, 3 matmuls)
#   out[m, b, o] = sum_i x[m, b, i] * w[m, i, o]   (complex)
# ----------------------------------------------------------------------------
def _spectral_kernel(xr_ref, xi_ref, wr_ref, wi_ref, ws_ref, or_ref, oi_ref):
    xr = xr_ref[...]                                     # (Mb, B, Cin) f32
    xi = xi_ref[...]
    xrb = xr.astype(jnp.bfloat16)
    xib = xi.astype(jnp.bfloat16)
    xsb = (xr + xi).astype(jnp.bfloat16)                 # sum in f32 (v5e VPU has no bf16)
    t1 = jnp.einsum("mbi,mio->mbo", xrb, wr_ref[...],
                    preferred_element_type=jnp.float32)
    t2 = jnp.einsum("mbi,mio->mbo", xib, wi_ref[...],
                    preferred_element_type=jnp.float32)
    t3 = jnp.einsum("mbi,mio->mbo", xsb, ws_ref[...],
                    preferred_element_type=jnp.float32)
    or_ref[...] = t1 - t2
    oi_ref[...] = t3 - t1 - t2


def spectral_contract(xr, xi, wr, wi, ws):
    M, B, Cin = xr.shape
    Cout = wr.shape[2]
    # Batch half the modes per grid step: 2 steps total -> per-step overhead is
    # amortized over M/2 modes and both v7x TensorCores get a step.
    Mb = M // 2 if (M % 2 == 0 and M >= 2) else M
    return pl.pallas_call(
        _spectral_kernel,
        out_shape=[
            jax.ShapeDtypeStruct((M, B, Cout), jnp.float32),
            jax.ShapeDtypeStruct((M, B, Cout), jnp.float32),
        ],
        grid_spec=pltpu.PrefetchScalarGridSpec(
            num_scalar_prefetch=0,
            grid=(M // Mb,),
            in_specs=[
                pl.BlockSpec((Mb, B, Cin), lambda g: (g, 0, 0)),
                pl.BlockSpec((Mb, B, Cin), lambda g: (g, 0, 0)),
                pl.BlockSpec((Mb, Cin, Cout), lambda g: (g, 0, 0)),
                pl.BlockSpec((Mb, Cin, Cout), lambda g: (g, 0, 0)),
                pl.BlockSpec((Mb, Cin, Cout), lambda g: (g, 0, 0)),
            ],
            out_specs=[
                pl.BlockSpec((Mb, B, Cout), lambda g: (g, 0, 0)),
                pl.BlockSpec((Mb, B, Cout), lambda g: (g, 0, 0)),
            ],
        ),
        compiler_params=pltpu.CompilerParams(dimension_semantics=("parallel",)),
    )(xr, xi, wr, wi, ws)


# ----------------------------------------------------------------------------
# Kernel 3: fused FNO block epilogue: out = GELU(spec + b_sc) + (x @ W_l + b_l)
# ----------------------------------------------------------------------------
def _fno_block_kernel(spec_ref, x_ref, w_ref, bsc_ref, bl_ref, o_ref):
    spec = spec_ref[...] + bsc_ref[...]
    skip = jnp.dot(x_ref[...].astype(jnp.bfloat16), w_ref[...],
                   preferred_element_type=jnp.float32) + bl_ref[...]
    o_ref[...] = (_gelu_exact(spec) + skip).astype(o_ref.dtype)


def fno_block_combine(spec2d, x2d, w, b_sc, b_l, tn_max=1024):
    N, C = x2d.shape
    tn = _pick_tn(N, tn_max)
    Np = _round_up(N, tn)
    spec_p = _pad_rows(spec2d, Np)
    x_p = _pad_rows(x2d, Np)
    out = pl.pallas_call(
        _fno_block_kernel,
        out_shape=jax.ShapeDtypeStruct((Np, C), jnp.float32),
        grid_spec=pltpu.PrefetchScalarGridSpec(
            num_scalar_prefetch=0,
            grid=(Np // tn,),
            in_specs=[
                pl.BlockSpec((tn, C), lambda i: (i, 0)),
                pl.BlockSpec((tn, C), lambda i: (i, 0)),
                pl.BlockSpec((C, C), lambda i: (0, 0)),
                pl.BlockSpec((1, C), lambda i: (0, 0)),
                pl.BlockSpec((1, C), lambda i: (0, 0)),
            ],
            out_specs=pl.BlockSpec((tn, C), lambda i: (i, 0)),
        ),
        compiler_params=pltpu.CompilerParams(dimension_semantics=("parallel",)),
    )(spec_p, x_p, w, b_sc, b_l)
    return out[:N] if Np != N else out


# ----------------------------------------------------------------------------
# Spectral conv (FFT glue in plain JAX, mode mixing in Pallas)
# ----------------------------------------------------------------------------
# TODO(synk): corner-mode gather/scatter around the FFT still materializes small
# intermediates in XLA; moving it into the Pallas kernel matters once H,W grow.
def spectral_conv(x, wr, wi, ws, m1, m2):
    # x: (B, H, W, C) f32;  wr/wi/ws: (2*m1*m2, C, C) bf16
    B, H, W, C = x.shape
    x_ft = jnp.fft.rfft2(x, axes=(1, 2))                 # (B, H, W//2+1, C) c64
    Wf = x_ft.shape[2]
    assert m2 <= Wf and 2 * m1 <= H
    blk1 = x_ft[:, :m1, :m2, :]
    blk2 = x_ft[:, H - m1:, :m2, :]
    xm = jnp.concatenate([blk1, blk2], axis=1)           # (B, 2*m1, m2, C)
    xm = jnp.transpose(xm, (1, 2, 0, 3)).reshape(2 * m1 * m2, B, C)
    xr = jnp.real(xm).astype(jnp.float32)
    xi = jnp.imag(xm).astype(jnp.float32)

    o_r, o_i = spectral_contract(xr, xi, wr, wi, ws)     # (2*m1*m2, B, C) each
    om = (o_r + 1j * o_i).astype(x_ft.dtype)
    om = om.reshape(2 * m1, m2, B, C).transpose(2, 0, 1, 3)   # (B, 2*m1, m2, C)

    out_ft = jnp.zeros((B, H, Wf, C), dtype=x_ft.dtype)
    out_ft = out_ft.at[:, :m1, :m2, :].set(om[:, :m1])
    out_ft = out_ft.at[:, H - m1:, :m2, :].set(om[:, m1:])
    return jnp.fft.irfft2(out_ft, s=(H, W), axes=(1, 2)).astype(jnp.float32)


# ----------------------------------------------------------------------------
# Parameter init (deterministic; only arrays go into the pytree -> jit-safe)
# ----------------------------------------------------------------------------
def init_params(key, in_ch, out_ch, hidden=32, lift=128, proj=128, n_modes=(8, 8)):
    m1, m2 = n_modes
    keys = iter(jax.random.split(key, 64))

    def conv_p(cin, cout):
        bound = 1.0 / math.sqrt(cin)
        w = jax.random.uniform(next(keys), (cin, cout), jnp.float32, -bound, bound)
        b = jax.random.uniform(next(keys), (1, cout), jnp.float32, -bound, bound)
        return {"w": w.astype(jnp.bfloat16), "b": b}

    def spectral_p(cin, cout):
        scale = 1.0 / (cin * cout)
        shp = (2 * m1 * m2, cin, cout)
        wr = scale * jax.random.normal(next(keys), shp, jnp.float32)
        wi = scale * jax.random.normal(next(keys), shp, jnp.float32)
        b_sc = 0.01 * jax.random.normal(next(keys), (1, cout), jnp.float32)
        return {
            "wr": wr.astype(jnp.bfloat16),
            "wi": wi.astype(jnp.bfloat16),
            "ws": (wr + wi).astype(jnp.bfloat16),   # precomputed Karatsuba sum
            "b": b_sc,
        }

    return {
        "lifting": {"fc0": conv_p(in_ch, lift), "fc1": conv_p(lift, hidden)},
        "projection": {"fc0": conv_p(hidden, proj), "fc1": conv_p(proj, out_ch)},
        "blocks": [{"sc": spectral_p(hidden, hidden), "l": conv_p(hidden, hidden)}
                   for _ in range(4)],
    }


# ----------------------------------------------------------------------------
# Full DDFNO forward
# ----------------------------------------------------------------------------
def ddfno_forward(params, x_nchw, xlim, ylim, *, n_modes):
    del xlim, ylim  # TODO(synk): only used by DDOpAdditive domain decomposition (not reproduced)
    m1, m2 = n_modes

    B, Cin, H, W = x_nchw.shape
    x = jnp.transpose(x_nchw, (0, 2, 3, 1)).astype(jnp.float32)   # (B,H,W,Cin)
    N = B * H * W
    C = int(params["lifting"]["fc1"]["w"].shape[1])               # hidden (static)

    h2d = mlp2(x.reshape(N, Cin), params["lifting"])              # (N, hidden)
    h = h2d.reshape(B, H, W, C)

    for blk in params["blocks"]:
        spec = spectral_conv(h, blk["sc"]["wr"], blk["sc"]["wi"], blk["sc"]["ws"],
                             m1, m2)                              # (B,H,W,C)
        out2d = fno_block_combine(
            spec.reshape(N, C), h.reshape(N, C),
            blk["l"]["w"], blk["sc"]["b"], blk["l"]["b"])
        h = out2d.reshape(B, H, W, C)

    y2d = mlp2(h.reshape(N, C), params["projection"])
    Cout = y2d.shape[-1]
    y = y2d.reshape(B, H, W, Cout)
    return jnp.transpose(y, (0, 3, 1, 2))                         # back to NCHW


# ----------------------------------------------------------------------------
if __name__ == "__main__":
    key = jax.random.PRNGKey(0)
    pkey, xkey = jax.random.split(key)

    B, Cin, H, W = 2, 4, 16, 16
    Cout = 3
    n_modes = (8, 8)

    params = init_params(pkey, Cin, Cout, n_modes=n_modes)
    x = jax.random.normal(xkey, (B, Cin, H, W), jnp.float32)

    fwd = jax.jit(functools.partial(ddfno_forward, n_modes=n_modes))
    y = fwd(params, x, 1.0, 1.0)
    y = jax.block_until_ready(y)

    assert y.shape == (B, Cout, H, W), y.shape
    assert bool(jnp.all(jnp.isfinite(y)))
    print("KERNEL_OK")
</pallas_src>

<mosaic_0001>
module attributes {stable_mosaic.version = 11 : i64} {
  func.func @_mlp2_kernel(%arg0: i32, %arg1: memref<256x4xf32, #tpu.memory_space<vmem>>, %arg2: memref<4x128xbf16, #tpu.memory_space<vmem>>, %arg3: memref<1x128xf32, #tpu.memory_space<vmem>>, %arg4: memref<128x32xbf16, #tpu.memory_space<vmem>>, %arg5: memref<1x32xf32, #tpu.memory_space<vmem>>, %arg6: memref<256x32xf32, #tpu.memory_space<vmem>>) attributes {dimension_semantics = [#tpu.dimension_semantics<parallel>], iteration_bounds = array<i64: 2>, scalar_prefetch = 0 : i64, scratch_operands = 0 : i64, tpu.core_type = #tpu.core_type<tc>, window_params = [{transform_indices = @transform_0, window_bounds = array<i64: 256, 4>}, {pipeline_mode = #tpu.pipeline_mode<synchronous>, transform_indices = @transform_1, window_bounds = array<i64: 4, 128>}, {pipeline_mode = #tpu.pipeline_mode<synchronous>, transform_indices = @transform_2, window_bounds = array<i64: 1, 128>}, {pipeline_mode = #tpu.pipeline_mode<synchronous>, transform_indices = @transform_3, window_bounds = array<i64: 128, 32>}, {pipeline_mode = #tpu.pipeline_mode<synchronous>, transform_indices = @transform_4, window_bounds = array<i64: 1, 32>}, {transform_indices = @transform_5, window_bounds = array<i64: 256, 32>}]} {
    %c0 = arith.constant 0 : index
    %c0_0 = arith.constant 0 : index
    %0 = vector.load %arg1[%c0, %c0_0] : memref<256x4xf32, #tpu.memory_space<vmem>>, vector<256x4xf32>
    %1 = arith.truncf %0 : vector<256x4xf32> to vector<256x4xbf16>
    %c0_1 = arith.constant 0 : index
    %c0_2 = arith.constant 0 : index
    %2 = vector.load %arg2[%c0_1, %c0_2] : memref<4x128xbf16, #tpu.memory_space<vmem>>, vector<4x128xbf16>
    %cst = arith.constant dense<0.000000e+00> : vector<256x128xf32>
    %3 = tpu.matmul %1, %2, %cst {dimension_numbers = #tpu.dot_dimension_numbers<[1], [0], [0], [1], [0, 0, 1, 1], [], []>} : vector<256x4xbf16>, vector<4x128xbf16>, vector<256x128xf32> -> vector<256x128xf32>
    %c0_3 = arith.constant 0 : index
    %c0_4 = arith.constant 0 : index
    %4 = vector.load %arg3[%c0_3, %c0_4] : memref<1x128xf32, #tpu.memory_space<vmem>>, vector<1x128xf32>
    %5 = vector.broadcast %4 : vector<1x128xf32> to vector<256x128xf32>
    %6 = arith.addf %3, %5 : vector<256x128xf32>
    %cst_5 = arith.constant 5.000000e-01 : f32
    %7 = vector.broadcast %cst_5 : f32 to vector<256x128xf32>
    %8 = arith.mulf %7, %6 : vector<256x128xf32>
    %cst_6 = arith.constant 0.707106769 : f32
    %9 = vector.broadcast %cst_6 : f32 to vector<256x128xf32>
    %10 = arith.mulf %6, %9 : vector<256x128xf32>
    %11 = math.absf %10 : vector<256x128xf32>
    %cst_7 = arith.constant 0.327591091 : f32
    %12 = vector.broadcast %cst_7 : f32 to vector<256x128xf32>
    %13 = arith.mulf %12, %11 : vector<256x128xf32>
    %cst_8 = arith.constant 1.000000e+00 : f32
    %14 = vector.broadcast %cst_8 : f32 to vector<256x128xf32>
    %15 = arith.addf %14, %13 : vector<256x128xf32>
    %cst_9 = arith.constant 1.000000e+00 : f32
    %16 = vector.broadcast %cst_9 : f32 to vector<256x128xf32>
    %17 = arith.divf %16, %15 : vector<256x128xf32>
    %cst_10 = arith.constant 1.06140542 : f32
    %18 = vector.broadcast %cst_10 : f32 to vector<256x128xf32>
    %19 = arith.mulf %17, %18 : vector<256x128xf32>
    %cst_11 = arith.constant -1.45315206 : f32
    %20 = vector.broadcast %cst_11 : f32 to vector<256x128xf32>
    %21 = arith.addf %20, %19 : vector<256x128xf32>
    %22 = arith.mulf %17, %21 : vector<256x128xf32>
    %cst_12 = arith.constant 1.42141378 : f32
    %23 = vector.broadcast %cst_12 : f32 to vector<256x128xf32>
    %24 = arith.addf %23, %22 : vector<256x128xf32>
    %25 = arith.mulf %17, %24 : vector<256x128xf32>
    %cst_13 = arith.constant -0.284496725 : f32
    %26 = vector.broadcast %cst_13 : f32 to vector<256x128xf32>
    %27 = arith.addf %26, %25 : vector<256x128xf32>
    %28 = arith.mulf %17, %27 : vector<256x128xf32>
    %cst_14 = arith.constant 0.254829586 : f32
    %29 = vector.broadcast %cst_14 : f32 to vector<256x128xf32>
    %30 = arith.addf %29, %28 : vector<256x128xf32>
    %31 = arith.mulf %17, %30 : vector<256x128xf32>
    %cst_15 = arith.constant 0.000000e+00 : f32
    %32 = vector.broadcast %cst_15 : f32 to vector<256x128xf32>
    %33 = arith.subf %32, %11 : vector<256x128xf32>
    %34 = arith.mulf %33, %11 : vector<256x128xf32>
    %35 = math.exp %34 : vector<256x128xf32>
    %36 = arith.mulf %31, %35 : vector<256x128xf32>
    %cst_16 = arith.constant 1.000000e+00 : f32
    %37 = vector.broadcast %cst_16 : f32 to vector<256x128xf32>
    %38 = arith.subf %37, %36 : vector<256x128xf32>
    %cst_17 = arith.constant 0.000000e+00 : f32
    %39 = vector.broadcast %cst_17 : f32 to vector<256x128xf32>
    %40 = arith.cmpf oge, %10, %39 : vector<256x128xf32>
    %cst_18 = arith.constant 0.000000e+00 : f32
    %41 = vector.broadcast %cst_18 : f32 to vector<256x128xf32>
    %42 = arith.subf %41, %38 : vector<256x128xf32>
    %43 = arith.select %40, %38, %42 : vector<256x128xi1>, vector<256x128xf32>
    %cst_19 = arith.constant 1.000000e+00 : f32
    %44 = vector.broadcast %cst_19 : f32 to vector<256x128xf32>
    %45 = arith.addf %44, %43 : vector<256x128xf32>
    %46 = arith.mulf %8, %45 : vector<256x128xf32>
    %47 = arith.truncf %46 : vector<256x128xf32> to vector<256x128xbf16>
    %c0_20 = arith.constant 0 : index
    %c0_21 = arith.constant 0 : index
    %48 = vector.load %arg4[%c0_20, %c0_21] : memref<128x32xbf16, #tpu.memory_space<vmem>>, vector<128x32xbf16>
    %cst_22 = arith.constant dense<0.000000e+00> : vector<256x32xf32>
    %49 = tpu.matmul %47, %48, %cst_22 {dimension_numbers = #tpu.dot_dimension_numbers<[1], [0], [0], [1], [0, 0, 1, 1], [], []>} : vector<256x128xbf16>, vector<128x32xbf16>, vector<256x32xf32> -> vector<256x32xf32>
    %c0_23 = arith.constant 0 : index
    %c0_24 = arith.constant 0 : index
    %50 = vector.load %arg5[%c0_23, %c0_24] : memref<1x32xf32, #tpu.memory_space<vmem>>, vector<1x32xf32>
    %51 = vector.broadcast %50 : vector<1x32xf32> to vector<256x32xf32>
    %52 = arith.addf %49, %51 : vector<256x32xf32>
    %c0_25 = arith.constant 0 : index
    %c0_26 = arith.constant 0 : index
    %53 = vector.load %arg6[%c0_25, %c0_26] : memref<256x32xf32, #tpu.memory_space<vmem>>, vector<256x32xf32>
    tpu.vector_store %arg6[%c0_25, %c0_26], %52 {strides = array<i32>} : memref<256x32xf32, #tpu.memory_space<vmem>>, vector<256x32xf32>,
    return
  }
  func.func @transform_0(%arg0: i32) -> (i32, i32) {
    %c0_i32 = arith.constant 0 : i32
    %c0_i32_0 = arith.constant 0 : i32
    return %arg0, %c0_i32 : i32, i32
  }
  func.func @transform_1(%arg0: i32) -> (i32, i32) {
    %c0_i32 = arith.constant 0 : i32
    %c0_i32_0 = arith.constant 0 : i32
    %c0_i32_1 = arith.constant 0 : i32
    return %c0_i32, %c0_i32_0 : i32, i32
  }
  func.func @transform_2(%arg0: i32) -> (i32, i32) {
    %c0_i32 = arith.constant 0 : i32
    %c0_i32_0 = arith.constant 0 : i32
    %c0_i32_1 = arith.constant 0 : i32
    return %c0_i32, %c0_i32_0 : i32, i32
  }
  func.func @transform_3(%arg0: i32) -> (i32, i32) {
    %c0_i32 = arith.constant 0 : i32
    %c0_i32_0 = arith.constant 0 : i32
    %c0_i32_1 = arith.constant 0 : i32
    return %c0_i32, %c0_i32_0 : i32, i32
  }
  func.func @transform_4(%arg0: i32) -> (i32, i32) {
    %c0_i32 = arith.constant 0 : i32
    %c0_i32_0 = arith.constant 0 : i32
    %c0_i32_1 = arith.constant 0 : i32
    return %c0_i32, %c0_i32_0 : i32, i32
  }
  func.func @transform_5(%arg0: i32) -> (i32, i32) {
    %c0_i32 = arith.constant 0 : i32
    %c0_i32_0 = arith.constant 0 : i32
    return %arg0, %c0_i32 : i32, i32
  }
}

module attributes {stable_mosaic.version = 11 : i64} {
  func.func @_spectral_kernel(%arg0: i32, %arg1: memref<64x2x32xf32, #tpu.memory_space<vmem>>, %arg2: memref<64x2x32xf32, #tpu.memory_space<vmem>>, %arg3: memref<64x32x32xbf16, #tpu.memory_space<vmem>>, %arg4: memref<64x32x32xbf16, #tpu.memory_space<vmem>>, %arg5: memref<64x32x32xbf16, #tpu.memory_space<vmem>>, %arg6: memref<64x2x32xf32, #tpu.memory_space<vmem>>, %arg7: memref<64x2x32xf32, #tpu.memory_space<vmem>>) attributes {dimension_semantics = [#tpu.dimension_semantics<parallel>], iteration_bounds = array<i64: 2>, scalar_prefetch = 0 : i64, scratch_operands = 0 : i64, tpu.core_type = #tpu.core_type<tc>, window_params = [{transform_indices = @transform_0, window_bounds = array<i64: 64, 2, 32>}, {transform_indices = @transform_1, window_bounds = array<i64: 64, 2, 32>}, {transform_indices = @transform_2, window_bounds = array<i64: 64, 32, 32>}, {transform_indices = @transform_3, window_bounds = array<i64: 64, 32, 32>}, {transform_indices = @transform_4, window_bounds = array<i64: 64, 32, 32>}, {transform_indices = @transform_5, window_bounds = array<i64: 64, 2, 32>}, {transform_indices = @transform_6, window_bounds = array<i64: 64, 2, 32>}]} {
    %c0 = arith.constant 0 : index
    %c0_0 = arith.constant 0 : index
    %c0_1 = arith.constant 0 : index
    %0 = vector.load %arg1[%c0, %c0_0, %c0_1] : memref<64x2x32xf32, #tpu.memory_space<vmem>>, vector<64x2x32xf32>
    %c0_2 = arith.constant 0 : index
    %c0_3 = arith.constant 0 : index
    %c0_4 = arith.constant 0 : index
    %1 = vector.load %arg2[%c0_2, %c0_3, %c0_4] : memref<64x2x32xf32, #tpu.memory_space<vmem>>, vector<64x2x32xf32>
    %2 = arith.truncf %0 : vector<64x2x32xf32> to vector<64x2x32xbf16>
    %3 = arith.truncf %1 : vector<64x2x32xf32> to vector<64x2x32xbf16>
    %4 = arith.addf %0, %1 : vector<64x2x32xf32>
    %5 = arith.truncf %4 : vector<64x2x32xf32> to vector<64x2x32xbf16>
    %c0_5 = arith.constant 0 : index
    %c0_6 = arith.constant 0 : index
    %c0_7 = arith.constant 0 : index
    %6 = vector.load %arg3[%c0_5, %c0_6, %c0_7] : memref<64x32x32xbf16, #tpu.memory_space<vmem>>, vector<64x32x32xbf16>
    "tpu.trace_start"() <{level = 10 : i32, message = "mbi,mio->mbo"}> : () -> ()
    %cst = arith.constant dense<0.000000e+00> : vector<64x2x32xf32>
    %7 = tpu.matmul %2, %6, %cst {dimension_numbers = #tpu.dot_dimension_numbers<[2], [1], [1], [2], [0, 0, 0, 1, 1, 2], [0], [0]>} : vector<64x2x32xbf16>, vector<64x32x32xbf16>, vector<64x2x32xf32> -> vector<64x2x32xf32>
    "tpu.trace_stop"() : () -> ()
    %c0_8 = arith.constant 0 : index
    %c0_9 = arith.constant 0 : index
    %c0_10 = arith.constant 0 : index
    %8 = vector.load %arg4[%c0_8, %c0_9, %c0_10] : memref<64x32x32xbf16, #tpu.memory_space<vmem>>, vector<64x32x32xbf16>
    "tpu.trace_start"() <{level = 10 : i32, message = "mbi,mio->mbo"}> : () -> ()
    %cst_11 = arith.constant dense<0.000000e+00> : vector<64x2x32xf32>
    %9 = tpu.matmul %3, %8, %cst_11 {dimension_numbers = #tpu.dot_dimension_numbers<[2], [1], [1], [2], [0, 0, 0, 1, 1, 2], [0], [0]>} : vector<64x2x32xbf16>, vector<64x32x32xbf16>, vector<64x2x32xf32> -> vector<64x2x32xf32>
    "tpu.trace_stop"() : () -> ()
    %c0_12 = arith.constant 0 : index
    %c0_13 = arith.constant 0 : index
    %c0_14 = arith.constant 0 : index
    %10 = vector.load %arg5[%c0_12, %c0_13, %c0_14] : memref<64x32x32xbf16, #tpu.memory_space<vmem>>, vector<64x32x32xbf16>
    "tpu.trace_start"() <{level = 10 : i32, message = "mbi,mio->mbo"}> : () -> ()
    %cst_15 = arith.constant dense<0.000000e+00> : vector<64x2x32xf32>
    %11 = tpu.matmul %5, %10, %cst_15 {dimension_numbers = #tpu.dot_dimension_numbers<[2], [1], [1], [2], [0, 0, 0, 1, 1, 2], [0], [0]>} : vector<64x2x32xbf16>, vector<64x32x32xbf16>, vector<64x2x32xf32> -> vector<64x2x32xf32>
    "tpu.trace_stop"() : () -> ()
    %12 = arith.subf %7, %9 : vector<64x2x32xf32>
    %c0_16 = arith.constant 0 : index
    %c0_17 = arith.constant 0 : index
    %c0_18 = arith.constant 0 : index
    %13 = vector.load %arg6[%c0_16, %c0_17, %c0_18] : memref<64x2x32xf32, #tpu.memory_space<vmem>>, vector<64x2x32xf32>
    tpu.vector_store %arg6[%c0_16, %c0_17, %c0_18], %12 {strides = array<i32>} : memref<64x2x32xf32, #tpu.memory_space<vmem>>, vector<64x2x32xf32>,
    %14 = arith.subf %11, %7 : vector<64x2x32xf32>
    %15 = arith.subf %14, %9 : vector<64x2x32xf32>
    %c0_19 = arith.constant 0 : index
    %c0_20 = arith.constant 0 : index
    %c0_21 = arith.constant 0 : index
    %16 = vector.load %arg7[%c0_19, %c0_20, %c0_21] : memref<64x2x32xf32, #tpu.memory_space<vmem>>, vector<64x2x32xf32>
    tpu.vector_store %arg7[%c0_19, %c0_20, %c0_21], %15 {strides = array<i32>} : memref<64x2x32xf32, #tpu.memory_space<vmem>>, vector<64x2x32xf32>,
    return
  }
  func.func @transform_0(%arg0: i32) -> (i32, i32, i32) {
    %c0_i32 = arith.constant 0 : i32
    %c0_i32_0 = arith.constant 0 : i32
    %c0_i32_1 = arith.constant 0 : i32
    return %arg0, %c0_i32, %c0_i32_0 : i32, i32, i32
  }
  func.func @transform_1(%arg0: i32) -> (i32, i32, i32) {
    %c0_i32 = arith.constant 0 : i32
    %c0_i32_0 = arith.constant 0 : i32
    %c0_i32_1 = arith.constant 0 : i32
    return %arg0, %c0_i32, %c0_i32_0 : i32, i32, i32
  }
  func.func @transform_2(%arg0: i32) -> (i32, i32, i32) {
    %c0_i32 = arith.constant 0 : i32
    %c0_i32_0 = arith.constant 0 : i32
    %c0_i32_1 = arith.constant 0 : i32
    return %arg0, %c0_i32, %c0_i32_0 : i32, i32, i32
  }
  func.func @transform_3(%arg0: i32) -> (i32, i32, i32) {
    %c0_i32 = arith.constant 0 : i32
    %c0_i32_0 = arith.constant 0 : i32
    %c0_i32_1 = arith.constant 0 : i32
    return %arg0, %c0_i32, %c0_i32_0 : i32, i32, i32
  }
  func.func @transform_4(%arg0: i32) -> (i32, i32, i32) {
    %c0_i32 = arith.constant 0 : i32
    %c0_i32_0 = arith.constant 0 : i32
    %c0_i32_1 = arith.constant 0 : i32
    return %arg0, %c0_i32, %c0_i32_0 : i32, i32, i32
  }
  func.func @transform_5(%arg0: i32) -> (i32, i32, i32) {
    %c0_i32 = arith.constant 0 : i32
    %c0_i32_0 = arith.constant 0 : i32
    %c0_i32_1 = arith.constant 0 : i32
    return %arg0, %c0_i32, %c0_i32_0 : i32, i32, i32
  }
  func.func @transform_6(%arg0: i32) -> (i32, i32, i32) {
    %c0_i32 = arith.constant 0 : i32
    %c0_i32_0 = arith.constant 0 : i32
    %c0_i32_1 = arith.constant 0 : i32
    return %arg0, %c0_i32, %c0_i32_0 : i32, i32, i32
  }
}

module attributes {stable_mosaic.version = 11 : i64} {
  func.func @_fno_block_kernel(%arg0: i32, %arg1: memref<256x32xf32, #tpu.memory_space<vmem>>, %arg2: memref<256x32xf32, #tpu.memory_space<vmem>>, %arg3: memref<32x32xbf16, #tpu.memory_space<vmem>>, %arg4: memref<1x32xf32, #tpu.memory_space<vmem>>, %arg5: memref<1x32xf32, #tpu.memory_space<vmem>>, %arg6: memref<256x32xf32, #tpu.memory_space<vmem>>) attributes {dimension_semantics = [#tpu.dimension_semantics<parallel>], iteration_bounds = array<i64: 2>, scalar_prefetch = 0 : i64, scratch_operands = 0 : i64, tpu.core_type = #tpu.core_type<tc>, window_params = [{transform_indices = @transform_0, window_bounds = array<i64: 256, 32>}, {transform_indices = @transform_1, window_bounds = array<i64: 256, 32>}, {pipeline_mode = #tpu.pipeline_mode<synchronous>, transform_indices = @transform_2, window_bounds = array<i64: 32, 32>}, {pipeline_mode = #tpu.pipeline_mode<synchronous>, transform_indices = @transform_3, window_bounds = array<i64: 1, 32>}, {pipeline_mode = #tpu.pipeline_mode<synchronous>, transform_indices = @transform_4, window_bounds = array<i64: 1, 32>}, {transform_indices = @transform_5, window_bounds = array<i64: 256, 32>}]} {
    %c0 = arith.constant 0 : index
    %c0_0 = arith.constant 0 : index
    %0 = vector.load %arg1[%c0, %c0_0] : memref<256x32xf32, #tpu.memory_space<vmem>>, vector<256x32xf32>
    %c0_1 = arith.constant 0 : index
    %c0_2 = arith.constant 0 : index
    %1 = vector.load %arg4[%c0_1, %c0_2] : memref<1x32xf32, #tpu.memory_space<vmem>>, vector<1x32xf32>
    %2 = vector.broadcast %1 : vector<1x32xf32> to vector<256x32xf32>
    %3 = arith.addf %0, %2 : vector<256x32xf32>
    %c0_3 = arith.constant 0 : index
    %c0_4 = arith.constant 0 : index
    %4 = vector.load %arg2[%c0_3, %c0_4] : memref<256x32xf32, #tpu.memory_space<vmem>>, vector<256x32xf32>
    %5 = arith.truncf %4 : vector<256x32xf32> to vector<256x32xbf16>
    %c0_5 = arith.constant 0 : index
    %c0_6 = arith.constant 0 : index
    %6 = vector.load %arg3[%c0_5, %c0_6] : memref<32x32xbf16, #tpu.memory_space<vmem>>, vector<32x32xbf16>
    %cst = arith.constant dense<0.000000e+00> : vector<256x32xf32>
    %7 = tpu.matmul %5, %6, %cst {dimension_numbers = #tpu.dot_dimension_numbers<[1], [0], [0], [1], [0, 0, 1, 1], [], []>} : vector<256x32xbf16>, vector<32x32xbf16>, vector<256x32xf32> -> vector<256x32xf32>
    %c0_7 = arith.constant 0 : index
    %c0_8 = arith.constant 0 : index
    %8 = vector.load %arg5[%c0_7, %c0_8] : memref<1x32xf32, #tpu.memory_space<vmem>>, vector<1x32xf32>
    %9 = vector.broadcast %8 : vector<1x32xf32> to vector<256x32xf32>
    %10 = arith.addf %7, %9 : vector<256x32xf32>
    %cst_9 = arith.constant 5.000000e-01 : f32
    %11 = vector.broadcast %cst_9 : f32 to vector<256x32xf32>
    %12 = arith.mulf %11, %3 : vector<256x32xf32>
    %cst_10 = arith.constant 0.707106769 : f32
    %13 = vector.broadcast %cst_10 : f32 to vector<256x32xf32>
    %14 = arith.mulf %3, %13 : vector<256x32xf32>
    %15 = math.absf %14 : vector<256x32xf32>
    %cst_11 = arith.constant 0.327591091 : f32
    %16 = vector.broadcast %cst_11 : f32 to vector<256x32xf32>
    %17 = arith.mulf %16, %15 : vector<256x32xf32>
    %cst_12 = arith.constant 1.000000e+00 : f32
    %18 = vector.broadcast %cst_12 : f32 to vector<256x32xf32>
    %19 = arith.addf %18, %17 : vector<256x32xf32>
    %cst_13 = arith.constant 1.000000e+00 : f32
    %20 = vector.broadcast %cst_13 : f32 to vector<256x32xf32>
    %21 = arith.divf %20, %19 : vector<256x32xf32>
    %cst_14 = arith.constant 1.06140542 : f32
    %22 = vector.broadcast %cst_14 : f32 to vector<256x32xf32>
    %23 = arith.mulf %21, %22 : vector<256x32xf32>
    %cst_15 = arith.constant -1.45315206 : f32
    %24 = vector.broadcast %cst_15 : f32 to vector<256x32xf32>
    %25 = arith.addf %24, %23 : vector<256x32xf32>
    %26 = arith.mulf %21, %25 : vector<256x32xf32>
    %cst_16 = arith.constant 1.42141378 : f32
    %27 = vector.broadcast %cst_16 : f32 to vector<256x32xf32>
    %28 = arith.addf %27, %26 : vector<256x32xf32>
    %29 = arith.mulf %21, %28 : vector<256x32xf32>
    %cst_17 = arith.constant -0.284496725 : f32
    %30 = vector.broadcast %cst_17 : f32 to vector<256x32xf32>
    %31 = arith.addf %30, %29 : vector<256x32xf32>
    %32 = arith.mulf %21, %31 : vector<256x32xf32>
    %cst_18 = arith.constant 0.254829586 : f32
    %33 = vector.broadcast %cst_18 : f32 to vector<256x32xf32>
    %34 = arith.addf %33, %32 : vector<256x32xf32>
    %35 = arith.mulf %21, %34 : vector<256x32xf32>
    %cst_19 = arith.constant 0.000000e+00 : f32
    %36 = vector.broadcast %cst_19 : f32 to vector<256x32xf32>
    %37 = arith.subf %36, %15 : vector<256x32xf32>
    %38 = arith.mulf %37, %15 : vector<256x32xf32>
    %39 = math.exp %38 : vector<256x32xf32>
    %40 = arith.mulf %35, %39 : vector<256x32xf32>
    %cst_20 = arith.constant 1.000000e+00 : f32
    %41 = vector.broadcast %cst_20 : f32 to vector<256x32xf32>
    %42 = arith.subf %41, %40 : vector<256x32xf32>
    %cst_21 = arith.constant 0.000000e+00 : f32
    %43 = vector.broadcast %cst_21 : f32 to vector<256x32xf32>
    %44 = arith.cmpf oge, %14, %43 : vector<256x32xf32>
    %cst_22 = arith.constant 0.000000e+00 : f32
    %45 = vector.broadcast %cst_22 : f32 to vector<256x32xf32>
    %46 = arith.subf %45, %42 : vector<256x32xf32>
    %47 = arith.select %44, %42, %46 : vector<256x32xi1>, vector<256x32xf32>
    %cst_23 = arith.constant 1.000000e+00 : f32
    %48 = vector.broadcast %cst_23 : f32 to vector<256x32xf32>
    %49 = arith.addf %48, %47 : vector<256x32xf32>
    %50 = arith.mulf %12, %49 : vector<256x32xf32>
    %51 = arith.addf %50, %10 : vector<256x32xf32>
    %c0_24 = arith.constant 0 : index
    %c0_25 = arith.constant 0 : index
    %52 = vector.load %arg6[%c0_24, %c0_25] : memref<256x32xf32, #tpu.memory_space<vmem>>, vector<256x32xf32>
    tpu.vector_store %arg6[%c0_24, %c0_25], %51 {strides = array<i32>} : memref<256x32xf32, #tpu.memory_space<vmem>>, vector<256x32xf32>,
    return
  }
  func.func @transform_0(%arg0: i32) -> (i32, i32) {
    %c0_i32 = arith.constant 0 : i32
    %c0_i32_0 = arith.constant 0 : i32
    return %arg0, %c0_i32 : i32, i32
  }
  func.func @transform_1(%arg0: i32) -> (i32, i32) {
    %c0_i32 = arith.constant 0 : i32
    %c0_i32_0 = arith.constant 0 : i32
    return %arg0, %c0_i32 : i32, i32
  }
  func.func @transform_2(%arg0: i32) -> (i32, i32) {
    %c0_i32 = arith.constant 0 : i32
    %c0_i32_0 = arith.constant 0 : i32
    %c0_i32_1 = arith.constant 0 : i32
    return %c0_i32, %c0_i32_0 : i32, i32
  }
  func.func @transform_3(%arg0: i32) -> (i32, i32) {
    %c0_i32 = arith.constant 0 : i32
    %c0_i32_0 = arith.constant 0 : i32
    %c0_i32_1 = arith.constant 0 : i32
    return %c0_i32, %c0_i32_0 : i32, i32
  }
  func.func @transform_4(%arg0: i32) -> (i32, i32) {
    %c0_i32 = arith.constant 0 : i32
    %c0_i32_0 = arith.constant 0 : i32
    %c0_i32_1 = arith.constant 0 : i32
    return %c0_i32, %c0_i32_0 : i32, i32
  }
  func.func @transform_5(%arg0: i32) -> (i32, i32) {
    %c0_i32 = arith.constant 0 : i32
    %c0_i32_0 = arith.constant 0 : i32
    return %arg0, %c0_i32 : i32, i32
  }
}

module attributes {stable_mosaic.version = 11 : i64} {
  func.func @_mlp2_kernel(%arg0: i32, %arg1: memref<256x32xf32, #tpu.memory_space<vmem>>, %arg2: memref<32x128xbf16, #tpu.memory_space<vmem>>, %arg3: memref<1x128xf32, #tpu.memory_space<vmem>>, %arg4: memref<128x3xbf16, #tpu.memory_space<vmem>>, %arg5: memref<1x3xf32, #tpu.memory_space<vmem>>, %arg6: memref<256x3xf32, #tpu.memory_space<vmem>>) attributes {dimension_semantics = [#tpu.dimension_semantics<parallel>], iteration_bounds = array<i64: 2>, scalar_prefetch = 0 : i64, scratch_operands = 0 : i64, tpu.core_type = #tpu.core_type<tc>, window_params = [{transform_indices = @transform_0, window_bounds = array<i64: 256, 32>}, {pipeline_mode = #tpu.pipeline_mode<synchronous>, transform_indices = @transform_1, window_bounds = array<i64: 32, 128>}, {pipeline_mode = #tpu.pipeline_mode<synchronous>, transform_indices = @transform_2, window_bounds = array<i64: 1, 128>}, {pipeline_mode = #tpu.pipeline_mode<synchronous>, transform_indices = @transform_3, window_bounds = array<i64: 128, 3>}, {pipeline_mode = #tpu.pipeline_mode<synchronous>, transform_indices = @transform_4, window_bounds = array<i64: 1, 3>}, {transform_indices = @transform_5, window_bounds = array<i64: 256, 3>}]} {
    %c0 = arith.constant 0 : index
    %c0_0 = arith.constant 0 : index
    %0 = vector.load %arg1[%c0, %c0_0] : memref<256x32xf32, #tpu.memory_space<vmem>>, vector<256x32xf32>
    %1 = arith.truncf %0 : vector<256x32xf32> to vector<256x32xbf16>
    %c0_1 = arith.constant 0 : index
    %c0_2 = arith.constant 0 : index
    %2 = vector.load %arg2[%c0_1, %c0_2] : memref<32x128xbf16, #tpu.memory_space<vmem>>, vector<32x128xbf16>
    %cst = arith.constant dense<0.000000e+00> : vector<256x128xf32>
    %3 = tpu.matmul %1, %2, %cst {dimension_numbers = #tpu.dot_dimension_numbers<[1], [0], [0], [1], [0, 0, 1, 1], [], []>} : vector<256x32xbf16>, vector<32x128xbf16>, vector<256x128xf32> -> vector<256x128xf32>
    %c0_3 = arith.constant 0 : index
    %c0_4 = arith.constant 0 : index
    %4 = vector.load %arg3[%c0_3, %c0_4] : memref<1x128xf32, #tpu.memory_space<vmem>>, vector<1x128xf32>
    %5 = vector.broadcast %4 : vector<1x128xf32> to vector<256x128xf32>
    %6 = arith.addf %3, %5 : vector<256x128xf32>
    %cst_5 = arith.constant 5.000000e-01 : f32
    %7 = vector.broadcast %cst_5 : f32 to vector<256x128xf32>
    %8 = arith.mulf %7, %6 : vector<256x128xf32>
    %cst_6 = arith.constant 0.707106769 : f32
    %9 = vector.broadcast %cst_6 : f32 to vector<256x128xf32>
    %10 = arith.mulf %6, %9 : vector<256x128xf32>
    %11 = math.absf %10 : vector<256x128xf32>
    %cst_7 = arith.constant 0.327591091 : f32
    %12 = vector.broadcast %cst_7 : f32 to vector<256x128xf32>
    %13 = arith.mulf %12, %11 : vector<256x128xf32>
    %cst_8 = arith.constant 1.000000e+00 : f32
    %14 = vector.broadcast %cst_8 : f32 to vector<256x128xf32>
    %15 = arith.addf %14, %13 : vector<256x128xf32>
    %cst_9 = arith.constant 1.000000e+00 : f32
    %16 = vector.broadcast %cst_9 : f32 to vector<256x128xf32>
    %17 = arith.divf %16, %15 : vector<256x128xf32>
    %cst_10 = arith.constant 1.06140542 : f32
    %18 = vector.broadcast %cst_10 : f32 to vector<256x128xf32>
    %19 = arith.mulf %17, %18 : vector<256x128xf32>
    %cst_11 = arith.constant -1.45315206 : f32
    %20 = vector.broadcast %cst_11 : f32 to vector<256x128xf32>
    %21 = arith.addf %20, %19 : vector<256x128xf32>
    %22 = arith.mulf %17, %21 : vector<256x128xf32>
    %cst_12 = arith.constant 1.42141378 : f32
    %23 = vector.broadcast %cst_12 : f32 to vector<256x128xf32>
    %24 = arith.addf %23, %22 : vector<256x128xf32>
    %25 = arith.mulf %17, %24 : vector<256x128xf32>
    %cst_13 = arith.constant -0.284496725 : f32
    %26 = vector.broadcast %cst_13 : f32 to vector<256x128xf32>
    %27 = arith.addf %26, %25 : vector<256x128xf32>
    %28 = arith.mulf %17, %27 : vector<256x128xf32>
    %cst_14 = arith.constant 0.254829586 : f32
    %29 = vector.broadcast %cst_14 : f32 to vector<256x128xf32>
    %30 = arith.addf %29, %28 : vector<256x128xf32>
    %31 = arith.mulf %17, %30 : vector<256x128xf32>
    %cst_15 = arith.constant 0.000000e+00 : f32
    %32 = vector.broadcast %cst_15 : f32 to vector<256x128xf32>
    %33 = arith.subf %32, %11 : vector<256x128xf32>
    %34 = arith.mulf %33, %11 : vector<256x128xf32>
    %35 = math.exp %34 : vector<256x128xf32>
    %36 = arith.mulf %31, %35 : vector<256x128xf32>
    %cst_16 = arith.constant 1.000000e+00 : f32
    %37 = vector.broadcast %cst_16 : f32 to vector<256x128xf32>
    %38 = arith.subf %37, %36 : vector<256x128xf32>
    %cst_17 = arith.constant 0.000000e+00 : f32
    %39 = vector.broadcast %cst_17 : f32 to vector<256x128xf32>
    %40 = arith.cmpf oge, %10, %39 : vector<256x128xf32>
    %cst_18 = arith.constant 0.000000e+00 : f32
    %41 = vector.broadcast %cst_18 : f32 to vector<256x128xf32>
    %42 = arith.subf %41, %38 : vector<256x128xf32>
    %43 = arith.select %40, %38, %42 : vector<256x128xi1>, vector<256x128xf32>
    %cst_19 = arith.constant 1.000000e+00 : f32
    %44 = vector.broadcast %cst_19 : f32 to vector<256x128xf32>
    %45 = arith.addf %44, %43 : vector<256x128xf32>
    %46 = arith.mulf %8, %45 : vector<256x128xf32>
    %47 = arith.truncf %46 : vector<256x128xf32> to vector<256x128xbf16>
    %c0_20 = arith.constant 0 : index
    %c0_21 = arith.constant 0 : index
    %48 = vector.load %arg4[%c0_20, %c0_21] : memref<128x3xbf16, #tpu.memory_space<vmem>>, vector<128x3xbf16>
    %cst_22 = arith.constant dense<0.000000e+00> : vector<256x3xf32>
    %49 = tpu.matmul %47, %48, %cst_22 {dimension_numbers = #tpu.dot_dimension_numbers<[1], [0], [0], [1], [0, 0, 1, 1], [], []>} : vector<256x128xbf16>, vector<128x3xbf16>, vector<256x3xf32> -> vector<256x3xf32>
    %c0_23 = arith.constant 0 : index
    %c0_24 = arith.constant 0 : index
    %50 = vector.load %arg5[%c0_23, %c0_24] : memref<1x3xf32, #tpu.memory_space<vmem>>, vector<1x3xf32>
    %51 = vector.broadcast %50 : vector<1x3xf32> to vector<256x3xf32>
    %52 = arith.addf %49, %51 : vector<256x3xf32>
    %c0_25 = arith.constant 0 : index
    %c0_26 = arith.constant 0 : index
    %53 = vector.load %arg6[%c0_25, %c0_26] : memref<256x3xf32, #tpu.memory_space<vmem>>, vector<256x3xf32>
    tpu.vector_store %arg6[%c0_25, %c0_26], %52 {strides = array<i32>} : memref<256x3xf32, #tpu.memory_space<vmem>>, vector<256x3xf32>,
    return
  }
  func.func @transform_0(%arg0: i32) -> (i32, i32) {
    %c0_i32 = arith.constant 0 : i32
    %c0_i32_0 = arith.constant 0 : i32
    return %arg0, %c0_i32 : i32, i32
  }
  func.func @transform_1(%arg0: i32) -> (i32, i32) {
    %c0_i32 = arith.constant 0 : i32
    %c0_i32_0 = arith.constant 0 : i32
    %c0_i32_1 = arith.constant 0 : i32
    return %c0_i32, %c0_i32_0 : i32, i32
  }
  func.func @transform_2(%arg0: i32) -> (i32, i32) {
    %c0_i32 = arith.constant 0 : i32
    %c0_i32_0 = arith.constant 0 : i32
    %c0_i32_1 = arith.constant 0 : i32
    return %c0_i32, %c0_i32_0 : i32, i32
  }
  func.func @transform_3(%arg0: i32) -> (i32, i32) {
    %c0_i32 = arith.constant 0 : i32
    %c0_i32_0 = arith.constant 0 : i32
    %c0_i32_1 = arith.constant 0 : i32
    return %c0_i32, %c0_i32_0 : i32, i32
  }
  func.func @transform_4(%arg0: i32) -> (i32, i32) {
    %c0_i32 = arith.constant 0 : i32
    %c0_i32_0 = arith.constant 0 : i32
    %c0_i32_1 = arith.constant 0 : i32
    return %c0_i32, %c0_i32_0 : i32, i32
  }
  func.func @transform_5(%arg0: i32) -> (i32, i32) {
    %c0_i32 = arith.constant 0 : i32
    %c0_i32_0 = arith.constant 0 : i32
    return %arg0, %c0_i32 : i32, i32
  }
}

</mosaic_0001>

<bundles_post_ra>
// kernel: ddfno_forward.10
= control target key start
LH: loop header
LB: loop body
LE: loop exit
PB: predicated region body
PF: predicated region fallthrough
CT: control target
= control target key end

     0   :  { %s2060_s18 = smov 0   ;;  %s3159_s0 = inlined_call_operand.vmem [shape: f32[512,4], index: 0, kind: input, shape index: {}]   ;;  %s3160_s1 = inlined_call_operand.vmem [shape: bf16[4,128], index: 1, kind: input, shape index: {}]   ;;  %s3161_s2 = inlined_call_operand.vmem [shape: f32[1,128], index: 2, kind: input, shape index: {}]   ;;  %s3162_s3 = inlined_call_operand.vmem [shape: bf16[128,32], index: 3, kind: input, shape index: {}]   ;;  %s3163_s4 = inlined_call_operand.vmem [shape: f32[1,32], index: 4, kind: input, shape index: {}]   ;;  %s3164_s5 = inlined_call_operand.vmem [shape: f32[512,32], index: 5, kind: output, shape index: {}]  }
   0x1 LB: > { %s1700_s19 = sadd.s32 4294967295, %s2028_s18   ;;  %p1704_p0 = scmp.ge.s32.totalorder %s2028_s18, 1  ;;  %s2028_s18 = sphi %s2060_s18, %s15_s18  }
   0x2   : > { %p188_p1 = scmp.lt.s32.totalorder %s2028_s18, 3 }
   0x4   : > { %p189_p2 = pnand %p1704_p0, %p188_p1 }
   0x6   : > { %192 = sbr.rel (%p189_p2) target bundleno = 654 (0x28e), region = 40 }
   0xb   : > { %v277_v0 = vld [vmem:[%s3160_s1] sm:$0x3]  ;;  %vm334_vm0 = vcmask 1041408   ;;  %s1705_s22 = sshll.u32 %s1700_s19, 5  ;;  %vm285_vm1 = vcmask 31744   ;;  %v1885_v50 = vld [vmem:[%s3162_s3 + $0x38] sm:$0xff]  }
   0xc   : > { %1876 = vmatprep.subr.msk.bf16.mxu0 %vm334_vm0, %v277_v0  ;;  %v336_v1 = vsel %vm334_vm0, %v277_v0, 0  ;;  %p217_p3 = scmp.lt.s32.totalorder %s1705_s22, 63  ;;  %1860 = vmatprep.subr.bf16.mxu1 %v1885_v50  ;;  %v1886_v51 = vld [vmem:[%s3162_s3 + $0x30] sm:$0xff]   ;;  %v1887_v52 = vld [vmem:[%s3162_s3 + $0x28] sm:$0xff]   ;;  %v1888_v53 = vld [vmem:[%s3162_s3 + $0x20] sm:$0xff]  }
   0xd   : > { %1779 = vmatpush3.bf16.msra.mxu0 %v336_v1  ;;  %1868 = vmatpush3.bf16.msra.mxu1 %v1885_v50  ;;  %v1889_v54 = vld [vmem:[%s3162_s3 + $0x18] sm:$0xff]   ;;  %v1890_v57 = vld [vmem:[%s3162_s3 + $0x10] sm:$0xff]   ;;  %v2150_v58 = vld [vmem:[%s3161_s2] ss:$0 sm:$0xff] }
   0xe   : > { %s3307_s22 = smov (!%p217_p3, %s1705_s22), 63  ;;  %1812 = vmatprep.subr.bf16.mxu0 %v1885_v50  ;;  %1861 = vmatprep.subr.bf16.mxu1 %v1886_v51  ;;  %v1891_v1 = vld [vmem:[%s3162_s3 + $0x8] sm:$0xff]  }
   0xf   : > { %s1706_s23 = sshll.u32 %s3307_s22, 3 }
  0x10   : > { %s2079_s26 = scalar_lea.vmem %s3159_s0, %s1706_s23  ;;  %s3058_s29 = scalar_lea.vmem %s3164_s5, %s1706_s23 }
  0x11   : > { %v229_v2 = vld [vmem:[%s2079_s26] sm:$0xff]  ;;  %v230_v3 = vld [vmem:[%s2079_s26 + $0x8] sm:$0xff]  ;;  %v231_v4 = vld [vmem:[%s2079_s26 + $0x10] sm:$0xff]  ;;  %1869 = vmatpush3.bf16.msra.mxu1 %v1886_v51 }
  0x12   : > { %v261_v5 = vpack.c.bf16 %v230_v3, %v229_v2  ;;  %v232_v6 = vld [vmem:[%s2079_s26 + $0x18] sm:$0xff]  ;;  %v233_v7 = vld [vmem:[%s2079_s26 + $0x20] sm:$0xff]  ;;  %v234_v8 = vld [vmem:[%s2079_s26 + $0x28] sm:$0xff]  ;;  %1862 = vmatprep.subr.bf16.mxu1 %v1887_v52 }
  0x13   : > { %v262_v9 = vpack.c.bf16 %v232_v6, %v231_v4  ;;  %v263_v10 = vpack.c.bf16 %v234_v8, %v233_v7  ;;  %v235_v11 = vld [vmem:[%s2079_s26 + $0x30] sm:$0xff]  ;;  %v236_v12 = vld [vmem:[%s2079_s26 + $0x38] sm:$0xff]  ;;  %v237_v13 = vld [vmem:[%s2079_s26 + $0x40] sm:$0xff] }
  0x14   : > { %1780 = vmatprep.mubr.msk.bf16.mxu0 %vm285_vm1, %v261_v5  ;;  %v238_v14 = vld [vmem:[%s2079_s26 + $0x48] sm:$0xff]  ;;  %v264_v15 = vpack.c.bf16 %v236_v12, %v235_v11  ;;  %v239_v17 = vld [vmem:[%s2079_s26 + $0x50] sm:$0xff]  ;;  %v240_v18 = vld [vmem:[%s2079_s26 + $0x58] sm:$0xff] }
  0x15   : > { %1781 = vmatmul.mubr.msk.bf16.vlgmr.msra.gmra.mxu0 %vm285_vm1, %v262_v9  ;;  %v265_v16 = vpack.c.bf16 %v238_v14, %v237_v13  ;;  %v241_v19 = vld [vmem:[%s2079_s26 + $0x60] sm:$0xff]  ;;  %v242_v20 = vld [vmem:[%s2079_s26 + $0x68] sm:$0xff]  ;;  %v266_v21 = vpack.c.bf16 %v240_v18, %v239_v17  ;;  %v243_v23 = vld [vmem:[%s2079_s26 + $0x70] sm:$0xff]  ;;  %1870 = vmatpush3.bf16.msra.mxu1 %v1887_v52 }
  0x16   : > { %1784 = vmatprep.mubr.msk.bf16.mxu0 %vm285_vm1, %v263_v10  ;;  %v267_v22 = vpack.c.bf16 %v242_v20, %v241_v19  ;;  %v244_v24 = vld [vmem:[%s2079_s26 + $0x78] sm:$0xff]  ;;  %v245_v25 = vld [vmem:[%s2079_s26 + $0x80] sm:$0xff]  ;;  %v246_v26 = vld [vmem:[%s2079_s26 + $0x88] sm:$0xff]  ;;  %1813 = vmatpush3.bf16.msra.mxu0 %v1885_v50 }
  0x17   : > { %v268_v27 = vpack.c.bf16 %v244_v24, %v243_v23  ;;  %v269_v28 = vpack.c.bf16 %v246_v26, %v245_v25  ;;  %v247_v29 = vld [vmem:[%s2079_s26 + $0x90] sm:$0xff]  ;;  %v248_v30 = vld [vmem:[%s2079_s26 + $0x98] sm:$0xff]  ;;  %v249_v31 = vld [vmem:[%s2079_s26 + $0xa0] sm:$0xff]  ;;  %1814 = vmatprep.subr.bf16.mxu0 %v1886_v51  ;;  %1863 = vmatprep.subr.bf16.mxu1 %v1888_v53 }
  0x18   : > { %v250_v32 = vld [vmem:[%s2079_s26 + $0xa8] sm:$0xff]  ;;  %v270_v33 = vpack.c.bf16 %v248_v30, %v247_v29  ;;  %v251_v35 = vld [vmem:[%s2079_s26 + $0xb0] sm:$0xff]  ;;  %v252_v36 = vld [vmem:[%s2079_s26 + $0xb8] sm:$0xff] }
  0x19   : > { %v271_v34 = vpack.c.bf16 %v250_v32, %v249_v31  ;;  %v253_v37 = vld [vmem:[%s2079_s26 + $0xc0] sm:$0xff]  ;;  %v254_v38 = vld [vmem:[%s2079_s26 + $0xc8] sm:$0xff]  ;;  %v272_v39 = vpack.c.bf16 %v252_v36, %v251_v35  ;;  %v255_v41 = vld [vmem:[%s2079_s26 + $0xd0] sm:$0xff]  ;;  %1871 = vmatpush3.bf16.msra.mxu1 %v1888_v53 }
  0x1a   : > { %v273_v40 = vpack.c.bf16 %v254_v38, %v253_v37  ;;  %v256_v42 = vld [vmem:[%s2079_s26 + $0xd8] sm:$0xff]  ;;  %v257_v43 = vld [vmem:[%s2079_s26 + $0xe0] sm:$0xff]  ;;  %v258_v44 = vld [vmem:[%s2079_s26 + $0xe8] sm:$0xff]  ;;  %1815 = vmatpush3.bf16.msra.mxu0 %v1886_v51  ;;  %1864 = vmatprep.subr.bf16.mxu1 %v1889_v54 }
  0x1b   : > { %v274_v45 = vpack.c.bf16 %v256_v42, %v255_v41  ;;  %v275_v46 = vpack.c.bf16 %v258_v44, %v257_v43  ;;  %v259_v47 = vld [vmem:[%s2079_s26 + $0xf0] sm:$0xff]  ;;  %v260_v48 = vld [vmem:[%s2079_s26 + $0xf8] sm:$0xff]  ;;  %1816 = vmatprep.subr.bf16.mxu0 %v1887_v52  ;;  %v1892_v26 = vld [vmem:[%s3162_s3] sm:$0xff]  }
  0x1c   : > { %v276_v49 = vpack.c.bf16 %v260_v48, %v259_v47 }
  0x1d   : > { %1785 = vmatmul.mubr.msk.bf16.gmra.mxu0 %vm285_vm1, %v264_v15  ;;  %1872 = vmatpush3.bf16.msra.mxu1 %v1889_v54 }
  0x1e   : > { %1788 = vmatprep.mubr.msk.bf16.mxu0 %vm285_vm1, %v265_v16  ;;  %1817 = vmatpush3.bf16.msra.mxu0 %v1887_v52 }
  0x1f   : > { %1818 = vmatprep.subr.bf16.mxu0 %v1888_v53  ;;  %1865 = vmatprep.subr.bf16.mxu1 %v1890_v57 }
  0x21   : > { %1873 = vmatpush3.bf16.msra.mxu1 %v1890_v57 }
  0x22   : > { %1819 = vmatpush3.bf16.msra.mxu0 %v1888_v53  ;;  %1866 = vmatprep.subr.bf16.mxu1 %v1891_v1 }
  0x23   : > { %1820 = vmatprep.subr.bf16.mxu0 %v1889_v54 }
  0x25   : > { %1789 = vmatmul.mubr.msk.bf16.gmra.mxu0 %vm285_vm1, %v266_v21  ;;  %1874 = vmatpush3.bf16.msra.mxu1 %v1891_v1 }
  0x26   : > { %1792 = vmatprep.mubr.msk.bf16.mxu0 %vm285_vm1, %v267_v22  ;;  %1821 = vmatpush3.bf16.msra.mxu0 %v1889_v54 }
  0x27   : > { %1822 = vmatprep.subr.bf16.mxu0 %v1890_v57  ;;  %1867 = vmatprep.subr.bf16.mxu1 %v1892_v26 }
  0x29   : > { %1875 = vmatpush3.bf16.msra.mxu1 %v1892_v26 }
  0x2a   : > { %1823 = vmatpush3.bf16.msra.mxu0 %v1890_v57 }
  0x2b   : > { %1824 = vmatprep.subr.bf16.mxu0 %v1891_v1 }
  0x2d   : > { %1793 = vmatmul.mubr.msk.bf16.gmra.mxu0 %vm285_vm1, %v268_v27 }
  0x2e   : > { %1796 = vmatprep.mubr.msk.bf16.mxu0 %vm285_vm1, %v269_v28  ;;  %1825 = vmatpush3.bf16.msra.mxu0 %v1891_v1 }
  0x2f   : > { %1826 = vmatprep.subr.bf16.mxu0 %v1892_v26 }
  0x32   : > { %1827 = vmatpush3.bf16.msra.mxu0 %v1892_v26 }
  0x35   : > { %1797 = vmatmul.mubr.msk.bf16.gmra.mxu0 %vm285_vm1, %v270_v33 }
  0x36   : > { %1800 = vmatprep.mubr.msk.bf16.mxu0 %vm285_vm1, %v271_v34 }
  0x3d   : > { %1801 = vmatmul.mubr.msk.bf16.gmra.mxu0 %vm285_vm1, %v272_v39 }
  0x3e   : > { %1804 = vmatprep.mubr.msk.bf16.mxu0 %vm285_vm1, %v273_v40 }
  0x45   : > { %1805 = vmatmul.mubr.msk.bf16.gmra.mxu0 %vm285_vm1, %v274_v45 }
  0x46   : > { %1808 = vmatprep.mubr.msk.bf16.mxu0 %vm285_vm1, %v275_v46 }
  0x4d   : > { %1809 = vmatmul.mubr.msk.bf16.gmra.mxu0 %vm285_vm1, %v276_v49 }
  0xd5   : > { %v1782_v55 = vpop.f32.mrf.mxu0 }
  0xd6   : > { %v2153_v60 = vadd.f32 %v1782_v55, %v2150_v58 }
  0xd7   : > { %v372_v56 = vpop.f32.mrf.mxu0 }
  0xd8   : > { %v2156_v61 = vadd.f32 %v2150_v58, %v372_v56  ;;  %v2162_v0 = vmul.f32 0.70710677, %v2153_v60 }
  0xd9   : > { %v1783_v59 = vpop.f32.mrf.mxu0 }
  0xda   : > { %v2159_v63 = vadd.f32 %v1783_v59, %v2150_v58  ;;  %v2168_v2 = vmul.f32 0.70710677, %v2156_v61  ;;  %v565_v6 = vand.u32 2147483647, %v2162_v0  ;;  %vm1205_vm2 = vcmp.ge.f32.partialorder %v2162_v0, 0.0 }
  0xdb   : > { %v375_v62 = vpop.f32.mrf.mxu0 }
  0xdc   : > { %v2171_v4 = vmul.f32 0.70710677, %v2159_v63  ;;  %v2174_v5 = vadd.f32 %v2150_v58, %v375_v62  ;;  %v2178_v7 = vand.u32 2147483647, %v2168_v2  ;;  %v597_v11 = vmul.f32 0.3275911, %v565_v6 }
  0xdd   : > { %v1786_v3 = vpop.f32.mrf.mxu0  ;;  %v1013_v42 = vsub.f32 0.0, %v565_v6  ;;  %vm1203_vm3 = vcmp.ge.f32.partialorder %v2168_v2, 0.0 }
  0xde   : > { %v2181_v9 = vand.u32 2147483647, %v2171_v4  ;;  %v2184_v10 = vmul.f32 0.70710677, %v2174_v5  ;;  %v2187_v12 = vadd.f32 %v1786_v3, %v2150_v58  ;;  %v595_v13 = vmul.f32 0.3275911, %v2178_v7 }
  0xdf   : > { %v388_v8 = vpop.f32.mrf.mxu0  ;;  %v629_v17 = vadd.f32 1.0, %v597_v11  ;;  %v1011_v49 = vsub.f32 0.0, %v2178_v7  ;;  %v1045_v52 = vmul.f32 %v1013_v42, %v565_v6  ;;  %v2256_v3 = vmul.f32 0.5, %v2153_v60 }
  0xe0   : > { %v598_v15 = vmul.f32 0.3275911, %v2181_v9  ;;  %v2192_v16 = vand.u32 2147483647, %v2184_v10  ;;  %v2195_v18 = vmul.f32 0.70710677, %v2187_v12  ;;  %v389_v53 = vadd.f32 %v2150_v58, %v388_v8 }
  0xe1   : > { %v1787_v14 = vpop.f32.mrf.mxu0  ;;  %v627_v19 = vadd.f32 1.0, %v595_v13  ;;  %1893 = vrcp.f32 %v629_v17  ;;  %v1014_v55 = vsub.f32 0.0, %v2181_v9  ;;  %v1043_v1 = vmul.f32 %v1011_v49, %v2178_v7 }
  0xe2   : > { %v630_v21 = vadd.f32 1.0, %v598_v15  ;;  %v596_v22 = vmul.f32 0.3275911, %v2192_v16  ;;  %v2201_v23 = vadd.f32 %v1787_v14, %v2150_v58  ;;  %v2204_v24 = vand.u32 2147483647, %v2195_v18 }
  0xe3   : > { %v2197_v20 = vpop.f32.mrf.mxu0  ;;  %1895 = vrcp.f32 %v627_v19  ;;  %v2259_v6 = vmul.f32 0.5, %v2156_v61  ;;  %v1079_v13 = vmul.f32 1.442695, %v1045_v52  ;;  %v2262_v14 = vmul.f32 0.70710677, %v389_v53 }
  0xe4   : > { %1897 = vrcp.f32 %v630_v21  ;;  %v628_v27 = vadd.f32 1.0, %v596_v22  ;;  %v2210_v28 = vmul.f32 0.70710677, %v2201_v23  ;;  %v601_v29 = vmul.f32 0.3275911, %v2204_v24 }
  0xe5   : > { %v1790_v25 = vpop.f32.mrf.mxu0  ;;  %3207 = vst [vmem:[#allocation2_spill] sm:$0xff] %v2262_v14  ;;  %v1046_v17 = vmul.f32 %v1014_v55, %v2181_v9  ;;  %v1012_v19 = vsub.f32 0.0, %v2192_v16  ;;  %v1075_v22 = vmul.f32 1.442695, %v1043_v1  ;;  %v2297_v52 = vmul.f32 0.5, %v389_v53 }
  0xe6   : > { %v2214_v30 = vadd.f32 %v1790_v25, %v2150_v58  ;;  %1899 = vrcp.f32 %v628_v27  ;;  %v2217_v32 = vand.u32 2147483647, %v2210_v28  ;;  %v633_v33 = vadd.f32 1.0, %v601_v29 }
  0xe7   : > { %v404_v31 = vpop.f32.mrf.mxu0  ;;  %v2274_v25 = vmul.f32 0.5, %v2159_v63  ;;  %v2278_v27 = vmul.f32 0.5, %v2174_v5  ;;  %v1017_v29 = vsub.f32 0.0, %v2204_v24  ;;  %v1081_v63 = vmul.f32 1.442695, %v1046_v17  ;;  %3208 = vst [vmem:[#allocation3_spill] sm:$0xff] %v2297_v52 }
  0xe8   : > { %v2220_v34 = vmul.f32 0.70710677, %v2214_v30  ;;  %v2223_v35 = vadd.f32 %v2150_v58, %v404_v31  ;;  %v602_v36 = vmul.f32 0.3275911, %v2217_v32  ;;  %1901 = vrcp.f32 %v633_v33 }
  0xe9   : > { %v1791_v46 = vpop.f32.mrf.mxu0  ;;  %v567_v33 = vand.u32 2147483647, %v2262_v14  ;;  %vm1206_vm4 = vcmp.ge.f32.partialorder %v2171_v4, 0.0  ;;  %vm1204_vm5 = vcmp.ge.f32.partialorder %v2184_v10, 0.0  ;;  %vm1209_vm6 = vcmp.ge.f32.partialorder %v2195_v18, 0.0 }
  0xea   : > { %v2227_v37 = vand.u32 2147483647, %v2220_v34  ;;  %v2230_v38 = vmul.f32 0.70710677, %v2223_v35  ;;  %v634_v43 = vadd.f32 1.0, %v602_v36  ;;  %v2250_v54 = vadd.f32 %v1791_v46, %v2150_v58 }
  0xeb   : > { %v407_v31 = vpop.f32.mrf.mxu0  ;;  %v392_v36 = vadd.f32 %v2150_v58, %v2197_v20  ;;  %v2294_v20 = vmul.f32 0.5, %v2187_v12  ;;  %v599_v1 = vmul.f32 0.3275911, %v567_v33  ;;  %vm1210_vm7 = vcmp.ge.f32.partialorder %v2210_v28, 0.0 }
  0xec   : > { %v605_v44 = vmul.f32 0.3275911, %v2227_v37  ;;  %v2240_v45 = vand.u32 2147483647, %v2230_v38  ;;  %1903 = vrcp.f32 %v634_v43  ;;  %v2265_v15 = vmul.f32 0.70710677, %v2250_v54 }
  0xed   : > { %v1044_v43 = vmul.f32 %v1012_v19, %v2192_v16  ;;  %v1015_v16 = vsub.f32 0.0, %v567_v33  ;;  %v2299_v55 = vmul.f32 0.70710677, %v392_v36  ;;  %v1794_v53 = vpop.f32.mrf.mxu0  ;;  %vm1213_vm8 = vcmp.ge.f32.partialorder %v2220_v34, 0.0 }
  0xee   : > { %v2232_v39 = vpop.eup %1893  ;;  %v637_v56 = vadd.f32 1.0, %v605_v44  ;;  %v603_v57 = vmul.f32 0.3275911, %v2240_v45  ;;  %v2285_v42 = vand.u32 2147483647, %v2265_v15  ;;  %vm1211_vm9 = vcmp.ge.f32.partialorder %v2230_v38, 0.0 }
  0xef   : > { %v725_v47 = vmul.f32 1.0614054, %v2232_v39  ;;  %3209 = vst [vmem:[#allocation4_spill] sm:$0xff] %v2299_v55  ;;  %vm1214_vm10 = vcmp.ge.f32.partialorder %v2265_v15, 0.0 }
  0xf0   : > { %v2234_v40 = vpop.eup %1895  ;;  %1905 = vrcp.f32 %v637_v56  ;;  %v635_v7 = vadd.f32 1.0, %v603_v57  ;;  %v606_v56 = vmul.f32 0.3275911, %v2285_v42 }
  0xf1   : > { %v2236_v41 = vpop.eup %1897  ;;  %v723_v48 = vmul.f32 1.0614054, %v2234_v40  ;;  %v757_v59 = vadd.f32 -1.4531521, %v725_v47  ;;  %1907 = vpow2.f32 %v1079_v13  ;;  %v2290_v47 = vadd.f32 %v2150_v58, %v407_v31 }
  0xf2   : > { %v726_v50 = vmul.f32 1.0614054, %v2236_v41  ;;  %1909 = vrcp.f32 %v635_v7  ;;  %v2312_v7 = vmul.f32 0.5, %v2201_v23  ;;  %v2317_v31 = vmul.f32 0.5, %v392_v36 }
  0xf3   : > { %v2246_v51 = vpop.eup %1899  ;;  %v755_v62 = vadd.f32 -1.4531521, %v723_v48  ;;  %v789_v61 = vmul.f32 %v2232_v39, %v757_v59  ;;  %1911 = vpow2.f32 %v1075_v22  ;;  %v1077_v59 = vmul.f32 1.442695, %v1044_v43 }
  0xf4   : > { %v758_v8 = vadd.f32 -1.4531521, %v726_v50  ;;  %v724_v11 = vmul.f32 1.0614054, %v2246_v51  ;;  %v1049_v50 = vmul.f32 %v1017_v29, %v2204_v24  ;;  %1913 = vpow2.f32 %v1081_v63  ;;  %3211 = vst [vmem:[#allocation6_spill] sm:$0xff] %v2317_v31 }
  0xf5   : > { %v2269_v60 = vpop.eup %1901  ;;  %v787_v21 = vmul.f32 %v2234_v40, %v755_v62  ;;  %v821_v5 = vadd.f32 1.4214138, %v789_v61  ;;  %v2308_v24 = vmul.f32 0.70710677, %v2290_v47  ;;  %v1047_v61 = vmul.f32 %v1015_v16, %v567_v33  ;;  %v420_v33 = vpop.f32.mrf.mxu0 }
  0xf6   : > { %v790_v26 = vmul.f32 %v2236_v41, %v758_v8  ;;  %v756_v9 = vadd.f32 -1.4531521, %v724_v11  ;;  %v729_v44 = vmul.f32 1.0614054, %v2269_v60  ;;  %v1018_v11 = vsub.f32 0.0, %v2217_v32 }
  0xf7   : > { %v819_v46 = vadd.f32 1.4214138, %v787_v21  ;;  %v853_v8 = vmul.f32 %v2232_v39, %v821_v5  ;;  %3210 = vst [vmem:[#allocation5_spill] sm:$0xff] %v2308_v24  ;;  %v1087_v19 = vmul.f32 1.442695, %v1049_v50  ;;  %1915 = vpow2.f32 %v1077_v59 }
  0xf8   : > { %v822_v48 = vadd.f32 1.4214138, %v790_v26  ;;  %v788_v49 = vmul.f32 %v2246_v51, %v756_v9  ;;  %v761_v62 = vadd.f32 -1.4531521, %v729_v44  ;;  %v568_v22 = vand.u32 2147483647, %v2299_v55 }
  0xf9   : > { %v2302_v57 = vpop.eup %1903  ;;  %v851_v12 = vmul.f32 %v2234_v40, %v819_v46  ;;  %v638_v26 = vadd.f32 1.0, %v606_v56  ;;  %v631_v29 = vadd.f32 1.0, %v599_v1  ;;  %v885_v43 = vadd.f32 -0.28449672, %v853_v8 }
  0xfa   : > { %v854_v13 = vmul.f32 %v2236_v41, %v822_v48  ;;  %v820_v17 = vadd.f32 1.4214138, %v788_v49  ;;  %v730_v21 = vmul.f32 1.0614054, %v2302_v57  ;;  %v793_v9 = vmul.f32 %v2269_v60, %v761_v62 }
  0xfb   : > { %v883_v44 = vadd.f32 -0.28449672, %v851_v12  ;;  %v1050_v5 = vmul.f32 %v1018_v11, %v2217_v32  ;;  %v2323_v23 = vand.u32 2147483647, %v2308_v24  ;;  %1917 = vpow2.f32 %v1087_v19 }
  0xfc   : > { %v886_v46 = vadd.f32 -0.28449672, %v854_v13  ;;  %v852_v48 = vmul.f32 %v2246_v51, %v820_v17  ;;  %v2327_v49 = vadd.f32 %v1794_v53, %v2150_v58  ;;  %v1083_v50 = vmul.f32 1.442695, %v1047_v61  ;;  %v1795_v13 = vpop.f32.mrf.mxu0 }
  0xfd   : > { %v2319_v63 = vpop.eup %1905  ;;  %v762_v36 = vadd.f32 -1.4531521, %v730_v21  ;;  %v600_v16 = vmul.f32 0.3275911, %v568_v22  ;;  %1919 = vrcp.f32 %v638_v26  ;;  %v825_v59 = vadd.f32 1.4214138, %v793_v9 }
  0xfe   : > { %v2329_v56 = vpop.eup %1907  ;;  %1921 = vrcp.f32 %v631_v29  ;;  %v2332_v32 = vmul.f32 0.5, %v2214_v30  ;;  %v733_v62 = vmul.f32 1.0614054, %v2319_v63  ;;  %v917_v8 = vmul.f32 %v2232_v39, %v885_v43 }
  0xff   : > { %v2335_v1 = vpop.eup %1909  ;;  %v915_v12 = vmul.f32 %v2234_v40, %v883_v44  ;;  %v1089_v11 = vmul.f32 1.442695, %v1050_v5  ;;  %v604_v53 = vmul.f32 0.3275911, %v2323_v23  ;;  %v918_v19 = vmul.f32 %v2236_v41, %v886_v46 }
 0x100   : > { %3212 = vst [vmem:[#allocation7_spill] sm:$0xff] %v2332_v32  ;;  %v1912_v17 = vpop.eup %1911  ;;  %v884_v61 = vadd.f32 -0.28449672, %v852_v48  ;;  %v2342_v21 = vmul.f32 0.70710677, %v2327_v49  ;;  %v2345_v30 = vadd.f32 %v2150_v58, %v420_v33  ;;  %1923 = vpow2.f32 %v1083_v50 }
 0x101   : > { %v794_v26 = vmul.f32 %v2302_v57, %v762_v36  ;;  %v632_v9 = vadd.f32 1.0, %v600_v16  ;;  %v1016_v29 = vsub.f32 0.0, %v568_v22  ;;  %v857_v43 = vmul.f32 %v2269_v60, %v825_v59  ;;  %v1914_v46 = vpop.eup %1913  ;;  %v423_v59 = vpop.f32.mrf.mxu0 }
 0x102   : > { %3213 = vst [vmem:[#allocation8_spill] sm:$0xff] %v2342_v21  ;;  %v765_v44 = vadd.f32 -1.4531521, %v733_v62  ;;  %v731_v5 = vmul.f32 1.0614054, %v2335_v1  ;;  %v2351_v31 = vadd.f32 %v1795_v13, %v2150_v58  ;;  %1925 = vpow2.f32 %v1089_v11 }
 0x103   : > { %v949_v48 = vadd.f32 0.2548296, %v917_v8  ;;  %v947_v52 = vadd.f32 0.2548296, %v915_v12  ;;  %v636_v55 = vadd.f32 1.0, %v604_v53  ;;  %v916_v50 = vmul.f32 %v2246_v51, %v884_v61 }
 0x104   : > { %3214 = vst [vmem:[#allocation9_spill] sm:$0xff] %v2351_v31  ;;  %v950_v33 = vadd.f32 0.2548296, %v918_v19  ;;  %v2355_v36 = vand.u32 2147483647, %v2342_v21  ;;  %1927 = vrcp.f32 %v632_v9  ;;  %v1048_v14 = vmul.f32 %v1016_v29, %v568_v22  ;;  %v1916_v53 = vpop.eup %1915 }
 0x105   : > { %v2358_v16 = vmul.f32 0.70710677, %v2345_v30  ;;  %v826_v62 = vadd.f32 1.4214138, %v794_v26  ;;  %v1021_v13 = vsub.f32 0.0, %v2227_v37  ;;  %v797_v8 = vmul.f32 %v2319_v63, %v765_v44 }
 0x106   : > { %v889_v24 = vadd.f32 -0.28449672, %v857_v43  ;;  %v763_v12 = vadd.f32 -1.4531521, %v731_v5  ;;  %v2363_v11 = vmul.f32 0.70710677, %v2351_v31  ;;  %v981_v19 = vmul.f32 %v2232_v39, %v949_v48  ;;  %v1798_v43 = vpop.f32.mrf.mxu0 }
 0x107   : > { %3215 = vst [vmem:[#allocation10_spill] sm:$0xff] %v2358_v16  ;;  %v979_v61 = vmul.f32 %v2234_v40, %v947_v52  ;;  %1929 = vrcp.f32 %v636_v55  ;;  %v2368_v21 = vadd.f32 %v2150_v58, %v423_v59  ;;  %v982_v22 = vmul.f32 %v2236_v41, %v950_v33 }
 0x108   : > { %3216 = vst [vmem:[#allocation11_spill] sm:$0xff] %v2363_v11  ;;  %v948_v26 = vadd.f32 0.2548296, %v916_v50  ;;  %v609_v9 = vmul.f32 0.3275911, %v2355_v36  ;;  %v2375_v44 = vpop.eup %1917  ;;  %v858_v5 = vmul.f32 %v2302_v57, %v826_v62  ;;  %v1053_v40 = vmul.f32 %v1021_v13, %v2227_v37 }
 0x109   : > { %3217 = vst [vmem:[#allocation12_spill] sm:$0xff] %v2368_v21  ;;  %v2373_v29 = vand.u32 2147483647, %v2358_v16  ;;  %v2378_v39 = vmul.f32 1.442695, %v1048_v14  ;;  %v1019_v52 = vsub.f32 0.0, %v2240_v45  ;;  %v921_v41 = vmul.f32 %v2269_v60, %v889_v24 }
 0x10a   : > { %v2382_v55 = vpop.eup %1919  ;;  %v829_v48 = vadd.f32 1.4214138, %v797_v8  ;;  %v795_v33 = vmul.f32 %v2335_v1, %v763_v12  ;;  %v2387_v50 = vand.u32 2147483647, %v2363_v11  ;;  %v2392_v62 = vmul.f32 %v2329_v56, %v981_v19 }
 0x10b   : > { %v2389_v59 = vpop.eup %1921  ;;  %v2394_v14 = vmul.f32 %v1912_v17, %v979_v61  ;;  %v2397_v37 = vmul.f32 0.70710677, %v2368_v21  ;;  %v2400_v13 = vadd.f32 %v1798_v43, %v2150_v58  ;;  %v2402_v24 = vmul.f32 %v1914_v46, %v982_v22  ;;  %v436_v22 = vpop.f32.mrf.mxu0 }
 0x10c   : > { %3218 = vst [vmem:[#allocation13_spill] sm:$0xff] %v2389_v59  ;;  %v980_v8 = vmul.f32 %v2246_v51, %v948_v26  ;;  %v641_v12 = vadd.f32 1.0, %v609_v9  ;;  %v607_v11 = vmul.f32 0.3275911, %v2373_v29  ;;  %v890_v16 = vadd.f32 -0.28449672, %v858_v5 }
 0x10d   : > { %3219 = vst [vmem:[#allocation14_spill] sm:$0xff] %v2397_v37  ;;  %3220 = vst [vmem:[#allocation15_spill] sm:$0xff] %v2400_v13  ;;  %v1095_v59 = vmul.f32 1.442695, %v1053_v40  ;;  %v1051_v56 = vmul.f32 %v1019_v52, %v2240_v45  ;;  %v734_v17 = vmul.f32 1.0614054, %v2382_v55  ;;  %v2408_v19 = vpop.eup %1923  ;;  %v861_v21 = vmul.f32 %v2319_v63, %v829_v48 }
 0x10e   : > { %3221 = vst [vmem:[#allocation16_spill] sm:$0xff] %v2408_v19  ;;  %v953_v61 = vadd.f32 0.2548296, %v921_v41  ;;  %v827_v43 = vadd.f32 1.4214138, %v795_v33  ;;  %v1173_v51 = vsub.f32 1.0, %v2392_v62  ;;  %v2424_v52 = vmul.f32 %v1916_v53, %v980_v8 }
 0x10f   : > { %v610_v46 = vmul.f32 0.3275911, %v2387_v50  ;;  %v1171_v26 = vsub.f32 1.0, %v2394_v14  ;;  %v2417_v45 = vand.u32 2147483647, %v2397_v37  ;;  %v1926_v5 = vpop.eup %1925  ;;  %v1174_v40 = vsub.f32 1.0, %v2402_v24 }
 0x110   : > { %v2420_v9 = vmul.f32 0.70710677, %v2400_v13  ;;  %1931 = vrcp.f32 %v641_v12  ;;  %v639_v41 = vadd.f32 1.0, %v607_v11  ;;  %v922_v48 = vmul.f32 %v2302_v57, %v890_v16 }
 0x111   : > { %v1091_v33 = vmul.f32 1.442695, %v1051_v56  ;;  %v766_v62 = vadd.f32 -1.4531521, %v734_v17  ;;  %v2428_v14 = vadd.f32 %v2150_v58, %v436_v22  ;;  %v2430_v19 = vpop.eup %1927  ;;  %v985_v37 = vmul.f32 %v2269_v60, %v953_v61  ;;  %v1799_v22 = vpop.f32.mrf.mxu0 }
 0x112   : > { %3222 = vst [vmem:[#allocation17_spill] sm:$0xff] %v2430_v19  ;;  %v893_v13 = vadd.f32 -0.28449672, %v861_v21  ;;  %v859_v24 = vmul.f32 %v2335_v1, %v827_v43  ;;  %v642_v32 = vadd.f32 1.0, %v610_v46  ;;  %v1237_v31 = vsub.f32 0.0, %v1173_v51 }
 0x113   : > { %1933 = vpow2.f32 %v1095_v59  ;;  %v608_v53 = vmul.f32 0.3275911, %v2417_v45  ;;  %v2436_v11 = vand.u32 2147483647, %v2420_v9  ;;  %v1235_v8 = vsub.f32 0.0, %v1171_v26 }
 0x114   : > { %v2438_v16 = vpop.eup %1929  ;;  %v1238_v12 = vsub.f32 0.0, %v1174_v40  ;;  %v1172_v56 = vsub.f32 1.0, %v2424_v52  ;;  %1935 = vrcp.f32 %v639_v41  ;;  %v954_v60 = vadd.f32 0.2548296, %v922_v48 }
 0x115   : > { %v798_v21 = vmul.f32 %v2382_v55, %v766_v62  ;;  %v1022_v17 = vsub.f32 0.0, %v2285_v42  ;;  %v2445_v59 = vmul.f32 0.70710677, %v2428_v14  ;;  %v1145_v61 = vmul.f32 %v2375_v44, %v985_v37 }
 0x116   : > { %v925_v43 = vmul.f32 %v2319_v63, %v893_v13  ;;  %v891_v46 = vadd.f32 -0.28449672, %v859_v24  ;;  %1937 = vrcp.f32 %v642_v32  ;;  %v732_v52 = vmul.f32 1.0614054, %v2438_v16 }
 0x117   : > { %1939 = vpow2.f32 %v2378_v39  ;;  %v640_v41 = vadd.f32 1.0, %v608_v53  ;;  %v613_v48 = vmul.f32 0.3275911, %v2436_v11  ;;  %v1269_v62 = vsel %vm1205_vm2, %v1173_v51, %v1237_v31  ;;  %v439_v31 = vpop.f32.mrf.mxu0 }
 0x118   : > { %v1267_v19 = vsel %vm1203_vm3, %v1171_v26, %v1235_v8  ;;  %v2457_v44 = vmul.f32 0.5, %v2223_v35  ;;  %1941 = vpow2.f32 %v1091_v33  ;;  %v1270_v32 = vsel %vm1206_vm4, %v1174_v40, %v1238_v12 }
 0x119   : > { %v986_v39 = vmul.f32 %v2302_v57, %v954_v60  ;;  %v830_v37 = vadd.f32 1.4214138, %v798_v21  ;;  %v2463_v13 = vand.u32 2147483647, %v2445_v59  ;;  %v1236_v24 = vsub.f32 0.0, %v1172_v56 }
 0x11a   : > { %v1177_v53 = vsub.f32 1.0, %v1145_v61  ;;  %v957_v0 = vadd.f32 0.2548296, %v925_v43  ;;  %v1054_v2 = vmul.f32 %v1022_v17, %v2285_v42  ;;  %v923_v35 = vmul.f32 %v2335_v1, %v891_v46 }
 0x11b   : > { %v764_v51 = vadd.f32 -1.4531521, %v732_v52  ;;  %1943 = vrcp.f32 %v640_v41  ;;  %v645_v4 = vadd.f32 1.0, %v613_v48  ;;  %v1301_v26 = vadd.f32 1.0, %v1269_v62 }
 0x11c   : > { %v1299_v40 = vadd.f32 1.0, %v1267_v19  ;;  %v2469_v57 = vmul.f32 0.5, %v2250_v54  ;;  %v2472_v33 = vadd.f32 %v1799_v22, %v2150_v58  ;;  %v1146_v12 = vmul.f32 %v1926_v5, %v986_v39 }
 0x11d   : > { %v2474_v8 = vpop.eup %1931  ;;  %v862_v60 = vmul.f32 %v2382_v55, %v830_v37  ;;  %v611_v42 = vmul.f32 0.3275911, %v2463_v13  ;;  %v2479_v21 = vadd.f32 %v2150_v58, %v439_v31  ;;  %v1302_v17 = vadd.f32 1.0, %v1270_v32 }
 0x11e   : > { %v1268_v19 = vsel %vm1204_vm5, %v1172_v56, %v1236_v24  ;;  %v1241_v61 = vsub.f32 0.0, %v1177_v53  ;;  %v989_v54 = vmul.f32 %v2319_v63, %v957_v0  ;;  %v955_v43 = vadd.f32 0.2548296, %v923_v35 }
 0x11f   : > { %v1097_v46 = vmul.f32 1.442695, %v1054_v2  ;;  %v796_v22 = vmul.f32 %v2438_v16, %v764_v51  ;;  %1945 = vrcp.f32 %v645_v4  ;;  %v2486_v52 = vmul.f32 %v1301_v26, %v2256_v3 }
 0x120   : > { %v1934_v5 = vpop.eup %1933  ;;  %v1020_v41 = vsub.f32 0.0, %v2323_v23  ;;  %v737_v48 = vmul.f32 1.0614054, %v2474_v8  ;;  %v2492_v10 = vmul.f32 0.70710677, %v2472_v33  ;;  %v1178_v63 = vsub.f32 1.0, %v1146_v12 }
 0x121   : > { %v2494_v56 = vpop.eup %1935  ;;  %v894_v62 = vadd.f32 -0.28449672, %v862_v60  ;;  %v643_v32 = vadd.f32 1.0, %v611_v42  ;;  %v2497_v39 = vmul.f32 0.70710677, %v2479_v21  ;;  %v2500_v3 = vmul.f32 %v1299_v40, %v2259_v6 }
 0x122   : > { %v2503_v37 = vmul.f32 %v1302_v17, %v2274_v25  ;;  %v1300_v24 = vadd.f32 1.0, %v1268_v19  ;;  %v1149_v0 = vmul.f32 %v1934_v5, %v989_v54  ;;  %v1273_v31 = vsel %vm1209_vm6, %v1177_v53, %v1241_v61 }
 0x123   : > { %v2505_v2 = vpop.eup %1937  ;;  %v987_v35 = vmul.f32 %v2335_v1, %v955_v43  ;;  %1947 = vpow2.f32 %v1097_v46  ;;  %v828_v51 = vadd.f32 1.4214138, %v796_v22  ;;  %v1052_v26 = vmul.f32 %v1020_v41, %v2323_v23 }
 0x124   : > { %v2510_v4 = vpop.eup %1939  ;;  %v769_v6 = vadd.f32 -1.4531521, %v737_v48  ;;  %v735_v40 = vmul.f32 1.0614054, %v2494_v56  ;;  %v2515_v25 = vand.u32 2147483647, %v2492_v10  ;;  %v926_v18 = vmul.f32 %v2382_v55, %v894_v62 }
 0x125   : > { %v1942_v12 = vpop.eup %1941  ;;  %v1242_v60 = vsub.f32 0.0, %v1178_v63  ;;  %1949 = vrcp.f32 %v643_v32  ;;  %v2520_v1 = vand.u32 2147483647, %v2497_v39  ;;  %v1181_v53 = vsub.f32 1.0, %v1149_v0 }
 0x126   : > { %v2523_v42 = vmul.f32 0.5, %v2290_v47  ;;  %v1025_v23 = vsub.f32 0.0, %v2355_v36  ;;  %v738_v17 = vmul.f32 1.0614054, %v2505_v2  ;;  %v1305_v61 = vadd.f32 1.0, %v1273_v31 }
 0x127   : > { %v1147_v54 = vmul.f32 %v1942_v12, %v987_v35  ;;  %v860_v43 = vmul.f32 %v2438_v16, %v828_v51  ;;  %v2533_v22 = vmul.f32 %v1300_v24, %v2278_v27  ;;  %v801_v5 = vmul.f32 %v2474_v8, %v769_v6 }
 0x128   : > { %v2530_v46 = vpop.eup %1943  ;;  %v767_v47 = vadd.f32 -1.4531521, %v735_v40  ;;  %v614_v41 = vmul.f32 0.3275911, %v2515_v25  ;;  %v1274_v48 = vsel %vm1210_vm7, %v1178_v63, %v1242_v60  ;;  %v958_v62 = vadd.f32 0.2548296, %v926_v18 }
 0x129   : > { %v1093_v32 = vmul.f32 1.442695, %v1052_v26  ;;  %v612_v0 = vmul.f32 0.3275911, %v2520_v1  ;;  %v1245_v31 = vsub.f32 0.0, %v1181_v53  ;;  %v1057_v35 = vmul.f32 %v1025_v23, %v2355_v36 }
 0x12a   : > { %v1023_v51 = vsub.f32 0.0, %v2373_v29  ;;  %v770_v12 = vadd.f32 -1.4531521, %v738_v17  ;;  %v2543_v27 = vmul.f32 %v1305_v61, %v2294_v20  ;;  %v1179_v24 = vsub.f32 1.0, %v1147_v54 }
 0x12b   : > { %v892_v6 = vadd.f32 -0.28449672, %v860_v43  ;;  %v736_v28 = vmul.f32 1.0614054, %v2530_v46  ;;  %v2550_v26 = vmul.f32 0.5, %v2327_v49  ;;  %v799_v36 = vmul.f32 %v2494_v56, %v767_v47 }
 0x12c   : > { %v2547_v63 = vpop.eup %1945  ;;  %v833_v40 = vadd.f32 1.4214138, %v801_v5  ;;  %v646_v60 = vadd.f32 1.0, %v614_v41  ;;  %v1306_v18 = vadd.f32 1.0, %v1274_v48  ;;  %v990_v23 = vmul.f32 %v2382_v55, %v958_v62  ;;  %v1802_v41 = vpop.f32.mrf.mxu0 }
 0x12d   : > { %1951 = vpow2.f32 %v1093_v32  ;;  %v644_v20 = vadd.f32 1.0, %v612_v0  ;;  %v1277_v17 = vsel %vm1213_vm8, %v1181_v53, %v1245_v31  ;;  %v1103_v61 = vmul.f32 1.442695, %v1057_v35 }
 0x12e   : > { %v1055_v54 = vmul.f32 %v1023_v51, %v2373_v29  ;;  %v802_v43 = vmul.f32 %v2505_v2, %v770_v12  ;;  %v1243_v19 = vsub.f32 0.0, %v1179_v24  ;;  %v924_v49 = vmul.f32 %v2438_v16, %v892_v6 }
 0x12f   : > { %v768_v5 = vadd.f32 -1.4531521, %v736_v28  ;;  %v741_v47 = vmul.f32 1.0614054, %v2547_v63  ;;  %v865_v55 = vmul.f32 %v2474_v8, %v833_v40  ;;  %v831_v62 = vadd.f32 1.4214138, %v799_v36  ;;  %v452_v36 = vpop.f32.mrf.mxu0 }
 0x130   : > { %v1948_v48 = vpop.eup %1947  ;;  %v1026_v32 = vsub.f32 0.0, %v2387_v50  ;;  %1953 = vrcp.f32 %v646_v60  ;;  %v2563_v53 = vmul.f32 0.5, %v2345_v30  ;;  %v1024_v29 = vsub.f32 0.0, %v2417_v45 }
 0x131   : > { %v1150_v34 = vmul.f32 %v1948_v48, %v990_v23  ;;  %1955 = vrcp.f32 %v644_v20  ;;  %v2569_v31 = vmul.f32 %v1306_v18, %v2312_v7  ;;  %v1309_v35 = vadd.f32 1.0, %v1277_v17  ;;  %v3223_v20 = vld [vmem:[#allocation9_spill] sm:$0xff]  ;;  %v1803_v48 = vpop.f32.mrf.mxu0 }
 0x132   : > { %v2566_v0 = vpop.eup %1949  ;;  %v1099_v51 = vmul.f32 1.442695, %v1055_v54  ;;  %v834_v12 = vadd.f32 1.4214138, %v802_v43  ;;  %v956_v6 = vadd.f32 0.2548296, %v924_v49  ;;  %1957 = vpow2.f32 %v1103_v61 }
 0x133   : > { %v800_v28 = vmul.f32 %v2530_v46, %v768_v5  ;;  %v773_v40 = vadd.f32 -1.4531521, %v741_v47  ;;  %v1275_v30 = vsel %vm1211_vm9, %v1179_v24, %v1243_v19  ;;  %v897_v60 = vadd.f32 -0.28449672, %v865_v55  ;;  %v3224_v43 = vld [vmem:[#allocation7_spill] sm:$0xff] }
 0x134   : > { %v863_v23 = vmul.f32 %v2494_v56, %v831_v62  ;;  %v1058_v7 = vmul.f32 %v1026_v32, %v2387_v50  ;;  %v1182_v18 = vsub.f32 1.0, %v1150_v34  ;;  %v2578_v17 = vmul.f32 0.5, %v3223_v20 }
 0x135   : > { %v1056_v61 = vmul.f32 %v1024_v29, %v2417_v45  ;;  %v739_v54 = vmul.f32 1.0614054, %v2566_v0  ;;  %v2583_v49 = vmul.f32 %v1309_v35, %v3224_v43  ;;  %1959 = vpow2.f32 %v1099_v51  ;;  %v3226_v29 = vld [vmem:[#allocation12_spill] sm:$0xff]  ;;  %v3227_v43 = vld [vmem:[#allocation15_spill] sm:$0xff] }
 0x136   : > { %v866_v38 = vmul.f32 %v2505_v2, %v834_v12  ;;  %v1029_v19 = vsub.f32 0.0, %v2436_v11  ;;  %v1307_v24 = vadd.f32 1.0, %v1275_v30  ;;  %v988_v5 = vmul.f32 %v2438_v16, %v956_v6 }
 0x137   : > { %3225 = vst [vmem:[#allocation9_spill] sm:$0xff] %v2583_v49  ;;  %v832_v50 = vadd.f32 1.4214138, %v800_v28  ;;  %v805_v47 = vmul.f32 %v2547_v63, %v773_v40  ;;  %v929_v55 = vmul.f32 %v2474_v8, %v897_v60  ;;  %v895_v45 = vadd.f32 -0.28449672, %v863_v23 }
 0x138   : > { %v1105_v62 = vmul.f32 1.442695, %v1058_v7  ;;  %v1027_v32 = vsub.f32 0.0, %v2463_v13  ;;  %v1246_v34 = vsub.f32 0.0, %v1182_v18  ;;  %v2592_v35 = vmul.f32 0.5, %v3226_v29  ;;  %v455_v29 = vpop.f32.mrf.mxu0 }
 0x139   : > { %v1101_v51 = vmul.f32 1.442695, %v1056_v61  ;;  %v771_v12 = vadd.f32 -1.4531521, %v739_v54  ;;  %v898_v30 = vadd.f32 -0.28449672, %v866_v38  ;;  %v1061_v6 = vmul.f32 %v1029_v19, %v2436_v11 }
 0x13a   : > { %v1952_v20 = vpop.eup %1951  ;;  %v2595_v16 = vmul.f32 0.5, %v3227_v43  ;;  %v2599_v28 = vadd.f32 %v1802_v41, %v2150_v58  ;;  %v2602_v40 = vmul.f32 %v1307_v24, %v2457_v44  ;;  %v864_v23 = vmul.f32 %v2530_v46, %v832_v50  ;;  %v3230_v24 = vld [vmem:[#allocation5_spill] sm:$0xff] }
 0x13b   : > { %v1148_v60 = vmul.f32 %v1952_v20, %v988_v5  ;;  %v837_v7 = vadd.f32 1.4214138, %v805_v47  ;;  %v961_v61 = vadd.f32 0.2548296, %v929_v55  ;;  %v927_v54 = vmul.f32 %v2494_v56, %v895_v45  ;;  %v2629_v45 = vpop.f32.mrf.mxu0 }
 0x13c   : > { %3228 = vst [vmem:[#allocation7_spill] sm:$0xff] %v2595_v16  ;;  %3229 = vst [vmem:[#allocation12_spill] sm:$0xff] %v2599_v28  ;;  %1961 = vpow2.f32 %v1105_v62  ;;  %v1059_v38 = vmul.f32 %v1027_v32, %v2463_v13  ;;  %v1278_v11 = vsel %vm1214_vm10, %v1182_v18, %v1246_v34  ;;  %v2612_v44 = vmul.f32 0.5, %v2428_v14 }
 0x13d   : > { %v2607_v43 = vpop.eup %1953  ;;  %1963 = vpow2.f32 %v1101_v51  ;;  %v803_v41 = vmul.f32 %v2566_v0, %v771_v12  ;;  %vm1212_vm11 = vcmp.ge.f32.partialorder %v3230_v24, 0.0  ;;  %v930_v5 = vmul.f32 %v2505_v2, %v898_v30 }
 0x13e   : > { %v2615_v19 = vpop.eup %1955  ;;  %v1111_v50 = vmul.f32 1.442695, %v1061_v6  ;;  %v2620_v13 = vmul.f32 0.70710677, %v2599_v28  ;;  %v2623_v47 = vadd.f32 %v2150_v58, %v452_v36  ;;  %v1180_v15 = vsub.f32 1.0, %v1148_v60 }
 0x13f   : > { %v896_v18 = vadd.f32 -0.28449672, %v864_v23  ;;  %v869_v14 = vmul.f32 %v2547_v63, %v837_v7  ;;  %v2627_v55 = vmul.f32 0.5, %v2472_v33  ;;  %v1958_v62 = vpop.eup %1957  ;;  %v1310_v32 = vadd.f32 1.0, %v1278_v11  ;;  %v468_v11 = vpop.f32.mrf.mxu0 }
 0x140   : > { %3231 = vst [vmem:[#allocation15_spill] sm:$0xff] %v2620_v13  ;;  %v993_v34 = vmul.f32 %v2474_v8, %v961_v61  ;;  %v959_v51 = vadd.f32 0.2548296, %v927_v54  ;;  %v1107_v12 = vmul.f32 1.442695, %v1059_v38  ;;  %v2635_v6 = vadd.f32 %v2150_v58, %v455_v29 }
 0x141   : > { %3232 = vst [vmem:[#allocation5_spill] sm:$0xff] %v2627_v55  ;;  %v835_v20 = vadd.f32 1.4214138, %v803_v41  ;;  %v742_v30 = vmul.f32 1.0614054, %v2607_v43  ;;  %1965 = vpow2.f32 %v1111_v50  ;;  %v1244_v8 = vsub.f32 0.0, %v1180_v15 }
 0x142   : > { %v740_v36 = vmul.f32 1.0614054, %v2615_v19  ;;  %v962_v60 = vadd.f32 0.2548296, %v930_v5  ;;  %v2638_v33 = vand.u32 2147483647, %v2620_v13  ;;  %v1960_v7 = vpop.eup %1959  ;;  %v928_v61 = vmul.f32 %v2530_v46, %v896_v18 }
 0x143   : > { %v2641_v23 = vmul.f32 0.70710677, %v2623_v47  ;;  %v901_v54 = vadd.f32 -0.28449672, %v869_v14  ;;  %v1030_v38 = vsub.f32 0.0, %v2515_v25  ;;  %v2646_v41 = vmul.f32 %v1310_v32, %v2469_v57 }
 0x144   : > { %v1153_v29 = vmul.f32 %v1958_v62, %v993_v34  ;;  %v991_v5 = vmul.f32 %v2494_v56, %v959_v51  ;;  %v2650_v50 = vadd.f32 %v1803_v48, %v2150_v58  ;;  %v867_v28 = vmul.f32 %v2566_v0, %v835_v20  ;;  %v3236_v58 = vld [vmem:[#allocation8_spill] sm:$0xff]  ;;  %v2666_v34 = vpop.f32.mrf.mxu0 }
 0x145   : > { %3233 = vst [vmem:[#allocation18_spill] sm:$0xff] %v2641_v23  ;;  %3234 = vst [vmem:[#allocation19_spill] sm:$0xff] %v2646_v41  ;;  %v774_v16 = vadd.f32 -1.4531521, %v742_v30  ;;  %v772_v55 = vadd.f32 -1.4531521, %v740_v36  ;;  %v994_v18 = vmul.f32 %v2505_v2, %v962_v60  ;;  %1967 = vpow2.f32 %v1107_v12 }
 0x146   : > { %3235 = vst [vmem:[#allocation20_spill] sm:$0xff] %v2650_v50  ;;  %v2654_v13 = vmul.f32 0.70710677, %v2635_v6  ;;  %v617_v14 = vmul.f32 0.3275911, %v2638_v33  ;;  %v1276_v56 = vsel %vm1212_vm11, %v1180_v15, %v1244_v8  ;;  %vm1217_vm12 = vcmp.ge.f32.partialorder %v3236_v58, 0.0 }
 0x147   : > { %v2659_v57 = vand.u32 2147483647, %v2641_v23  ;;  %v960_v48 = vadd.f32 0.2548296, %v928_v61  ;;  %v933_v62 = vmul.f32 %v2547_v63, %v901_v54  ;;  %v1062_v32 = vmul.f32 %v1030_v38, %v2515_v25 }
 0x148   : > { %v1185_v51 = vsub.f32 1.0, %v1153_v29  ;;  %v1151_v2 = vmul.f32 %v1960_v7, %v991_v5  ;;  %v1028_v12 = vsub.f32 0.0, %v2520_v1  ;;  %v2670_v20 = vmul.f32 0.70710677, %v2650_v50  ;;  %v3239_v29 = vld [vmem:[#allocation10_spill] sm:$0xff]  ;;  %v471_v50 = vpop.f32.mrf.mxu0 }
 0x149   : > { %v1962_v30 = vpop.eup %1961  ;;  %v899_v36 = vadd.f32 -0.28449672, %v867_v28  ;;  %v806_v24 = vmul.f32 %v2607_v43, %v774_v16  ;;  %v804_v15 = vmul.f32 %v2615_v19, %v772_v55  ;;  %v2675_v60 = vand.u32 2147483647, %v2654_v13 }
 0x14a   : > { %3237 = vst [vmem:[#allocation8_spill] sm:$0xff] %v2670_v20  ;;  %v1964_v8 = vpop.eup %1963  ;;  %v1154_v25 = vmul.f32 %v1962_v30, %v994_v18  ;;  %v2678_v61 = vmul.f32 0.5, %v2479_v21  ;;  %v649_v7 = vadd.f32 1.0, %v617_v14  ;;  %v615_v54 = vmul.f32 0.3275911, %v2659_v57  ;;  %v3240_v21 = vld [vmem:[#allocation11_spill] sm:$0xff] }
 0x14b   : > { %v1308_v38 = vadd.f32 1.0, %v1276_v56  ;;  %vm1215_vm13 = vcmp.ge.f32.partialorder %v3239_v29, 0.0  ;;  %v992_v28 = vmul.f32 %v2530_v46, %v960_v48  ;;  %v965_v5 = vadd.f32 0.2548296, %v933_v62  ;;  %v2693_v48 = vld [vmem:[%s3161_s2] ss:$0 sm:$0xff] }
 0x14c   : > { %3238 = vst [vmem:[#allocation21_spill] sm:$0xff] %v2678_v61  ;;  %v1113_v16 = vmul.f32 1.442695, %v1062_v32  ;;  %v1249_v55 = vsub.f32 0.0, %v1185_v51  ;;  %v1183_v41 = vsub.f32 1.0, %v1151_v2  ;;  %v1060_v49 = vmul.f32 %v1028_v12, %v2520_v1 }
 0x14d   : > { %v2685_v18 = vand.u32 2147483647, %v2670_v20  ;;  %vm1218_vm14 = vcmp.ge.f32.partialorder %v3240_v21, 0.0  ;;  %v931_v14 = vmul.f32 %v2566_v0, %v899_v36  ;;  %v838_v30 = vadd.f32 1.4214138, %v806_v24 }
 0x14e   : > { %v836_v56 = vadd.f32 1.4214138, %v804_v15  ;;  %v616_v61 = vmul.f32 0.3275911, %v2675_v60  ;;  %v1186_v23 = vsub.f32 1.0, %v1154_v25  ;;  %1969 = vrcp.f32 %v649_v7  ;;  %v1966_v62 = vpop.eup %1965 }
 0x14f   : > { %v647_v46 = vadd.f32 1.0, %v615_v54  ;;  %v2696_v1 = vadd.f32 %v2693_v48, %v471_v50  ;;  %v1152_v32 = vmul.f32 %v1964_v8, %v992_v28  ;;  %v997_v2 = vmul.f32 %v2547_v63, %v965_v5  ;;  %v2710_v63 = vpop.f32.mrf.mxu0 }
 0x150   : > { %1971 = vpow2.f32 %v1113_v16  ;;  %v2700_v12 = vadd.f32 %v2693_v48, %v468_v11  ;;  %v2703_v36 = vmul.f32 %v1308_v38, %v2523_v42  ;;  %v1281_v24 = vsel %vm1217_vm12, %v1185_v51, %v1249_v55  ;;  %v3243_v11 = vld [vmem:[#allocation14_spill] sm:$0xff] }
 0x151   : > { %3241 = vst [vmem:[#allocation10_spill] sm:$0xff] %v2696_v1  ;;  %v1247_v15 = vsub.f32 0.0, %v1183_v41  ;;  %v618_v25 = vmul.f32 0.3275911, %v2685_v18  ;;  %v963_v7 = vadd.f32 0.2548296, %v931_v14  ;;  %v870_v50 = vmul.f32 %v2607_v43, %v838_v30 }
 0x152   : > { %3242 = vst [vmem:[#allocation11_spill] sm:$0xff] %v2700_v12  ;;  %v868_v8 = vmul.f32 %v2615_v19, %v836_v56  ;;  %v648_v54 = vadd.f32 1.0, %v616_v61  ;;  %v1250_v28 = vsub.f32 0.0, %v1186_v23  ;;  %vm1216_vm15 = vcmp.ge.f32.partialorder %v3243_v11, 0.0  ;;  %v1968_v58 = vpop.eup %1967 }
 0x153   : > { %v1109_v5 = vmul.f32 1.442695, %v1060_v49  ;;  %1973 = vrcp.f32 %v647_v46  ;;  %v2714_v42 = vmul.f32 0.70710677, %v2696_v1  ;;  %v1184_v51 = vsub.f32 1.0, %v1152_v32 }
 0x154   : > { %v1157_v38 = vmul.f32 %v1966_v62, %v997_v2  ;;  %v1033_v16 = vsub.f32 0.0, %v2638_v33  ;;  %v2718_v55 = vmul.f32 0.70710677, %v2700_v12  ;;  %v1313_v14 = vadd.f32 1.0, %v1281_v24  ;;  %v484_v62 = vpop.f32.mrf.mxu0 }
 0x155   : > { %3244 = vst [vmem:[#allocation14_spill] sm:$0xff] %v2714_v42  ;;  %v1279_v61 = vsel %vm1215_vm13, %v1183_v41, %v1247_v15  ;;  %v650_v30 = vadd.f32 1.0, %v618_v25  ;;  %v2724_v49 = vadd.f32 %v2693_v48, %v2629_v45  ;;  %v995_v56 = vmul.f32 %v2566_v0, %v963_v7 }
 0x156   : > { %3245 = vst [vmem:[#allocation22_spill] sm:$0xff] %v2718_v55  ;;  %v902_v46 = vadd.f32 -0.28449672, %v870_v50  ;;  %v900_v1 = vadd.f32 -0.28449672, %v868_v8  ;;  %1975 = vrcp.f32 %v648_v54  ;;  %v1282_v32 = vsel %vm1218_vm14, %v1186_v23, %v1250_v28 }
 0x157   : > { %3246 = vst [vmem:[#allocation23_spill] sm:$0xff] %v2724_v49  ;;  %1977 = vpow2.f32 %v1109_v5  ;;  %v2731_v2 = vadd.f32 %v2693_v48, %v2666_v34  ;;  %v2734_v41 = vand.u32 2147483647, %v2714_v42  ;;  %v1248_v29 = vsub.f32 0.0, %v1184_v51 }
 0x158   : > { %v1189_v45 = vsub.f32 1.0, %v1157_v38  ;;  %vm1221_vm0 = vcmp.ge.f32.partialorder %v2420_v9, 0.0  ;;  %v1065_v0 = vmul.f32 %v1033_v16, %v2638_v33  ;;  %v2739_v24 = vand.u32 2147483647, %v2718_v55 }
 0x159   : > { %3247 = vst [vmem:[#allocation24_spill] sm:$0xff] %v2731_v2  ;;  %v1031_v21 = vsub.f32 0.0, %v2659_v57  ;;  %1979 = vrcp.f32 %v650_v30  ;;  %v2743_v23 = vmul.f32 0.70710677, %v2724_v49  ;;  %v2746_v34 = vadd.f32 %v2693_v48, %v484_v62 }
 0x15a   : > { %v1311_v15 = vadd.f32 1.0, %v1279_v61  ;;  %v1155_v25 = vmul.f32 %v1968_v58, %v995_v56  ;;  %v934_v7 = vmul.f32 %v2607_v43, %v902_v46  ;;  %v932_v50 = vmul.f32 %v2615_v19, %v900_v1  ;;  %v1811_v46 = vpop.f32.mrf.mxu0 }
 0x15b   : > { %3248 = vst [vmem:[#allocation25_spill] sm:$0xff] %v2743_v23  ;;  %3249 = vst [vmem:[#allocation26_spill] sm:$0xff] %v2746_v34  ;;  %v2751_v33 = vmul.f32 %v1313_v14, %v2550_v26  ;;  %v1314_v8 = vadd.f32 1.0, %v1282_v32  ;;  %v2754_v54 = vmul.f32 0.70710677, %v2731_v2  ;;  %v2757_v5 = vpop.eup %1969  ;;  %v1280_v38 = vsel %vm1216_vm15, %v1184_v51, %v1248_v29 }
 0x15c   : > { %v620_v28 = vmul.f32 0.3275911, %v2734_v41  ;;  %v1119_v16 = vmul.f32 1.442695, %v1065_v0  ;;  %v2762_v58 = vmul.f32 0.5, %v2623_v47  ;;  %v1253_v26 = vsub.f32 0.0, %v1189_v45 }
 0x15d   : > { %3250 = vst [vmem:[#allocation27_spill] sm:$0xff] %v2751_v33  ;;  %3251 = vst [vmem:[#allocation28_spill] sm:$0xff] %v2754_v54  ;;  %v619_v1 = vmul.f32 0.3275911, %v2739_v24  ;;  %v1972_v61 = vpop.eup %1971  ;;  %v1063_v14 = vmul.f32 %v1031_v21, %v2659_v57  ;;  %v2767_v30 = vand.u32 2147483647, %v2743_v23  ;;  %v2773_v11 = vmul.f32 %v1311_v15, %v2563_v53 }
 0x15e   : > { %3252 = vst [vmem:[#allocation29_spill] sm:$0xff] %v2762_v58  ;;  %v2770_v56 = vmul.f32 0.70710677, %v2746_v34  ;;  %v1187_v51 = vsub.f32 1.0, %v1155_v25  ;;  %vm1219_vm1 = vcmp.ge.f32.partialorder %v2445_v59, 0.0  ;;  %v2777_v32 = vmul.f32 %v1314_v8, %v2578_v17 }
 0x15f   : > { %v966_v47 = vadd.f32 0.2548296, %v934_v7  ;;  %v964_v62 = vadd.f32 0.2548296, %v932_v50  ;;  %v745_v57 = vmul.f32 1.0614054, %v2757_v5  ;;  %1981 = vpow2.f32 %v1119_v16 }
 0x160   : > { %3253 = vst [vmem:[#allocation30_spill] sm:$0xff] %v2770_v56  ;;  %3254 = vst [vmem:[#allocation31_spill] sm:$0xff] %v2777_v32  ;;  %v2781_v29 = vand.u32 2147483647, %v2754_v54  ;;  %v652_v0 = vadd.f32 1.0, %v620_v28  ;;  %v2783_v21 = vpop.eup %1973  ;;  %v1312_v49 = vadd.f32 1.0, %v1280_v38  ;;  %v2786_v15 = vadd.f32 %v2693_v48, %v1811_v46 }
 0x161   : > { %v651_v53 = vadd.f32 1.0, %v619_v1  ;;  %v1285_v25 = vsel %vm1221_vm0, %v1189_v45, %v1253_v26  ;;  %v1115_v7 = vmul.f32 1.442695, %v1063_v14  ;;  %v621_v17 = vmul.f32 0.3275911, %v2767_v30 }
 0x162   : > { %3255 = vst [vmem:[#allocation32_spill] sm:$0xff] %v2786_v15  ;;  %v2792_v50 = vand.u32 2147483647, %v2770_v56  ;;  %v1251_v8 = vsub.f32 0.0, %v1187_v51  ;;  %v998_v28 = vmul.f32 %v2607_v43, %v966_v47  ;;  %v996_v34 = vmul.f32 %v2615_v19, %v964_v62 }
 0x163   : > { %v2798_v38 = vadd.f32 %v2693_v48, %v2710_v63  ;;  %v2800_v16 = vpop.eup %1975  ;;  %v777_v1 = vadd.f32 -1.4531521, %v745_v57  ;;  %v743_v9 = vmul.f32 1.0614054, %v2783_v21  ;;  %v622_v45 = vmul.f32 0.3275911, %v2781_v29 }
 0x164   : > { %1983 = vrcp.f32 %v652_v0  ;;  %v1978_v26 = vpop.eup %1977  ;;  %v2805_v14 = vmul.f32 %v1312_v49, %v2592_v35  ;;  %v1034_v43 = vsub.f32 0.0, %v2685_v18  ;;  %v2809_v19 = vmul.f32 0.70710677, %v2786_v15 }
 0x165   : > { %3256 = vst [vmem:[#allocation33_spill] sm:$0xff] %v2798_v38  ;;  %1985 = vrcp.f32 %v651_v53  ;;  %v2811_v63 = vadd.f32 1.0, %v1285_v25  ;;  %v653_v46 = vadd.f32 1.0, %v621_v17  ;;  %v623_v47 = vmul.f32 0.3275911, %v2792_v50  ;;  %v487_v53 = vpop.f32.mrf.mxu0 }
 0x166   : > { %3257 = vst [vmem:[#allocation34_spill] sm:$0xff] %v2809_v19  ;;  %1987 = vpow2.f32 %v1115_v7  ;;  %v2814_v62 = vpop.eup %1979  ;;  %v2816_v57 = vmul.f32 %v1972_v61, %v998_v28  ;;  %v1156_v0 = vmul.f32 %v1978_v26, %v996_v34  ;;  %v744_v35 = vmul.f32 1.0614054, %v2800_v16 }
 0x167   : > { %3258 = vst [vmem:[#allocation35_spill] sm:$0xff] %v2811_v63  ;;  %v2820_v49 = vmul.f32 0.70710677, %v2798_v38  ;;  %v1283_v15 = vsel %vm1219_vm1, %v1187_v51, %v1251_v8  ;;  %v809_v25 = vmul.f32 %v2757_v5, %v777_v1  ;;  %v775_v7 = vadd.f32 -1.4531521, %v743_v9 }
 0x168   : > { %v654_v17 = vadd.f32 1.0, %v622_v45  ;;  %v1066_v2 = vmul.f32 %v1034_v43, %v2685_v18  ;;  %v2827_v23 = vmul.f32 0.5, %v2635_v6  ;;  %v1032_v34 = vsub.f32 0.0, %v2675_v60 }
 0x169   : > { %3259 = vst [vmem:[#allocation36_spill] sm:$0xff] %v2820_v49  ;;  %v2831_v61 = vand.u32 2147483647, %v2809_v19  ;;  %vm1220_vm2 = vcmp.ge.f32.partialorder %v2497_v39, 0.0  ;;  %v746_v28 = vmul.f32 1.0614054, %v2814_v62  ;;  %1989 = vrcp.f32 %v653_v46 }
 0x16a   : > { %3260 = vst [vmem:[#allocation37_spill] sm:$0xff] %v2827_v23  ;;  %v655_v59 = vadd.f32 1.0, %v623_v47  ;;  %v2836_v51 = vadd.f32 %v2693_v48, %v487_v53  ;;  %v1315_v8 = vadd.f32 1.0, %v1283_v15  ;;  %v1188_v1 = vsub.f32 1.0, %v1156_v0 }
 0x16b   : > { %v776_v18 = vadd.f32 -1.4531521, %v744_v35  ;;  %v2839_v6 = vand.u32 2147483647, %v2820_v49  ;;  %v841_v45 = vadd.f32 1.4214138, %v809_v25  ;;  %v807_v26 = vmul.f32 %v2783_v21, %v775_v7 }
 0x16c   : > { %3261 = vst [vmem:[#allocation38_spill] sm:$0xff] %v2836_v51  ;;  %1991 = vrcp.f32 %v654_v17  ;;  %v1121_v43 = vmul.f32 1.442695, %v1066_v2  ;;  %v1064_v38 = vmul.f32 %v1032_v34, %v2675_v60  ;;  %v626_v46 = vmul.f32 0.3275911, %v2831_v61  ;;  %v2847_v15 = vpop.eup %1981  ;;  %v3263_v35 = vld [vmem:[#allocation13_spill] sm:$0xff] }
 0x16d   : > { %v1363_v48 = vpack.c.bf16 %v2533_v22, %v2500_v3  ;;  %v778_v47 = vadd.f32 -1.4531521, %v746_v28  ;;  %1993 = vrcp.f32 %v655_v59  ;;  %v2850_v0 = vmul.f32 0.70710677, %v2836_v51  ;;  %v3264_v60 = vld [vmem:[#allocation17_spill] sm:$0xff] }
 0x16e   : > { %v727_v53 = vmul.f32 1.0614054, %v3263_v35  ;;  %v1252_v25 = vsub.f32 0.0, %v1188_v1  ;;  %v808_v7 = vmul.f32 %v2800_v16, %v776_v18  ;;  %v625_v2 = vmul.f32 0.3275911, %v2839_v6 }
 0x16f   : > { %3262 = vst [vmem:[#allocation39_spill] sm:$0xff] %v2850_v0  ;;  %1828 = vmatprep.mubr.bf16.mxu0 %v1363_v48  ;;  %v728_v17 = vmul.f32 1.0614054, %v3264_v60  ;;  %v2857_v34 = vmul.f32 %v1315_v8, %v2612_v44  ;;  %v873_v3 = vmul.f32 %v2757_v5, %v841_v45  ;;  %v839_v22 = vadd.f32 1.4214138, %v807_v26 }
 0x170   : > { %v2861_v28 = vand.u32 2147483647, %v2850_v0  ;;  %v3266_v59 = vpack.c.bf16 %v2503_v37, %v2486_v52  ;;  %v3267_v18 = vsub.f32 1.0, %v2816_v57  ;;  %1995 = vpow2.f32 %v1121_v43 }
 0x171   : > { %3265 = vst [vmem:[#allocation13_spill] sm:$0xff] %v2857_v34  ;;  %v2866_v9 = vpop.eup %1983  ;;  %v658_v49 = vadd.f32 1.0, %v626_v46  ;;  %v759_v44 = vadd.f32 -1.4531521, %v727_v53  ;;  %v810_v45 = vmul.f32 %v2814_v62, %v778_v47  ;;  %v1117_v26 = vmul.f32 1.442695, %v1064_v38 }
 0x172   : > { %1829 = vmatmul.mubr.bf16.vlgmr.msra.gmra.mxu0 %v3266_v59  ;;  %v2870_v48 = vsub.f32 0.0, %v3267_v18  ;;  %v2872_v8 = vpop.eup %1985  ;;  %v1037_v19 = vsub.f32 0.0, %v2767_v30  ;;  %v624_v51 = vmul.f32 0.3275911, %v2861_v28  ;;  %v1284_v37 = vsel %vm1220_vm2, %v1188_v1, %v1252_v25 }
 0x173   : > { %v2877_v52 = vpop.eup %1987  ;;  %v840_v59 = vadd.f32 1.4214138, %v808_v7  ;;  %v657_v18 = vadd.f32 1.0, %v625_v2  ;;  %v760_v56 = vadd.f32 -1.4531521, %v728_v17  ;;  %v871_v46 = vmul.f32 %v2783_v21, %v839_v22 }
 0x174   : > { %v905_v43 = vadd.f32 -0.28449672, %v873_v3  ;;  %v748_v53 = vmul.f32 1.0614054, %v2866_v9  ;;  %v656_v54 = vadd.f32 1.0, %v624_v51  ;;  %1997 = vrcp.f32 %v658_v49 }
 0x175   : > { %v747_v38 = vmul.f32 1.0614054, %v2872_v8  ;;  %v791_v47 = vmul.f32 %v3263_v35, %v759_v44  ;;  %v792_v0 = vmul.f32 %v3264_v60, %v760_v56  ;;  %v842_v12 = vadd.f32 1.4214138, %v810_v45 }
 0x176   : > { %v1069_v39 = vmul.f32 %v1037_v19, %v2767_v30  ;;  %v1035_v1 = vsub.f32 0.0, %v2739_v24  ;;  %1999 = vrcp.f32 %v656_v54  ;;  %v2888_v25 = vpop.eup %1989  ;;  %v872_v7 = vmul.f32 %v2800_v16, %v840_v59 }
 0x177   : > { %2001 = vrcp.f32 %v657_v18  ;;  %v823_v2 = vadd.f32 1.4214138, %v791_v47  ;;  %v824_v51 = vadd.f32 1.4214138, %v792_v0  ;;  %v2891_v17 = vadd.f32 1.0, %v1284_v37 }
 0x178   : > { %v937_v49 = vmul.f32 %v2757_v5, %v905_v43  ;;  %v780_v3 = vadd.f32 -1.4531521, %v748_v53  ;;  %v1036_v56 = vsub.f32 0.0, %v2734_v41  ;;  %v903_v30 = vadd.f32 -0.28449672, %v871_v46 }
 0x179   : > { %v2895_v22 = vpop.eup %1991  ;;  %v779_v19 = vadd.f32 -1.4531521, %v747_v38  ;;  %v855_v54 = vmul.f32 %v3263_v35, %v823_v2  ;;  %v856_v44 = vmul.f32 %v3264_v60, %v824_v51  ;;  %v749_v45 = vmul.f32 1.0614054, %v2888_v25 }
 0x17a   : > { %v2900_v59 = vmul.f32 1.442695, %v1069_v39  ;;  %v1067_v0 = vmul.f32 %v1035_v1, %v2739_v24  ;;  %v1038_v37 = vsub.f32 0.0, %v2781_v29  ;;  %v2904_v18 = vpop.eup %1993  ;;  %v874_v43 = vmul.f32 %v2814_v62, %v842_v12 }
 0x17b   : > { %v904_v53 = vadd.f32 -0.28449672, %v872_v7  ;;  %v887_v47 = vadd.f32 -0.28449672, %v855_v54  ;;  %v888_v46 = vadd.f32 -0.28449672, %v856_v44  ;;  %v812_v51 = vmul.f32 %v2866_v9, %v780_v3 }
 0x17c   : > { %v2907_v38 = vadd.f32 0.2548296, %v937_v49  ;;  %v750_v2 = vmul.f32 1.0614054, %v2895_v22  ;;  %v1068_v39 = vmul.f32 %v1036_v56, %v2734_v41  ;;  %v935_v63 = vmul.f32 %v2783_v21, %v903_v30  ;;  %v3268_v30 = vld [vmem:[#allocation2_spill] sm:$0xff] }
 0x17d   : > { %v811_v24 = vmul.f32 %v2872_v8, %v779_v19  ;;  %v919_v1 = vmul.f32 %v3263_v35, %v887_v47  ;;  %v920_v58 = vmul.f32 %v3264_v60, %v888_v46  ;;  %v2916_v12 = vpop.eup %1995  ;;  %v781_v7 = vadd.f32 -1.4531521, %v749_v45  ;;  %v3269_v19 = vld [vmem:[#allocation4_spill] sm:$0xff] }
 0x17e   : > { %v1123_v54 = vmul.f32 1.442695, %v1067_v0  ;;  %v1070_v49 = vmul.f32 %v1038_v37, %v2781_v29  ;;  %v751_v44 = vmul.f32 1.0614054, %v2904_v18  ;;  %v906_v55 = vadd.f32 -0.28449672, %v874_v43 }
 0x17f   : > { %v936_v3 = vmul.f32 %v2800_v16, %v904_v53  ;;  %v951_v41 = vadd.f32 0.2548296, %v919_v1  ;;  %v952_v56 = vadd.f32 0.2548296, %v920_v58  ;;  %vm1207_vm3 = vcmp.ge.f32.partialorder %v3268_v30, 0.0 }
 0x180   : > { %vm1208_vm4 = vcmp.ge.f32.partialorder %v3269_v19, 0.0  ;;  %2003 = vpow2.f32 %v1117_v26  ;;  %v782_v47 = vadd.f32 -1.4531521, %v750_v2  ;;  %v844_v46 = vadd.f32 1.4214138, %v812_v51  ;;  %v3270_v51 = vld [vmem:[#allocation16_spill] sm:$0xff] }
 0x181   : > { %v1125_v42 = vmul.f32 1.442695, %v1068_v39  ;;  %v967_v23 = vadd.f32 0.2548296, %v935_v63  ;;  %v843_v45 = vadd.f32 1.4214138, %v811_v24  ;;  %v983_v0 = vmul.f32 %v3263_v35, %v951_v41  ;;  %v2925_v37 = vpop.eup %1997 }
 0x182   : > { %v984_v29 = vmul.f32 %v3264_v60, %v952_v56  ;;  %v813_v43 = vmul.f32 %v2888_v25, %v781_v7  ;;  %2005 = vpow2.f32 %v1123_v54  ;;  %v2928_v58 = vmul.f32 1.442695, %v1070_v49 }
 0x183   : > { %v783_v53 = vadd.f32 -1.4531521, %v751_v44  ;;  %v2930_v1 = vpop.eup %1999  ;;  %v938_v26 = vmul.f32 %v2814_v62, %v906_v55  ;;  %v968_v2 = vadd.f32 0.2548296, %v936_v3  ;;  %v1143_v63 = vmul.f32 %v3270_v51, %v983_v0 }
 0x184   : > { %v1144_v39 = vmul.f32 %v2510_v4, %v984_v29  ;;  %v2935_v35 = vpop.eup %2001  ;;  %v814_v60 = vmul.f32 %v2895_v22, %v782_v47  ;;  %v876_v24 = vmul.f32 %v2866_v9, %v844_v46  ;;  %2007 = vpow2.f32 %v1125_v42 }
 0x185   : > { %v752_v7 = vmul.f32 1.0614054, %v2930_v1  ;;  %v875_v54 = vmul.f32 %v2872_v8, %v843_v45  ;;  %v754_v49 = vmul.f32 1.0614054, %v2925_v37  ;;  %v1175_v44 = vsub.f32 1.0, %v1143_v63 }
 0x186   : > { %v1176_v55 = vsub.f32 1.0, %v1144_v39  ;;  %v845_v3 = vadd.f32 1.4214138, %v813_v43  ;;  %v815_v41 = vmul.f32 %v2904_v18, %v783_v53  ;;  %v1040_v4 = vsub.f32 0.0, %v2861_v28 }
 0x187   : > { %v784_v56 = vadd.f32 -1.4531521, %v752_v7  ;;  %v1000_v0 = vmul.f32 %v2800_v16, %v968_v2  ;;  %v753_v47 = vmul.f32 1.0614054, %v2935_v35  ;;  %v1239_v46 = vsub.f32 0.0, %v1175_v44 }
 0x188   : > { %v1240_v42 = vsub.f32 0.0, %v1176_v55  ;;  %v846_v29 = vadd.f32 1.4214138, %v814_v60  ;;  %v908_v51 = vadd.f32 -0.28449672, %v876_v24  ;;  %v1039_v45 = vsub.f32 0.0, %v2792_v50 }
 0x189   : > { %v816_v20 = vmul.f32 %v2930_v1, %v784_v56  ;;  %v907_v63 = vadd.f32 -0.28449672, %v875_v54  ;;  %v786_v39 = vadd.f32 -1.4531521, %v754_v49  ;;  %v1271_v43 = vsel %vm1207_vm3, %v1175_v44, %v1239_v46 }
 0x18a   : > { %v1272_v53 = vsel %vm1208_vm4, %v1176_v55, %v1240_v42  ;;  %v847_v7 = vadd.f32 1.4214138, %v815_v41  ;;  %v1072_v2 = vmul.f32 %v1040_v4, %v2861_v28  ;;  %v1303_v32 = vadd.f32 1.0, %v1271_v43  ;;  %v3271_v28 = vld [vmem:[#allocation3_spill] sm:$0xff]  ;;  %v3272_v41 = vld [vmem:[#allocation6_spill] sm:$0xff] }
 0x18b   : > { %v848_v16 = vadd.f32 1.4214138, %v816_v20  ;;  %v999_v60 = vmul.f32 %v2783_v21, %v967_v23  ;;  %v970_v24 = vadd.f32 0.2548296, %v938_v26  ;;  %v785_v33 = vadd.f32 -1.4531521, %v753_v47 }
 0x18c   : > { %v1304_v34 = vadd.f32 1.0, %v1272_v53  ;;  %v877_v56 = vmul.f32 %v2888_v25, %v845_v3  ;;  %v940_v54 = vmul.f32 %v2866_v9, %v908_v51  ;;  %v1071_v30 = vmul.f32 %v1039_v45, %v2792_v50 }
 0x18d   : > { %v880_v49 = vmul.f32 %v2930_v1, %v848_v16  ;;  %v2004_v19 = vpop.eup %2003  ;;  %v878_v44 = vmul.f32 %v2895_v22, %v846_v29  ;;  %v818_v20 = vmul.f32 %v2925_v37, %v786_v39  ;;  %v1335_v55 = vmul.f32 %v1303_v32, %v3271_v28  ;;  %v3273_v16 = vld [vmem:[#allocation18_spill] sm:$0xff]  ;;  %v3274_v28 = vld [vmem:[#allocation9_spill] sm:$0xff] }
 0x18e   : > { %v1336_v23 = vmul.f32 %v1304_v34, %v3272_v41  ;;  %v2962_v21 = vmul.f32 %v2004_v19, %v1000_v0  ;;  %v939_v26 = vmul.f32 %v2872_v8, %v907_v63  ;;  %v879_v3 = vmul.f32 %v2904_v18, %v847_v7 }
 0x18f   : > { %v1133_v4 = vmul.f32 1.442695, %v1072_v2  ;;  %v2006_v47 = vpop.eup %2005  ;;  %v817_v50 = vmul.f32 %v2935_v35, %v785_v33  ;;  %v1042_v46 = vsub.f32 0.0, %v2831_v61  ;;  %v1367_v29 = vpack.c.bf16 %v2703_v36, %v2602_v40 }
 0x190   : > { %v1365_v42 = vpack.c.bf16 %v1336_v23, %v1335_v55  ;;  %v972_v51 = vadd.f32 0.2548296, %v940_v54  ;;  %v1131_v32 = vmul.f32 1.442695, %v1071_v30  ;;  %v912_v45 = vadd.f32 -0.28449672, %v880_v49 }
 0x191   : > { %v1366_v34 = vpack.c.bf16 %v2569_v31, %v2543_v27  ;;  %v2008_v0 = vpop.eup %2007  ;;  %2009 = vpow2.f32 %v2900_v59  ;;  %v910_v63 = vadd.f32 -0.28449672, %v878_v44  ;;  %v1041_v39 = vsub.f32 0.0, %v2839_v6  ;;  %v3275_v55 = vld [vmem:[#allocation19_spill] sm:$0xff] }
 0x192   : > { %v850_v43 = vadd.f32 1.4214138, %v818_v20  ;;  %1832 = vmatprep.mubr.bf16.mxu1 %v1365_v42  ;;  %v1159_v33 = vmul.f32 %v2877_v52, %v999_v60  ;;  %v971_v53 = vadd.f32 0.2548296, %v939_v26  ;;  %v911_v7 = vadd.f32 -0.28449672, %v879_v3 }
 0x193   : > { %2011 = vpow2.f32 %v1133_v4  ;;  %1833 = vmatmul.mubr.bf16.vlgmr.msra.gmra.mxu1 %v1366_v34  ;;  %vm1222_vm5 = vcmp.ge.f32.partialorder %v2492_v10, 0.0  ;;  %vm1224_vm6 = vcmp.ge.f32.partialorder %v2654_v13, 0.0  ;;  %v909_v40 = vadd.f32 -0.28449672, %v877_v56 }
 0x194   : > { %2013 = vpow2.f32 %v2928_v58  ;;  %v849_v27 = vadd.f32 1.4214138, %v817_v50  ;;  %v1074_v31 = vmul.f32 %v1042_v46, %v2831_v61  ;;  %1836 = vmatprep.mubr.bf16.mxu1 %v1367_v29  ;;  %v1192_v36 = vsub.f32 1.0, %v2962_v21  ;;  %v3276_v50 = vld [vmem:[#allocation21_spill] sm:$0xff] }
 0x195   : > { %v1004_v59 = vmul.f32 %v2866_v9, %v972_v51  ;;  %2015 = vpow2.f32 %v1131_v32  ;;  %v944_v52 = vmul.f32 %v2930_v1, %v912_v45  ;;  %vm1223_vm7 = vcmp.ge.f32.partialorder %v3273_v16, 0.0  ;;  %v3278_v51 = vld [vmem:[#allocation15_spill] sm:$0xff] }
 0x196   : > { %v1002_v2 = vmul.f32 %v2814_v62, %v970_v24  ;;  %v942_v60 = vmul.f32 %v2895_v22, %v910_v63  ;;  %v1073_v56 = vmul.f32 %v1041_v39, %v2839_v6  ;;  %v882_v58 = vmul.f32 %v2925_v37, %v850_v43  ;;  %v3279_v43 = vld [vmem:[#allocation13_spill] sm:$0xff] }
 0x197   : > { %v1001_v61 = vmul.f32 %v2757_v5, %v2907_v38  ;;  %v1191_v54 = vsub.f32 1.0, %v1159_v33  ;;  %v1003_v30 = vmul.f32 %v2872_v8, %v971_v53  ;;  %v943_v9 = vmul.f32 %v2904_v18, %v911_v7 }
 0x198   : > { %v941_v49 = vmul.f32 %v2888_v25, %v909_v40  ;;  %v881_v19 = vmul.f32 %v2935_v35, %v849_v27  ;;  %v1137_v44 = vmul.f32 1.442695, %v1074_v31  ;;  %v1369_v62 = vpack.c.bf16 %v2805_v14, %v2773_v11  ;;  %v3280_v27 = vld [vmem:[#allocation27_spill] sm:$0xff] }
 0x199   : > { %v1256_v24 = vsub.f32 0.0, %v1192_v36  ;;  %v1164_v6 = vmul.f32 %v2008_v0, %v1004_v59  ;;  %v976_v20 = vadd.f32 0.2548296, %v944_v52  ;;  %v1368_v41 = vpack.c.bf16 %v3275_v55, %v3274_v28  ;;  %v3281_v31 = vld [vmem:[#allocation31_spill] sm:$0xff] }
 0x19a   : > { %v1162_v5 = vmul.f32 %v2916_v12, %v1002_v2  ;;  %v974_v38 = vadd.f32 0.2548296, %v942_v60  ;;  %v1135_v8 = vmul.f32 1.442695, %v1073_v56  ;;  %v914_v23 = vadd.f32 -0.28449672, %v882_v58 }
 0x19b   : > { %v1161_v21 = vmul.f32 %v2847_v15, %v1001_v61  ;;  %v1255_v26 = vsub.f32 0.0, %v1191_v54  ;;  %v1163_v3 = vmul.f32 %v2006_v47, %v1003_v30  ;;  %v975_v4 = vadd.f32 0.2548296, %v943_v9  ;;  %1837 = vmatmul.mubr.bf16.gmra.mxu1 %v1368_v41  ;;  %v3282_v56 = vld [vmem:[#allocation8_spill] sm:$0xff]  ;;  %v3283_v61 = vld [vmem:[#allocation37_spill] sm:$0xff]  ;;  %v3284_v9 = vld [vmem:[#allocation14_spill] sm:$0xff] }
 0x19c   : > { %v1348_v11 = vmul.f32 %v2891_v17, %v3276_v50  ;;  %v973_v14 = vadd.f32 0.2548296, %v941_v49  ;;  %v913_v46 = vadd.f32 -0.28449672, %v881_v19  ;;  %2017 = vpow2.f32 %v1137_v44  ;;  %1840 = vmatprep.mubr.bf16.mxu1 %v1369_v62  ;;  %v3285_v19 = vld [vmem:[#allocation5_spill] sm:$0xff]  ;;  %v3286_v62 = vld [vmem:[#allocation22_spill] sm:$0xff] }
 0x19d   : > { %v3277_v42 = vsub.f32 1.0, %v2816_v57  ;;  %v1288_v15 = vsel %vm1224_vm6, %v1192_v36, %v1256_v24  ;;  %v1196_v29 = vsub.f32 1.0, %v1164_v6  ;;  %v1008_v47 = vmul.f32 %v2930_v1, %v976_v20  ;;  %v3287_v20 = vld [vmem:[#allocation29_spill] sm:$0xff] }
 0x19e   : > { %vm1225_vm8 = vcmp.ge.f32.partialorder %v3278_v51, 0.0  ;;  %v1194_v32 = vsub.f32 1.0, %v1162_v5  ;;  %v1006_v17 = vmul.f32 %v2895_v22, %v974_v38  ;;  %2019 = vpow2.f32 %v1135_v8  ;;  %v2010_v34 = vpop.eup %2009  ;;  %v3288_v38 = vld [vmem:[#allocation7_spill] sm:$0xff]  ;;  %v3291_v51 = vld [vmem:[#allocation20_spill] sm:$0xff] }
 0x19f   : > { %v1286_v12 = vsel %vm1222_vm5, %v3277_v42, %v2870_v48  ;;  %v946_v45 = vmul.f32 %v2925_v37, %v914_v23  ;;  %v1193_v0 = vsub.f32 1.0, %v1161_v21  ;;  %v1287_v10 = vsel %vm1223_vm7, %v1191_v54, %v1255_v26  ;;  %v3289_v8 = vld [vmem:[#allocation35_spill] sm:$0xff] }
 0x1a0   : > { %v1195_v57 = vsub.f32 1.0, %v1163_v3  ;;  %v1007_v13 = vmul.f32 %v2904_v18, %v975_v4  ;;  %v2012_v48 = vpop.eup %2011  ;;  %v1320_v63 = vadd.f32 1.0, %v1288_v15  ;;  %v1005_v1 = vmul.f32 %v2888_v25, %v973_v14 }
 0x1a1   : > { %v945_v39 = vmul.f32 %v2935_v35, %v913_v46  ;;  %v1371_v33 = vpack.c.bf16 %v1348_v11, %v3279_v43  ;;  %v2014_v22 = vpop.eup %2013  ;;  %v1318_v53 = vadd.f32 1.0, %v1286_v12  ;;  %v1260_v7 = vsub.f32 0.0, %v1196_v29 }
 0x1a2   : > { %v1168_v40 = vmul.f32 %v2012_v48, %v1008_v47  ;;  %v1370_v36 = vpack.c.bf16 %v3281_v31, %v3280_v27  ;;  %v2016_v59 = vpop.eup %2015  ;;  %v1319_v52 = vadd.f32 1.0, %v1287_v10  ;;  %v1258_v16 = vsub.f32 0.0, %v1194_v32  ;;  %v3292_v10 = vld [vmem:[#allocation11_spill] sm:$0xff]  ;;  %v3296_v27 = vld [vmem:[#allocation30_spill] sm:$0xff] }
 0x1a3   : > { %v1166_v2 = vmul.f32 %v2014_v22, %v1006_v17  ;;  %v978_v18 = vadd.f32 0.2548296, %v946_v45  ;;  %v1257_v60 = vsub.f32 0.0, %v1193_v0  ;;  %vm1226_vm9 = vcmp.ge.f32.partialorder %v3282_v56, 0.0  ;;  %v3295_v22 = vld [vmem:[#allocation28_spill] sm:$0xff] }
 0x1a4   : > { %v1259_v25 = vsub.f32 0.0, %v1195_v57  ;;  %v1167_v58 = vmul.f32 %v2016_v59, %v1007_v13  ;;  %1841 = vmatmul.mubr.bf16.gmra.mxu1 %v1370_v36  ;;  %v1352_v54 = vmul.f32 %v1320_v63, %v3283_v61  ;;  %v1165_v30 = vmul.f32 %v2010_v34, %v1005_v1  ;;  %v3293_v1 = vld [vmem:[#allocation39_spill] sm:$0xff]  ;;  %v3297_v59 = vld [vmem:[#allocation25_spill] sm:$0xff] }
 0x1a5   : > { %vm1228_vm10 = vcmp.ge.f32.partialorder %v3284_v9, 0.0  ;;  %v977_v49 = vadd.f32 0.2548296, %v945_v39  ;;  %1844 = vmatprep.mubr.bf16.mxu1 %v1371_v33  ;;  %v1350_v44 = vmul.f32 %v1318_v53, %v3285_v19  ;;  %vm1227_vm11 = vcmp.ge.f32.partialorder %v3286_v62, 0.0  ;;  %v3294_v39 = vld [vmem:[#allocation12_spill] sm:$0xff]  ;;  %v3300_v62 = vld [vmem:[#allocation26_spill] sm:$0xff] }
 0x1a6   : > { %v1292_v24 = vsel %vm1228_vm10, %v1196_v29, %v1260_v7  ;;  %v1200_v6 = vsub.f32 1.0, %v1168_v40  ;;  %v1351_v28 = vmul.f32 %v1319_v52, %v3287_v20  ;;  %v1290_v55 = vsel %vm1226_vm9, %v1194_v32, %v1258_v16  ;;  %v3301_v20 = vld [vmem:[#allocation23_spill] sm:$0xff] }
 0x1a7   : > { %v1198_v41 = vsub.f32 1.0, %v1166_v2  ;;  %v1010_v5 = vmul.f32 %v2925_v37, %v978_v18  ;;  %v1349_v23 = vmul.f32 %v3289_v8, %v3288_v38  ;;  %v1289_v21 = vsel %vm1225_vm8, %v1193_v0, %v1257_v60  ;;  %v3290_v37 = vld [vmem:[#allocation10_spill] sm:$0xff] }
 0x1a8   : > { %v1291_v26 = vsel %vm1227_vm11, %v1195_v57, %v1259_v25  ;;  %v1199_v3 = vsub.f32 1.0, %v1167_v58  ;;  %v1197_v4 = vsub.f32 1.0, %v1165_v30  ;;  %v1324_v50 = vadd.f32 1.0, %v1292_v24 }
 0x1a9   : > { %v1009_v11 = vmul.f32 %v2935_v35, %v977_v49  ;;  %v1373_v14 = vpack.c.bf16 %v1352_v54, %v1351_v28  ;;  %v2018_v46 = vpop.eup %2017  ;;  %v1322_v42 = vadd.f32 1.0, %v1290_v55  ;;  %v1264_v12 = vsub.f32 0.0, %v1200_v6  ;;  %v3298_v54 = vld [vmem:[#allocation38_spill] sm:$0xff]  ;;  %v3299_v49 = vld [vmem:[#allocation24_spill] sm:$0xff] }
 0x1aa   : > { %v1372_v15 = vpack.c.bf16 %v1350_v44, %v1349_v23  ;;  %v1323_v29 = vadd.f32 1.0, %v1291_v26  ;;  %v1262_v47 = vsub.f32 0.0, %v1198_v41  ;;  %v524_v32 = vmul.f32 0.5, %v3290_v37  ;;  %v3303_v23 = vld [vmem:[#allocation36_spill] sm:$0xff] }
 0x1ab   : > { %v1170_v17 = vmul.f32 %v2018_v46, %v1010_v5  ;;  %v2020_v45 = vpop.eup %2019  ;;  %v1321_v34 = vadd.f32 1.0, %v1289_v21  ;;  %v522_v0 = vmul.f32 0.5, %v3291_v51  ;;  %v523_v57 = vmul.f32 0.5, %v3292_v10  ;;  %v3305_v46 = vld [vmem:[#allocation33_spill] sm:$0xff] }
 0x1ac   : > { %v1263_v13 = vsub.f32 0.0, %v1199_v3  ;;  %1845 = vmatmul.mubr.bf16.gmra.mxu1 %v1372_v15  ;;  %v1261_v48 = vsub.f32 0.0, %v1197_v4  ;;  %v1356_v35 = vmul.f32 %v1324_v50, %v524_v32  ;;  %v1169_v63 = vmul.f32 %v2020_v45, %v1009_v11  ;;  %v3304_v11 = vld [vmem:[#allocation32_spill] sm:$0xff] }
 0x1ad   : > { %vm1232_vm12 = vcmp.ge.f32.partialorder %v3293_v1, 0.0  ;;  %1848 = vmatprep.mubr.bf16.mxu1 %v1373_v14  ;;  %v521_v43 = vmul.f32 0.5, %v3294_v39  ;;  %v1354_v33 = vmul.f32 %v1322_v42, %v522_v0  ;;  %vm1230_vm13 = vcmp.ge.f32.partialorder %v3295_v22, 0.0 }
 0x1ae   : > { %v1296_v53 = vsel %vm1232_vm12, %v1200_v6, %v1264_v12  ;;  %v1355_v7 = vmul.f32 %v1323_v29, %v523_v57  ;;  %v1294_v40 = vsel %vm1230_vm13, %v1198_v41, %v1262_v47  ;;  %vm1231_vm14 = vcmp.ge.f32.partialorder %v3296_v27, 0.0  ;;  %v3302_v41 = vld [vmem:[#allocation34_spill] sm:$0xff] }
 0x1af   : > { %v1202_v31 = vsub.f32 1.0, %v1170_v17  ;;  %v1353_v36 = vmul.f32 %v1321_v34, %v521_v43  ;;  %vm1229_vm15 = vcmp.ge.f32.partialorder %v3297_v59, 0.0  ;;  %v1295_v52 = vsel %vm1231_vm14, %v1199_v3, %v1263_v13  ;;  %v3051_v47 = vld [vmem:[%s3163_s4] ss:$0 sm:$0xff] }
 0x1b0   : > { %v1293_v16 = vsel %vm1229_vm15, %v1197_v4, %v1261_v48  ;;  %v1201_v2 = vsub.f32 1.0, %v1169_v63  ;;  %v1328_v18 = vadd.f32 1.0, %v1296_v53  ;;  %v1375_v60 = vpack.c.bf16 %v1356_v35, %v1355_v7 }
 0x1b1   : > { %v1326_v56 = vadd.f32 1.0, %v1294_v40  ;;  %v1374_v25 = vpack.c.bf16 %v1354_v33, %v1353_v36  ;;  %v1327_v58 = vadd.f32 1.0, %v1295_v52  ;;  %v1266_v61 = vsub.f32 0.0, %v1202_v31 }
 0x1b2   : > { %v528_v30 = vmul.f32 0.5, %v3298_v54  ;;  %v1325_v9 = vadd.f32 1.0, %v1293_v16  ;;  %v526_v19 = vmul.f32 0.5, %v3299_v49  ;;  %v1265_v44 = vsub.f32 0.0, %v1201_v2 }
 0x1b3   : > { %v527_v24 = vmul.f32 0.5, %v3300_v62  ;;  %v525_v28 = vmul.f32 0.5, %v3301_v20  ;;  %vm1234_vm0 = vcmp.ge.f32.partialorder %v3302_v41, 0.0  ;;  %vm1233_vm1 = vcmp.ge.f32.partialorder %v3303_v23, 0.0 }
 0x1b4   : > { %1849 = vmatmul.mubr.bf16.gmra.mxu1 %v1374_v25  ;;  %v1360_v6 = vmul.f32 %v1328_v18, %v528_v30  ;;  %v1358_v55 = vmul.f32 %v1326_v56, %v526_v19  ;;  %v1298_v38 = vsel %vm1234_vm0, %v1202_v31, %v1266_v61  ;;  %v1297_v21 = vsel %vm1233_vm1, %v1201_v2, %v1265_v44 }
 0x1b5   : > { %1852 = vmatprep.mubr.bf16.mxu1 %v1375_v60  ;;  %v1359_v5 = vmul.f32 %v1327_v58, %v527_v24  ;;  %v1357_v8 = vmul.f32 %v1325_v9, %v525_v28  ;;  %v1330_v3 = vadd.f32 1.0, %v1298_v38  ;;  %v1329_v50 = vadd.f32 1.0, %v1297_v21 }
 0x1b6   : > { %v530_v14 = vmul.f32 0.5, %v3304_v11  ;;  %v529_v42 = vmul.f32 0.5, %v3305_v46  ;;  %vm1611_vm2 = vcmask 261120  }
 0x1b7   : > { %v1377_v26 = vpack.c.bf16 %v1360_v6, %v1359_v5  ;;  %v1376_v4 = vpack.c.bf16 %v1358_v55, %v1357_v8 }
 0x1b8   : > { %v1362_v12 = vmul.f32 %v1330_v3, %v530_v14  ;;  %v1361_v15 = vmul.f32 %v1329_v50, %v529_v42 }
 0x1ba   : > { %v1378_v29 = vpack.c.bf16 %v1362_v12, %v1361_v15 }
 0x1bc   : > { %1853 = vmatmul.mubr.bf16.gmra.mxu1 %v1376_v4 }
 0x1bd   : > { %1856 = vmatprep.mubr.bf16.mxu1 %v1377_v26 }
 0x1c4   : > { %1857 = vmatmul.mubr.bf16.gmra.mxu1 %v1378_v29 }
 0x232   : > { %v1830_v37 = vpop.f32.mrf.mxu0 }
 0x233   : > { %v1493_v32 = vadd.f32 %v1830_v37, %v3051_v47 }
 0x234   : > { %v1484_v17 = vpop.f32.mrf.mxu0 }
 0x235   : > { %1614 = vst.msk [vmem:[%s3058_s29 + $0x10] sm:$0xff] %vm1611_vm2, %v1493_v32  ;;  %v1485_v45 = vadd.f32 %v3051_v47, %v1484_v17 }
 0x236   : > { %v1831_v34 = vpop.f32.mrf.mxu0 }
 0x237   : > { %1612 = vst.msk [vmem:[%s3058_s29] sm:$0xff] %vm1611_vm2, %v1485_v45  ;;  %v1496_v51 = vadd.f32 %v1831_v34, %v3051_v47 }
 0x238   : > { %v1487_v0 = vpop.f32.mrf.mxu0 }
 0x239   : > { %1615 = vst.msk [vmem:[%s3058_s29 + $0x18] sm:$0xff] %vm1611_vm2, %v1496_v51  ;;  %v1488_v10 = vadd.f32 %v3051_v47, %v1487_v0 }
 0x23b   : > { %1613 = vst.msk [vmem:[%s3058_s29 + $0x8] sm:$0xff] %vm1611_vm2, %v1488_v10 }
 0x253   : > { %v1834_v57 = vpop.f32.mrf.mxu1 }
 0x254   : > { %v1509_v13 = vadd.f32 %v1834_v57, %v3051_v47 }
 0x255   : > { %v1500_v48 = vpop.f32.mrf.mxu1 }
 0x256   : > { %1618 = vst.msk [vmem:[%s3058_s29 + $0x30] sm:$0xff] %vm1611_vm2, %v1509_v13  ;;  %v1501_v35 = vadd.f32 %v3051_v47, %v1500_v48 }
 0x257   : > { %v1835_v63 = vpop.f32.mrf.mxu1 }
 0x258   : > { %1616 = vst.msk [vmem:[%s3058_s29 + $0x20] sm:$0xff] %vm1611_vm2, %v1501_v35  ;;  %v1512_v1 = vadd.f32 %v1835_v63, %v3051_v47 }
 0x259   : > { %v1503_v39 = vpop.f32.mrf.mxu1 }
 0x25a   : > { %1619 = vst.msk [vmem:[%s3058_s29 + $0x38] sm:$0xff] %vm1611_vm2, %v1512_v1  ;;  %v1504_v43 = vadd.f32 %v3051_v47, %v1503_v39 }
 0x25b   : > { %v1838_v33 = vpop.f32.mrf.mxu1 }
 0x25c   : > { %1617 = vst.msk [vmem:[%s3058_s29 + $0x28] sm:$0xff] %vm1611_vm2, %v1504_v43  ;;  %v1525_v22 = vadd.f32 %v1838_v33, %v3051_v47 }
 0x25d   : > { %v1516_v53 = vpop.f32.mrf.mxu1 }
 0x25e   : > { %1622 = vst.msk [vmem:[%s3058_s29 + $0x50] sm:$0xff] %vm1611_vm2, %v1525_v22  ;;  %v1517_v7 = vadd.f32 %v3051_v47, %v1516_v53 }
 0x25f   : > { %v1839_v40 = vpop.f32.mrf.mxu1 }
 0x260   : > { %1620 = vst.msk [vmem:[%s3058_s29 + $0x40] sm:$0xff] %vm1611_vm2, %v1517_v7  ;;  %v1528_v27 = vadd.f32 %v1839_v40, %v3051_v47 }
 0x261   : > { %v1519_v31 = vpop.f32.mrf.mxu1 }
 0x262   : > { %1623 = vst.msk [vmem:[%s3058_s29 + $0x58] sm:$0xff] %vm1611_vm2, %v1528_v27  ;;  %v1520_v36 = vadd.f32 %v3051_v47, %v1519_v31 }
 0x264   : > { %v1842_v59 = vpop.f32.mrf.mxu1  ;;  %1621 = vst.msk [vmem:[%s3058_s29 + $0x48] sm:$0xff] %vm1611_vm2, %v1520_v36 }
 0x265   : > { %v1541_v52 = vadd.f32 %v1842_v59, %v3051_v47 }
 0x266   : > { %v1532_v16 = vpop.f32.mrf.mxu1 }
 0x267   : > { %1626 = vst.msk [vmem:[%s3058_s29 + $0x70] sm:$0xff] %vm1611_vm2, %v1541_v52  ;;  %v1533_v2 = vadd.f32 %v3051_v47, %v1532_v16 }
 0x268   : > { %v1843_v18 = vpop.f32.mrf.mxu1 }
 0x269   : > { %1624 = vst.msk [vmem:[%s3058_s29 + $0x60] sm:$0xff] %vm1611_vm2, %v1533_v2  ;;  %v1544_v60 = vadd.f32 %v1843_v18, %v3051_v47 }
 0x26a   : > { %v1535_v56 = vpop.f32.mrf.mxu1 }
 0x26b   : > { %1627 = vst.msk [vmem:[%s3058_s29 + $0x78] sm:$0xff] %vm1611_vm2, %v1544_v60  ;;  %v1536_v25 = vadd.f32 %v3051_v47, %v1535_v56 }
 0x26c   : > { %v1846_v58 = vpop.f32.mrf.mxu1 }
 0x26d   : > { %1625 = vst.msk [vmem:[%s3058_s29 + $0x68] sm:$0xff] %vm1611_vm2, %v1536_v25  ;;  %v1557_v61 = vadd.f32 %v1846_v58, %v3051_v47 }
 0x26e   : > { %v1548_v54 = vpop.f32.mrf.mxu1 }
 0x26f   : > { %1630 = vst.msk [vmem:[%s3058_s29 + $0x90] sm:$0xff] %vm1611_vm2, %v1557_v61  ;;  %v1549_v30 = vadd.f32 %v3051_v47, %v1548_v54 }
 0x270   : > { %v1847_v9 = vpop.f32.mrf.mxu1 }
 0x271   : > { %1628 = vst.msk [vmem:[%s3058_s29 + $0x80] sm:$0xff] %vm1611_vm2, %v1549_v30  ;;  %v1560_v49 = vadd.f32 %v1847_v9, %v3051_v47 }
 0x272   : > { %v1551_v19 = vpop.f32.mrf.mxu1 }
 0x273   : > { %1631 = vst.msk [vmem:[%s3058_s29 + $0x98] sm:$0xff] %vm1611_vm2, %v1560_v49  ;;  %v1552_v44 = vadd.f32 %v3051_v47, %v1551_v19 }
 0x274   : > { %v1850_v62 = vpop.f32.mrf.mxu1 }
 0x275   : > { %1629 = vst.msk [vmem:[%s3058_s29 + $0x88] sm:$0xff] %vm1611_vm2, %v1552_v44  ;;  %v1573_v24 = vadd.f32 %v1850_v62, %v3051_v47 }
 0x276   : > { %v1564_v6 = vpop.f32.mrf.mxu1 }
 0x277   : > { %1634 = vst.msk [vmem:[%s3058_s29 + $0xb0] sm:$0xff] %vm1611_vm2, %v1573_v24  ;;  %v1565_v20 = vadd.f32 %v3051_v47, %v1564_v6 }
 0x278   : > { %v1851_v28 = vpop.f32.mrf.mxu1 }
 0x279   : > { %1632 = vst.msk [vmem:[%s3058_s29 + $0xa0] sm:$0xff] %vm1611_vm2, %v1565_v20  ;;  %v1576_v55 = vadd.f32 %v1851_v28, %v3051_v47 }
 0x27a   : > { %v1567_v41 = vpop.f32.mrf.mxu1 }
 0x27b   : > { %1635 = vst.msk [vmem:[%s3058_s29 + $0xb8] sm:$0xff] %vm1611_vm2, %v1576_v55  ;;  %v1568_v5 = vadd.f32 %v3051_v47, %v1567_v41 }
 0x27c   : > { %v1854_v38 = vpop.f32.mrf.mxu1 }
 0x27d   : > { %1633 = vst.msk [vmem:[%s3058_s29 + $0xa8] sm:$0xff] %vm1611_vm2, %v1568_v5  ;;  %v1589_v8 = vadd.f32 %v1854_v38, %v3051_v47 }
 0x27e   : > { %v1580_v23 = vpop.f32.mrf.mxu1 }
 0x27f   : > { %1638 = vst.msk [vmem:[%s3058_s29 + $0xd0] sm:$0xff] %vm1611_vm2, %v1589_v8  ;;  %v1581_v21 = vadd.f32 %v3051_v47, %v1580_v23 }
 0x280   : > { %v1855_v26 = vpop.f32.mrf.mxu1 }
 0x281   : > { %1636 = vst.msk [vmem:[%s3058_s29 + $0xc0] sm:$0xff] %vm1611_vm2, %v1581_v21  ;;  %v1592_v3 = vadd.f32 %v1855_v26, %v3051_v47 }
 0x282   : > { %v1583_v4 = vpop.f32.mrf.mxu1 }
 0x283   : > { %1639 = vst.msk [vmem:[%s3058_s29 + $0xd8] sm:$0xff] %vm1611_vm2, %v1592_v3  ;;  %v1584_v50 = vadd.f32 %v3051_v47, %v1583_v4 }
 0x284   : > { %v1858_v11 = vpop.f32.mrf.mxu1 }
 0x285   : > { %1637 = vst.msk [vmem:[%s3058_s29 + $0xc8] sm:$0xff] %vm1611_vm2, %v1584_v50  ;;  %v1605_v14 = vadd.f32 %v1858_v11, %v3051_v47 }
 0x286   : > { %v1596_v46 = vpop.f32.mrf.mxu1 }
 0x287   : > { %1642 = vst.msk [vmem:[%s3058_s29 + $0xf0] sm:$0xff] %vm1611_vm2, %v1605_v14  ;;  %v1597_v42 = vadd.f32 %v3051_v47, %v1596_v46 }
 0x288   : > { %v1859_v12 = vpop.f32.mrf.mxu1 }
 0x289   : > { %1640 = vst.msk [vmem:[%s3058_s29 + $0xe0] sm:$0xff] %vm1611_vm2, %v1597_v42  ;;  %v1608_v15 = vadd.f32 %v1859_v12, %v3051_v47 }
 0x28a   : > { %v1599_v29 = vpop.f32.mrf.mxu1 }
 0x28b   : > { %1643 = vst.msk [vmem:[%s3058_s29 + $0xf8] sm:$0xff] %vm1611_vm2, %v1608_v15  ;;  %v1600_v37 = vadd.f32 %v3051_v47, %v1599_v29 }
 0x28d   : > { %1641 = vst.msk [vmem:[%s3058_s29 + $0xe8] sm:$0xff] %vm1611_vm2, %v1600_v37 }
 0x28e PF: > { %s15_s18 = sadd.s32 1, %s2028_s18  }
 0x28f   : > { %p12_p4 = scmp.ge.s32.totalorder %s15_s18, 4  }
 0x291   :  { %14 = sbr.rel (!%p12_p4) target bundleno = 1 (0x1), region = 70 }

// kernel: reverse.8
= control target key start
LH: loop header
LB: loop body
LE: loop exit
PB: predicated region body
PF: predicated region fallthrough
CT: control target
= control target key end

     0   :  { %s344_s0 = inlined_call_operand.vmem [shape: f32[2,32,16,7], index: 0, kind: input, shape index: {}]   ;;  %s345_s1 = inlined_call_operand.vmem [shape: f32[2,32,16,7], index: 1, kind: output, shape index: {}]  }
   0x1   :  { %v112_v0 = vld [vmem:[%s344_s0 + $0x60] sm:$0xff]  ;;  %v113_v1 = vld [vmem:[%s344_s0 + $0xd0] sm:$0xff]  ;;  %v138_v14 = vld [vmem:[%s344_s0 + $0x68] sm:$0xff] }
   0x2   :  { %v115_v2 = vld [vmem:[%s344_s0 + $0x50] sm:$0xff]  ;;  %4 = vst [vmem:[%s345_s1] sm:$0xff] %v112_v0  ;;  %114 = vst [vmem:[%s345_s1 + $0x70] sm:$0xff] %v113_v1  ;;  %v117_v3 = vld [vmem:[%s344_s0 + $0xc0] sm:$0xff] }
   0x3   :  { %116 = vst [vmem:[%s345_s1 + $0x10] sm:$0xff] %v115_v2  ;;  %v119_v4 = vld [vmem:[%s344_s0 + $0x40] sm:$0xff]  ;;  %v121_v5 = vld [vmem:[%s344_s0 + $0xb0] sm:$0xff]  ;;  %118 = vst [vmem:[%s345_s1 + $0x80] sm:$0xff] %v117_v3 }
   0x4   :  { %120 = vst [vmem:[%s345_s1 + $0x20] sm:$0xff] %v119_v4  ;;  %122 = vst [vmem:[%s345_s1 + $0x90] sm:$0xff] %v121_v5  ;;  %v123_v6 = vld [vmem:[%s344_s0 + $0x30] sm:$0xff]  ;;  %v125_v7 = vld [vmem:[%s344_s0 + $0xa0] sm:$0xff] }
   0x5   :  { %v127_v8 = vld [vmem:[%s344_s0 + $0x20] sm:$0xff]  ;;  %124 = vst [vmem:[%s345_s1 + $0x30] sm:$0xff] %v123_v6  ;;  %126 = vst [vmem:[%s345_s1 + $0xa0] sm:$0xff] %v125_v7  ;;  %v129_v9 = vld [vmem:[%s344_s0 + $0x90] sm:$0xff] }
   0x6   :  { %128 = vst [vmem:[%s345_s1 + $0x40] sm:$0xff] %v127_v8  ;;  %v131_v10 = vld [vmem:[%s344_s0 + $0x10] sm:$0xff]  ;;  %v133_v11 = vld [vmem:[%s344_s0 + $0x80] sm:$0xff]  ;;  %130 = vst [vmem:[%s345_s1 + $0xb0] sm:$0xff] %v129_v9 }
   0x7   :  { %132 = vst [vmem:[%s345_s1 + $0x50] sm:$0xff] %v131_v10  ;;  %134 = vst [vmem:[%s345_s1 + $0xc0] sm:$0xff] %v133_v11  ;;  %v49_v12 = vld [vmem:[%s344_s0] sm:$0xff]  ;;  %v136_v13 = vld [vmem:[%s344_s0 + $0x70] sm:$0xff] }
   0x8   :  { %135 = vst [vmem:[%s345_s1 + $0x60] sm:$0xff] %v49_v12  ;;  %137 = vst [vmem:[%s345_s1 + $0xd0] sm:$0xff] %v136_v13  ;;  %v140_v15 = vld [vmem:[%s344_s0 + $0xd8] sm:$0xff]  ;;  %v144_v17 = vld [vmem:[%s344_s0 + $0xc8] sm:$0xff] }
   0x9   :  { %139 = vst [vmem:[%s345_s1 + $0x8] sm:$0xff] %v138_v14  ;;  %v142_v16 = vld [vmem:[%s344_s0 + $0x58] sm:$0xff]  ;;  %141 = vst [vmem:[%s345_s1 + $0x78] sm:$0xff] %v140_v15  ;;  %v146_v18 = vld [vmem:[%s344_s0 + $0x48] sm:$0xff] }
   0xa   :  { %143 = vst [vmem:[%s345_s1 + $0x18] sm:$0xff] %v142_v16  ;;  %145 = vst [vmem:[%s345_s1 + $0x88] sm:$0xff] %v144_v17  ;;  %v148_v19 = vld [vmem:[%s344_s0 + $0xb8] sm:$0xff]  ;;  %v152_v21 = vld [vmem:[%s344_s0 + $0xa8] sm:$0xff] }
   0xb   :  { %v150_v20 = vld [vmem:[%s344_s0 + $0x38] sm:$0xff]  ;;  %147 = vst [vmem:[%s345_s1 + $0x28] sm:$0xff] %v146_v18  ;;  %149 = vst [vmem:[%s345_s1 + $0x98] sm:$0xff] %v148_v19  ;;  %v154_v22 = vld [vmem:[%s344_s0 + $0x28] sm:$0xff] }
   0xc   :  { %151 = vst [vmem:[%s345_s1 + $0x38] sm:$0xff] %v150_v20  ;;  %v156_v23 = vld [vmem:[%s344_s0 + $0x98] sm:$0xff]  ;;  %153 = vst [vmem:[%s345_s1 + $0xa8] sm:$0xff] %v152_v21  ;;  %v160_v25 = vld [vmem:[%s344_s0 + $0x88] sm:$0xff] }
   0xd   :  { %155 = vst [vmem:[%s345_s1 + $0x48] sm:$0xff] %v154_v22  ;;  %157 = vst [vmem:[%s345_s1 + $0xb8] sm:$0xff] %v156_v23  ;;  %v158_v24 = vld [vmem:[%s344_s0 + $0x18] sm:$0xff]  ;;  %v162_v26 = vld [vmem:[%s344_s0 + $0x8] sm:$0xff] }
   0xe   :  { %159 = vst [vmem:[%s345_s1 + $0x58] sm:$0xff] %v158_v24  ;;  %161 = vst [vmem:[%s345_s1 + $0xc8] sm:$0xff] %v160_v25  ;;  %v164_v27 = vld [vmem:[%s344_s0 + $0x78] sm:$0xff] }
   0xf   :  { %163 = vst [vmem:[%s345_s1 + $0x68] sm:$0xff] %v162_v26  ;;  %165 = vst [vmem:[%s345_s1 + $0xd8] sm:$0xff] %v164_v27 }

// kernel: ddfno_forward.12
= control target key start
LH: loop header
LB: loop body
LE: loop exit
PB: predicated region body
PF: predicated region fallthrough
CT: control target
= control target key end

     0   :  { %s1867_s18 = smov 0   ;;  %s2871_s0 = inlined_call_operand.vmem [shape: f32[512,32], index: 0, kind: input, shape index: {}]   ;;  %s2872_s1 = inlined_call_operand.vmem [shape: f32[512,32], index: 1, kind: input, shape index: {}]   ;;  %s2873_s2 = inlined_call_operand.vmem [shape: bf16[32,32], index: 2, kind: input, shape index: {}]   ;;  %s2874_s3 = inlined_call_operand.vmem [shape: f32[1,32], index: 3, kind: input, shape index: {}]   ;;  %s2875_s4 = inlined_call_operand.vmem [shape: f32[1,32], index: 4, kind: input, shape index: {}]   ;;  %s2876_s5 = inlined_call_operand.vmem [shape: f32[512,32], index: 5, kind: output, shape index: {}]  }
   0x1 LB: > { %s1599_s19 = sadd.s32 4294967295, %s1835_s18   ;;  %p1603_p0 = scmp.ge.s32.totalorder %s1835_s18, 1  ;;  %s1835_s18 = sphi %s1867_s18, %s15_s18  }
   0x2   : > { %p199_p1 = scmp.lt.s32.totalorder %s1835_s18, 3 }
   0x4   : > { %p200_p2 = pnand %p1603_p0, %p199_p1 }
   0x6   : > { %203 = sbr.rel (%p200_p2) target bundleno = 298 (0x12a), region = 40 }
   0xb   : > { %v1698_v0 = vld [vmem:[%s2873_s2 + $0x8] sm:$0xff]   ;;  %s1604_s22 = sshll.u32 %s1599_s19, 5  ;;  %v1699_v1 = vld [vmem:[%s2873_s2] sm:$0xff]   ;;  %vm393_vm0 = vcmask 261120  }
   0xc   : > { %p233_p3 = scmp.lt.s32.totalorder %s1604_s22, 63  ;;  %1650 = vmatprep.subr.bf16.mxu0 %v1698_v0  ;;  %1686 = vmatprep.subr.bf16.mxu1 %v1698_v0  ;;  %v1926_v33 = vld [vmem:[%s2874_s3] ss:$0 sm:$0xff] }
   0xd   : > { %1651 = vmatpush3.bf16.msra.mxu0 %v1698_v0  ;;  %1688 = vmatpush3.bf16.msra.mxu1 %v1698_v0 }
   0xe   : > { %s2887_s22 = smov (!%p233_p3, %s1604_s22), 63  ;;  %1652 = vmatprep.subr.bf16.mxu0 %v1699_v1  ;;  %1687 = vmatprep.subr.bf16.mxu1 %v1699_v1 }
   0xf   : > { %s1881_s25 = sshll.u32 %s2887_s22, 3 }
  0x10   : > { %s1887_s28 = scalar_lea.vmem %s2872_s1, %s1881_s25  ;;  %s1919_s6 = scalar_lea.vmem %s2871_s0, %s1881_s25 }
  0x11   : > { %1653 = vmatpush3.bf16.msra.mxu0 %v1699_v1  ;;  %1689 = vmatpush3.bf16.msra.mxu1 %v1699_v1  ;;  %v322_v2 = vld [vmem:[%s1887_s28] sm:$0xff]  ;;  %v323_v3 = vld [vmem:[%s1887_s28 + $0x8] sm:$0xff]  ;;  %v324_v7 = vld [vmem:[%s1887_s28 + $0x10] sm:$0xff]  ;;  %s2662_s15 = scalar_lea.vmem %s2876_s5, %s1881_s25 }
  0x12   : > { %v338_v4 = vld [vmem:[%s1887_s28 + $0x80] sm:$0xff]  ;;  %v354_v5 = vpack.c.bf16 %v323_v3, %v322_v2  ;;  %v339_v6 = vld [vmem:[%s1887_s28 + $0x88] sm:$0xff]  ;;  %v325_v8 = vld [vmem:[%s1887_s28 + $0x18] sm:$0xff] }
  0x13   : > { %v362_v9 = vpack.c.bf16 %v339_v6, %v338_v4  ;;  %v355_v10 = vpack.c.bf16 %v325_v8, %v324_v7  ;;  %v340_v11 = vld [vmem:[%s1887_s28 + $0x90] sm:$0xff]  ;;  %v341_v12 = vld [vmem:[%s1887_s28 + $0x98] sm:$0xff]  ;;  %v326_v13 = vld [vmem:[%s1887_s28 + $0x20] sm:$0xff] }
  0x14   : > { %1654 = vmatprep.mubr.msk.bf16.mxu0 %vm393_vm0, %v354_v5  ;;  %v363_v14 = vpack.c.bf16 %v341_v12, %v340_v11  ;;  %v327_v15 = vld [vmem:[%s1887_s28 + $0x28] sm:$0xff]  ;;  %v342_v16 = vld [vmem:[%s1887_s28 + $0xa0] sm:$0xff]  ;;  %v328_v20 = vld [vmem:[%s1887_s28 + $0x30] sm:$0xff] }
  0x15   : > { %v343_v17 = vld [vmem:[%s1887_s28 + $0xa8] sm:$0xff]  ;;  %1670 = vmatprep.mubr.msk.bf16.mxu1 %vm393_vm0, %v362_v9  ;;  %1655 = vmatmul.mubr.msk.bf16.vlgmr.msra.gmra.mxu0 %vm393_vm0, %v355_v10  ;;  %v356_v18 = vpack.c.bf16 %v327_v15, %v326_v13  ;;  %v329_v21 = vld [vmem:[%s1887_s28 + $0x38] sm:$0xff]  ;;  %v344_v22 = vld [vmem:[%s1887_s28 + $0xb0] sm:$0xff] }
  0x16   : > { %v364_v19 = vpack.c.bf16 %v343_v17, %v342_v16  ;;  %1671 = vmatmul.mubr.msk.bf16.vlgmr.msra.gmra.mxu1 %vm393_vm0, %v363_v14  ;;  %v345_v23 = vld [vmem:[%s1887_s28 + $0xb8] sm:$0xff]  ;;  %v330_v24 = vld [vmem:[%s1887_s28 + $0x40] sm:$0xff]  ;;  %v331_v25 = vld [vmem:[%s1887_s28 + $0x48] sm:$0xff]  ;;  %v357_v28 = vpack.c.bf16 %v329_v21, %v328_v20 }
  0x17   : > { %1658 = vmatprep.mubr.msk.bf16.mxu0 %vm393_vm0, %v356_v18  ;;  %v346_v26 = vld [vmem:[%s1887_s28 + $0xc0] sm:$0xff]  ;;  %v347_v27 = vld [vmem:[%s1887_s28 + $0xc8] sm:$0xff]  ;;  %v365_v29 = vpack.c.bf16 %v345_v23, %v344_v22  ;;  %v358_v30 = vpack.c.bf16 %v331_v25, %v330_v24  ;;  %v332_v32 = vld [vmem:[%s1887_s28 + $0x50] sm:$0xff] }
  0x18   : > { %1674 = vmatprep.mubr.msk.bf16.mxu1 %vm393_vm0, %v364_v19  ;;  %v366_v31 = vpack.c.bf16 %v347_v27, %v346_v26  ;;  %v333_v34 = vld [vmem:[%s1887_s28 + $0x58] sm:$0xff]  ;;  %v348_v35 = vld [vmem:[%s1887_s28 + $0xd0] sm:$0xff]  ;;  %v334_v37 = vld [vmem:[%s1887_s28 + $0x60] sm:$0xff] }
  0x19   : > { %v349_v36 = vld [vmem:[%s1887_s28 + $0xd8] sm:$0xff]  ;;  %v335_v38 = vld [vmem:[%s1887_s28 + $0x68] sm:$0xff]  ;;  %v253_v39 = vld [vmem:[%s1919_s6 + $0x10] sm:$0xff]  ;;  %v359_v42 = vpack.c.bf16 %v333_v34, %v332_v32 }
  0x1a   : > { %v350_v40 = vld [vmem:[%s1887_s28 + $0xe0] sm:$0xff]  ;;  %v351_v41 = vld [vmem:[%s1887_s28 + $0xe8] sm:$0xff]  ;;  %v367_v43 = vpack.c.bf16 %v349_v36, %v348_v35  ;;  %v360_v44 = vpack.c.bf16 %v335_v38, %v334_v37  ;;  %v1940_v45 = vadd.f32 %v1926_v33, %v253_v39  ;;  %v269_v47 = vld [vmem:[%s1919_s6 + $0x90] sm:$0xff] }
  0x1b   : > { %v368_v46 = vpack.c.bf16 %v351_v41, %v350_v40  ;;  %v336_v48 = vld [vmem:[%s1887_s28 + $0x70] sm:$0xff]  ;;  %v1945_v49 = vadd.f32 %v1926_v33, %v269_v47  ;;  %v337_v50 = vld [vmem:[%s1887_s28 + $0x78] sm:$0xff]  ;;  %v251_v51 = vld [vmem:[%s1919_s6] sm:$0xff] }
  0x1c   : > { %v267_v52 = vld [vmem:[%s1919_s6 + $0x80] sm:$0xff]  ;;  %v352_v53 = vld [vmem:[%s1887_s28 + $0xf0] sm:$0xff]  ;;  %v353_v54 = vld [vmem:[%s1887_s28 + $0xf8] sm:$0xff]  ;;  %v1956_v55 = vmul.f32 0.70710677, %v1940_v45  ;;  %v1962_v57 = vadd.f32 %v1926_v33, %v251_v51  ;;  %v361_v1 = vpack.c.bf16 %v337_v50, %v336_v48 }
  0x1d   : > { %1659 = vmatmul.mubr.msk.bf16.gmra.mxu0 %vm393_vm0, %v357_v28  ;;  %v1959_v56 = vmul.f32 0.70710677, %v1945_v49  ;;  %v1965_v58 = vadd.f32 %v1926_v33, %v267_v52  ;;  %v254_v59 = vld [vmem:[%s1919_s6 + $0x18] sm:$0xff]  ;;  %v369_v2 = vpack.c.bf16 %v353_v54, %v352_v53  ;;  %v252_v5 = vld [vmem:[%s1919_s6 + $0x8] sm:$0xff]  ;;  %v255_v37 = vld [vmem:[%s1919_s6 + $0x20] sm:$0xff] }
  0x1e   : > { %1675 = vmatmul.mubr.msk.bf16.gmra.mxu1 %vm393_vm0, %v365_v29  ;;  %1662 = vmatprep.mubr.msk.bf16.mxu0 %vm393_vm0, %v358_v30  ;;  %v270_v60 = vld [vmem:[%s1919_s6 + $0x98] sm:$0xff]  ;;  %v1971_v61 = vand.u32 2147483647, %v1956_v55  ;;  %v1977_v63 = vmul.f32 0.70710677, %v1962_v57  ;;  %v1980_v0 = vadd.f32 %v1926_v33, %v254_v59  ;;  %v268_v6 = vld [vmem:[%s1919_s6 + $0x88] sm:$0xff]  ;;  %v1996_v10 = vadd.f32 %v1926_v33, %v252_v5 }
  0x1f   : > { %1678 = vmatprep.mubr.msk.bf16.mxu1 %vm393_vm0, %v366_v31  ;;  %v1974_v62 = vand.u32 2147483647, %v1959_v56  ;;  %v1983_v3 = vmul.f32 0.70710677, %v1965_v58  ;;  %v1986_v4 = vadd.f32 %v1926_v33, %v270_v60  ;;  %v2008_v14 = vadd.f32 %v1926_v33, %v268_v6  ;;  %v257_v29 = vld [vmem:[%s1919_s6 + $0x30] sm:$0xff]  ;;  %v271_v40 = vld [vmem:[%s1919_s6 + $0xa0] sm:$0xff] }
  0x20   : > { %v701_v7 = vmul.f32 0.3275911, %v1971_v61  ;;  %v1993_v9 = vand.u32 2147483647, %v1977_v63  ;;  %v2002_v12 = vmul.f32 0.70710677, %v1980_v0  ;;  %v2038_v35 = vadd.f32 %v1926_v33, %v257_v29 }
  0x21   : > { %v717_v8 = vmul.f32 0.3275911, %v1974_v62  ;;  %v1999_v11 = vand.u32 2147483647, %v1983_v3  ;;  %v2005_v13 = vmul.f32 0.70710677, %v1986_v4  ;;  %v2057_v47 = vadd.f32 %v1926_v33, %v271_v40 }
  0x22   : > { %v733_v15 = vadd.f32 1.0, %v701_v7  ;;  %v699_v17 = vmul.f32 0.3275911, %v1993_v9  ;;  %v2012_v18 = vmul.f32 0.70710677, %v1996_v10  ;;  %v273_v30 = vld [vmem:[%s1919_s6 + $0xb0] sm:$0xff] }
  0x23   : > { %v749_v16 = vadd.f32 1.0, %v717_v8  ;;  %v715_v19 = vmul.f32 0.3275911, %v1999_v11  ;;  %v2017_v20 = vand.u32 2147483647, %v2002_v12  ;;  %v2041_v36 = vadd.f32 %v1926_v33, %v273_v30 }
  0x24   : > { %v2020_v21 = vand.u32 2147483647, %v2005_v13  ;;  %1700 = vrcp.f32 %v733_v15  ;;  %v731_v22 = vadd.f32 1.0, %v699_v17  ;;  %v2024_v23 = vand.u32 2147483647, %v2012_v18 }
  0x25   : > { %1663 = vmatmul.mubr.msk.bf16.gmra.mxu0 %vm393_vm0, %v359_v42  ;;  %v2027_v24 = vmul.f32 0.70710677, %v2008_v14  ;;  %1702 = vrcp.f32 %v749_v16  ;;  %v747_v25 = vadd.f32 1.0, %v715_v19  ;;  %v702_v26 = vmul.f32 0.3275911, %v2017_v20 }
  0x26   : > { %1679 = vmatmul.mubr.msk.bf16.gmra.mxu1 %vm393_vm0, %v367_v43  ;;  %1666 = vmatprep.mubr.msk.bf16.mxu0 %vm393_vm0, %v360_v44  ;;  %v718_v27 = vmul.f32 0.3275911, %v2020_v21  ;;  %1704 = vrcp.f32 %v731_v22  ;;  %v700_v28 = vmul.f32 0.3275911, %v2024_v23  ;;  %v2047_v41 = vmul.f32 0.70710677, %v2038_v35 }
  0x27   : > { %1682 = vmatprep.mubr.msk.bf16.mxu1 %vm393_vm0, %v368_v46  ;;  %1706 = vrcp.f32 %v747_v25  ;;  %v734_v31 = vadd.f32 1.0, %v702_v26  ;;  %v2035_v34 = vand.u32 2147483647, %v2027_v24  ;;  %v2050_v42 = vmul.f32 0.70710677, %v2041_v36  ;;  %v258_v44 = vld [vmem:[%s1919_s6 + $0x38] sm:$0xff] }
  0x28   : > { %v750_v32 = vadd.f32 1.0, %v718_v27  ;;  %v732_v38 = vadd.f32 1.0, %v700_v28  ;;  %v2053_v43 = vadd.f32 %v1926_v33, %v255_v37  ;;  %v1117_v48 = vsub.f32 0.0, %v1971_v61 }
  0x29   : > { %1708 = vrcp.f32 %v734_v31  ;;  %v716_v39 = vmul.f32 0.3275911, %v2035_v34  ;;  %v1133_v50 = vsub.f32 0.0, %v1974_v62  ;;  %v2064_v52 = vand.u32 2147483647, %v2047_v41 }
  0x2a   : > { %1710 = vrcp.f32 %v750_v32  ;;  %v2067_v53 = vand.u32 2147483647, %v2050_v42  ;;  %v2070_v54 = vmul.f32 0.70710677, %v2053_v43  ;;  %v2073_v59 = vadd.f32 %v1926_v33, %v258_v44 }
  0x2b   : > { %1712 = vrcp.f32 %v732_v38  ;;  %v748_v46 = vadd.f32 1.0, %v716_v39  ;;  %v1165_v5 = vmul.f32 %v1133_v50, %v1974_v62  ;;  %v1115_v6 = vsub.f32 0.0, %v1993_v9 }
  0x2c   : > { %2880 = vst [vmem:[#allocation2_spill] sm:$0xff] %v2070_v54  ;;  %2881 = vst [vmem:[#allocation3_spill] sm:$0xff] %v2073_v59  ;;  %v1131_v15 = vsub.f32 0.0, %v1999_v11  ;;  %v2086_v16 = vmul.f32 0.70710677, %v2057_v47  ;;  %v1118_v44 = vsub.f32 0.0, %v2017_v20 }
  0x2d   : > { %1667 = vmatmul.mubr.msk.bf16.gmra.mxu0 %vm393_vm0, %v361_v1  ;;  %1714 = vrcp.f32 %v748_v46  ;;  %v1215_v25 = vmul.f32 1.442695, %v1165_v5  ;;  %v2098_v32 = vmul.f32 0.70710677, %v2073_v59  ;;  %vm1309_vm1 = vcmp.ge.f32.partialorder %v1956_v55, 0.0 }
  0x2e   : > { %1683 = vmatmul.mubr.msk.bf16.gmra.mxu1 %vm393_vm0, %v369_v2  ;;  %v1149_v2 = vmul.f32 %v1117_v48, %v1971_v61  ;;  %v1147_v61 = vmul.f32 %v1115_v6, %v1993_v9  ;;  %v1163_v28 = vmul.f32 %v1131_v15, %v1999_v11  ;;  %vm1325_vm2 = vcmp.ge.f32.partialorder %v1959_v56, 0.0 }
  0x2f   : > { %vm1307_vm3 = vcmp.ge.f32.partialorder %v1977_v63, 0.0  ;;  %vm1323_vm4 = vcmp.ge.f32.partialorder %v1983_v3, 0.0  ;;  %v1132_v63 = vsub.f32 0.0, %v2035_v34  ;;  %vm1310_vm5 = vcmp.ge.f32.partialorder %v2002_v12, 0.0 }
  0x30   : > { %v1183_v22 = vmul.f32 1.442695, %v1149_v2  ;;  %v1179_v31 = vmul.f32 1.442695, %v1147_v61  ;;  %v622_v3 = vmul.f32 0.5, %v1986_v4  ;;  %vm1326_vm6 = vcmp.ge.f32.partialorder %v2005_v13, 0.0 }
  0x31   : > { %v2061_v51 = vpop.eup %1700  ;;  %vm1308_vm7 = vcmp.ge.f32.partialorder %v2012_v18, 0.0  ;;  %vm1324_vm8 = vcmp.ge.f32.partialorder %v2027_v24, 0.0  ;;  %vm1313_vm9 = vcmp.ge.f32.partialorder %v2047_v41, 0.0  ;;  %v2298_v18 = vmul.f32 0.5, %v2057_v47 }
  0x32   : > { %v2075_v60 = vpop.eup %1702  ;;  %v829_v1 = vmul.f32 1.0614054, %v2061_v51  ;;  %1716 = vpow2.f32 %v1183_v22  ;;  %vm1329_vm10 = vcmp.ge.f32.partialorder %v2050_v42, 0.0  ;;  %vm1327_vm12 = vcmp.ge.f32.partialorder %v2086_v16, 0.0 }
  0x33   : > { %v2081_v7 = vpop.eup %1704  ;;  %v845_v8 = vmul.f32 1.0614054, %v2075_v60  ;;  %1718 = vpow2.f32 %v1215_v25  ;;  %v2112_v25 = vand.u32 2147483647, %v2070_v54  ;;  %vm1314_vm13 = vcmp.ge.f32.partialorder %v2098_v32, 0.0 }
  0x34   : > { %v2088_v17 = vpop.eup %1706  ;;  %v861_v19 = vadd.f32 -1.4531521, %v829_v1  ;;  %v827_v26 = vmul.f32 1.0614054, %v2081_v7  ;;  %1720 = vpow2.f32 %v1179_v31  ;;  %v1211_v1 = vmul.f32 1.442695, %v1163_v28 }
  0x35   : > { %v877_v62 = vadd.f32 -1.4531521, %v845_v8  ;;  %v843_v27 = vmul.f32 1.0614054, %v2088_v17  ;;  %v705_v8 = vmul.f32 0.3275911, %v2064_v52 }
  0x36   : > { %v2094_v29 = vpop.eup %1708  ;;  %v893_v30 = vmul.f32 %v2061_v51, %v861_v19  ;;  %v859_v38 = vadd.f32 -1.4531521, %v827_v26  ;;  %1722 = vpow2.f32 %v1211_v1  ;;  %v721_v1 = vmul.f32 0.3275911, %v2067_v53 }
  0x37   : > { %v2100_v37 = vpop.eup %1710  ;;  %v909_v9 = vmul.f32 %v2075_v60, %v877_v62  ;;  %v875_v39 = vadd.f32 -1.4531521, %v843_v27  ;;  %v830_v11 = vmul.f32 1.0614054, %v2094_v29  ;;  %v1150_v27 = vmul.f32 %v1118_v44, %v2017_v20 }
  0x38   : > { %v925_v40 = vadd.f32 1.4214138, %v893_v30  ;;  %v891_v48 = vmul.f32 %v2081_v7, %v859_v38  ;;  %v846_v6 = vmul.f32 1.0614054, %v2100_v37  ;;  %v2114_v61 = vpop.eup %1712 }
  0x39   : > { %v941_v46 = vadd.f32 1.4214138, %v909_v9  ;;  %v907_v50 = vmul.f32 %v2088_v17, %v875_v39  ;;  %v862_v5 = vadd.f32 -1.4531521, %v830_v11  ;;  %v1134_v11 = vsub.f32 0.0, %v2020_v21 }
  0x3a   : > { %v957_v2 = vmul.f32 %v2061_v51, %v925_v40  ;;  %v923_v19 = vadd.f32 1.4214138, %v891_v48  ;;  %v878_v28 = vadd.f32 -1.4531521, %v846_v6  ;;  %v828_v20 = vmul.f32 1.0614054, %v2114_v61  ;;  %v2126_v44 = vpop.eup %1714 }
  0x3b   : > { %v973_v15 = vmul.f32 %v2075_v60, %v941_v46  ;;  %v939_v22 = vadd.f32 1.4214138, %v907_v50  ;;  %v894_v26 = vmul.f32 %v2094_v29, %v862_v5  ;;  %v274_v46 = vld [vmem:[%s1919_s6 + $0xb8] sm:$0xff] }
  0x3c   : > { %v989_v62 = vadd.f32 -0.28449672, %v957_v2  ;;  %v955_v31 = vmul.f32 %v2081_v7, %v923_v19  ;;  %v910_v40 = vmul.f32 %v2100_v37, %v878_v28 }
  0x3d   : > { %v1005_v30 = vadd.f32 -0.28449672, %v973_v15  ;;  %v971_v9 = vmul.f32 %v2088_v17, %v939_v22  ;;  %v926_v39 = vadd.f32 1.4214138, %v894_v26  ;;  %v860_v22 = vadd.f32 -1.4531521, %v828_v20 }
  0x3e   : > { %v1021_v38 = vmul.f32 %v2061_v51, %v989_v62  ;;  %v987_v50 = vadd.f32 -0.28449672, %v955_v31  ;;  %v942_v6 = vadd.f32 1.4214138, %v910_v40  ;;  %v737_v62 = vadd.f32 1.0, %v705_v8 }
  0x3f   : > { %v1037_v48 = vmul.f32 %v2075_v60, %v1005_v30  ;;  %v1003_v2 = vadd.f32 -0.28449672, %v971_v9  ;;  %v958_v30 = vmul.f32 %v2094_v29, %v926_v39  ;;  %v1185_v31 = vmul.f32 1.442695, %v1150_v27  ;;  %v1717_v9 = vpop.eup %1716 }
  0x40   : > { %v1053_v5 = vadd.f32 0.2548296, %v1021_v38  ;;  %v1019_v19 = vmul.f32 %v2081_v7, %v987_v50  ;;  %v1166_v38 = vmul.f32 %v1134_v11, %v2020_v21  ;;  %v2136_v40 = vadd.f32 %v1926_v33, %v274_v46 }
  0x41   : > { %v1069_v15 = vadd.f32 0.2548296, %v1037_v48  ;;  %v1035_v28 = vmul.f32 %v2088_v17, %v1003_v2  ;;  %v1719_v48 = vpop.eup %1718  ;;  %v974_v8 = vmul.f32 %v2100_v37, %v942_v6  ;;  %v703_v2 = vmul.f32 0.3275911, %v2112_v25 }
  0x42   : > { %v1085_v26 = vmul.f32 %v2061_v51, %v1053_v5  ;;  %v1051_v59 = vadd.f32 0.2548296, %v1019_v19  ;;  %v892_v51 = vmul.f32 %v2114_v61, %v860_v22  ;;  %v1721_v20 = vpop.eup %1720  ;;  %1724 = vrcp.f32 %v737_v62 }
  0x43   : > { %v1101_v54 = vmul.f32 %v2075_v60, %v1069_v15  ;;  %v753_v60 = vadd.f32 1.0, %v721_v1  ;;  %v1067_v15 = vadd.f32 0.2548296, %v1035_v28  ;;  %v990_v21 = vadd.f32 -0.28449672, %v958_v30 }
  0x44   : > { %v1245_v50 = vmul.f32 %v1717_v9, %v1085_v26  ;;  %v1083_v27 = vmul.f32 %v2081_v7, %v1051_v59  ;;  %1726 = vpow2.f32 %v1185_v31  ;;  %v1217_v11 = vmul.f32 1.442695, %v1166_v38  ;;  %v1723_v7 = vpop.eup %1722  ;;  %v256_v31 = vld [vmem:[%s1919_s6 + $0x28] sm:$0xff] }
  0x45   : > { %v1261_v39 = vmul.f32 %v1719_v48, %v1101_v54  ;;  %v2143_v46 = vand.u32 2147483647, %v2086_v16  ;;  %v2146_v6 = vand.u32 2147483647, %v2098_v32  ;;  %v1006_v22 = vadd.f32 -0.28449672, %v974_v8 }
  0x46   : > { %v1277_v5 = vsub.f32 1.0, %v1245_v50  ;;  %v924_v26 = vadd.f32 1.4214138, %v892_v51  ;;  %v735_v54 = vadd.f32 1.0, %v703_v2  ;;  %v1243_v9 = vmul.f32 %v1721_v20, %v1083_v27  ;;  %v261_v2 = vld [vmem:[%s1919_s6 + $0x50] sm:$0xff] }
  0x47   : > { %v1293_v19 = vsub.f32 1.0, %v1261_v39  ;;  %v1116_v59 = vsub.f32 0.0, %v2024_v23  ;;  %1728 = vrcp.f32 %v753_v60  ;;  %v1099_v62 = vmul.f32 %v2088_v17, %v1067_v15  ;;  %v272_v17 = vld [vmem:[%s1919_s6 + $0xa8] sm:$0xff] }
  0x48   : > { %v1341_v1 = vsub.f32 0.0, %v1277_v5  ;;  %v1022_v28 = vmul.f32 %v2094_v29, %v990_v21  ;;  %v2152_v30 = vmul.f32 0.70710677, %v2136_v40  ;;  %1730 = vpow2.f32 %v1217_v11 }
  0x49   : > { %v719_v38 = vmul.f32 0.3275911, %v2143_v46  ;;  %v706_v48 = vmul.f32 0.3275911, %v2146_v6  ;;  %v1357_v50 = vsub.f32 0.0, %v1293_v19  ;;  %v1038_v8 = vmul.f32 %v2100_v37, %v1006_v22 }
  0x4a   : > { %v956_v51 = vmul.f32 %v2114_v61, %v924_v26  ;;  %1732 = vrcp.f32 %v735_v54  ;;  %v1275_v20 = vsub.f32 1.0, %v1243_v9  ;;  %v1148_v39 = vmul.f32 %v1116_v59, %v2024_v23 }
  0x4b   : > { %v2165_v55 = vadd.f32 %v1926_v33, %v256_v31  ;;  %v1373_v27 = vsel %vm1309_vm1, %v1277_v5, %v1341_v1  ;;  %v2167_v60 = vmul.f32 %v1723_v7, %v1099_v62  ;;  %v1054_v15 = vadd.f32 0.2548296, %v1022_v28 }
  0x4c   : > { %v2170_v21 = vand.u32 2147483647, %v2152_v30  ;;  %v844_v11 = vmul.f32 1.0614054, %v2126_v44  ;;  %v2173_v22 = vadd.f32 1.0, %v719_v38  ;;  %v2176_v26 = vadd.f32 %v1926_v33, %v272_v17 }
  0x4d   : > { %v2179_v56 = vadd.f32 %v1926_v33, %v261_v2  ;;  %v1389_v23 = vsel %vm1325_vm2, %v1293_v19, %v1357_v50  ;;  %v1070_v54 = vadd.f32 0.2548296, %v1038_v8  ;;  %v988_v9 = vadd.f32 -0.28449672, %v956_v51 }
  0x4e   : > { %v2181_v5 = vadd.f32 1.0, %v706_v48  ;;  %v605_v59 = vmul.f32 0.5, %v1940_v45  ;;  %v1405_v7 = vadd.f32 1.0, %v1373_v27  ;;  %v1339_v1 = vsub.f32 0.0, %v1275_v20 }
  0x4f   : > { %v1181_v62 = vmul.f32 1.442695, %v1148_v39  ;;  %v2184_v28 = vpop.eup %1724  ;;  %v1291_v31 = vsub.f32 1.0, %v2167_v60  ;;  %v1086_v38 = vmul.f32 %v2094_v29, %v1054_v15  ;;  %v2190_v17 = vmul.f32 0.3275911, %v2170_v21 }
  0x50   : > { %v621_v48 = vmul.f32 0.5, %v1945_v49  ;;  %v1421_v50 = vadd.f32 1.0, %v1389_v23  ;;  %v876_v45 = vadd.f32 -1.4531521, %v844_v11  ;;  %v1102_v8 = vmul.f32 %v2100_v37, %v1070_v54 }
  0x51   : > { %v1727_v19 = vpop.eup %1726  ;;  %1734 = vpow2.f32 %v1181_v62  ;;  %v1020_v51 = vmul.f32 %v2114_v61, %v988_v9  ;;  %v2197_v2 = vmul.f32 %v1405_v7, %v605_v59  ;;  %v2200_v29 = vmul.f32 0.5, %v1962_v57 }
  0x52   : > { %v1371_v39 = vsel %vm1307_vm3, %v1275_v20, %v1339_v1  ;;  %v908_v27 = vmul.f32 %v2126_v44, %v876_v45  ;;  %v1246_v60 = vmul.f32 %v1727_v19, %v1086_v38  ;;  %v1164_v15 = vmul.f32 %v1132_v63, %v2035_v34 }
  0x53   : > { %v833_v11 = vmul.f32 1.0614054, %v2184_v28  ;;  %v1121_v37 = vsub.f32 0.0, %v2064_v52  ;;  %v2208_v23 = vmul.f32 %v1421_v50, %v621_v48  ;;  %v2211_v54 = vmul.f32 0.5, %v1965_v58 }
  0x54   : > { %v2203_v49 = vpop.eup %1728  ;;  %v1355_v9 = vsub.f32 0.0, %v1291_v31  ;;  %v940_v57 = vadd.f32 1.4214138, %v908_v27  ;;  %v1052_v20 = vadd.f32 0.2548296, %v1020_v51  ;;  %v1403_v34 = vadd.f32 1.0, %v1371_v39 }
  0x55   : > { %2882 = vst [vmem:[#allocation4_spill] sm:$0xff] %v2208_v23  ;;  %v1731_v59 = vpop.eup %1730  ;;  %v1213_v7 = vmul.f32 1.442695, %v1164_v15  ;;  %v865_v1 = vadd.f32 -1.4531521, %v833_v11  ;;  %v1153_v62 = vmul.f32 %v1121_v37, %v2064_v52  ;;  %v1137_v58 = vsub.f32 0.0, %v2067_v53 }
  0x56   : > { %v972_v19 = vmul.f32 %v2126_v44, %v940_v57  ;;  %v849_v48 = vmul.f32 1.0614054, %v2203_v49  ;;  %v1278_v50 = vsub.f32 1.0, %v1246_v60  ;;  %v1262_v63 = vmul.f32 %v1731_v59, %v1102_v8 }
  0x57   : > { %v2214_v38 = vpop.eup %1732  ;;  %1736 = vpow2.f32 %v1213_v7  ;;  %v897_v45 = vmul.f32 %v2184_v28, %v865_v1  ;;  %v1191_v51 = vmul.f32 1.442695, %v1153_v62  ;;  %v1169_v52 = vmul.f32 %v1137_v58, %v2067_v53 }
  0x58   : > { %v1004_v27 = vadd.f32 -0.28449672, %v972_v19  ;;  %v881_v15 = vadd.f32 -1.4531521, %v849_v48  ;;  %v1084_v39 = vmul.f32 %v2114_v61, %v1052_v20  ;;  %v831_v37 = vmul.f32 1.0614054, %v2214_v38 }
  0x59   : > { %v929_v11 = vadd.f32 1.4214138, %v897_v45  ;;  %v1119_v57 = vsub.f32 0.0, %v2112_v25  ;;  %1738 = vpow2.f32 %v1191_v51  ;;  %v1223_v7 = vmul.f32 1.442695, %v1169_v52 }
  0x5a   : > { %v1036_v23 = vmul.f32 %v2126_v44, %v1004_v27  ;;  %v913_v60 = vmul.f32 %v2203_v49, %v881_v15  ;;  %v1387_v8 = vsel %vm1323_vm4, %v1291_v31, %v1355_v9  ;;  %v863_v1 = vadd.f32 -1.4531521, %v831_v37 }
  0x5b   : > { %v961_v59 = vmul.f32 %v2184_v28, %v929_v11  ;;  %v1151_v53 = vmul.f32 %v1119_v57, %v2112_v25  ;;  %v606_v61 = vmul.f32 0.5, %v1980_v0  ;;  %v1342_v20 = vsub.f32 0.0, %v1278_v50 }
  0x5c   : > { %v1294_v62 = vsub.f32 1.0, %v1262_v63  ;;  %v945_v19 = vadd.f32 1.4214138, %v913_v60  ;;  %v1068_v58 = vadd.f32 0.2548296, %v1036_v23  ;;  %v895_v51 = vmul.f32 %v2214_v38, %v863_v1 }
  0x5d   : > { %v993_v45 = vadd.f32 -0.28449672, %v961_v59  ;;  %1740 = vrcp.f32 %v2173_v22  ;;  %v1419_v27 = vadd.f32 1.0, %v1387_v8  ;;  %v1187_v15 = vmul.f32 1.442695, %v1151_v53 }
  0x5e   : > { %v1735_v48 = vpop.eup %1734  ;;  %v977_v9 = vmul.f32 %v2203_v49, %v945_v19  ;;  %1742 = vpow2.f32 %v1223_v7  ;;  %v927_v0 = vadd.f32 1.4214138, %v895_v51  ;;  %v1358_v63 = vsub.f32 0.0, %v1294_v62 }
  0x5f   : > { %v1244_v31 = vmul.f32 %v1735_v48, %v1084_v39  ;;  %v1025_v25 = vmul.f32 %v2184_v28, %v993_v45  ;;  %v1135_v52 = vsub.f32 0.0, %v2143_v46  ;;  %v1374_v22 = vsel %vm1310_vm5, %v1278_v50, %v1342_v20 }
  0x60   : > { %v1009_v23 = vadd.f32 -0.28449672, %v977_v9  ;;  %v1100_v4 = vmul.f32 %v2126_v44, %v1068_v58  ;;  %v959_v39 = vmul.f32 %v2214_v38, %v927_v0  ;;  %1744 = vrcp.f32 %v2181_v5 }
  0x61   : > { %v2245_v11 = vmul.f32 %v1403_v34, %v2200_v29  ;;  %v1276_v37 = vsub.f32 1.0, %v1244_v31  ;;  %v1057_v57 = vadd.f32 0.2548296, %v1025_v25  ;;  %v2249_v7 = vmul.f32 %v1419_v27, %v2211_v54 }
  0x62   : > { %v1041_v60 = vmul.f32 %v2203_v49, %v1009_v23  ;;  %v2252_v8 = vmul.f32 0.5, %v1996_v10  ;;  %v991_v12 = vadd.f32 -0.28449672, %v959_v39  ;;  %1746 = vpow2.f32 %v1187_v15 }
  0x63   : > { %v1406_v50 = vadd.f32 1.0, %v1374_v22  ;;  %v1390_v5 = vsel %vm1326_vm6, %v1294_v62, %v1358_v63  ;;  %v1167_v29 = vmul.f32 %v1135_v52, %v2143_v46  ;;  %v754_v34 = vadd.f32 1.0, %v2190_v17 }
  0x64   : > { %v1737_v44 = vpop.eup %1736  ;;  %v2260_v59 = vmul.f32 0.5, %v2008_v14  ;;  %v1122_v10 = vsub.f32 0.0, %v2146_v6  ;;  %v1340_v1 = vsub.f32 0.0, %v1276_v37  ;;  %v1089_v53 = vmul.f32 %v2184_v28, %v1057_v57 }
  0x65   : > { %v1260_v54 = vmul.f32 %v1737_v44, %v1100_v4  ;;  %v1073_v20 = vadd.f32 0.2548296, %v1041_v60  ;;  %1748 = vrcp.f32 %v754_v34  ;;  %v1422_v13 = vadd.f32 1.0, %v1390_v5 }
  0x66   : > { %v1739_v19 = vpop.eup %1738  ;;  %v2266_v46 = vmul.f32 0.5, %v2038_v35  ;;  %v1023_v17 = vmul.f32 %v2214_v38, %v991_v12  ;;  %v2269_v62 = vmul.f32 %v1406_v50, %v606_v61  ;;  %v1219_v14 = vmul.f32 1.442695, %v1167_v29  ;;  %v2883_v12 = vld [vmem:[#allocation3_spill] sm:$0xff] }
  0x67   : > { %v1138_v48 = vsub.f32 0.0, %v2170_v21  ;;  %v2273_v58 = vmul.f32 0.70710677, %v2165_v55  ;;  %v1292_v28 = vsub.f32 1.0, %v1260_v54  ;;  %v2276_v45 = vmul.f32 0.5, %v2041_v36 }
  0x68   : > { %v2279_v51 = vmul.f32 0.5, %v2053_v43  ;;  %v1154_v35 = vmul.f32 %v1122_v10, %v2146_v6  ;;  %v1372_v61 = vsel %vm1308_vm7, %v1276_v37, %v1340_v1  ;;  %v1249_v9 = vmul.f32 %v1739_v19, %v1089_v53 }
  0x69   : > { %v1105_v27 = vmul.f32 %v2203_v49, %v1073_v20  ;;  %v2288_v25 = vand.u32 2147483647, %v2273_v58  ;;  %v2290_v15 = vmul.f32 %v1422_v13, %v622_v3  ;;  %v1055_v36 = vadd.f32 0.2548296, %v1023_v17 }
  0x6a   : > { %v2282_v31 = vpop.eup %1740  ;;  %v2295_v6 = vmul.f32 0.70710677, %v2176_v26  ;;  %1750 = vpow2.f32 %v1219_v14  ;;  %v1170_v49 = vmul.f32 %v1138_v48, %v2170_v21  ;;  %v1404_v23 = vadd.f32 1.0, %v1372_v61 }
  0x6b   : > { %v1743_v0 = vpop.eup %1742  ;;  %v847_v43 = vmul.f32 1.0614054, %v2282_v31  ;;  %v704_v63 = vmul.f32 0.3275911, %v2288_v25  ;;  %v1356_v52 = vsub.f32 0.0, %v1292_v28  ;;  %v1281_v39 = vsub.f32 1.0, %v1249_v9 }
  0x6c   : > { %v2303_v22 = vand.u32 2147483647, %v2295_v6  ;;  %v1265_v37 = vmul.f32 %v1743_v0, %v1105_v27  ;;  %v1193_v57 = vmul.f32 1.442695, %v1154_v35  ;;  %v1087_v47 = vmul.f32 %v2214_v38, %v1055_v36  ;;  %v277_v9 = vld [vmem:[%s1919_s6 + $0xd0] sm:$0xff] }
  0x6d   : > { %v879_v3 = vadd.f32 -1.4531521, %v847_v43  ;;  %v2305_v4 = vpop.eup %1744  ;;  %v736_v60 = vadd.f32 1.0, %v704_v63  ;;  %v2311_v44 = vmul.f32 0.5, %v2883_v12  ;;  %v2315_v29 = vmul.f32 0.5, %v2136_v40  ;;  %v259_v43 = vld [vmem:[%s1919_s6 + $0x40] sm:$0xff] }
  0x6e   : > { %v834_v50 = vmul.f32 1.0614054, %v2305_v4  ;;  %v1225_v34 = vmul.f32 1.442695, %v1170_v49  ;;  %v720_v54 = vmul.f32 0.3275911, %v2303_v22  ;;  %v2319_v10 = vmul.f32 %v1404_v23, %v2252_v8 }
  0x6f   : > { %v911_v21 = vmul.f32 %v2282_v31, %v879_v3  ;;  %v1747_v5 = vpop.eup %1746  ;;  %1752 = vrcp.f32 %v736_v60  ;;  %v1388_v38 = vsel %vm1324_vm8, %v1292_v28, %v1356_v52  ;;  %v1345_v20 = vsub.f32 0.0, %v1281_v39  ;;  %v2884_v28 = vld [vmem:[#allocation2_spill] sm:$0xff] }
  0x70   : > { %v866_v53 = vadd.f32 -1.4531521, %v834_v50  ;;  %v1297_v19 = vsub.f32 1.0, %v1265_v37  ;;  %1754 = vpow2.f32 %v1193_v57  ;;  %v752_v13 = vadd.f32 1.0, %v720_v54 }
  0x71   : > { %v943_v1 = vadd.f32 1.4214138, %v911_v21  ;;  %v1247_v17 = vmul.f32 %v1747_v5, %v1087_v47  ;;  %v2328_v8 = vmul.f32 0.5, %v2165_v55  ;;  %v1420_v24 = vadd.f32 1.0, %v1388_v38 }
  0x72   : > { %v2323_v40 = vpop.eup %1748  ;;  %v898_v48 = vmul.f32 %v2305_v4, %v866_v53  ;;  %vm1311_vm11 = vcmp.ge.f32.partialorder %v2884_v28, 0.0  ;;  %1756 = vpow2.f32 %v1225_v34  ;;  %v2333_v61 = vmul.f32 0.5, %v2176_v26 }
  0x73   : > { %v975_v14 = vmul.f32 %v2282_v31, %v943_v1  ;;  %v850_v35 = vmul.f32 1.0614054, %v2323_v40  ;;  %v1120_v36 = vsub.f32 0.0, %v2288_v25  ;;  %1758 = vrcp.f32 %v752_v13 }
  0x74   : > { %v930_v0 = vadd.f32 1.4214138, %v898_v48  ;;  %v1377_v55 = vsel %vm1313_vm9, %v1281_v39, %v1345_v20  ;;  %v1361_v49 = vsub.f32 0.0, %v1297_v19  ;;  %v2341_v23 = vmul.f32 0.70710677, %v2179_v56 }
  0x75   : > { %v1007_v27 = vadd.f32 -0.28449672, %v975_v14  ;;  %v882_v63 = vadd.f32 -1.4531521, %v850_v35  ;;  %v1279_v52 = vsub.f32 1.0, %v1247_v17  ;;  %v2346_v37 = vadd.f32 %v1926_v33, %v277_v9 }
  0x76   : > { %v962_v26 = vmul.f32 %v2305_v4, %v930_v0  ;;  %v1136_v60 = vsub.f32 0.0, %v2303_v22  ;;  %v677_v41 = vand.u32 2147483647, %v2341_v23  ;;  %v2352_v39 = vadd.f32 %v1926_v33, %v259_v43 }
  0x77   : > { %v1039_v3 = vmul.f32 %v2282_v31, %v1007_v27  ;;  %v914_v57 = vmul.f32 %v2323_v40, %v882_v63  ;;  %v1751_v47 = vpop.eup %1750  ;;  %v2355_v21 = vmul.f32 %v1420_v24, %v2260_v59  ;;  %v1152_v5 = vmul.f32 %v1120_v36, %v2288_v25 }
  0x78   : > { %v994_v50 = vadd.f32 -0.28449672, %v962_v26  ;;  %v1409_v34 = vadd.f32 1.0, %v1377_v55  ;;  %v1393_v54 = vsel %vm1329_vm10, %v1297_v19, %v1361_v49  ;;  %v709_v1 = vmul.f32 0.3275911, %v677_v41 }
  0x79   : > { %v1071_v12 = vadd.f32 0.2548296, %v1039_v3  ;;  %v946_v38 = vadd.f32 1.4214138, %v914_v57  ;;  %v1343_v53 = vsub.f32 0.0, %v1279_v52  ;;  %v1168_v14 = vmul.f32 %v1136_v60, %v2303_v22 }
  0x7a   : > { %v1026_v13 = vmul.f32 %v2305_v4, %v994_v50  ;;  %v2363_v17 = vmul.f32 0.70710677, %v2346_v37  ;;  %v741_v48 = vadd.f32 1.0, %v709_v1  ;;  %v2368_v25 = vmul.f32 0.70710677, %v2352_v39 }
  0x7b   : > { %v1103_v20 = vmul.f32 %v2282_v31, %v1071_v12  ;;  %v978_v59 = vmul.f32 %v2323_v40, %v946_v38  ;;  %v1189_v35 = vmul.f32 1.442695, %v1152_v5  ;;  %v2374_v9 = vmul.f32 %v1409_v34, %v2266_v46  ;;  %v275_v34 = vld [vmem:[%s1919_s6 + $0xc0] sm:$0xff] }
  0x7c   : > { %v2370_v42 = vpop.eup %1752  ;;  %v1058_v24 = vadd.f32 0.2548296, %v1026_v13  ;;  %v693_v31 = vand.u32 2147483647, %v2363_v17  ;;  %1760 = vrcp.f32 %v741_v48  ;;  %v1425_v22 = vadd.f32 1.0, %v1393_v54 }
  0x7d   : > { %v1263_v19 = vmul.f32 %v1751_v47, %v1103_v20  ;;  %v1010_v27 = vadd.f32 -0.28449672, %v978_v59  ;;  %v832_v0 = vmul.f32 1.0614054, %v2370_v42  ;;  %v1755_v36 = vpop.eup %1754  ;;  %v1375_v43 = vsel %vm1311_vm11, %v1279_v52, %v1343_v53 }
  0x7e   : > { %v1090_v55 = vmul.f32 %v2305_v4, %v1058_v24  ;;  %v725_v49 = vmul.f32 0.3275911, %v693_v31  ;;  %v1221_v46 = vmul.f32 1.442695, %v1168_v14  ;;  %v2383_v26 = vand.u32 2147483647, %v2368_v25 }
  0x7f   : > { %v1042_v63 = vmul.f32 %v2323_v40, %v1010_v27  ;;  %v864_v3 = vadd.f32 -1.4531521, %v832_v0  ;;  %v1757_v57 = vpop.eup %1756  ;;  %v1295_v60 = vsub.f32 1.0, %v1263_v19  ;;  %1762 = vpow2.f32 %v1189_v35  ;;  %v262_v0 = vld [vmem:[%s1919_s6 + $0x58] sm:$0xff] }
  0x80   : > { %v1125_v47 = vsub.f32 0.0, %v677_v41  ;;  %v757_v12 = vadd.f32 1.0, %v725_v49  ;;  %v2385_v28 = vpop.eup %1758  ;;  %v1141_v4 = vsub.f32 0.0, %v693_v31  ;;  %v707_v5 = vmul.f32 0.3275911, %v2383_v26 }
  0x81   : > { %v1074_v52 = vadd.f32 0.2548296, %v1042_v63  ;;  %v896_v50 = vmul.f32 %v2370_v42, %v864_v3  ;;  %v2391_v54 = vmul.f32 %v1425_v22, %v2276_v45  ;;  %v1250_v38 = vmul.f32 %v1755_v36, %v1090_v55 }
  0x82   : > { %v848_v1 = vmul.f32 1.0614054, %v2385_v28  ;;  %1764 = vrcp.f32 %v757_v12  ;;  %v1407_v53 = vadd.f32 1.0, %v1375_v43  ;;  %v1157_v14 = vmul.f32 %v1125_v47, %v677_v41 }
  0x83   : > { %v1106_v20 = vmul.f32 %v2323_v40, %v1074_v52  ;;  %v928_v13 = vadd.f32 1.4214138, %v896_v50  ;;  %1766 = vpow2.f32 %v1221_v46  ;;  %v739_v48 = vadd.f32 1.0, %v707_v5 }
  0x84   : > { %v880_v59 = vadd.f32 -1.4531521, %v848_v1  ;;  %v314_v19 = vadd.f32 %v1926_v33, %v275_v34  ;;  %v1359_v24 = vsub.f32 0.0, %v1295_v60  ;;  %v2399_v35 = vmul.f32 0.5, %v2179_v56 }
  0x85   : > { %v960_v45 = vmul.f32 %v2370_v42, %v928_v13  ;;  %v1173_v27 = vmul.f32 %v1141_v4, %v693_v31  ;;  %v1282_v36 = vsub.f32 1.0, %v1250_v38  ;;  %v1266_v22 = vmul.f32 %v1757_v57, %v1106_v20 }
  0x86   : > { %v912_v40 = vmul.f32 %v2385_v28, %v880_v59  ;;  %1768 = vrcp.f32 %v739_v48  ;;  %vm1330_vm14 = vcmp.ge.f32.partialorder %v2152_v30, 0.0  ;;  %v2405_v41 = vmul.f32 0.5, %v2346_v37 }
  0x87   : > { %v992_v43 = vadd.f32 -0.28449672, %v960_v45  ;;  %v2408_v55 = vmul.f32 0.5, %v2352_v39  ;;  %v2410_v49 = vmul.f32 0.5, %v314_v19  ;;  %v1199_v63 = vmul.f32 1.442695, %v1157_v14 }
  0x88   : > { %v944_v56 = vadd.f32 1.4214138, %v912_v40  ;;  %v2412_v31 = vmul.f32 0.70710677, %v314_v19  ;;  %v2415_v3 = vadd.f32 %v1926_v33, %v262_v0  ;;  %v1391_v46 = vsel %vm1327_vm12, %v1295_v60, %v1359_v24 }
  0x89   : > { %v1024_v57 = vmul.f32 %v2370_v42, %v992_v43  ;;  %v1231_v47 = vmul.f32 1.442695, %v1173_v27  ;;  %v1123_v37 = vsub.f32 0.0, %v2383_v26  ;;  %v2421_v12 = vpop.eup %1760  ;;  %v1346_v39 = vsub.f32 0.0, %v1282_v36 }
  0x8a   : > { %v1298_v52 = vsub.f32 1.0, %v1266_v22  ;;  %v976_v50 = vmul.f32 %v2385_v28, %v944_v56  ;;  %v691_v4 = vand.u32 2147483647, %v2412_v31  ;;  %v2426_v33 = vmul.f32 %v1407_v53, %v2279_v51  ;;  %v278_v51 = vld [vmem:[%s1919_s6 + $0xd8] sm:$0xff]  ;;  %v2446_v56 = vld [vmem:[%s2874_s3] ss:$0 sm:$0xff] }
  0x8b   : > { %v1056_v5 = vadd.f32 0.2548296, %v1024_v57  ;;  %v837_v16 = vmul.f32 1.0614054, %v2421_v12  ;;  %v2430_v60 = vmul.f32 0.70710677, %v2415_v3  ;;  %1770 = vpow2.f32 %v1199_v63 }
  0x8c   : > { %v1423_v34 = vadd.f32 1.0, %v1391_v46  ;;  %v1008_v38 = vadd.f32 -0.28449672, %v976_v50  ;;  %v723_v1 = vmul.f32 0.3275911, %v691_v4  ;;  %v1763_v20 = vpop.eup %1762  ;;  %v1155_v14 = vmul.f32 %v1123_v37, %v2383_v26 }
  0x8d   : > { %v1088_v13 = vmul.f32 %v2370_v42, %v1056_v5  ;;  %v869_v59 = vadd.f32 -1.4531521, %v837_v16  ;;  %v678_v48 = vand.u32 2147483647, %v2430_v60  ;;  %v1362_v53 = vsub.f32 0.0, %v1298_v52 }
  0x8e   : > { %v1040_v19 = vmul.f32 %v2385_v28, %v1008_v38  ;;  %1772 = vpow2.f32 %v1231_v47  ;;  %v755_v24 = vadd.f32 1.0, %v723_v1  ;;  %v1378_v27 = vsel %vm1314_vm13, %v1282_v36, %v1346_v39 }
  0x8f   : > { %v2437_v45 = vpop.eup %1764  ;;  %v901_v0 = vmul.f32 %v2421_v12, %v869_v59  ;;  %v1139_v22 = vsub.f32 0.0, %v691_v4  ;;  %v710_v42 = vmul.f32 0.3275911, %v678_v48  ;;  %v2449_v63 = vadd.f32 %v2446_v56, %v278_v51 }
  0x90   : > { %v1767_v40 = vpop.eup %1766  ;;  %v1072_v43 = vadd.f32 0.2548296, %v1040_v19  ;;  %v853_v26 = vmul.f32 1.0614054, %v2437_v45  ;;  %1774 = vrcp.f32 %v755_v24  ;;  %v1248_v32 = vmul.f32 %v1763_v20, %v1088_v13  ;;  %v260_v20 = vld [vmem:[%s1919_s6 + $0x48] sm:$0xff] }
  0x91   : > { %v933_v36 = vadd.f32 1.4214138, %v901_v0  ;;  %v1195_v46 = vmul.f32 1.442695, %v1155_v14  ;;  %v742_v57 = vadd.f32 1.0, %v710_v42  ;;  %v1410_v47 = vadd.f32 1.0, %v1378_v27 }
  0x92   : > { %v1394_v37 = vsel %vm1330_vm14, %v1298_v52, %v1362_v53  ;;  %vm1312_vm15 = vcmp.ge.f32.partialorder %v2273_v58, 0.0  ;;  %v1104_v39 = vmul.f32 %v2385_v28, %v1072_v43  ;;  %v885_v50 = vadd.f32 -1.4531521, %v853_v26 }
  0x93   : > { %v2455_v5 = vpop.eup %1768  ;;  %v965_v16 = vmul.f32 %v2421_v12, %v933_v36  ;;  %v1171_v38 = vmul.f32 %v1139_v22, %v691_v4  ;;  %1776 = vrcp.f32 %v742_v57  ;;  %v1126_v1 = vsub.f32 0.0, %v678_v48 }
  0x94   : > { %v1264_v13 = vmul.f32 %v1767_v40, %v1104_v39  ;;  %vm1328_vm1 = vcmp.ge.f32.partialorder %v2295_v6, 0.0  ;;  %v917_v59 = vmul.f32 %v2437_v45, %v885_v50  ;;  %v835_v30 = vmul.f32 1.0614054, %v2455_v5 }
  0x95   : > { %v2463_v52 = vmul.f32 0.70710677, %v2449_v63  ;;  %v2466_v28 = vmul.f32 %v1423_v34, %v2298_v18  ;;  %v1280_v14 = vsub.f32 1.0, %v1248_v32  ;;  %v997_v51 = vadd.f32 -0.28449672, %v965_v16 }
  0x96   : > { %1778 = vpow2.f32 %v1195_v46  ;;  %v1426_v4 = vadd.f32 1.0, %v1394_v37  ;;  %v949_v53 = vadd.f32 1.4214138, %v917_v59  ;;  %v867_v19 = vadd.f32 -1.4531521, %v835_v30 }
  0x97   : > { %v2469_v24 = vadd.f32 %v2446_v56, %v260_v20  ;;  %v1296_v27 = vsub.f32 1.0, %v1264_v13  ;;  %v1029_v0 = vmul.f32 %v2421_v12, %v997_v51  ;;  %v1158_v22 = vmul.f32 %v1126_v1, %v678_v48  ;;  %v276_v20 = vld [vmem:[%s1919_s6 + $0xc8] sm:$0xff] }
  0x98   : > { %v694_v42 = vand.u32 2147483647, %v2463_v52  ;;  %v2474_v40 = vmul.f32 %v1410_v47, %v2311_v44  ;;  %v981_v18 = vmul.f32 %v2437_v45, %v949_v53  ;;  %v899_v34 = vmul.f32 %v2455_v5, %v867_v19  ;;  %v1771_v26 = vpop.eup %1770 }
  0x99   : > { %v1227_v43 = vmul.f32 1.442695, %v1171_v38  ;;  %v1344_v32 = vsub.f32 0.0, %v1280_v14  ;;  %v1061_v36 = vadd.f32 0.2548296, %v1029_v0  ;;  %v2479_v46 = vmul.f32 0.5, %v2415_v3 }
  0x9a   : > { %v726_v57 = vmul.f32 0.3275911, %v694_v42  ;;  %v2482_v48 = vmul.f32 %v1426_v4, %v2315_v29  ;;  %v1013_v37 = vadd.f32 -0.28449672, %v981_v18  ;;  %v931_v39 = vadd.f32 1.4214138, %v899_v34 }
  0x9b   : > { %v2485_v44 = vmul.f32 0.70710677, %v2469_v24  ;;  %v1773_v47 = vpop.eup %1772  ;;  %v1360_v50 = vsub.f32 0.0, %v1296_v27  ;;  %v1093_v16 = vmul.f32 %v2421_v12, %v1061_v36  ;;  %v1201_v38 = vmul.f32 1.442695, %v1158_v22 }
  0x9c   : > { %v758_v1 = vadd.f32 1.0, %v726_v57  ;;  %vm1317_vm2 = vcmp.ge.f32.partialorder %v2341_v23, 0.0  ;;  %v1045_v3 = vmul.f32 %v2437_v45, %v1013_v37  ;;  %v963_v13 = vmul.f32 %v2455_v5, %v931_v39 }
  0x9d   : > { %1780 = vpow2.f32 %v1227_v43  ;;  %v676_v29 = vand.u32 2147483647, %v2485_v44  ;;  %v2493_v59 = vpop.eup %1774  ;;  %v1376_v30 = vsel %vm1312_vm15, %v1280_v14, %v1344_v32  ;;  %v1253_v51 = vmul.f32 %v1771_v26, %v1093_v16  ;;  %v265_v16 = vld [vmem:[%s1919_s6 + $0x70] sm:$0xff] }
  0x9e   : > { %1782 = vrcp.f32 %v758_v1  ;;  %v1142_v12 = vsub.f32 0.0, %v694_v42  ;;  %v1077_v4 = vadd.f32 0.2548296, %v1045_v3  ;;  %v995_v53 = vadd.f32 -0.28449672, %v963_v13 }
  0x9f   : > { %v851_v19 = vmul.f32 1.0614054, %v2493_v59  ;;  %v2499_v0 = vadd.f32 %v2446_v56, %v276_v20  ;;  %v1392_v22 = vsel %vm1328_vm1, %v1296_v27, %v1360_v50  ;;  %v1285_v18 = vsub.f32 1.0, %v1253_v51 }
  0xa0   : > { %1784 = vpow2.f32 %v1201_v38  ;;  %v708_v34 = vmul.f32 0.3275911, %v676_v29  ;;  %v2503_v43 = vpop.eup %1776  ;;  %v1109_v58 = vmul.f32 %v2437_v45, %v1077_v4  ;;  %v1027_v14 = vmul.f32 %v2455_v5, %v995_v53 }
  0xa1   : > { %v883_v26 = vadd.f32 -1.4531521, %v851_v19  ;;  %v1124_v32 = vsub.f32 0.0, %v676_v29  ;;  %v1408_v36 = vadd.f32 1.0, %v1376_v30  ;;  %v838_v57 = vmul.f32 1.0614054, %v2503_v43 }
  0xa2   : > { %v1174_v37 = vmul.f32 %v1142_v12, %v694_v42  ;;  %v740_v39 = vadd.f32 1.0, %v708_v34  ;;  %v1269_v6 = vmul.f32 %v1773_v47, %v1109_v58  ;;  %vm1333_vm3 = vcmp.ge.f32.partialorder %v2363_v17, 0.0 }
  0xa3   : > { %v1779_v1 = vpop.eup %1778  ;;  %v1059_v27 = vadd.f32 0.2548296, %v1027_v14  ;;  %v915_v50 = vmul.f32 %v2493_v59, %v883_v26  ;;  %v2512_v38 = vmul.f32 0.70710677, %v2499_v0  ;;  %v1424_v45 = vadd.f32 1.0, %v1392_v22 }
  0xa4   : > { %v1349_v20 = vsub.f32 0.0, %v1285_v18  ;;  %v870_v3 = vadd.f32 -1.4531521, %v838_v57  ;;  %1786 = vrcp.f32 %v740_v39  ;;  %v1156_v42 = vmul.f32 %v1124_v32, %v676_v29 }
  0xa5   : > { %v1091_v13 = vmul.f32 %v2455_v5, %v1059_v27  ;;  %v947_v30 = vadd.f32 1.4214138, %v915_v50  ;;  %v2516_v51 = vadd.f32 %v2446_v56, %v265_v16  ;;  %v1301_v47 = vsub.f32 1.0, %v1269_v6 }
  0xa6   : > { %v902_v12 = vmul.f32 %v2503_v43, %v870_v3  ;;  %v2520_v4 = vmul.f32 0.5, %v2449_v63  ;;  %v692_v53 = vand.u32 2147483647, %v2512_v38  ;;  %vm1315_vm4 = vcmp.ge.f32.partialorder %v2368_v25, 0.0 }
  0xa7   : > { %v1251_v19 = vmul.f32 %v1779_v1, %v1091_v13  ;;  %v979_v22 = vmul.f32 %v2493_v59, %v947_v30  ;;  %v1233_v34 = vmul.f32 1.442695, %v1174_v37  ;;  %v2526_v5 = vmul.f32 0.5, %v2469_v24 }
  0xa8   : > { %v2529_v29 = vmul.f32 %v1408_v36, %v2328_v8  ;;  %v1381_v58 = vsel %vm1317_vm2, %v1285_v18, %v1349_v20  ;;  %v934_v14 = vadd.f32 1.4214138, %v902_v12  ;;  %v724_v63 = vmul.f32 0.3275911, %v692_v53 }
  0xa9   : > { %v2534_v26 = vmul.f32 %v1424_v45, %v2333_v61  ;;  %v1011_v32 = vadd.f32 -0.28449672, %v979_v22  ;;  %v1197_v57 = vmul.f32 1.442695, %v1156_v42  ;;  %v2537_v39 = vmul.f32 0.70710677, %v2516_v51 }
  0xaa   : > { %v1781_v37 = vpop.eup %1780  ;;  %v1365_v24 = vsub.f32 0.0, %v1301_v47  ;;  %v1283_v16 = vsub.f32 1.0, %v1251_v19  ;;  %v966_v8 = vmul.f32 %v2503_v43, %v934_v14  ;;  %v756_v36 = vadd.f32 1.0, %v724_v63  ;;  %v281_v45 = vld [vmem:[%s1919_s6 + $0xf0] sm:$0xff] }
  0xab   : > { %v2540_v1 = vpop.eup %1782  ;;  %v1413_v23 = vadd.f32 1.0, %v1381_v58  ;;  %v1043_v18 = vmul.f32 %v2493_v59, %v1011_v32  ;;  %1788 = vpow2.f32 %v1233_v34  ;;  %v681_v61 = vand.u32 2147483647, %v2537_v39 }
  0xac   : > { %v998_v6 = vadd.f32 -0.28449672, %v966_v8  ;;  %v854_v27 = vmul.f32 1.0614054, %v2540_v1  ;;  %1790 = vrcp.f32 %v756_v36  ;;  %v1140_v50 = vsub.f32 0.0, %v692_v53  ;;  %v263_v36 = vld [vmem:[%s1919_s6 + $0x60] sm:$0xff] }
  0xad   : > { %v1785_v20 = vpop.eup %1784  ;;  %v1075_v3 = vadd.f32 0.2548296, %v1043_v18  ;;  %vm1331_vm5 = vcmp.ge.f32.partialorder %v2412_v31, 0.0  ;;  %1792 = vpow2.f32 %v1197_v57  ;;  %v2548_v13 = vmul.f32 0.5, %v2499_v0 }
  0xae   : > { %v713_v30 = vmul.f32 0.3275911, %v681_v61  ;;  %v1397_v42 = vsel %vm1333_vm3, %v1301_v47, %v1365_v24  ;;  %v1347_v12 = vsub.f32 0.0, %v1283_v16  ;;  %v1030_v19 = vmul.f32 %v2503_v43, %v998_v6 }
  0xaf   : > { %v886_v22 = vadd.f32 -1.4531521, %v854_v27  ;;  %v1107_v34 = vmul.f32 %v2493_v59, %v1075_v3  ;;  %v1129_v14 = vsub.f32 0.0, %v681_v61  ;;  %v320_v63 = vadd.f32 %v2446_v56, %v281_v45 }
  0xb0   : > { %v745_v58 = vadd.f32 1.0, %v713_v30  ;;  %v2556_v32 = vmul.f32 %v1413_v23, %v2399_v35  ;;  %v1062_v57 = vadd.f32 0.2548296, %v1030_v19  ;;  %v1172_v8 = vmul.f32 %v1140_v50, %v692_v53 }
  0xb1   : > { %v918_v0 = vmul.f32 %v2540_v1, %v886_v22  ;;  %v2560_v17 = vpop.eup %1786  ;;  %v1429_v47 = vadd.f32 1.0, %v1397_v42  ;;  %v1267_v24 = vmul.f32 %v1781_v37, %v1107_v34  ;;  %v2562_v18 = vmul.f32 0.70710677, %v320_v63 }
  0xb2   : > { %1794 = vrcp.f32 %v745_v58  ;;  %v1379_v59 = vsel %vm1315_vm4, %v1283_v16, %v1347_v12  ;;  %v1094_v6 = vmul.f32 %v2503_v43, %v1062_v57  ;;  %vm1318_vm6 = vcmp.ge.f32.partialorder %v2430_v60, 0.0  ;;  %v279_v58 = vld [vmem:[%s1919_s6 + $0xe0] sm:$0xff] }
  0xb3   : > { %v950_v35 = vadd.f32 1.4214138, %v918_v0  ;;  %v836_v23 = vmul.f32 1.0614054, %v2560_v17  ;;  %v1299_v27 = vsub.f32 1.0, %v1267_v24  ;;  %v1161_v53 = vmul.f32 %v1129_v14, %v681_v61 }
  0xb4   : > { %v697_v50 = vand.u32 2147483647, %v2562_v18  ;;  %v2571_v37 = vadd.f32 %v2446_v56, %v263_v36  ;;  %v1254_v45 = vmul.f32 %v1785_v20, %v1094_v6  ;;  %v1229_v16 = vmul.f32 1.442695, %v1172_v8 }
  0xb5   : > { %v982_v3 = vmul.f32 %v2540_v1, %v950_v35  ;;  %v868_v25 = vadd.f32 -1.4531521, %v836_v23  ;;  %v1411_v30 = vadd.f32 1.0, %v1379_v59  ;;  %v1363_v43 = vsub.f32 0.0, %v1299_v27 }
  0xb6   : > { %v729_v42 = vmul.f32 0.3275911, %v697_v50  ;;  %v1145_v12 = vsub.f32 0.0, %v697_v50  ;;  %v1286_v19 = vsub.f32 1.0, %v1254_v45  ;;  %v2576_v61 = vmul.f32 0.70710677, %v2571_v37 }
  0xb7   : > { %v1014_v22 = vadd.f32 -0.28449672, %v982_v3  ;;  %v900_v34 = vmul.f32 %v2560_v17, %v868_v25  ;;  %v2580_v14 = vmul.f32 %v1429_v47, %v2405_v41  ;;  %v2583_v20 = vmul.f32 0.5, %v2516_v51 }
  0xb8   : > { %v1207_v57 = vmul.f32 1.442695, %v1161_v53  ;;  %v761_v0 = vadd.f32 1.0, %v729_v42  ;;  %v1789_v8 = vpop.eup %1788  ;;  %v1395_v36 = vsel %vm1331_vm5, %v1299_v27, %v1363_v43  ;;  %1796 = vpow2.f32 %v1229_v16 }
  0xb9   : > { %v1046_v24 = vmul.f32 %v2540_v1, %v1014_v22  ;;  %v932_v59 = vadd.f32 1.4214138, %v900_v34  ;;  %v2588_v6 = vpop.eup %1790  ;;  %v1350_v35 = vsub.f32 0.0, %v1286_v19  ;;  %vm1334_vm7 = vcmp.ge.f32.partialorder %v2463_v52, 0.0 }
  0xba   : > { %1798 = vrcp.f32 %v761_v0  ;;  %v679_v41 = vand.u32 2147483647, %v2576_v61  ;;  %v2593_v51 = vadd.f32 %v2446_v56, %v279_v58  ;;  %v1793_v47 = vpop.eup %1792  ;;  %v2596_v23 = vmul.f32 %v1411_v30, %v2408_v55 }
  0xbb   : > { %v1078_v31 = vadd.f32 0.2548296, %v1046_v24  ;;  %v964_v27 = vmul.f32 %v2560_v17, %v932_v59  ;;  %v1177_v53 = vmul.f32 %v1145_v12, %v697_v50  ;;  %v852_v45 = vmul.f32 1.0614054, %v2588_v6  ;;  %v266_v50 = vld [vmem:[%s1919_s6 + $0x78] sm:$0xff] }
  0xbc   : > { %1800 = vpow2.f32 %v1207_v57  ;;  %v2600_v3 = vmul.f32 0.5, %v320_v63  ;;  %v711_v25 = vmul.f32 0.3275911, %v679_v41  ;;  %v1427_v16 = vadd.f32 1.0, %v1395_v36 }
  0xbd   : > { %v1110_v43 = vmul.f32 %v2540_v1, %v1078_v31  ;;  %v996_v42 = vadd.f32 -0.28449672, %v964_v27  ;;  %v1127_v22 = vsub.f32 0.0, %v679_v41  ;;  %v1382_v55 = vsel %vm1318_vm6, %v1286_v19, %v1350_v35 }
  0xbe   : > { %v884_v30 = vadd.f32 -1.4531521, %v852_v45  ;;  %v743_v34 = vadd.f32 1.0, %v711_v25  ;;  %v2606_v58 = vmul.f32 0.70710677, %v2593_v51  ;;  %vm1316_vm8 = vcmp.ge.f32.partialorder %v2485_v44, 0.0 }
  0xbf   : > { %v2609_v12 = vpop.eup %1794  ;;  %v1270_v57 = vmul.f32 %v1789_v8, %v1110_v43  ;;  %v1028_v63 = vmul.f32 %v2560_v17, %v996_v42  ;;  %v1239_v0 = vmul.f32 1.442695, %v1177_v53  ;;  %v1159_v36 = vmul.f32 %v1127_v22, %v679_v41 }
  0xc0   : > { %v916_v1 = vmul.f32 %v2588_v6, %v884_v30  ;;  %v841_v60 = vmul.f32 1.0614054, %v2609_v12  ;;  %1802 = vrcp.f32 %v743_v34  ;;  %v695_v19 = vand.u32 2147483647, %v2606_v58  ;;  %v282_v34 = vld [vmem:[%s1919_s6 + $0xf8] sm:$0xff] }
  0xc1   : > { %v1414_v24 = vadd.f32 1.0, %v1382_v55  ;;  %v1302_v59 = vsub.f32 1.0, %v1270_v57  ;;  %v1060_v35 = vadd.f32 0.2548296, %v1028_v63  ;;  %v2617_v31 = vadd.f32 %v2446_v56, %v266_v50 }
  0xc2   : > { %v2620_v8 = vmul.f32 %v1427_v16, %v2410_v49  ;;  %v948_v41 = vadd.f32 1.4214138, %v916_v1  ;;  %v873_v27 = vadd.f32 -1.4531521, %v841_v60  ;;  %v727_v53 = vmul.f32 0.3275911, %v695_v19 }
  0xc3   : > { %v1366_v45 = vsub.f32 0.0, %v1302_v59  ;;  %v1092_v25 = vmul.f32 %v2560_v17, %v1060_v35  ;;  %1804 = vpow2.f32 %v1239_v0  ;;  %v1143_v43 = vsub.f32 0.0, %v695_v19  ;;  %v2629_v49 = vld [vmem:[%s2875_s4] ss:$0 sm:$0xff] }
  0xc4   : > { %v980_v42 = vmul.f32 %v2588_v6, %v948_v41  ;;  %v905_v22 = vmul.f32 %v2609_v12, %v873_v27  ;;  %v1203_v55 = vmul.f32 1.442695, %v1159_v36  ;;  %v759_v30 = vadd.f32 1.0, %v727_v53 }
  0xc5   : > { %v1398_v16 = vsel %vm1334_vm7, %v1302_v59, %v1366_v45  ;;  %v1252_v50 = vmul.f32 %v1793_v47, %v1092_v25  ;;  %v1175_v57 = vmul.f32 %v1143_v43, %v695_v19  ;;  %v2634_v17 = vmul.f32 0.70710677, %v2617_v31  ;;  %v1797_v63 = vpop.eup %1796 }
  0xc6   : > { %v2637_v0 = vmul.f32 %v1414_v24, %v2479_v46  ;;  %v1430_v36 = vadd.f32 1.0, %v1398_v16  ;;  %v1012_v1 = vadd.f32 -0.28449672, %v980_v42  ;;  %v937_v60 = vadd.f32 1.4214138, %v905_v22 }
  0xc7   : > { %v2639_v35 = vpop.eup %1798  ;;  %v1284_v41 = vsub.f32 1.0, %v1252_v50  ;;  %v1235_v27 = vmul.f32 1.442695, %v1175_v57  ;;  %v2642_v53 = vand.u32 2147483647, %v2634_v17  ;;  %v2645_v52 = vadd.f32 %v2446_v56, %v282_v34 }
  0xc8   : > { %v1044_v47 = vmul.f32 %v2588_v6, %v1012_v1  ;;  %v969_v19 = vmul.f32 %v2609_v12, %v937_v60  ;;  %v857_v46 = vmul.f32 1.0614054, %v2639_v35  ;;  %1806 = vpow2.f32 %v1203_v55 }
  0xc9   : > { %v2650_v24 = vpop.eup %1800  ;;  %v2653_v45 = vmul.f32 %v1430_v36, %v2520_v4  ;;  %v1348_v25 = vsub.f32 0.0, %v1284_v41  ;;  %vm1332_vm9 = vcmp.ge.f32.partialorder %v2512_v38, 0.0  ;;  %1808 = vrcp.f32 %v759_v30 }
  0xca   : > { %v714_v43 = vmul.f32 0.3275911, %v2642_v53  ;;  %v1076_v34 = vadd.f32 0.2548296, %v1044_v47  ;;  %v1001_v16 = vadd.f32 -0.28449672, %v969_v19  ;;  %1810 = vpow2.f32 %v1235_v27 }
  0xcb   : > { %v889_v50 = vadd.f32 -1.4531521, %v857_v46  ;;  %v1380_v30 = vsel %vm1316_vm8, %v1284_v41, %v1348_v25  ;;  %v1130_v57 = vsub.f32 0.0, %v2642_v53  ;;  %vm1321_vm10 = vcmp.ge.f32.partialorder %v2537_v39, 0.0 }
  0xcc   : > { %v1108_v47 = vmul.f32 %v2588_v6, %v1076_v34  ;;  %v2671_v19 = vadd.f32 1.0, %v714_v43  ;;  %v1033_v27 = vmul.f32 %v2609_v12, %v1001_v16  ;;  %vm1337_vm11 = vcmp.ge.f32.partialorder %v2562_v18, 0.0 }
  0xcd   : > { %v2673_v46 = vpop.eup %1802  ;;  %vm1319_vm12 = vcmp.ge.f32.partialorder %v2576_v61, 0.0  ;;  %vm1335_vm13 = vcmp.ge.f32.partialorder %v2606_v58, 0.0  ;;  %vm1322_vm14 = vcmp.ge.f32.partialorder %v2634_v17, 0.0 }
  0xce   : > { %v1268_v34 = vmul.f32 %v1797_v63, %v1108_v47  ;;  %v839_v47 = vmul.f32 1.0614054, %v2673_v46  ;;  %1812 = vrcp.f32 %v2671_v19 }
  0xd5   : > { %v1656_v59 = vpop.f32.mrf.mxu0 }
  0xd6   : > { %v485_v42 = vadd.f32 %v1656_v59, %v2629_v49  ;;  %v1672_v22 = vpop.f32.mrf.mxu1  ;;  %v2885_v59 = vld [vmem:[#allocation4_spill] sm:$0xff] }
  0xd7   : > { %v549_v4 = vadd.f32 %v1672_v22, %v2629_v49  ;;  %v476_v55 = vpop.f32.mrf.mxu0 }
  0xd8   : > { %v1469_v36 = vadd.f32 %v2197_v2, %v485_v42  ;;  %v477_v1 = vadd.f32 %v2629_v49, %v476_v55  ;;  %v540_v60 = vpop.f32.mrf.mxu1  ;;  %v921_v2 = vmul.f32 %v2639_v35, %v889_v50  ;;  %v1412_v42 = vadd.f32 1.0, %v1380_v30 }
  0xd9   : > { %v1485_v22 = vadd.f32 %v2885_v59, %v549_v4  ;;  %v541_v44 = vadd.f32 %v2629_v49, %v540_v60  ;;  %v1657_v41 = vpop.f32.mrf.mxu0  ;;  %v1065_v50 = vadd.f32 0.2548296, %v1033_v27  ;;  %v2688_v60 = vpop.eup %1804 }
  0xda   : > { %1501 = vst.msk [vmem:[%s2662_s15 + $0x10] sm:$0xff] %vm393_vm0, %v1469_v36  ;;  %v1467_v25 = vadd.f32 %v2245_v11, %v477_v1  ;;  %v488_v6 = vadd.f32 %v1657_v41, %v2629_v49  ;;  %v1673_v43 = vpop.f32.mrf.mxu1  ;;  %v953_v36 = vadd.f32 1.4214138, %v921_v2  ;;  %v1300_v1 = vsub.f32 1.0, %v1268_v34 }
  0xdb   : > { %1517 = vst.msk [vmem:[%s2662_s15 + $0x90] sm:$0xff] %vm393_vm0, %v1485_v22  ;;  %v1483_v4 = vadd.f32 %v2249_v7, %v541_v44  ;;  %v552_v16 = vadd.f32 %v1673_v43, %v2629_v49  ;;  %v479_v55 = vpop.f32.mrf.mxu0  ;;  %v1097_v44 = vmul.f32 %v2609_v12, %v1065_v50 }
  0xdc   : > { %1499 = vst.msk [vmem:[%s2662_s15] sm:$0xff] %vm393_vm0, %v1467_v25  ;;  %v1470_v11 = vadd.f32 %v2269_v62, %v488_v6  ;;  %v480_v63 = vadd.f32 %v2629_v49, %v479_v55  ;;  %v543_v30 = vpop.f32.mrf.mxu1  ;;  %v985_v41 = vmul.f32 %v2639_v35, %v953_v36  ;;  %v1364_v25 = vsub.f32 0.0, %v1300_v1  ;;  %v2717_v36 = vpop.eup %1806 }
  0xdd   : > { %1515 = vst.msk [vmem:[%s2662_s15 + $0x80] sm:$0xff] %vm393_vm0, %v1483_v4  ;;  %v1486_v7 = vadd.f32 %v2290_v15, %v552_v16  ;;  %v544_v59 = vadd.f32 %v2629_v49, %v543_v30  ;;  %v1660_v22 = vpop.f32.mrf.mxu0  ;;  %v871_v6 = vadd.f32 -1.4531521, %v839_v47  ;;  %v1257_v12 = vmul.f32 %v2650_v24, %v1097_v44  ;;  %v2723_v47 = vpop.eup %1808 }
  0xde   : > { %1502 = vst.msk [vmem:[%s2662_s15 + $0x18] sm:$0xff] %vm393_vm0, %v1470_v11  ;;  %v1468_v62 = vadd.f32 %v2319_v10, %v480_v63  ;;  %v501_v27 = vadd.f32 %v1660_v22, %v2629_v49  ;;  %v1676_v2 = vpop.f32.mrf.mxu1  ;;  %v1017_v4 = vadd.f32 -0.28449672, %v985_v41  ;;  %v1396_v50 = vsel %vm1332_vm9, %v1300_v1, %v1364_v25 }
  0xdf   : > { %1518 = vst.msk [vmem:[%s2662_s15 + $0x98] sm:$0xff] %vm393_vm0, %v1486_v7  ;;  %v1484_v15 = vadd.f32 %v2355_v21, %v544_v59  ;;  %v565_v43 = vadd.f32 %v1676_v2, %v2629_v49  ;;  %v492_v34 = vpop.f32.mrf.mxu0  ;;  %v903_v21 = vmul.f32 %v2673_v46, %v871_v6  ;;  %v1428_v30 = vadd.f32 1.0, %v1396_v50 }
  0xe0   : > { %1500 = vst.msk [vmem:[%s2662_s15 + $0x8] sm:$0xff] %vm393_vm0, %v1468_v62  ;;  %v1473_v10 = vadd.f32 %v2374_v9, %v501_v27  ;;  %v493_v16 = vadd.f32 %v2629_v49, %v492_v34  ;;  %v556_v55 = vpop.f32.mrf.mxu1  ;;  %v1289_v9 = vsub.f32 1.0, %v1257_v12  ;;  %v1049_v59 = vmul.f32 %v2639_v35, %v1017_v4 }
  0xe1   : > { %1516 = vst.msk [vmem:[%s2662_s15 + $0x88] sm:$0xff] %vm393_vm0, %v1484_v15  ;;  %v1489_v24 = vadd.f32 %v2391_v54, %v565_v43  ;;  %v557_v11 = vadd.f32 %v2629_v49, %v556_v55  ;;  %v1661_v63 = vpop.f32.mrf.mxu0  ;;  %v935_v22 = vadd.f32 1.4214138, %v903_v21  ;;  %v2735_v62 = vmul.f32 %v1412_v42, %v2526_v5 }
  0xe2   : > { %1505 = vst.msk [vmem:[%s2662_s15 + $0x30] sm:$0xff] %vm393_vm0, %v1473_v10  ;;  %v1471_v38 = vadd.f32 %v2426_v33, %v493_v16  ;;  %v504_v1 = vadd.f32 %v1661_v63, %v2629_v49  ;;  %v1677_v7 = vpop.f32.mrf.mxu1  ;;  %v1353_v27 = vsub.f32 0.0, %v1289_v9  ;;  %v2738_v33 = vpop.eup %1810  ;;  %v1081_v6 = vadd.f32 0.2548296, %v1049_v59 }
  0xe3   : > { %1521 = vst.msk [vmem:[%s2662_s15 + $0xb0] sm:$0xff] %vm393_vm0, %v1489_v24  ;;  %v1487_v54 = vadd.f32 %v2466_v28, %v557_v11  ;;  %v568_v44 = vadd.f32 %v1677_v7, %v2629_v49  ;;  %v495_v41 = vpop.f32.mrf.mxu0  ;;  %v967_v15 = vmul.f32 %v2673_v46, %v935_v22  ;;  %v1460_v16 = vmul.f32 %v1428_v30, %v2548_v13 }
  0xe4   : > { %1503 = vst.msk [vmem:[%s2662_s15 + $0x20] sm:$0xff] %vm393_vm0, %v1471_v38  ;;  %v1474_v2 = vadd.f32 %v2474_v40, %v504_v1  ;;  %v496_v25 = vadd.f32 %v2629_v49, %v495_v41  ;;  %v559_v28 = vpop.f32.mrf.mxu1  ;;  %v1385_v34 = vsel %vm1321_vm10, %v1289_v9, %v1353_v27  ;;  %v855_v40 = vmul.f32 1.0614054, %v2723_v47 }
  0xe5   : > { %1519 = vst.msk [vmem:[%s2662_s15 + $0xa0] sm:$0xff] %vm393_vm0, %v1487_v54  ;;  %v1490_v5 = vadd.f32 %v2482_v48, %v568_v44  ;;  %v560_v42 = vadd.f32 %v2629_v49, %v559_v28  ;;  %v1664_v43 = vpop.f32.mrf.mxu0  ;;  %v1113_v48 = vmul.f32 %v2639_v35, %v1081_v6  ;;  %v999_v21 = vadd.f32 -0.28449672, %v967_v15 }
  0xe6   : > { %1506 = vst.msk [vmem:[%s2662_s15 + $0x38] sm:$0xff] %vm393_vm0, %v1474_v2  ;;  %v1472_v12 = vadd.f32 %v2529_v29, %v496_v25  ;;  %v517_v4 = vadd.f32 %v1664_v43, %v2629_v49  ;;  %v1680_v10 = vpop.f32.mrf.mxu1  ;;  %v887_v24 = vadd.f32 -1.4531521, %v855_v40  ;;  %v1417_v63 = vadd.f32 1.0, %v1385_v34 }
  0xe7   : > { %1522 = vst.msk [vmem:[%s2662_s15 + $0xb8] sm:$0xff] %vm393_vm0, %v1490_v5  ;;  %v1488_v55 = vadd.f32 %v2534_v26, %v560_v42  ;;  %v581_v39 = vadd.f32 %v1680_v10, %v2629_v49  ;;  %v508_v50 = vpop.f32.mrf.mxu0  ;;  %v1273_v35 = vmul.f32 %v2688_v60, %v1113_v48  ;;  %v1031_v38 = vmul.f32 %v2673_v46, %v999_v21 }
  0xe8   : > { %1504 = vst.msk [vmem:[%s2662_s15 + $0x28] sm:$0xff] %vm393_vm0, %v1472_v12  ;;  %v1477_v29 = vadd.f32 %v2556_v32, %v517_v4  ;;  %v509_v11 = vadd.f32 %v2629_v49, %v508_v50  ;;  %v572_v13 = vpop.f32.mrf.mxu1  ;;  %v919_v1 = vmul.f32 %v2723_v47, %v887_v24  ;;  %v1449_v19 = vmul.f32 %v1417_v63, %v2583_v20  ;;  %v264_v12 = vld [vmem:[%s1919_s6 + $0x68] sm:$0xff] }
  0xe9   : > { %1520 = vst.msk [vmem:[%s2662_s15 + $0xa8] sm:$0xff] %vm393_vm0, %v1488_v55  ;;  %v1493_v26 = vadd.f32 %v2580_v14, %v581_v39  ;;  %v573_v30 = vadd.f32 %v2629_v49, %v572_v13  ;;  %v1665_v9 = vpop.f32.mrf.mxu0  ;;  %v1305_v59 = vsub.f32 1.0, %v1273_v35  ;;  %v1063_v44 = vadd.f32 0.2548296, %v1031_v38 }
  0xea   : > { %1509 = vst.msk [vmem:[%s2662_s15 + $0x50] sm:$0xff] %vm393_vm0, %v1477_v29  ;;  %v1475_v32 = vadd.f32 %v2596_v23, %v509_v11  ;;  %v520_v7 = vadd.f32 %v1665_v9, %v2629_v49  ;;  %v1681_v60 = vpop.f32.mrf.mxu1  ;;  %v951_v41 = vadd.f32 1.4214138, %v919_v1  ;;  %v1162_v43 = vmul.f32 %v1130_v57, %v2642_v53  ;;  %v280_v57 = vld [vmem:[%s1919_s6 + $0xe8] sm:$0xff]  ;;  %v1813_v9 = vpop.eup %1812 }
  0xeb   : > { %1525 = vst.msk [vmem:[%s2662_s15 + $0xd0] sm:$0xff] %vm393_vm0, %v1493_v26  ;;  %v1491_v14 = vadd.f32 %v2620_v8, %v573_v30  ;;  %v584_v22 = vadd.f32 %v1681_v60, %v2629_v49  ;;  %v511_v54 = vpop.f32.mrf.mxu0  ;;  %v1369_v25 = vsub.f32 0.0, %v1305_v59  ;;  %v1095_v15 = vmul.f32 %v2673_v46, %v1063_v44 }
  0xec   : > { %1507 = vst.msk [vmem:[%s2662_s15 + $0x40] sm:$0xff] %vm393_vm0, %v1475_v32  ;;  %v1478_v23 = vadd.f32 %v2637_v0, %v520_v7  ;;  %v512_v27 = vadd.f32 %v2629_v49, %v511_v54  ;;  %v575_v2 = vpop.f32.mrf.mxu1  ;;  %v983_v0 = vmul.f32 %v2723_v47, %v951_v41  ;;  %v2813_v53 = vmul.f32 0.70710677, %v2645_v52 }
  0xed   : > { %1523 = vst.msk [vmem:[%s2662_s15 + $0xc0] sm:$0xff] %vm393_vm0, %v1491_v14  ;;  %v1494_v8 = vadd.f32 %v2653_v45, %v584_v22  ;;  %v576_v28 = vadd.f32 %v2629_v49, %v575_v2  ;;  %v1668_v6 = vpop.f32.mrf.mxu0  ;;  %v1401_v45 = vsel %vm1337_vm11, %v1305_v59, %v1369_v25  ;;  %v1209_v21 = vmul.f32 1.442695, %v1162_v43 }
  0xee   : > { %1510 = vst.msk [vmem:[%s2662_s15 + $0x58] sm:$0xff] %vm393_vm0, %v1478_v23  ;;  %v1476_v5 = vadd.f32 %v2735_v62, %v512_v27  ;;  %v533_v20 = vadd.f32 %v1668_v6, %v2629_v49  ;;  %v1684_v42 = vpop.f32.mrf.mxu1  ;;  %v1433_v40 = vadd.f32 1.0, %v1401_v45  ;;  %v1255_v62 = vmul.f32 %v2717_v36, %v1095_v15 }
  0xef   : > { %1526 = vst.msk [vmem:[%s2662_s15 + $0xd8] sm:$0xff] %vm393_vm0, %v1494_v8  ;;  %v1492_v46 = vadd.f32 %v1460_v16, %v576_v28  ;;  %v597_v34 = vadd.f32 %v1684_v42, %v2629_v49  ;;  %v1015_v18 = vadd.f32 -0.28449672, %v983_v0  ;;  %v2821_v16 = vadd.f32 %v2446_v56, %v264_v12  ;;  %v524_v39 = vpop.f32.mrf.mxu0 }
  0xf0   : > { %1508 = vst.msk [vmem:[%s2662_s15 + $0x48] sm:$0xff] %vm393_vm0, %v1476_v5  ;;  %v1481_v4 = vadd.f32 %v1449_v19, %v533_v20  ;;  %v1465_v10 = vmul.f32 %v1433_v40, %v2600_v3  ;;  %v1287_v48 = vsub.f32 1.0, %v1255_v62  ;;  %v698_v3 = vand.u32 2147483647, %v2813_v53  ;;  %v588_v44 = vpop.f32.mrf.mxu1 }
  0xf1   : > { %1524 = vst.msk [vmem:[%s2662_s15 + $0xc8] sm:$0xff] %vm393_vm0, %v1492_v46  ;;  %v1047_v36 = vmul.f32 %v2723_v47, %v1015_v18  ;;  %v615_v24 = vmul.f32 0.5, %v2571_v37  ;;  %v2826_v11 = vadd.f32 %v2446_v56, %v280_v57  ;;  %v2831_v63 = vmul.f32 0.70710677, %v2821_v16 }
  0xf2   : > { %1513 = vst.msk [vmem:[%s2662_s15 + $0x70] sm:$0xff] %vm393_vm0, %v1481_v4  ;;  %v1497_v55 = vadd.f32 %v1465_v10, %v597_v34  ;;  %v1351_v50 = vsub.f32 0.0, %v1287_v48  ;;  %v730_v13 = vmul.f32 0.3275911, %v698_v3  ;;  %v525_v35 = vadd.f32 %v2629_v49, %v524_v39 }
  0xf3   : > { %v1079_v29 = vadd.f32 0.2548296, %v1047_v36  ;;  %1814 = vpow2.f32 %v1209_v21  ;;  %v680_v38 = vand.u32 2147483647, %v2831_v63  ;;  %v842_v32 = vmul.f32 1.0614054, %v1813_v9 }
  0xf4   : > { %1529 = vst.msk [vmem:[%s2662_s15 + $0xf0] sm:$0xff] %vm393_vm0, %v1497_v55  ;;  %v1383_v61 = vsel %vm1319_vm12, %v1287_v48, %v1351_v50  ;;  %v762_v37 = vadd.f32 1.0, %v730_v13  ;;  %v2838_v7 = vmul.f32 0.70710677, %v2826_v11  ;;  %v631_v27 = vmul.f32 0.5, %v2593_v51 }
  0xf5   : > { %v1415_v26 = vadd.f32 1.0, %v1383_v61  ;;  %v1111_v30 = vmul.f32 %v2723_v47, %v1079_v29  ;;  %v712_v60 = vmul.f32 0.3275911, %v680_v38  ;;  %v874_v22 = vadd.f32 -1.4531521, %v842_v32  ;;  %v1669_v61 = vpop.f32.mrf.mxu0 }
  0xf6   : > { %1816 = vrcp.f32 %v762_v37  ;;  %v696_v47 = vand.u32 2147483647, %v2838_v7  ;;  %v1146_v2 = vsub.f32 0.0, %v698_v3  ;;  %v589_v28 = vadd.f32 %v2629_v49, %v588_v44 }
  0xf7   : > { %v1447_v56 = vmul.f32 %v1415_v26, %v615_v24  ;;  %v1271_v1 = vmul.f32 %v2738_v33, %v1111_v30  ;;  %v744_v54 = vadd.f32 1.0, %v712_v60  ;;  %v906_v23 = vmul.f32 %v1813_v9, %v874_v22 }
  0xf8   : > { %v728_v33 = vmul.f32 0.3275911, %v696_v47  ;;  %v1178_v0 = vmul.f32 %v1146_v2, %v698_v3  ;;  %v1128_v5 = vsub.f32 0.0, %v680_v38  ;;  %v1144_v46 = vsub.f32 0.0, %v696_v47 }
  0xf9   : > { %v1479_v59 = vadd.f32 %v1447_v56, %v525_v35  ;;  %v1303_v14 = vsub.f32 1.0, %v1271_v1  ;;  %1818 = vrcp.f32 %v744_v54  ;;  %v938_v25 = vadd.f32 1.4214138, %v906_v23 }
  0xfa   : > { %v760_v8 = vadd.f32 1.0, %v728_v33  ;;  %v1241_v51 = vmul.f32 1.442695, %v1178_v0  ;;  %v1160_v34 = vmul.f32 %v1128_v5, %v680_v38  ;;  %v1176_v18 = vmul.f32 %v1144_v46, %v696_v47  ;;  %v1685_v5 = vpop.f32.mrf.mxu1 }
  0xfb   : > { %1511 = vst.msk [vmem:[%s2662_s15 + $0x60] sm:$0xff] %vm393_vm0, %v1479_v59  ;;  %v1367_v41 = vsub.f32 0.0, %v1303_v14  ;;  %v970_v15 = vmul.f32 %v1813_v9, %v938_v25  ;;  %v618_v26 = vmul.f32 0.5, %v2617_v31  ;;  %v536_v56 = vadd.f32 %v1669_v61, %v2629_v49 }
  0xfc   : > { %1820 = vrcp.f32 %v760_v8  ;;  %v1205_v48 = vmul.f32 1.442695, %v1160_v34  ;;  %v1237_v21 = vmul.f32 1.442695, %v1176_v18  ;;  %vm1338_vm15 = vcmp.ge.f32.partialorder %v2813_v53, 0.0 }
  0xfd   : > { %v1399_v19 = vsel %vm1335_vm13, %v1303_v14, %v1367_v41  ;;  %v1002_v20 = vadd.f32 -0.28449672, %v970_v15  ;;  %1822 = vpow2.f32 %v1241_v51  ;;  %v600_v34 = vadd.f32 %v1685_v5, %v2629_v49 }
  0xfe   : > { %v1431_v6 = vadd.f32 1.0, %v1399_v19  ;;  %1824 = vpow2.f32 %v1205_v48  ;;  %vm1320_vm1 = vcmp.ge.f32.partialorder %v2831_v63, 0.0  ;;  %v616_v18 = vmul.f32 0.5, %v2821_v16 }
  0xff   : > { %v1034_v43 = vmul.f32 %v1813_v9, %v1002_v20  ;;  %1826 = vpow2.f32 %v1237_v21  ;;  %vm1336_vm2 = vcmp.ge.f32.partialorder %v2838_v7, 0.0  ;;  %v632_v63 = vmul.f32 0.5, %v2826_v11 }
 0x100   : > { %v1463_v58 = vmul.f32 %v1431_v6, %v631_v27  ;;  %v1815_v45 = vpop.eup %1814 }
 0x101   : > { %v1066_v62 = vadd.f32 0.2548296, %v1034_v43 }
 0x102   : > { %v1495_v42 = vadd.f32 %v1463_v58, %v589_v28 }
 0x103   : > { %v1817_v40 = vpop.eup %1816  ;;  %v1098_v4 = vmul.f32 %v1813_v9, %v1066_v62 }
 0x104   : > { %1527 = vst.msk [vmem:[%s2662_s15 + $0xe0] sm:$0xff] %vm393_vm0, %v1495_v42  ;;  %v858_v12 = vmul.f32 1.0614054, %v1817_v40 }
 0x105   : > { %v1258_v36 = vmul.f32 %v1815_v45, %v1098_v4  ;;  %v634_v45 = vmul.f32 0.5, %v2645_v52 }
 0x106   : > { %v890_v10 = vadd.f32 -1.4531521, %v858_v12  ;;  %v1819_v57 = vpop.eup %1818  ;;  %v527_v12 = vpop.f32.mrf.mxu0 }
 0x107   : > { %v840_v39 = vmul.f32 1.0614054, %v1819_v57  ;;  %v1290_v50 = vsub.f32 1.0, %v1258_v36 }
 0x108   : > { %v922_v55 = vmul.f32 %v1817_v40, %v890_v10 }
 0x109   : > { %v1821_v3 = vpop.eup %1820  ;;  %v872_v29 = vadd.f32 -1.4531521, %v840_v39  ;;  %v1354_v13 = vsub.f32 0.0, %v1290_v50 }
 0x10a   : > { %v954_v24 = vadd.f32 1.4214138, %v922_v55  ;;  %v856_v35 = vmul.f32 1.0614054, %v1821_v3  ;;  %v1823_v31 = vpop.eup %1822  ;;  %v591_v55 = vpop.f32.mrf.mxu1 }
 0x10b   : > { %v904_v9 = vmul.f32 %v1819_v57, %v872_v29  ;;  %v1386_v37 = vsel %vm1322_vm14, %v1290_v50, %v1354_v13  ;;  %v1825_v8 = vpop.eup %1824  ;;  %v592_v16 = vadd.f32 %v2629_v49, %v591_v55 }
 0x10c   : > { %v986_v30 = vmul.f32 %v1817_v40, %v954_v24  ;;  %v888_v38 = vadd.f32 -1.4531521, %v856_v35  ;;  %v1418_v1 = vadd.f32 1.0, %v1386_v37  ;;  %v1827_v0 = vpop.eup %1826 }
 0x10d   : > { %v936_v60 = vadd.f32 1.4214138, %v904_v9 }
 0x10e   : > { %v1018_v32 = vadd.f32 -0.28449672, %v986_v30  ;;  %v920_v17 = vmul.f32 %v1821_v3, %v888_v38  ;;  %v1450_v59 = vmul.f32 %v1418_v1, %v618_v26 }
 0x10f   : > { %v968_v22 = vmul.f32 %v1819_v57, %v936_v60 }
 0x110   : > { %v1050_v14 = vmul.f32 %v1817_v40, %v1018_v32  ;;  %v952_v47 = vadd.f32 1.4214138, %v920_v17  ;;  %v1482_v54 = vadd.f32 %v1450_v59, %v536_v56 }
 0x111   : > { %v1000_v41 = vadd.f32 -0.28449672, %v968_v22 }
 0x112   : > { %v1082_v44 = vadd.f32 0.2548296, %v1050_v14  ;;  %v984_v23 = vmul.f32 %v1821_v3, %v952_v47  ;;  %1514 = vst.msk [vmem:[%s2662_s15 + $0x78] sm:$0xff] %vm393_vm0, %v1482_v54 }
 0x113   : > { %v1032_v27 = vmul.f32 %v1819_v57, %v1000_v41 }
 0x114   : > { %v1114_v33 = vmul.f32 %v1817_v40, %v1082_v44  ;;  %v1016_v2 = vadd.f32 -0.28449672, %v984_v23 }
 0x115   : > { %v1064_v25 = vadd.f32 0.2548296, %v1032_v27 }
 0x116   : > { %v1274_v19 = vmul.f32 %v1823_v31, %v1114_v33  ;;  %v1048_v28 = vmul.f32 %v1821_v3, %v1016_v2 }
 0x117   : > { %v1096_v15 = vmul.f32 %v1819_v57, %v1064_v25  ;;  %v528_v57 = vadd.f32 %v2629_v49, %v527_v12 }
 0x118   : > { %v1306_v6 = vsub.f32 1.0, %v1274_v19  ;;  %v1080_v58 = vadd.f32 0.2548296, %v1048_v28 }
 0x119   : > { %v1256_v42 = vmul.f32 %v1825_v8, %v1096_v15 }
 0x11a   : > { %v1370_v20 = vsub.f32 0.0, %v1306_v6  ;;  %v1112_v43 = vmul.f32 %v1821_v3, %v1080_v58 }
 0x11b   : > { %v1288_v51 = vsub.f32 1.0, %v1256_v42 }
 0x11c   : > { %v1402_v46 = vsel %vm1338_vm15, %v1306_v6, %v1370_v20  ;;  %v1272_v62 = vmul.f32 %v1827_v0, %v1112_v43 }
 0x11d   : > { %v1434_v40 = vadd.f32 1.0, %v1402_v46  ;;  %v1352_v4 = vsub.f32 0.0, %v1288_v51 }
 0x11e   : > { %v1304_v10 = vsub.f32 1.0, %v1272_v62 }
 0x11f   : > { %v1466_v53 = vmul.f32 %v1434_v40, %v634_v45  ;;  %v1384_v48 = vsel %vm1320_vm1, %v1288_v51, %v1352_v4 }
 0x120   : > { %v1416_v36 = vadd.f32 1.0, %v1384_v48  ;;  %v1368_v39 = vsub.f32 0.0, %v1304_v10 }
 0x121   : > { %v1498_v52 = vadd.f32 %v1466_v53, %v600_v34 }
 0x122   : > { %v1448_v50 = vmul.f32 %v1416_v36, %v616_v18  ;;  %v1400_v21 = vsel %vm1336_vm2, %v1304_v10, %v1368_v39 }
 0x123   : > { %1530 = vst.msk [vmem:[%s2662_s15 + $0xf8] sm:$0xff] %vm393_vm0, %v1498_v52  ;;  %v1432_v3 = vadd.f32 1.0, %v1400_v21 }
 0x124   : > { %v1480_v24 = vadd.f32 %v1448_v50, %v528_v57 }
 0x125   : > { %v1464_v29 = vmul.f32 %v1432_v3, %v632_v63 }
 0x126   : > { %1512 = vst.msk [vmem:[%s2662_s15 + $0x68] sm:$0xff] %vm393_vm0, %v1480_v24 }
 0x127   : > { %v1496_v7 = vadd.f32 %v1464_v29, %v592_v16 }
 0x129   : > { %1528 = vst.msk [vmem:[%s2662_s15 + $0xe8] sm:$0xff] %vm393_vm0, %v1496_v7 }
 0x12a PF: > { %s15_s18 = sadd.s32 1, %s1835_s18  }
 0x12b   : > { %p12_p4 = scmp.ge.s32.totalorder %s15_s18, 4  }
 0x12d   :  { %14 = sbr.rel (!%p12_p4) target bundleno = 1 (0x1), region = 73 }

// kernel: ddfno_forward.19
= control target key start
LH: loop header
LB: loop body
LE: loop exit
PB: predicated region body
PF: predicated region fallthrough
CT: control target
= control target key end

     0   :  { %s2077_s18 = smov 0   ;;  %s3179_s0 = inlined_call_operand.vmem [shape: f32[512,32], index: 0, kind: input, shape index: {}]   ;;  %s3180_s1 = inlined_call_operand.vmem [shape: bf16[32,128], index: 1, kind: input, shape index: {}]   ;;  %s3181_s2 = inlined_call_operand.vmem [shape: f32[1,128], index: 2, kind: input, shape index: {}]   ;;  %s3182_s3 = inlined_call_operand.vmem [shape: bf16[128,3], index: 3, kind: input, shape index: {}]   ;;  %s3183_s4 = inlined_call_operand.vmem [shape: f32[1,3], index: 4, kind: input, shape index: {}]   ;;  %s3184_s5 = inlined_call_operand.vmem [shape: f32[512,3], index: 5, kind: output, shape index: {}]  }
   0x1 LB: > { %s1711_s19 = sadd.s32 4294967295, %s2045_s18   ;;  %p1715_p0 = scmp.ge.s32.totalorder %s2045_s18, 1  ;;  %s2045_s18 = sphi %s2077_s18, %s15_s18  }
   0x2   : > { %p188_p1 = scmp.lt.s32.totalorder %s2045_s18, 3 }
   0x4   : > { %p189_p2 = pnand %p1715_p0, %p188_p1 }
   0x6   : > { %192 = sbr.rel (%p189_p2) target bundleno = 654 (0x28e), region = 40 }
   0xb   : > { %v1900_v0 = vld [vmem:[%s3180_s1 + $0x8] sm:$0xff]   ;;  %s1716_s22 = sshll.u32 %s1711_s19, 5  ;;  %v1901_v1 = vld [vmem:[%s3180_s1] sm:$0xff]   ;;  %vm300_vm0 = vcmask 261120   ;;  %v1902_v50 = vld [vmem:[%s3182_s3 + $0x38] sm:$0xff]  }
   0xc   : > { %p217_p3 = scmp.lt.s32.totalorder %s1716_s22, 63  ;;  %1792 = vmatprep.subr.bf16.mxu0 %v1900_v0  ;;  %1876 = vmatprep.subr.bf16.mxu1 %v1902_v50  ;;  %v1903_v51 = vld [vmem:[%s3182_s3 + $0x30] sm:$0xff]   ;;  %v1904_v52 = vld [vmem:[%s3182_s3 + $0x28] sm:$0xff]   ;;  %v1905_v53 = vld [vmem:[%s3182_s3 + $0x20] sm:$0xff]  }
   0xd   : > { %1793 = vmatpush3.bf16.msra.mxu0 %v1900_v0  ;;  %1884 = vmatpush3.bf16.msra.mxu1 %v1902_v50  ;;  %v1906_v54 = vld [vmem:[%s3182_s3 + $0x18] sm:$0xff]   ;;  %v1907_v57 = vld [vmem:[%s3182_s3 + $0x10] sm:$0xff]   ;;  %v2170_v58 = vld [vmem:[%s3181_s2] ss:$0 sm:$0xff] }
   0xe   : > { %s3327_s22 = smov (!%p217_p3, %s1716_s22), 63  ;;  %1794 = vmatprep.subr.bf16.mxu0 %v1901_v1  ;;  %1877 = vmatprep.subr.bf16.mxu1 %v1903_v51 }
   0xf   : > { %s1717_s25 = sshll.u32 %s3327_s22, 3 }
  0x10   : > { %s2099_s28 = scalar_lea.vmem %s3179_s0, %s1717_s25  ;;  %s3078_s6 = scalar_lea.vmem %s3184_s5, %s1717_s25 }
  0x11   : > { %1795 = vmatpush3.bf16.msra.mxu0 %v1901_v1  ;;  %v229_v2 = vld [vmem:[%s2099_s28] sm:$0xff]  ;;  %v230_v3 = vld [vmem:[%s2099_s28 + $0x8] sm:$0xff]  ;;  %v231_v4 = vld [vmem:[%s2099_s28 + $0x10] sm:$0xff]  ;;  %1885 = vmatpush3.bf16.msra.mxu1 %v1903_v51 }
  0x12   : > { %v261_v5 = vpack.c.bf16 %v230_v3, %v229_v2  ;;  %v232_v6 = vld [vmem:[%s2099_s28 + $0x18] sm:$0xff]  ;;  %v233_v7 = vld [vmem:[%s2099_s28 + $0x20] sm:$0xff]  ;;  %v234_v8 = vld [vmem:[%s2099_s28 + $0x28] sm:$0xff]  ;;  %1828 = vmatprep.subr.bf16.mxu0 %v1902_v50  ;;  %1878 = vmatprep.subr.bf16.mxu1 %v1904_v52 }
  0x13   : > { %v262_v9 = vpack.c.bf16 %v232_v6, %v231_v4  ;;  %v263_v10 = vpack.c.bf16 %v234_v8, %v233_v7  ;;  %v235_v11 = vld [vmem:[%s2099_s28 + $0x30] sm:$0xff]  ;;  %v236_v12 = vld [vmem:[%s2099_s28 + $0x38] sm:$0xff]  ;;  %v237_v13 = vld [vmem:[%s2099_s28 + $0x40] sm:$0xff] }
  0x14   : > { %1796 = vmatprep.mubr.msk.bf16.mxu0 %vm300_vm0, %v261_v5  ;;  %v238_v14 = vld [vmem:[%s2099_s28 + $0x48] sm:$0xff]  ;;  %v264_v15 = vpack.c.bf16 %v236_v12, %v235_v11  ;;  %v239_v17 = vld [vmem:[%s2099_s28 + $0x50] sm:$0xff]  ;;  %v240_v18 = vld [vmem:[%s2099_s28 + $0x58] sm:$0xff] }
  0x15   : > { %1797 = vmatmul.mubr.msk.bf16.vlgmr.msra.gmra.mxu0 %vm300_vm0, %v262_v9  ;;  %v265_v16 = vpack.c.bf16 %v238_v14, %v237_v13  ;;  %v241_v19 = vld [vmem:[%s2099_s28 + $0x60] sm:$0xff]  ;;  %v242_v20 = vld [vmem:[%s2099_s28 + $0x68] sm:$0xff]  ;;  %v266_v21 = vpack.c.bf16 %v240_v18, %v239_v17  ;;  %v243_v23 = vld [vmem:[%s2099_s28 + $0x70] sm:$0xff]  ;;  %1886 = vmatpush3.bf16.msra.mxu1 %v1904_v52 }
  0x16   : > { %1800 = vmatprep.mubr.msk.bf16.mxu0 %vm300_vm0, %v263_v10  ;;  %v267_v22 = vpack.c.bf16 %v242_v20, %v241_v19  ;;  %v244_v24 = vld [vmem:[%s2099_s28 + $0x78] sm:$0xff]  ;;  %v245_v25 = vld [vmem:[%s2099_s28 + $0x80] sm:$0xff]  ;;  %v246_v26 = vld [vmem:[%s2099_s28 + $0x88] sm:$0xff]  ;;  %1829 = vmatpush3.bf16.msra.mxu0 %v1902_v50 }
  0x17   : > { %v268_v27 = vpack.c.bf16 %v244_v24, %v243_v23  ;;  %v269_v28 = vpack.c.bf16 %v246_v26, %v245_v25  ;;  %v247_v29 = vld [vmem:[%s2099_s28 + $0x90] sm:$0xff]  ;;  %v248_v30 = vld [vmem:[%s2099_s28 + $0x98] sm:$0xff]  ;;  %v249_v31 = vld [vmem:[%s2099_s28 + $0xa0] sm:$0xff]  ;;  %1830 = vmatprep.subr.bf16.mxu0 %v1903_v51  ;;  %1879 = vmatprep.subr.bf16.mxu1 %v1905_v53 }
  0x18   : > { %v250_v32 = vld [vmem:[%s2099_s28 + $0xa8] sm:$0xff]  ;;  %v270_v33 = vpack.c.bf16 %v248_v30, %v247_v29  ;;  %v251_v35 = vld [vmem:[%s2099_s28 + $0xb0] sm:$0xff]  ;;  %v252_v36 = vld [vmem:[%s2099_s28 + $0xb8] sm:$0xff] }
  0x19   : > { %v271_v34 = vpack.c.bf16 %v250_v32, %v249_v31  ;;  %v253_v37 = vld [vmem:[%s2099_s28 + $0xc0] sm:$0xff]  ;;  %v254_v38 = vld [vmem:[%s2099_s28 + $0xc8] sm:$0xff]  ;;  %v272_v39 = vpack.c.bf16 %v252_v36, %v251_v35  ;;  %v255_v41 = vld [vmem:[%s2099_s28 + $0xd0] sm:$0xff]  ;;  %1887 = vmatpush3.bf16.msra.mxu1 %v1905_v53 }
  0x1a   : > { %v273_v40 = vpack.c.bf16 %v254_v38, %v253_v37  ;;  %v256_v42 = vld [vmem:[%s2099_s28 + $0xd8] sm:$0xff]  ;;  %v257_v43 = vld [vmem:[%s2099_s28 + $0xe0] sm:$0xff]  ;;  %v258_v44 = vld [vmem:[%s2099_s28 + $0xe8] sm:$0xff]  ;;  %1831 = vmatpush3.bf16.msra.mxu0 %v1903_v51  ;;  %1880 = vmatprep.subr.bf16.mxu1 %v1906_v54 }
  0x1b   : > { %v274_v45 = vpack.c.bf16 %v256_v42, %v255_v41  ;;  %v275_v46 = vpack.c.bf16 %v258_v44, %v257_v43  ;;  %v259_v47 = vld [vmem:[%s2099_s28 + $0xf0] sm:$0xff]  ;;  %v260_v48 = vld [vmem:[%s2099_s28 + $0xf8] sm:$0xff]  ;;  %1832 = vmatprep.subr.bf16.mxu0 %v1904_v52  ;;  %v1908_v1 = vld [vmem:[%s3182_s3 + $0x8] sm:$0xff]  }
  0x1c   : > { %v276_v49 = vpack.c.bf16 %v260_v48, %v259_v47  ;;  %v1909_v26 = vld [vmem:[%s3182_s3] sm:$0xff]  }
  0x1d   : > { %1801 = vmatmul.mubr.msk.bf16.gmra.mxu0 %vm300_vm0, %v264_v15  ;;  %1888 = vmatpush3.bf16.msra.mxu1 %v1906_v54 }
  0x1e   : > { %1804 = vmatprep.mubr.msk.bf16.mxu0 %vm300_vm0, %v265_v16  ;;  %1833 = vmatpush3.bf16.msra.mxu0 %v1904_v52 }
  0x1f   : > { %1834 = vmatprep.subr.bf16.mxu0 %v1905_v53  ;;  %1881 = vmatprep.subr.bf16.mxu1 %v1907_v57 }
  0x21   : > { %1889 = vmatpush3.bf16.msra.mxu1 %v1907_v57 }
  0x22   : > { %1835 = vmatpush3.bf16.msra.mxu0 %v1905_v53  ;;  %1882 = vmatprep.subr.bf16.mxu1 %v1908_v1 }
  0x23   : > { %1836 = vmatprep.subr.bf16.mxu0 %v1906_v54 }
  0x25   : > { %1805 = vmatmul.mubr.msk.bf16.gmra.mxu0 %vm300_vm0, %v266_v21  ;;  %1890 = vmatpush3.bf16.msra.mxu1 %v1908_v1 }
  0x26   : > { %1808 = vmatprep.mubr.msk.bf16.mxu0 %vm300_vm0, %v267_v22  ;;  %1837 = vmatpush3.bf16.msra.mxu0 %v1906_v54 }
  0x27   : > { %1838 = vmatprep.subr.bf16.mxu0 %v1907_v57  ;;  %1883 = vmatprep.subr.bf16.mxu1 %v1909_v26 }
  0x29   : > { %1891 = vmatpush3.bf16.msra.mxu1 %v1909_v26 }
  0x2a   : > { %1839 = vmatpush3.bf16.msra.mxu0 %v1907_v57 }
  0x2b   : > { %1840 = vmatprep.subr.bf16.mxu0 %v1908_v1 }
  0x2d   : > { %1809 = vmatmul.mubr.msk.bf16.gmra.mxu0 %vm300_vm0, %v268_v27 }
  0x2e   : > { %1812 = vmatprep.mubr.msk.bf16.mxu0 %vm300_vm0, %v269_v28  ;;  %1841 = vmatpush3.bf16.msra.mxu0 %v1908_v1 }
  0x2f   : > { %1842 = vmatprep.subr.bf16.mxu0 %v1909_v26 }
  0x32   : > { %1843 = vmatpush3.bf16.msra.mxu0 %v1909_v26 }
  0x35   : > { %1813 = vmatmul.mubr.msk.bf16.gmra.mxu0 %vm300_vm0, %v270_v33 }
  0x36   : > { %1816 = vmatprep.mubr.msk.bf16.mxu0 %vm300_vm0, %v271_v34 }
  0x3d   : > { %1817 = vmatmul.mubr.msk.bf16.gmra.mxu0 %vm300_vm0, %v272_v39 }
  0x3e   : > { %1820 = vmatprep.mubr.msk.bf16.mxu0 %vm300_vm0, %v273_v40 }
  0x45   : > { %1821 = vmatmul.mubr.msk.bf16.gmra.mxu0 %vm300_vm0, %v274_v45 }
  0x46   : > { %1824 = vmatprep.mubr.msk.bf16.mxu0 %vm300_vm0, %v275_v46 }
  0x4d   : > { %1825 = vmatmul.mubr.msk.bf16.gmra.mxu0 %vm300_vm0, %v276_v49 }
  0xd5   : > { %v1798_v55 = vpop.f32.mrf.mxu0 }
  0xd6   : > { %v2173_v60 = vadd.f32 %v1798_v55, %v2170_v58 }
  0xd7   : > { %v383_v56 = vpop.f32.mrf.mxu0 }
  0xd8   : > { %v2176_v61 = vadd.f32 %v2170_v58, %v383_v56  ;;  %v2182_v0 = vmul.f32 0.70710677, %v2173_v60 }
  0xd9   : > { %v1799_v59 = vpop.f32.mrf.mxu0 }
  0xda   : > { %v2179_v63 = vadd.f32 %v1799_v59, %v2170_v58  ;;  %v2188_v2 = vmul.f32 0.70710677, %v2176_v61  ;;  %v576_v6 = vand.u32 2147483647, %v2182_v0  ;;  %vm1216_vm1 = vcmp.ge.f32.partialorder %v2182_v0, 0.0 }
  0xdb   : > { %v386_v62 = vpop.f32.mrf.mxu0 }
  0xdc   : > { %v2191_v4 = vmul.f32 0.70710677, %v2179_v63  ;;  %v2194_v5 = vadd.f32 %v2170_v58, %v386_v62  ;;  %v2198_v7 = vand.u32 2147483647, %v2188_v2  ;;  %v608_v11 = vmul.f32 0.3275911, %v576_v6 }
  0xdd   : > { %v1802_v3 = vpop.f32.mrf.mxu0  ;;  %v1024_v42 = vsub.f32 0.0, %v576_v6  ;;  %vm1214_vm2 = vcmp.ge.f32.partialorder %v2188_v2, 0.0 }
  0xde   : > { %v2201_v9 = vand.u32 2147483647, %v2191_v4  ;;  %v2204_v10 = vmul.f32 0.70710677, %v2194_v5  ;;  %v2207_v12 = vadd.f32 %v1802_v3, %v2170_v58  ;;  %v606_v13 = vmul.f32 0.3275911, %v2198_v7 }
  0xdf   : > { %v399_v8 = vpop.f32.mrf.mxu0  ;;  %v640_v17 = vadd.f32 1.0, %v608_v11  ;;  %v1022_v49 = vsub.f32 0.0, %v2198_v7  ;;  %v1056_v52 = vmul.f32 %v1024_v42, %v576_v6  ;;  %v2276_v3 = vmul.f32 0.5, %v2173_v60 }
  0xe0   : > { %v609_v15 = vmul.f32 0.3275911, %v2201_v9  ;;  %v2212_v16 = vand.u32 2147483647, %v2204_v10  ;;  %v2215_v18 = vmul.f32 0.70710677, %v2207_v12  ;;  %v400_v53 = vadd.f32 %v2170_v58, %v399_v8 }
  0xe1   : > { %v1803_v14 = vpop.f32.mrf.mxu0  ;;  %v638_v19 = vadd.f32 1.0, %v606_v13  ;;  %1910 = vrcp.f32 %v640_v17  ;;  %v1025_v55 = vsub.f32 0.0, %v2201_v9  ;;  %v1054_v1 = vmul.f32 %v1022_v49, %v2198_v7 }
  0xe2   : > { %v641_v21 = vadd.f32 1.0, %v609_v15  ;;  %v607_v22 = vmul.f32 0.3275911, %v2212_v16  ;;  %v2221_v23 = vadd.f32 %v1803_v14, %v2170_v58  ;;  %v2224_v24 = vand.u32 2147483647, %v2215_v18 }
  0xe3   : > { %v2217_v20 = vpop.f32.mrf.mxu0  ;;  %1912 = vrcp.f32 %v638_v19  ;;  %v2279_v6 = vmul.f32 0.5, %v2176_v61  ;;  %v1090_v13 = vmul.f32 1.442695, %v1056_v52  ;;  %v2282_v14 = vmul.f32 0.70710677, %v400_v53 }
  0xe4   : > { %1914 = vrcp.f32 %v641_v21  ;;  %v639_v27 = vadd.f32 1.0, %v607_v22  ;;  %v2230_v28 = vmul.f32 0.70710677, %v2221_v23  ;;  %v612_v29 = vmul.f32 0.3275911, %v2224_v24 }
  0xe5   : > { %v1806_v25 = vpop.f32.mrf.mxu0  ;;  %3227 = vst [vmem:[#allocation2_spill] sm:$0xff] %v2282_v14  ;;  %v1057_v17 = vmul.f32 %v1025_v55, %v2201_v9  ;;  %v1023_v19 = vsub.f32 0.0, %v2212_v16  ;;  %v1086_v22 = vmul.f32 1.442695, %v1054_v1  ;;  %v2317_v52 = vmul.f32 0.5, %v400_v53 }
  0xe6   : > { %v2234_v30 = vadd.f32 %v1806_v25, %v2170_v58  ;;  %1916 = vrcp.f32 %v639_v27  ;;  %v2237_v32 = vand.u32 2147483647, %v2230_v28  ;;  %v644_v33 = vadd.f32 1.0, %v612_v29 }
  0xe7   : > { %v415_v31 = vpop.f32.mrf.mxu0  ;;  %v2294_v25 = vmul.f32 0.5, %v2179_v63  ;;  %v2298_v27 = vmul.f32 0.5, %v2194_v5  ;;  %v1028_v29 = vsub.f32 0.0, %v2224_v24  ;;  %v1092_v63 = vmul.f32 1.442695, %v1057_v17  ;;  %3228 = vst [vmem:[#allocation3_spill] sm:$0xff] %v2317_v52 }
  0xe8   : > { %v2240_v34 = vmul.f32 0.70710677, %v2234_v30  ;;  %v2243_v35 = vadd.f32 %v2170_v58, %v415_v31  ;;  %v613_v36 = vmul.f32 0.3275911, %v2237_v32  ;;  %1918 = vrcp.f32 %v644_v33 }
  0xe9   : > { %v1807_v46 = vpop.f32.mrf.mxu0  ;;  %v578_v33 = vand.u32 2147483647, %v2282_v14  ;;  %vm1217_vm3 = vcmp.ge.f32.partialorder %v2191_v4, 0.0  ;;  %vm1215_vm4 = vcmp.ge.f32.partialorder %v2204_v10, 0.0  ;;  %vm1220_vm5 = vcmp.ge.f32.partialorder %v2215_v18, 0.0 }
  0xea   : > { %v2247_v37 = vand.u32 2147483647, %v2240_v34  ;;  %v2250_v38 = vmul.f32 0.70710677, %v2243_v35  ;;  %v645_v43 = vadd.f32 1.0, %v613_v36  ;;  %v2270_v54 = vadd.f32 %v1807_v46, %v2170_v58 }
  0xeb   : > { %v418_v31 = vpop.f32.mrf.mxu0  ;;  %v403_v36 = vadd.f32 %v2170_v58, %v2217_v20  ;;  %v2314_v20 = vmul.f32 0.5, %v2207_v12  ;;  %v610_v1 = vmul.f32 0.3275911, %v578_v33  ;;  %vm1221_vm6 = vcmp.ge.f32.partialorder %v2230_v28, 0.0 }
  0xec   : > { %v616_v44 = vmul.f32 0.3275911, %v2247_v37  ;;  %v2260_v45 = vand.u32 2147483647, %v2250_v38  ;;  %1920 = vrcp.f32 %v645_v43  ;;  %v2285_v15 = vmul.f32 0.70710677, %v2270_v54 }
  0xed   : > { %v1055_v43 = vmul.f32 %v1023_v19, %v2212_v16  ;;  %v1026_v16 = vsub.f32 0.0, %v578_v33  ;;  %v2319_v55 = vmul.f32 0.70710677, %v403_v36  ;;  %v1810_v53 = vpop.f32.mrf.mxu0  ;;  %vm1224_vm7 = vcmp.ge.f32.partialorder %v2240_v34, 0.0 }
  0xee   : > { %v2252_v39 = vpop.eup %1910  ;;  %v648_v56 = vadd.f32 1.0, %v616_v44  ;;  %v614_v57 = vmul.f32 0.3275911, %v2260_v45  ;;  %v2305_v42 = vand.u32 2147483647, %v2285_v15  ;;  %vm1222_vm8 = vcmp.ge.f32.partialorder %v2250_v38, 0.0 }
  0xef   : > { %v736_v47 = vmul.f32 1.0614054, %v2252_v39  ;;  %3229 = vst [vmem:[#allocation4_spill] sm:$0xff] %v2319_v55  ;;  %vm1225_vm9 = vcmp.ge.f32.partialorder %v2285_v15, 0.0 }
  0xf0   : > { %v2254_v40 = vpop.eup %1912  ;;  %1922 = vrcp.f32 %v648_v56  ;;  %v646_v7 = vadd.f32 1.0, %v614_v57  ;;  %v617_v56 = vmul.f32 0.3275911, %v2305_v42 }
  0xf1   : > { %v2256_v41 = vpop.eup %1914  ;;  %v734_v48 = vmul.f32 1.0614054, %v2254_v40  ;;  %v768_v59 = vadd.f32 -1.4531521, %v736_v47  ;;  %1924 = vpow2.f32 %v1090_v13  ;;  %v2310_v47 = vadd.f32 %v2170_v58, %v418_v31 }
  0xf2   : > { %v737_v50 = vmul.f32 1.0614054, %v2256_v41  ;;  %1926 = vrcp.f32 %v646_v7  ;;  %v2332_v7 = vmul.f32 0.5, %v2221_v23  ;;  %v2337_v31 = vmul.f32 0.5, %v403_v36 }
  0xf3   : > { %v2266_v51 = vpop.eup %1916  ;;  %v766_v62 = vadd.f32 -1.4531521, %v734_v48  ;;  %v800_v61 = vmul.f32 %v2252_v39, %v768_v59  ;;  %1928 = vpow2.f32 %v1086_v22  ;;  %v1088_v59 = vmul.f32 1.442695, %v1055_v43 }
  0xf4   : > { %v769_v8 = vadd.f32 -1.4531521, %v737_v50  ;;  %v735_v11 = vmul.f32 1.0614054, %v2266_v51  ;;  %v1060_v50 = vmul.f32 %v1028_v29, %v2224_v24  ;;  %1930 = vpow2.f32 %v1092_v63  ;;  %3231 = vst [vmem:[#allocation6_spill] sm:$0xff] %v2337_v31 }
  0xf5   : > { %v2289_v60 = vpop.eup %1918  ;;  %v798_v21 = vmul.f32 %v2254_v40, %v766_v62  ;;  %v832_v5 = vadd.f32 1.4214138, %v800_v61  ;;  %v2328_v24 = vmul.f32 0.70710677, %v2310_v47  ;;  %v1058_v61 = vmul.f32 %v1026_v16, %v578_v33  ;;  %v431_v33 = vpop.f32.mrf.mxu0 }
  0xf6   : > { %v801_v26 = vmul.f32 %v2256_v41, %v769_v8  ;;  %v767_v9 = vadd.f32 -1.4531521, %v735_v11  ;;  %v740_v44 = vmul.f32 1.0614054, %v2289_v60  ;;  %v1029_v11 = vsub.f32 0.0, %v2237_v32 }
  0xf7   : > { %v830_v46 = vadd.f32 1.4214138, %v798_v21  ;;  %v864_v8 = vmul.f32 %v2252_v39, %v832_v5  ;;  %3230 = vst [vmem:[#allocation5_spill] sm:$0xff] %v2328_v24  ;;  %v1098_v19 = vmul.f32 1.442695, %v1060_v50  ;;  %1932 = vpow2.f32 %v1088_v59 }
  0xf8   : > { %v833_v48 = vadd.f32 1.4214138, %v801_v26  ;;  %v799_v49 = vmul.f32 %v2266_v51, %v767_v9  ;;  %v772_v62 = vadd.f32 -1.4531521, %v740_v44  ;;  %v579_v22 = vand.u32 2147483647, %v2319_v55 }
  0xf9   : > { %v2322_v57 = vpop.eup %1920  ;;  %v862_v12 = vmul.f32 %v2254_v40, %v830_v46  ;;  %v649_v26 = vadd.f32 1.0, %v617_v56  ;;  %v642_v29 = vadd.f32 1.0, %v610_v1  ;;  %v896_v43 = vadd.f32 -0.28449672, %v864_v8 }
  0xfa   : > { %v865_v13 = vmul.f32 %v2256_v41, %v833_v48  ;;  %v831_v17 = vadd.f32 1.4214138, %v799_v49  ;;  %v741_v21 = vmul.f32 1.0614054, %v2322_v57  ;;  %v804_v9 = vmul.f32 %v2289_v60, %v772_v62 }
  0xfb   : > { %v894_v44 = vadd.f32 -0.28449672, %v862_v12  ;;  %v1061_v5 = vmul.f32 %v1029_v11, %v2237_v32  ;;  %v2343_v23 = vand.u32 2147483647, %v2328_v24  ;;  %1934 = vpow2.f32 %v1098_v19 }
  0xfc   : > { %v897_v46 = vadd.f32 -0.28449672, %v865_v13  ;;  %v863_v48 = vmul.f32 %v2266_v51, %v831_v17  ;;  %v2347_v49 = vadd.f32 %v1810_v53, %v2170_v58  ;;  %v1094_v50 = vmul.f32 1.442695, %v1058_v61  ;;  %v1811_v13 = vpop.f32.mrf.mxu0 }
  0xfd   : > { %v2339_v63 = vpop.eup %1922  ;;  %v773_v36 = vadd.f32 -1.4531521, %v741_v21  ;;  %v611_v16 = vmul.f32 0.3275911, %v579_v22  ;;  %1936 = vrcp.f32 %v649_v26  ;;  %v836_v59 = vadd.f32 1.4214138, %v804_v9 }
  0xfe   : > { %v2349_v56 = vpop.eup %1924  ;;  %1938 = vrcp.f32 %v642_v29  ;;  %v2352_v32 = vmul.f32 0.5, %v2234_v30  ;;  %v744_v62 = vmul.f32 1.0614054, %v2339_v63  ;;  %v928_v8 = vmul.f32 %v2252_v39, %v896_v43 }
  0xff   : > { %v2355_v1 = vpop.eup %1926  ;;  %v926_v12 = vmul.f32 %v2254_v40, %v894_v44  ;;  %v1100_v11 = vmul.f32 1.442695, %v1061_v5  ;;  %v615_v53 = vmul.f32 0.3275911, %v2343_v23  ;;  %v929_v19 = vmul.f32 %v2256_v41, %v897_v46 }
 0x100   : > { %3232 = vst [vmem:[#allocation7_spill] sm:$0xff] %v2352_v32  ;;  %v1929_v17 = vpop.eup %1928  ;;  %v895_v61 = vadd.f32 -0.28449672, %v863_v48  ;;  %v2362_v21 = vmul.f32 0.70710677, %v2347_v49  ;;  %v2365_v30 = vadd.f32 %v2170_v58, %v431_v33  ;;  %1940 = vpow2.f32 %v1094_v50 }
 0x101   : > { %v805_v26 = vmul.f32 %v2322_v57, %v773_v36  ;;  %v643_v9 = vadd.f32 1.0, %v611_v16  ;;  %v1027_v29 = vsub.f32 0.0, %v579_v22  ;;  %v868_v43 = vmul.f32 %v2289_v60, %v836_v59  ;;  %v1931_v46 = vpop.eup %1930  ;;  %v434_v59 = vpop.f32.mrf.mxu0 }
 0x102   : > { %3233 = vst [vmem:[#allocation8_spill] sm:$0xff] %v2362_v21  ;;  %v776_v44 = vadd.f32 -1.4531521, %v744_v62  ;;  %v742_v5 = vmul.f32 1.0614054, %v2355_v1  ;;  %v2371_v31 = vadd.f32 %v1811_v13, %v2170_v58  ;;  %1942 = vpow2.f32 %v1100_v11 }
 0x103   : > { %v960_v48 = vadd.f32 0.2548296, %v928_v8  ;;  %v958_v52 = vadd.f32 0.2548296, %v926_v12  ;;  %v647_v55 = vadd.f32 1.0, %v615_v53  ;;  %v927_v50 = vmul.f32 %v2266_v51, %v895_v61 }
 0x104   : > { %3234 = vst [vmem:[#allocation9_spill] sm:$0xff] %v2371_v31  ;;  %v961_v33 = vadd.f32 0.2548296, %v929_v19  ;;  %v2375_v36 = vand.u32 2147483647, %v2362_v21  ;;  %1944 = vrcp.f32 %v643_v9  ;;  %v1059_v14 = vmul.f32 %v1027_v29, %v579_v22  ;;  %v1933_v53 = vpop.eup %1932 }
 0x105   : > { %v2378_v16 = vmul.f32 0.70710677, %v2365_v30  ;;  %v837_v62 = vadd.f32 1.4214138, %v805_v26  ;;  %v1032_v13 = vsub.f32 0.0, %v2247_v37  ;;  %v808_v8 = vmul.f32 %v2339_v63, %v776_v44 }
 0x106   : > { %v900_v24 = vadd.f32 -0.28449672, %v868_v43  ;;  %v774_v12 = vadd.f32 -1.4531521, %v742_v5  ;;  %v2383_v11 = vmul.f32 0.70710677, %v2371_v31  ;;  %v992_v19 = vmul.f32 %v2252_v39, %v960_v48  ;;  %v1814_v43 = vpop.f32.mrf.mxu0 }
 0x107   : > { %3235 = vst [vmem:[#allocation10_spill] sm:$0xff] %v2378_v16  ;;  %v990_v61 = vmul.f32 %v2254_v40, %v958_v52  ;;  %1946 = vrcp.f32 %v647_v55  ;;  %v2388_v21 = vadd.f32 %v2170_v58, %v434_v59  ;;  %v993_v22 = vmul.f32 %v2256_v41, %v961_v33 }
 0x108   : > { %3236 = vst [vmem:[#allocation11_spill] sm:$0xff] %v2383_v11  ;;  %v959_v26 = vadd.f32 0.2548296, %v927_v50  ;;  %v620_v9 = vmul.f32 0.3275911, %v2375_v36  ;;  %v2395_v44 = vpop.eup %1934  ;;  %v869_v5 = vmul.f32 %v2322_v57, %v837_v62  ;;  %v1064_v40 = vmul.f32 %v1032_v13, %v2247_v37 }
 0x109   : > { %3237 = vst [vmem:[#allocation12_spill] sm:$0xff] %v2388_v21  ;;  %v2393_v29 = vand.u32 2147483647, %v2378_v16  ;;  %v2398_v39 = vmul.f32 1.442695, %v1059_v14  ;;  %v1030_v52 = vsub.f32 0.0, %v2260_v45  ;;  %v932_v41 = vmul.f32 %v2289_v60, %v900_v24 }
 0x10a   : > { %v2402_v55 = vpop.eup %1936  ;;  %v840_v48 = vadd.f32 1.4214138, %v808_v8  ;;  %v806_v33 = vmul.f32 %v2355_v1, %v774_v12  ;;  %v2407_v50 = vand.u32 2147483647, %v2383_v11  ;;  %v2412_v62 = vmul.f32 %v2349_v56, %v992_v19 }
 0x10b   : > { %v2409_v59 = vpop.eup %1938  ;;  %v2414_v14 = vmul.f32 %v1929_v17, %v990_v61  ;;  %v2417_v37 = vmul.f32 0.70710677, %v2388_v21  ;;  %v2420_v13 = vadd.f32 %v1814_v43, %v2170_v58  ;;  %v2422_v24 = vmul.f32 %v1931_v46, %v993_v22  ;;  %v447_v22 = vpop.f32.mrf.mxu0 }
 0x10c   : > { %3238 = vst [vmem:[#allocation13_spill] sm:$0xff] %v2409_v59  ;;  %v991_v8 = vmul.f32 %v2266_v51, %v959_v26  ;;  %v652_v12 = vadd.f32 1.0, %v620_v9  ;;  %v618_v11 = vmul.f32 0.3275911, %v2393_v29  ;;  %v901_v16 = vadd.f32 -0.28449672, %v869_v5 }
 0x10d   : > { %3239 = vst [vmem:[#allocation14_spill] sm:$0xff] %v2417_v37  ;;  %3240 = vst [vmem:[#allocation15_spill] sm:$0xff] %v2420_v13  ;;  %v1106_v59 = vmul.f32 1.442695, %v1064_v40  ;;  %v1062_v56 = vmul.f32 %v1030_v52, %v2260_v45  ;;  %v745_v17 = vmul.f32 1.0614054, %v2402_v55  ;;  %v2428_v19 = vpop.eup %1940  ;;  %v872_v21 = vmul.f32 %v2339_v63, %v840_v48 }
 0x10e   : > { %3241 = vst [vmem:[#allocation16_spill] sm:$0xff] %v2428_v19  ;;  %v964_v61 = vadd.f32 0.2548296, %v932_v41  ;;  %v838_v43 = vadd.f32 1.4214138, %v806_v33  ;;  %v1184_v51 = vsub.f32 1.0, %v2412_v62  ;;  %v2444_v52 = vmul.f32 %v1933_v53, %v991_v8 }
 0x10f   : > { %v621_v46 = vmul.f32 0.3275911, %v2407_v50  ;;  %v1182_v26 = vsub.f32 1.0, %v2414_v14  ;;  %v2437_v45 = vand.u32 2147483647, %v2417_v37  ;;  %v1943_v5 = vpop.eup %1942  ;;  %v1185_v40 = vsub.f32 1.0, %v2422_v24 }
 0x110   : > { %v2440_v9 = vmul.f32 0.70710677, %v2420_v13  ;;  %1948 = vrcp.f32 %v652_v12  ;;  %v650_v41 = vadd.f32 1.0, %v618_v11  ;;  %v933_v48 = vmul.f32 %v2322_v57, %v901_v16 }
 0x111   : > { %v1102_v33 = vmul.f32 1.442695, %v1062_v56  ;;  %v777_v62 = vadd.f32 -1.4531521, %v745_v17  ;;  %v2448_v14 = vadd.f32 %v2170_v58, %v447_v22  ;;  %v2450_v19 = vpop.eup %1944  ;;  %v996_v37 = vmul.f32 %v2289_v60, %v964_v61  ;;  %v1815_v22 = vpop.f32.mrf.mxu0 }
 0x112   : > { %3242 = vst [vmem:[#allocation17_spill] sm:$0xff] %v2450_v19  ;;  %v904_v13 = vadd.f32 -0.28449672, %v872_v21  ;;  %v870_v24 = vmul.f32 %v2355_v1, %v838_v43  ;;  %v653_v32 = vadd.f32 1.0, %v621_v46  ;;  %v1248_v31 = vsub.f32 0.0, %v1184_v51 }
 0x113   : > { %1950 = vpow2.f32 %v1106_v59  ;;  %v619_v53 = vmul.f32 0.3275911, %v2437_v45  ;;  %v2456_v11 = vand.u32 2147483647, %v2440_v9  ;;  %v1246_v8 = vsub.f32 0.0, %v1182_v26 }
 0x114   : > { %v2458_v16 = vpop.eup %1946  ;;  %v1249_v12 = vsub.f32 0.0, %v1185_v40  ;;  %v1183_v56 = vsub.f32 1.0, %v2444_v52  ;;  %1952 = vrcp.f32 %v650_v41  ;;  %v965_v60 = vadd.f32 0.2548296, %v933_v48 }
 0x115   : > { %v809_v21 = vmul.f32 %v2402_v55, %v777_v62  ;;  %v1033_v17 = vsub.f32 0.0, %v2305_v42  ;;  %v2465_v59 = vmul.f32 0.70710677, %v2448_v14  ;;  %v1156_v61 = vmul.f32 %v2395_v44, %v996_v37 }
 0x116   : > { %v936_v43 = vmul.f32 %v2339_v63, %v904_v13  ;;  %v902_v46 = vadd.f32 -0.28449672, %v870_v24  ;;  %1954 = vrcp.f32 %v653_v32  ;;  %v743_v52 = vmul.f32 1.0614054, %v2458_v16 }
 0x117   : > { %1956 = vpow2.f32 %v2398_v39  ;;  %v651_v41 = vadd.f32 1.0, %v619_v53  ;;  %v624_v48 = vmul.f32 0.3275911, %v2456_v11  ;;  %v1280_v62 = vsel %vm1216_vm1, %v1184_v51, %v1248_v31  ;;  %v450_v31 = vpop.f32.mrf.mxu0 }
 0x118   : > { %v1278_v19 = vsel %vm1214_vm2, %v1182_v26, %v1246_v8  ;;  %v2477_v44 = vmul.f32 0.5, %v2243_v35  ;;  %1958 = vpow2.f32 %v1102_v33  ;;  %v1281_v32 = vsel %vm1217_vm3, %v1185_v40, %v1249_v12 }
 0x119   : > { %v997_v39 = vmul.f32 %v2322_v57, %v965_v60  ;;  %v841_v37 = vadd.f32 1.4214138, %v809_v21  ;;  %v2483_v13 = vand.u32 2147483647, %v2465_v59  ;;  %v1247_v24 = vsub.f32 0.0, %v1183_v56 }
 0x11a   : > { %v1188_v53 = vsub.f32 1.0, %v1156_v61  ;;  %v968_v0 = vadd.f32 0.2548296, %v936_v43  ;;  %v1065_v2 = vmul.f32 %v1033_v17, %v2305_v42  ;;  %v934_v35 = vmul.f32 %v2355_v1, %v902_v46 }
 0x11b   : > { %v775_v51 = vadd.f32 -1.4531521, %v743_v52  ;;  %1960 = vrcp.f32 %v651_v41  ;;  %v656_v4 = vadd.f32 1.0, %v624_v48  ;;  %v1312_v26 = vadd.f32 1.0, %v1280_v62 }
 0x11c   : > { %v1310_v40 = vadd.f32 1.0, %v1278_v19  ;;  %v2489_v57 = vmul.f32 0.5, %v2270_v54  ;;  %v2492_v33 = vadd.f32 %v1815_v22, %v2170_v58  ;;  %v1157_v12 = vmul.f32 %v1943_v5, %v997_v39 }
 0x11d   : > { %v2494_v8 = vpop.eup %1948  ;;  %v873_v60 = vmul.f32 %v2402_v55, %v841_v37  ;;  %v622_v42 = vmul.f32 0.3275911, %v2483_v13  ;;  %v2499_v21 = vadd.f32 %v2170_v58, %v450_v31  ;;  %v1313_v17 = vadd.f32 1.0, %v1281_v32 }
 0x11e   : > { %v1279_v19 = vsel %vm1215_vm4, %v1183_v56, %v1247_v24  ;;  %v1252_v61 = vsub.f32 0.0, %v1188_v53  ;;  %v1000_v54 = vmul.f32 %v2339_v63, %v968_v0  ;;  %v966_v43 = vadd.f32 0.2548296, %v934_v35 }
 0x11f   : > { %v1108_v46 = vmul.f32 1.442695, %v1065_v2  ;;  %v807_v22 = vmul.f32 %v2458_v16, %v775_v51  ;;  %1962 = vrcp.f32 %v656_v4  ;;  %v2506_v52 = vmul.f32 %v1312_v26, %v2276_v3 }
 0x120   : > { %v1951_v5 = vpop.eup %1950  ;;  %v1031_v41 = vsub.f32 0.0, %v2343_v23  ;;  %v748_v48 = vmul.f32 1.0614054, %v2494_v8  ;;  %v2512_v10 = vmul.f32 0.70710677, %v2492_v33  ;;  %v1189_v63 = vsub.f32 1.0, %v1157_v12 }
 0x121   : > { %v2514_v56 = vpop.eup %1952  ;;  %v905_v62 = vadd.f32 -0.28449672, %v873_v60  ;;  %v654_v32 = vadd.f32 1.0, %v622_v42  ;;  %v2517_v39 = vmul.f32 0.70710677, %v2499_v21  ;;  %v2520_v3 = vmul.f32 %v1310_v40, %v2279_v6 }
 0x122   : > { %v2523_v37 = vmul.f32 %v1313_v17, %v2294_v25  ;;  %v1311_v24 = vadd.f32 1.0, %v1279_v19  ;;  %v1160_v0 = vmul.f32 %v1951_v5, %v1000_v54  ;;  %v1284_v31 = vsel %vm1220_vm5, %v1188_v53, %v1252_v61 }
 0x123   : > { %v2525_v2 = vpop.eup %1954  ;;  %v998_v35 = vmul.f32 %v2355_v1, %v966_v43  ;;  %1964 = vpow2.f32 %v1108_v46  ;;  %v839_v51 = vadd.f32 1.4214138, %v807_v22  ;;  %v1063_v26 = vmul.f32 %v1031_v41, %v2343_v23 }
 0x124   : > { %v2530_v4 = vpop.eup %1956  ;;  %v780_v6 = vadd.f32 -1.4531521, %v748_v48  ;;  %v746_v40 = vmul.f32 1.0614054, %v2514_v56  ;;  %v2535_v25 = vand.u32 2147483647, %v2512_v10  ;;  %v937_v18 = vmul.f32 %v2402_v55, %v905_v62 }
 0x125   : > { %v1959_v12 = vpop.eup %1958  ;;  %v1253_v60 = vsub.f32 0.0, %v1189_v63  ;;  %1966 = vrcp.f32 %v654_v32  ;;  %v2540_v1 = vand.u32 2147483647, %v2517_v39  ;;  %v1192_v53 = vsub.f32 1.0, %v1160_v0 }
 0x126   : > { %v2543_v42 = vmul.f32 0.5, %v2310_v47  ;;  %v1036_v23 = vsub.f32 0.0, %v2375_v36  ;;  %v749_v17 = vmul.f32 1.0614054, %v2525_v2  ;;  %v1316_v61 = vadd.f32 1.0, %v1284_v31 }
 0x127   : > { %v1158_v54 = vmul.f32 %v1959_v12, %v998_v35  ;;  %v871_v43 = vmul.f32 %v2458_v16, %v839_v51  ;;  %v2553_v22 = vmul.f32 %v1311_v24, %v2298_v27  ;;  %v812_v5 = vmul.f32 %v2494_v8, %v780_v6 }
 0x128   : > { %v2550_v46 = vpop.eup %1960  ;;  %v778_v47 = vadd.f32 -1.4531521, %v746_v40  ;;  %v625_v41 = vmul.f32 0.3275911, %v2535_v25  ;;  %v1285_v48 = vsel %vm1221_vm6, %v1189_v63, %v1253_v60  ;;  %v969_v62 = vadd.f32 0.2548296, %v937_v18 }
 0x129   : > { %v1104_v32 = vmul.f32 1.442695, %v1063_v26  ;;  %v623_v0 = vmul.f32 0.3275911, %v2540_v1  ;;  %v1256_v31 = vsub.f32 0.0, %v1192_v53  ;;  %v1068_v35 = vmul.f32 %v1036_v23, %v2375_v36 }
 0x12a   : > { %v1034_v51 = vsub.f32 0.0, %v2393_v29  ;;  %v781_v12 = vadd.f32 -1.4531521, %v749_v17  ;;  %v2563_v27 = vmul.f32 %v1316_v61, %v2314_v20  ;;  %v1190_v24 = vsub.f32 1.0, %v1158_v54 }
 0x12b   : > { %v903_v6 = vadd.f32 -0.28449672, %v871_v43  ;;  %v747_v28 = vmul.f32 1.0614054, %v2550_v46  ;;  %v2570_v26 = vmul.f32 0.5, %v2347_v49  ;;  %v810_v36 = vmul.f32 %v2514_v56, %v778_v47 }
 0x12c   : > { %v2567_v63 = vpop.eup %1962  ;;  %v844_v40 = vadd.f32 1.4214138, %v812_v5  ;;  %v657_v60 = vadd.f32 1.0, %v625_v41  ;;  %v1317_v18 = vadd.f32 1.0, %v1285_v48  ;;  %v1001_v23 = vmul.f32 %v2402_v55, %v969_v62  ;;  %v1818_v41 = vpop.f32.mrf.mxu0 }
 0x12d   : > { %1968 = vpow2.f32 %v1104_v32  ;;  %v655_v20 = vadd.f32 1.0, %v623_v0  ;;  %v1288_v17 = vsel %vm1224_vm7, %v1192_v53, %v1256_v31  ;;  %v1114_v61 = vmul.f32 1.442695, %v1068_v35 }
 0x12e   : > { %v1066_v54 = vmul.f32 %v1034_v51, %v2393_v29  ;;  %v813_v43 = vmul.f32 %v2525_v2, %v781_v12  ;;  %v1254_v19 = vsub.f32 0.0, %v1190_v24  ;;  %v935_v49 = vmul.f32 %v2458_v16, %v903_v6 }
 0x12f   : > { %v779_v5 = vadd.f32 -1.4531521, %v747_v28  ;;  %v752_v47 = vmul.f32 1.0614054, %v2567_v63  ;;  %v876_v55 = vmul.f32 %v2494_v8, %v844_v40  ;;  %v842_v62 = vadd.f32 1.4214138, %v810_v36  ;;  %v463_v36 = vpop.f32.mrf.mxu0 }
 0x130   : > { %v1965_v48 = vpop.eup %1964  ;;  %v1037_v32 = vsub.f32 0.0, %v2407_v50  ;;  %1970 = vrcp.f32 %v657_v60  ;;  %v2583_v53 = vmul.f32 0.5, %v2365_v30  ;;  %v1035_v29 = vsub.f32 0.0, %v2437_v45 }
 0x131   : > { %v1161_v34 = vmul.f32 %v1965_v48, %v1001_v23  ;;  %1972 = vrcp.f32 %v655_v20  ;;  %v2589_v31 = vmul.f32 %v1317_v18, %v2332_v7  ;;  %v1320_v35 = vadd.f32 1.0, %v1288_v17  ;;  %v3243_v20 = vld [vmem:[#allocation9_spill] sm:$0xff]  ;;  %v1819_v48 = vpop.f32.mrf.mxu0 }
 0x132   : > { %v2586_v0 = vpop.eup %1966  ;;  %v1110_v51 = vmul.f32 1.442695, %v1066_v54  ;;  %v845_v12 = vadd.f32 1.4214138, %v813_v43  ;;  %v967_v6 = vadd.f32 0.2548296, %v935_v49  ;;  %1974 = vpow2.f32 %v1114_v61 }
 0x133   : > { %v811_v28 = vmul.f32 %v2550_v46, %v779_v5  ;;  %v784_v40 = vadd.f32 -1.4531521, %v752_v47  ;;  %v1286_v30 = vsel %vm1222_vm8, %v1190_v24, %v1254_v19  ;;  %v908_v60 = vadd.f32 -0.28449672, %v876_v55  ;;  %v3244_v43 = vld [vmem:[#allocation7_spill] sm:$0xff] }
 0x134   : > { %v874_v23 = vmul.f32 %v2514_v56, %v842_v62  ;;  %v1069_v7 = vmul.f32 %v1037_v32, %v2407_v50  ;;  %v1193_v18 = vsub.f32 1.0, %v1161_v34  ;;  %v2598_v17 = vmul.f32 0.5, %v3243_v20 }
 0x135   : > { %v1067_v61 = vmul.f32 %v1035_v29, %v2437_v45  ;;  %v750_v54 = vmul.f32 1.0614054, %v2586_v0  ;;  %v2603_v49 = vmul.f32 %v1320_v35, %v3244_v43  ;;  %1976 = vpow2.f32 %v1110_v51  ;;  %v3246_v29 = vld [vmem:[#allocation12_spill] sm:$0xff]  ;;  %v3247_v43 = vld [vmem:[#allocation15_spill] sm:$0xff] }
 0x136   : > { %v877_v38 = vmul.f32 %v2525_v2, %v845_v12  ;;  %v1040_v19 = vsub.f32 0.0, %v2456_v11  ;;  %v1318_v24 = vadd.f32 1.0, %v1286_v30  ;;  %v999_v5 = vmul.f32 %v2458_v16, %v967_v6 }
 0x137   : > { %3245 = vst [vmem:[#allocation9_spill] sm:$0xff] %v2603_v49  ;;  %v843_v50 = vadd.f32 1.4214138, %v811_v28  ;;  %v816_v47 = vmul.f32 %v2567_v63, %v784_v40  ;;  %v940_v55 = vmul.f32 %v2494_v8, %v908_v60  ;;  %v906_v45 = vadd.f32 -0.28449672, %v874_v23 }
 0x138   : > { %v1116_v62 = vmul.f32 1.442695, %v1069_v7  ;;  %v1038_v32 = vsub.f32 0.0, %v2483_v13  ;;  %v1257_v34 = vsub.f32 0.0, %v1193_v18  ;;  %v2612_v35 = vmul.f32 0.5, %v3246_v29  ;;  %v466_v29 = vpop.f32.mrf.mxu0 }
 0x139   : > { %v1112_v51 = vmul.f32 1.442695, %v1067_v61  ;;  %v782_v12 = vadd.f32 -1.4531521, %v750_v54  ;;  %v909_v30 = vadd.f32 -0.28449672, %v877_v38  ;;  %v1072_v6 = vmul.f32 %v1040_v19, %v2456_v11 }
 0x13a   : > { %v1969_v20 = vpop.eup %1968  ;;  %v2615_v16 = vmul.f32 0.5, %v3247_v43  ;;  %v2619_v28 = vadd.f32 %v1818_v41, %v2170_v58  ;;  %v2622_v40 = vmul.f32 %v1318_v24, %v2477_v44  ;;  %v875_v23 = vmul.f32 %v2550_v46, %v843_v50  ;;  %v3250_v24 = vld [vmem:[#allocation5_spill] sm:$0xff] }
 0x13b   : > { %v1159_v60 = vmul.f32 %v1969_v20, %v999_v5  ;;  %v848_v7 = vadd.f32 1.4214138, %v816_v47  ;;  %v972_v61 = vadd.f32 0.2548296, %v940_v55  ;;  %v938_v54 = vmul.f32 %v2514_v56, %v906_v45  ;;  %v2649_v45 = vpop.f32.mrf.mxu0 }
 0x13c   : > { %3248 = vst [vmem:[#allocation7_spill] sm:$0xff] %v2615_v16  ;;  %3249 = vst [vmem:[#allocation12_spill] sm:$0xff] %v2619_v28  ;;  %1978 = vpow2.f32 %v1116_v62  ;;  %v1070_v38 = vmul.f32 %v1038_v32, %v2483_v13  ;;  %v1289_v11 = vsel %vm1225_vm9, %v1193_v18, %v1257_v34  ;;  %v2632_v44 = vmul.f32 0.5, %v2448_v14 }
 0x13d   : > { %v2627_v43 = vpop.eup %1970  ;;  %1980 = vpow2.f32 %v1112_v51  ;;  %v814_v41 = vmul.f32 %v2586_v0, %v782_v12  ;;  %vm1223_vm10 = vcmp.ge.f32.partialorder %v3250_v24, 0.0  ;;  %v941_v5 = vmul.f32 %v2525_v2, %v909_v30 }
 0x13e   : > { %v2635_v19 = vpop.eup %1972  ;;  %v1122_v50 = vmul.f32 1.442695, %v1072_v6  ;;  %v2640_v13 = vmul.f32 0.70710677, %v2619_v28  ;;  %v2643_v47 = vadd.f32 %v2170_v58, %v463_v36  ;;  %v1191_v15 = vsub.f32 1.0, %v1159_v60 }
 0x13f   : > { %v907_v18 = vadd.f32 -0.28449672, %v875_v23  ;;  %v880_v14 = vmul.f32 %v2567_v63, %v848_v7  ;;  %v2647_v55 = vmul.f32 0.5, %v2492_v33  ;;  %v1975_v62 = vpop.eup %1974  ;;  %v1321_v32 = vadd.f32 1.0, %v1289_v11  ;;  %v479_v11 = vpop.f32.mrf.mxu0 }
 0x140   : > { %3251 = vst [vmem:[#allocation15_spill] sm:$0xff] %v2640_v13  ;;  %v1004_v34 = vmul.f32 %v2494_v8, %v972_v61  ;;  %v970_v51 = vadd.f32 0.2548296, %v938_v54  ;;  %v1118_v12 = vmul.f32 1.442695, %v1070_v38  ;;  %v2655_v6 = vadd.f32 %v2170_v58, %v466_v29 }
 0x141   : > { %3252 = vst [vmem:[#allocation5_spill] sm:$0xff] %v2647_v55  ;;  %v846_v20 = vadd.f32 1.4214138, %v814_v41  ;;  %v753_v30 = vmul.f32 1.0614054, %v2627_v43  ;;  %1982 = vpow2.f32 %v1122_v50  ;;  %v1255_v8 = vsub.f32 0.0, %v1191_v15 }
 0x142   : > { %v751_v36 = vmul.f32 1.0614054, %v2635_v19  ;;  %v973_v60 = vadd.f32 0.2548296, %v941_v5  ;;  %v2658_v33 = vand.u32 2147483647, %v2640_v13  ;;  %v1977_v7 = vpop.eup %1976  ;;  %v939_v61 = vmul.f32 %v2550_v46, %v907_v18 }
 0x143   : > { %v2661_v23 = vmul.f32 0.70710677, %v2643_v47  ;;  %v912_v54 = vadd.f32 -0.28449672, %v880_v14  ;;  %v1041_v38 = vsub.f32 0.0, %v2535_v25  ;;  %v2666_v41 = vmul.f32 %v1321_v32, %v2489_v57 }
 0x144   : > { %v1164_v29 = vmul.f32 %v1975_v62, %v1004_v34  ;;  %v1002_v5 = vmul.f32 %v2514_v56, %v970_v51  ;;  %v2670_v50 = vadd.f32 %v1819_v48, %v2170_v58  ;;  %v878_v28 = vmul.f32 %v2586_v0, %v846_v20  ;;  %v3256_v58 = vld [vmem:[#allocation8_spill] sm:$0xff]  ;;  %v2686_v34 = vpop.f32.mrf.mxu0 }
 0x145   : > { %3253 = vst [vmem:[#allocation18_spill] sm:$0xff] %v2661_v23  ;;  %3254 = vst [vmem:[#allocation19_spill] sm:$0xff] %v2666_v41  ;;  %v785_v16 = vadd.f32 -1.4531521, %v753_v30  ;;  %v783_v55 = vadd.f32 -1.4531521, %v751_v36  ;;  %v1005_v18 = vmul.f32 %v2525_v2, %v973_v60  ;;  %1984 = vpow2.f32 %v1118_v12 }
 0x146   : > { %3255 = vst [vmem:[#allocation20_spill] sm:$0xff] %v2670_v50  ;;  %v2674_v13 = vmul.f32 0.70710677, %v2655_v6  ;;  %v628_v14 = vmul.f32 0.3275911, %v2658_v33  ;;  %v1287_v56 = vsel %vm1223_vm10, %v1191_v15, %v1255_v8  ;;  %vm1228_vm11 = vcmp.ge.f32.partialorder %v3256_v58, 0.0 }
 0x147   : > { %v2679_v57 = vand.u32 2147483647, %v2661_v23  ;;  %v971_v48 = vadd.f32 0.2548296, %v939_v61  ;;  %v944_v62 = vmul.f32 %v2567_v63, %v912_v54  ;;  %v1073_v32 = vmul.f32 %v1041_v38, %v2535_v25 }
 0x148   : > { %v1196_v51 = vsub.f32 1.0, %v1164_v29  ;;  %v1162_v2 = vmul.f32 %v1977_v7, %v1002_v5  ;;  %v1039_v12 = vsub.f32 0.0, %v2540_v1  ;;  %v2690_v20 = vmul.f32 0.70710677, %v2670_v50  ;;  %v3259_v29 = vld [vmem:[#allocation10_spill] sm:$0xff]  ;;  %v482_v50 = vpop.f32.mrf.mxu0 }
 0x149   : > { %v1979_v30 = vpop.eup %1978  ;;  %v910_v36 = vadd.f32 -0.28449672, %v878_v28  ;;  %v817_v24 = vmul.f32 %v2627_v43, %v785_v16  ;;  %v815_v15 = vmul.f32 %v2635_v19, %v783_v55  ;;  %v2695_v60 = vand.u32 2147483647, %v2674_v13 }
 0x14a   : > { %3257 = vst [vmem:[#allocation8_spill] sm:$0xff] %v2690_v20  ;;  %v1981_v8 = vpop.eup %1980  ;;  %v1165_v25 = vmul.f32 %v1979_v30, %v1005_v18  ;;  %v2698_v61 = vmul.f32 0.5, %v2499_v21  ;;  %v660_v7 = vadd.f32 1.0, %v628_v14  ;;  %v626_v54 = vmul.f32 0.3275911, %v2679_v57  ;;  %v3260_v21 = vld [vmem:[#allocation11_spill] sm:$0xff] }
 0x14b   : > { %v1319_v38 = vadd.f32 1.0, %v1287_v56  ;;  %vm1226_vm12 = vcmp.ge.f32.partialorder %v3259_v29, 0.0  ;;  %v1003_v28 = vmul.f32 %v2550_v46, %v971_v48  ;;  %v976_v5 = vadd.f32 0.2548296, %v944_v62  ;;  %v2713_v48 = vld [vmem:[%s3181_s2] ss:$0 sm:$0xff] }
 0x14c   : > { %3258 = vst [vmem:[#allocation21_spill] sm:$0xff] %v2698_v61  ;;  %v1124_v16 = vmul.f32 1.442695, %v1073_v32  ;;  %v1260_v55 = vsub.f32 0.0, %v1196_v51  ;;  %v1194_v41 = vsub.f32 1.0, %v1162_v2  ;;  %v1071_v49 = vmul.f32 %v1039_v12, %v2540_v1 }
 0x14d   : > { %v2705_v18 = vand.u32 2147483647, %v2690_v20  ;;  %vm1229_vm13 = vcmp.ge.f32.partialorder %v3260_v21, 0.0  ;;  %v942_v14 = vmul.f32 %v2586_v0, %v910_v36  ;;  %v849_v30 = vadd.f32 1.4214138, %v817_v24 }
 0x14e   : > { %v847_v56 = vadd.f32 1.4214138, %v815_v15  ;;  %v627_v61 = vmul.f32 0.3275911, %v2695_v60  ;;  %v1197_v23 = vsub.f32 1.0, %v1165_v25  ;;  %1986 = vrcp.f32 %v660_v7  ;;  %v1983_v62 = vpop.eup %1982 }
 0x14f   : > { %v658_v46 = vadd.f32 1.0, %v626_v54  ;;  %v2716_v1 = vadd.f32 %v2713_v48, %v482_v50  ;;  %v1163_v32 = vmul.f32 %v1981_v8, %v1003_v28  ;;  %v1008_v2 = vmul.f32 %v2567_v63, %v976_v5  ;;  %v2730_v63 = vpop.f32.mrf.mxu0 }
 0x150   : > { %1988 = vpow2.f32 %v1124_v16  ;;  %v2720_v12 = vadd.f32 %v2713_v48, %v479_v11  ;;  %v2723_v36 = vmul.f32 %v1319_v38, %v2543_v42  ;;  %v1292_v24 = vsel %vm1228_vm11, %v1196_v51, %v1260_v55  ;;  %v3263_v11 = vld [vmem:[#allocation14_spill] sm:$0xff] }
 0x151   : > { %3261 = vst [vmem:[#allocation10_spill] sm:$0xff] %v2716_v1  ;;  %v1258_v15 = vsub.f32 0.0, %v1194_v41  ;;  %v629_v25 = vmul.f32 0.3275911, %v2705_v18  ;;  %v974_v7 = vadd.f32 0.2548296, %v942_v14  ;;  %v881_v50 = vmul.f32 %v2627_v43, %v849_v30 }
 0x152   : > { %3262 = vst [vmem:[#allocation11_spill] sm:$0xff] %v2720_v12  ;;  %v879_v8 = vmul.f32 %v2635_v19, %v847_v56  ;;  %v659_v54 = vadd.f32 1.0, %v627_v61  ;;  %v1261_v28 = vsub.f32 0.0, %v1197_v23  ;;  %vm1227_vm14 = vcmp.ge.f32.partialorder %v3263_v11, 0.0  ;;  %v1985_v58 = vpop.eup %1984 }
 0x153   : > { %v1120_v5 = vmul.f32 1.442695, %v1071_v49  ;;  %1990 = vrcp.f32 %v658_v46  ;;  %v2734_v42 = vmul.f32 0.70710677, %v2716_v1  ;;  %v1195_v51 = vsub.f32 1.0, %v1163_v32 }
 0x154   : > { %v1168_v38 = vmul.f32 %v1983_v62, %v1008_v2  ;;  %v1044_v16 = vsub.f32 0.0, %v2658_v33  ;;  %v2738_v55 = vmul.f32 0.70710677, %v2720_v12  ;;  %v1324_v14 = vadd.f32 1.0, %v1292_v24  ;;  %v495_v62 = vpop.f32.mrf.mxu0 }
 0x155   : > { %3264 = vst [vmem:[#allocation14_spill] sm:$0xff] %v2734_v42  ;;  %v1290_v61 = vsel %vm1226_vm12, %v1194_v41, %v1258_v15  ;;  %v661_v30 = vadd.f32 1.0, %v629_v25  ;;  %v2744_v49 = vadd.f32 %v2713_v48, %v2649_v45  ;;  %v1006_v56 = vmul.f32 %v2586_v0, %v974_v7 }
 0x156   : > { %3265 = vst [vmem:[#allocation22_spill] sm:$0xff] %v2738_v55  ;;  %v913_v46 = vadd.f32 -0.28449672, %v881_v50  ;;  %v911_v1 = vadd.f32 -0.28449672, %v879_v8  ;;  %1992 = vrcp.f32 %v659_v54  ;;  %v1293_v32 = vsel %vm1229_vm13, %v1197_v23, %v1261_v28 }
 0x157   : > { %3266 = vst [vmem:[#allocation23_spill] sm:$0xff] %v2744_v49  ;;  %1994 = vpow2.f32 %v1120_v5  ;;  %v2751_v2 = vadd.f32 %v2713_v48, %v2686_v34  ;;  %v2754_v41 = vand.u32 2147483647, %v2734_v42  ;;  %v1259_v29 = vsub.f32 0.0, %v1195_v51 }
 0x158   : > { %v1200_v45 = vsub.f32 1.0, %v1168_v38  ;;  %vm1232_vm15 = vcmp.ge.f32.partialorder %v2440_v9, 0.0  ;;  %v1076_v0 = vmul.f32 %v1044_v16, %v2658_v33  ;;  %v2759_v24 = vand.u32 2147483647, %v2738_v55 }
 0x159   : > { %3267 = vst [vmem:[#allocation24_spill] sm:$0xff] %v2751_v2  ;;  %v1042_v21 = vsub.f32 0.0, %v2679_v57  ;;  %1996 = vrcp.f32 %v661_v30  ;;  %v2763_v23 = vmul.f32 0.70710677, %v2744_v49  ;;  %v2766_v34 = vadd.f32 %v2713_v48, %v495_v62 }
 0x15a   : > { %v1322_v15 = vadd.f32 1.0, %v1290_v61  ;;  %v1166_v25 = vmul.f32 %v1985_v58, %v1006_v56  ;;  %v945_v7 = vmul.f32 %v2627_v43, %v913_v46  ;;  %v943_v50 = vmul.f32 %v2635_v19, %v911_v1  ;;  %v1827_v46 = vpop.f32.mrf.mxu0 }
 0x15b   : > { %3268 = vst [vmem:[#allocation25_spill] sm:$0xff] %v2763_v23  ;;  %3269 = vst [vmem:[#allocation26_spill] sm:$0xff] %v2766_v34  ;;  %v2771_v33 = vmul.f32 %v1324_v14, %v2570_v26  ;;  %v1325_v8 = vadd.f32 1.0, %v1293_v32  ;;  %v2774_v54 = vmul.f32 0.70710677, %v2751_v2  ;;  %v2777_v5 = vpop.eup %1986  ;;  %v1291_v38 = vsel %vm1227_vm14, %v1195_v51, %v1259_v29 }
 0x15c   : > { %v631_v28 = vmul.f32 0.3275911, %v2754_v41  ;;  %v1130_v16 = vmul.f32 1.442695, %v1076_v0  ;;  %v2782_v58 = vmul.f32 0.5, %v2643_v47  ;;  %v1264_v26 = vsub.f32 0.0, %v1200_v45 }
 0x15d   : > { %3270 = vst [vmem:[#allocation27_spill] sm:$0xff] %v2771_v33  ;;  %3271 = vst [vmem:[#allocation28_spill] sm:$0xff] %v2774_v54  ;;  %v630_v1 = vmul.f32 0.3275911, %v2759_v24  ;;  %v1989_v61 = vpop.eup %1988  ;;  %v1074_v14 = vmul.f32 %v1042_v21, %v2679_v57  ;;  %v2787_v30 = vand.u32 2147483647, %v2763_v23  ;;  %v2793_v11 = vmul.f32 %v1322_v15, %v2583_v53 }
 0x15e   : > { %3272 = vst [vmem:[#allocation29_spill] sm:$0xff] %v2782_v58  ;;  %v2790_v56 = vmul.f32 0.70710677, %v2766_v34  ;;  %v1198_v51 = vsub.f32 1.0, %v1166_v25  ;;  %vm1230_vm0 = vcmp.ge.f32.partialorder %v2465_v59, 0.0  ;;  %v2797_v32 = vmul.f32 %v1325_v8, %v2598_v17 }
 0x15f   : > { %v977_v47 = vadd.f32 0.2548296, %v945_v7  ;;  %v975_v62 = vadd.f32 0.2548296, %v943_v50  ;;  %v756_v57 = vmul.f32 1.0614054, %v2777_v5  ;;  %1998 = vpow2.f32 %v1130_v16 }
 0x160   : > { %3273 = vst [vmem:[#allocation30_spill] sm:$0xff] %v2790_v56  ;;  %3274 = vst [vmem:[#allocation31_spill] sm:$0xff] %v2797_v32  ;;  %v2801_v29 = vand.u32 2147483647, %v2774_v54  ;;  %v663_v0 = vadd.f32 1.0, %v631_v28  ;;  %v2803_v21 = vpop.eup %1990  ;;  %v1323_v49 = vadd.f32 1.0, %v1291_v38  ;;  %v2806_v15 = vadd.f32 %v2713_v48, %v1827_v46 }
 0x161   : > { %v662_v53 = vadd.f32 1.0, %v630_v1  ;;  %v1296_v25 = vsel %vm1232_vm15, %v1200_v45, %v1264_v26  ;;  %v1126_v7 = vmul.f32 1.442695, %v1074_v14  ;;  %v632_v17 = vmul.f32 0.3275911, %v2787_v30 }
 0x162   : > { %3275 = vst [vmem:[#allocation32_spill] sm:$0xff] %v2806_v15  ;;  %v2812_v50 = vand.u32 2147483647, %v2790_v56  ;;  %v1262_v8 = vsub.f32 0.0, %v1198_v51  ;;  %v1009_v28 = vmul.f32 %v2627_v43, %v977_v47  ;;  %v1007_v34 = vmul.f32 %v2635_v19, %v975_v62 }
 0x163   : > { %v2818_v38 = vadd.f32 %v2713_v48, %v2730_v63  ;;  %v2820_v16 = vpop.eup %1992  ;;  %v788_v1 = vadd.f32 -1.4531521, %v756_v57  ;;  %v754_v9 = vmul.f32 1.0614054, %v2803_v21  ;;  %v633_v45 = vmul.f32 0.3275911, %v2801_v29 }
 0x164   : > { %2000 = vrcp.f32 %v663_v0  ;;  %v1995_v26 = vpop.eup %1994  ;;  %v2825_v14 = vmul.f32 %v1323_v49, %v2612_v35  ;;  %v1045_v43 = vsub.f32 0.0, %v2705_v18  ;;  %v2829_v19 = vmul.f32 0.70710677, %v2806_v15 }
 0x165   : > { %3276 = vst [vmem:[#allocation33_spill] sm:$0xff] %v2818_v38  ;;  %2002 = vrcp.f32 %v662_v53  ;;  %v2831_v63 = vadd.f32 1.0, %v1296_v25  ;;  %v664_v46 = vadd.f32 1.0, %v632_v17  ;;  %v634_v47 = vmul.f32 0.3275911, %v2812_v50  ;;  %v498_v53 = vpop.f32.mrf.mxu0 }
 0x166   : > { %3277 = vst [vmem:[#allocation34_spill] sm:$0xff] %v2829_v19  ;;  %2004 = vpow2.f32 %v1126_v7  ;;  %v2834_v62 = vpop.eup %1996  ;;  %v2836_v57 = vmul.f32 %v1989_v61, %v1009_v28  ;;  %v1167_v0 = vmul.f32 %v1995_v26, %v1007_v34  ;;  %v755_v35 = vmul.f32 1.0614054, %v2820_v16 }
 0x167   : > { %3278 = vst [vmem:[#allocation35_spill] sm:$0xff] %v2831_v63  ;;  %v2840_v49 = vmul.f32 0.70710677, %v2818_v38  ;;  %v1294_v15 = vsel %vm1230_vm0, %v1198_v51, %v1262_v8  ;;  %v820_v25 = vmul.f32 %v2777_v5, %v788_v1  ;;  %v786_v7 = vadd.f32 -1.4531521, %v754_v9 }
 0x168   : > { %v665_v17 = vadd.f32 1.0, %v633_v45  ;;  %v1077_v2 = vmul.f32 %v1045_v43, %v2705_v18  ;;  %v2847_v23 = vmul.f32 0.5, %v2655_v6  ;;  %v1043_v34 = vsub.f32 0.0, %v2695_v60 }
 0x169   : > { %3279 = vst [vmem:[#allocation36_spill] sm:$0xff] %v2840_v49  ;;  %v2851_v61 = vand.u32 2147483647, %v2829_v19  ;;  %vm1231_vm1 = vcmp.ge.f32.partialorder %v2517_v39, 0.0  ;;  %v757_v28 = vmul.f32 1.0614054, %v2834_v62  ;;  %2006 = vrcp.f32 %v664_v46 }
 0x16a   : > { %3280 = vst [vmem:[#allocation37_spill] sm:$0xff] %v2847_v23  ;;  %v666_v59 = vadd.f32 1.0, %v634_v47  ;;  %v2856_v51 = vadd.f32 %v2713_v48, %v498_v53  ;;  %v1326_v8 = vadd.f32 1.0, %v1294_v15  ;;  %v1199_v1 = vsub.f32 1.0, %v1167_v0 }
 0x16b   : > { %v787_v18 = vadd.f32 -1.4531521, %v755_v35  ;;  %v2859_v6 = vand.u32 2147483647, %v2840_v49  ;;  %v852_v45 = vadd.f32 1.4214138, %v820_v25  ;;  %v818_v26 = vmul.f32 %v2803_v21, %v786_v7 }
 0x16c   : > { %3281 = vst [vmem:[#allocation38_spill] sm:$0xff] %v2856_v51  ;;  %2008 = vrcp.f32 %v665_v17  ;;  %v1132_v43 = vmul.f32 1.442695, %v1077_v2  ;;  %v1075_v38 = vmul.f32 %v1043_v34, %v2695_v60  ;;  %v637_v46 = vmul.f32 0.3275911, %v2851_v61  ;;  %v2867_v15 = vpop.eup %1998  ;;  %v3283_v35 = vld [vmem:[#allocation13_spill] sm:$0xff] }
 0x16d   : > { %v1374_v48 = vpack.c.bf16 %v2553_v22, %v2520_v3  ;;  %v789_v47 = vadd.f32 -1.4531521, %v757_v28  ;;  %2010 = vrcp.f32 %v666_v59  ;;  %v2870_v0 = vmul.f32 0.70710677, %v2856_v51  ;;  %v3284_v60 = vld [vmem:[#allocation17_spill] sm:$0xff] }
 0x16e   : > { %v738_v53 = vmul.f32 1.0614054, %v3283_v35  ;;  %v1263_v25 = vsub.f32 0.0, %v1199_v1  ;;  %v819_v7 = vmul.f32 %v2820_v16, %v787_v18  ;;  %v636_v2 = vmul.f32 0.3275911, %v2859_v6 }
 0x16f   : > { %3282 = vst [vmem:[#allocation39_spill] sm:$0xff] %v2870_v0  ;;  %1844 = vmatprep.mubr.bf16.mxu0 %v1374_v48  ;;  %v739_v17 = vmul.f32 1.0614054, %v3284_v60  ;;  %v2877_v34 = vmul.f32 %v1326_v8, %v2632_v44  ;;  %v884_v3 = vmul.f32 %v2777_v5, %v852_v45  ;;  %v850_v22 = vadd.f32 1.4214138, %v818_v26 }
 0x170   : > { %v2881_v28 = vand.u32 2147483647, %v2870_v0  ;;  %v3286_v59 = vpack.c.bf16 %v2523_v37, %v2506_v52  ;;  %v3287_v18 = vsub.f32 1.0, %v2836_v57  ;;  %2012 = vpow2.f32 %v1132_v43 }
 0x171   : > { %3285 = vst [vmem:[#allocation13_spill] sm:$0xff] %v2877_v34  ;;  %v2886_v9 = vpop.eup %2000  ;;  %v669_v49 = vadd.f32 1.0, %v637_v46  ;;  %v770_v44 = vadd.f32 -1.4531521, %v738_v53  ;;  %v821_v45 = vmul.f32 %v2834_v62, %v789_v47  ;;  %v1128_v26 = vmul.f32 1.442695, %v1075_v38 }
 0x172   : > { %1845 = vmatmul.mubr.bf16.vlgmr.msra.gmra.mxu0 %v3286_v59  ;;  %v2890_v48 = vsub.f32 0.0, %v3287_v18  ;;  %v2892_v8 = vpop.eup %2002  ;;  %v1048_v19 = vsub.f32 0.0, %v2787_v30  ;;  %v635_v51 = vmul.f32 0.3275911, %v2881_v28  ;;  %v1295_v37 = vsel %vm1231_vm1, %v1199_v1, %v1263_v25 }
 0x173   : > { %v2897_v52 = vpop.eup %2004  ;;  %v851_v59 = vadd.f32 1.4214138, %v819_v7  ;;  %v668_v18 = vadd.f32 1.0, %v636_v2  ;;  %v771_v56 = vadd.f32 -1.4531521, %v739_v17  ;;  %v882_v46 = vmul.f32 %v2803_v21, %v850_v22 }
 0x174   : > { %v916_v43 = vadd.f32 -0.28449672, %v884_v3  ;;  %v759_v53 = vmul.f32 1.0614054, %v2886_v9  ;;  %v667_v54 = vadd.f32 1.0, %v635_v51  ;;  %2014 = vrcp.f32 %v669_v49 }
 0x175   : > { %v758_v38 = vmul.f32 1.0614054, %v2892_v8  ;;  %v802_v47 = vmul.f32 %v3283_v35, %v770_v44  ;;  %v803_v0 = vmul.f32 %v3284_v60, %v771_v56  ;;  %v853_v12 = vadd.f32 1.4214138, %v821_v45 }
 0x176   : > { %v1080_v39 = vmul.f32 %v1048_v19, %v2787_v30  ;;  %v1046_v1 = vsub.f32 0.0, %v2759_v24  ;;  %2016 = vrcp.f32 %v667_v54  ;;  %v2908_v25 = vpop.eup %2006  ;;  %v883_v7 = vmul.f32 %v2820_v16, %v851_v59 }
 0x177   : > { %2018 = vrcp.f32 %v668_v18  ;;  %v834_v2 = vadd.f32 1.4214138, %v802_v47  ;;  %v835_v51 = vadd.f32 1.4214138, %v803_v0  ;;  %v2911_v17 = vadd.f32 1.0, %v1295_v37 }
 0x178   : > { %v948_v49 = vmul.f32 %v2777_v5, %v916_v43  ;;  %v791_v3 = vadd.f32 -1.4531521, %v759_v53  ;;  %v1047_v56 = vsub.f32 0.0, %v2754_v41  ;;  %v914_v30 = vadd.f32 -0.28449672, %v882_v46 }
 0x179   : > { %v2915_v22 = vpop.eup %2008  ;;  %v790_v19 = vadd.f32 -1.4531521, %v758_v38  ;;  %v866_v54 = vmul.f32 %v3283_v35, %v834_v2  ;;  %v867_v44 = vmul.f32 %v3284_v60, %v835_v51  ;;  %v760_v45 = vmul.f32 1.0614054, %v2908_v25 }
 0x17a   : > { %v2920_v59 = vmul.f32 1.442695, %v1080_v39  ;;  %v1078_v0 = vmul.f32 %v1046_v1, %v2759_v24  ;;  %v1049_v37 = vsub.f32 0.0, %v2801_v29  ;;  %v2924_v18 = vpop.eup %2010  ;;  %v885_v43 = vmul.f32 %v2834_v62, %v853_v12 }
 0x17b   : > { %v915_v53 = vadd.f32 -0.28449672, %v883_v7  ;;  %v898_v47 = vadd.f32 -0.28449672, %v866_v54  ;;  %v899_v46 = vadd.f32 -0.28449672, %v867_v44  ;;  %v823_v51 = vmul.f32 %v2886_v9, %v791_v3 }
 0x17c   : > { %v2927_v38 = vadd.f32 0.2548296, %v948_v49  ;;  %v761_v2 = vmul.f32 1.0614054, %v2915_v22  ;;  %v1079_v39 = vmul.f32 %v1047_v56, %v2754_v41  ;;  %v946_v63 = vmul.f32 %v2803_v21, %v914_v30  ;;  %v3288_v30 = vld [vmem:[#allocation2_spill] sm:$0xff] }
 0x17d   : > { %v822_v24 = vmul.f32 %v2892_v8, %v790_v19  ;;  %v930_v1 = vmul.f32 %v3283_v35, %v898_v47  ;;  %v931_v58 = vmul.f32 %v3284_v60, %v899_v46  ;;  %v2936_v12 = vpop.eup %2012  ;;  %v792_v7 = vadd.f32 -1.4531521, %v760_v45  ;;  %v3289_v19 = vld [vmem:[#allocation4_spill] sm:$0xff] }
 0x17e   : > { %v1134_v54 = vmul.f32 1.442695, %v1078_v0  ;;  %v1081_v49 = vmul.f32 %v1049_v37, %v2801_v29  ;;  %v762_v44 = vmul.f32 1.0614054, %v2924_v18  ;;  %v917_v55 = vadd.f32 -0.28449672, %v885_v43 }
 0x17f   : > { %v947_v3 = vmul.f32 %v2820_v16, %v915_v53  ;;  %v962_v41 = vadd.f32 0.2548296, %v930_v1  ;;  %v963_v56 = vadd.f32 0.2548296, %v931_v58  ;;  %vm1218_vm2 = vcmp.ge.f32.partialorder %v3288_v30, 0.0 }
 0x180   : > { %vm1219_vm3 = vcmp.ge.f32.partialorder %v3289_v19, 0.0  ;;  %2020 = vpow2.f32 %v1128_v26  ;;  %v793_v47 = vadd.f32 -1.4531521, %v761_v2  ;;  %v855_v46 = vadd.f32 1.4214138, %v823_v51  ;;  %v3290_v51 = vld [vmem:[#allocation16_spill] sm:$0xff] }
 0x181   : > { %v1136_v42 = vmul.f32 1.442695, %v1079_v39  ;;  %v978_v23 = vadd.f32 0.2548296, %v946_v63  ;;  %v854_v45 = vadd.f32 1.4214138, %v822_v24  ;;  %v994_v0 = vmul.f32 %v3283_v35, %v962_v41  ;;  %v2945_v37 = vpop.eup %2014 }
 0x182   : > { %v995_v29 = vmul.f32 %v3284_v60, %v963_v56  ;;  %v824_v43 = vmul.f32 %v2908_v25, %v792_v7  ;;  %2022 = vpow2.f32 %v1134_v54  ;;  %v2948_v58 = vmul.f32 1.442695, %v1081_v49 }
 0x183   : > { %v794_v53 = vadd.f32 -1.4531521, %v762_v44  ;;  %v2950_v1 = vpop.eup %2016  ;;  %v949_v26 = vmul.f32 %v2834_v62, %v917_v55  ;;  %v979_v2 = vadd.f32 0.2548296, %v947_v3  ;;  %v1154_v63 = vmul.f32 %v3290_v51, %v994_v0 }
 0x184   : > { %v1155_v39 = vmul.f32 %v2530_v4, %v995_v29  ;;  %v2955_v35 = vpop.eup %2018  ;;  %v825_v60 = vmul.f32 %v2915_v22, %v793_v47  ;;  %v887_v24 = vmul.f32 %v2886_v9, %v855_v46  ;;  %2024 = vpow2.f32 %v1136_v42 }
 0x185   : > { %v763_v7 = vmul.f32 1.0614054, %v2950_v1  ;;  %v886_v54 = vmul.f32 %v2892_v8, %v854_v45  ;;  %v765_v49 = vmul.f32 1.0614054, %v2945_v37  ;;  %v1186_v44 = vsub.f32 1.0, %v1154_v63 }
 0x186   : > { %v1187_v55 = vsub.f32 1.0, %v1155_v39  ;;  %v856_v3 = vadd.f32 1.4214138, %v824_v43  ;;  %v826_v41 = vmul.f32 %v2924_v18, %v794_v53  ;;  %v1051_v4 = vsub.f32 0.0, %v2881_v28 }
 0x187   : > { %v795_v56 = vadd.f32 -1.4531521, %v763_v7  ;;  %v1011_v0 = vmul.f32 %v2820_v16, %v979_v2  ;;  %v764_v47 = vmul.f32 1.0614054, %v2955_v35  ;;  %v1250_v46 = vsub.f32 0.0, %v1186_v44 }
 0x188   : > { %v1251_v42 = vsub.f32 0.0, %v1187_v55  ;;  %v857_v29 = vadd.f32 1.4214138, %v825_v60  ;;  %v919_v51 = vadd.f32 -0.28449672, %v887_v24  ;;  %v1050_v45 = vsub.f32 0.0, %v2812_v50 }
 0x189   : > { %v827_v20 = vmul.f32 %v2950_v1, %v795_v56  ;;  %v918_v63 = vadd.f32 -0.28449672, %v886_v54  ;;  %v797_v39 = vadd.f32 -1.4531521, %v765_v49  ;;  %v1282_v43 = vsel %vm1218_vm2, %v1186_v44, %v1250_v46 }
 0x18a   : > { %v1283_v53 = vsel %vm1219_vm3, %v1187_v55, %v1251_v42  ;;  %v858_v7 = vadd.f32 1.4214138, %v826_v41  ;;  %v1083_v2 = vmul.f32 %v1051_v4, %v2881_v28  ;;  %v1314_v32 = vadd.f32 1.0, %v1282_v43  ;;  %v3291_v28 = vld [vmem:[#allocation3_spill] sm:$0xff]  ;;  %v3292_v41 = vld [vmem:[#allocation6_spill] sm:$0xff] }
 0x18b   : > { %v859_v16 = vadd.f32 1.4214138, %v827_v20  ;;  %v1010_v60 = vmul.f32 %v2803_v21, %v978_v23  ;;  %v981_v24 = vadd.f32 0.2548296, %v949_v26  ;;  %v796_v33 = vadd.f32 -1.4531521, %v764_v47 }
 0x18c   : > { %v1315_v34 = vadd.f32 1.0, %v1283_v53  ;;  %v888_v56 = vmul.f32 %v2908_v25, %v856_v3  ;;  %v951_v54 = vmul.f32 %v2886_v9, %v919_v51  ;;  %v1082_v30 = vmul.f32 %v1050_v45, %v2812_v50 }
 0x18d   : > { %v891_v49 = vmul.f32 %v2950_v1, %v859_v16  ;;  %v2021_v19 = vpop.eup %2020  ;;  %v889_v44 = vmul.f32 %v2915_v22, %v857_v29  ;;  %v829_v20 = vmul.f32 %v2945_v37, %v797_v39  ;;  %v1346_v55 = vmul.f32 %v1314_v32, %v3291_v28  ;;  %v3293_v16 = vld [vmem:[#allocation18_spill] sm:$0xff]  ;;  %v3294_v28 = vld [vmem:[#allocation9_spill] sm:$0xff] }
 0x18e   : > { %v1347_v23 = vmul.f32 %v1315_v34, %v3292_v41  ;;  %v2982_v21 = vmul.f32 %v2021_v19, %v1011_v0  ;;  %v950_v26 = vmul.f32 %v2892_v8, %v918_v63  ;;  %v890_v3 = vmul.f32 %v2924_v18, %v858_v7 }
 0x18f   : > { %v1144_v4 = vmul.f32 1.442695, %v1083_v2  ;;  %v2023_v47 = vpop.eup %2022  ;;  %v828_v50 = vmul.f32 %v2955_v35, %v796_v33  ;;  %v1053_v46 = vsub.f32 0.0, %v2851_v61  ;;  %v1378_v29 = vpack.c.bf16 %v2723_v36, %v2622_v40 }
 0x190   : > { %v1376_v42 = vpack.c.bf16 %v1347_v23, %v1346_v55  ;;  %v983_v51 = vadd.f32 0.2548296, %v951_v54  ;;  %v1142_v32 = vmul.f32 1.442695, %v1082_v30  ;;  %v923_v45 = vadd.f32 -0.28449672, %v891_v49 }
 0x191   : > { %v1377_v34 = vpack.c.bf16 %v2589_v31, %v2563_v27  ;;  %v2025_v0 = vpop.eup %2024  ;;  %2026 = vpow2.f32 %v2920_v59  ;;  %v921_v63 = vadd.f32 -0.28449672, %v889_v44  ;;  %v1052_v39 = vsub.f32 0.0, %v2859_v6  ;;  %v3295_v55 = vld [vmem:[#allocation19_spill] sm:$0xff] }
 0x192   : > { %v861_v43 = vadd.f32 1.4214138, %v829_v20  ;;  %1848 = vmatprep.mubr.bf16.mxu1 %v1376_v42  ;;  %v1170_v33 = vmul.f32 %v2897_v52, %v1010_v60  ;;  %v982_v53 = vadd.f32 0.2548296, %v950_v26  ;;  %v922_v7 = vadd.f32 -0.28449672, %v890_v3 }
 0x193   : > { %2028 = vpow2.f32 %v1144_v4  ;;  %1849 = vmatmul.mubr.bf16.vlgmr.msra.gmra.mxu1 %v1377_v34  ;;  %vm1233_vm4 = vcmp.ge.f32.partialorder %v2512_v10, 0.0  ;;  %vm1235_vm5 = vcmp.ge.f32.partialorder %v2674_v13, 0.0  ;;  %v920_v40 = vadd.f32 -0.28449672, %v888_v56 }
 0x194   : > { %2030 = vpow2.f32 %v2948_v58  ;;  %v860_v27 = vadd.f32 1.4214138, %v828_v50  ;;  %v1085_v31 = vmul.f32 %v1053_v46, %v2851_v61  ;;  %1852 = vmatprep.mubr.bf16.mxu1 %v1378_v29  ;;  %v1203_v36 = vsub.f32 1.0, %v2982_v21  ;;  %v3296_v50 = vld [vmem:[#allocation21_spill] sm:$0xff] }
 0x195   : > { %v1015_v59 = vmul.f32 %v2886_v9, %v983_v51  ;;  %2032 = vpow2.f32 %v1142_v32  ;;  %v955_v52 = vmul.f32 %v2950_v1, %v923_v45  ;;  %vm1234_vm6 = vcmp.ge.f32.partialorder %v3293_v16, 0.0  ;;  %v3298_v51 = vld [vmem:[#allocation15_spill] sm:$0xff] }
 0x196   : > { %v1013_v2 = vmul.f32 %v2834_v62, %v981_v24  ;;  %v953_v60 = vmul.f32 %v2915_v22, %v921_v63  ;;  %v1084_v56 = vmul.f32 %v1052_v39, %v2859_v6  ;;  %v893_v58 = vmul.f32 %v2945_v37, %v861_v43  ;;  %v3299_v43 = vld [vmem:[#allocation13_spill] sm:$0xff] }
 0x197   : > { %v1012_v61 = vmul.f32 %v2777_v5, %v2927_v38  ;;  %v1202_v54 = vsub.f32 1.0, %v1170_v33  ;;  %v1014_v30 = vmul.f32 %v2892_v8, %v982_v53  ;;  %v954_v9 = vmul.f32 %v2924_v18, %v922_v7 }
 0x198   : > { %v952_v49 = vmul.f32 %v2908_v25, %v920_v40  ;;  %v892_v19 = vmul.f32 %v2955_v35, %v860_v27  ;;  %v1148_v44 = vmul.f32 1.442695, %v1085_v31  ;;  %v1380_v62 = vpack.c.bf16 %v2825_v14, %v2793_v11  ;;  %v3300_v27 = vld [vmem:[#allocation27_spill] sm:$0xff] }
 0x199   : > { %v1267_v24 = vsub.f32 0.0, %v1203_v36  ;;  %v1175_v6 = vmul.f32 %v2025_v0, %v1015_v59  ;;  %v987_v20 = vadd.f32 0.2548296, %v955_v52  ;;  %v1379_v41 = vpack.c.bf16 %v3295_v55, %v3294_v28  ;;  %v3301_v31 = vld [vmem:[#allocation31_spill] sm:$0xff] }
 0x19a   : > { %v1173_v5 = vmul.f32 %v2936_v12, %v1013_v2  ;;  %v985_v38 = vadd.f32 0.2548296, %v953_v60  ;;  %v1146_v8 = vmul.f32 1.442695, %v1084_v56  ;;  %v925_v23 = vadd.f32 -0.28449672, %v893_v58 }
 0x19b   : > { %v1172_v21 = vmul.f32 %v2867_v15, %v1012_v61  ;;  %v1266_v26 = vsub.f32 0.0, %v1202_v54  ;;  %v1174_v3 = vmul.f32 %v2023_v47, %v1014_v30  ;;  %v986_v4 = vadd.f32 0.2548296, %v954_v9  ;;  %1853 = vmatmul.mubr.bf16.gmra.mxu1 %v1379_v41  ;;  %v3302_v56 = vld [vmem:[#allocation8_spill] sm:$0xff]  ;;  %v3303_v61 = vld [vmem:[#allocation37_spill] sm:$0xff]  ;;  %v3304_v9 = vld [vmem:[#allocation14_spill] sm:$0xff] }
 0x19c   : > { %v1359_v11 = vmul.f32 %v2911_v17, %v3296_v50  ;;  %v984_v14 = vadd.f32 0.2548296, %v952_v49  ;;  %v924_v46 = vadd.f32 -0.28449672, %v892_v19  ;;  %2034 = vpow2.f32 %v1148_v44  ;;  %1856 = vmatprep.mubr.bf16.mxu1 %v1380_v62  ;;  %v3305_v19 = vld [vmem:[#allocation5_spill] sm:$0xff]  ;;  %v3306_v62 = vld [vmem:[#allocation22_spill] sm:$0xff] }
 0x19d   : > { %v3297_v42 = vsub.f32 1.0, %v2836_v57  ;;  %v1299_v15 = vsel %vm1235_vm5, %v1203_v36, %v1267_v24  ;;  %v1207_v29 = vsub.f32 1.0, %v1175_v6  ;;  %v1019_v47 = vmul.f32 %v2950_v1, %v987_v20  ;;  %v3307_v20 = vld [vmem:[#allocation29_spill] sm:$0xff] }
 0x19e   : > { %vm1236_vm7 = vcmp.ge.f32.partialorder %v3298_v51, 0.0  ;;  %v1205_v32 = vsub.f32 1.0, %v1173_v5  ;;  %v1017_v17 = vmul.f32 %v2915_v22, %v985_v38  ;;  %2036 = vpow2.f32 %v1146_v8  ;;  %v2027_v34 = vpop.eup %2026  ;;  %v3308_v38 = vld [vmem:[#allocation7_spill] sm:$0xff]  ;;  %v3311_v51 = vld [vmem:[#allocation20_spill] sm:$0xff] }
 0x19f   : > { %v1297_v12 = vsel %vm1233_vm4, %v3297_v42, %v2890_v48  ;;  %v957_v45 = vmul.f32 %v2945_v37, %v925_v23  ;;  %v1204_v0 = vsub.f32 1.0, %v1172_v21  ;;  %v1298_v10 = vsel %vm1234_vm6, %v1202_v54, %v1266_v26  ;;  %v3309_v8 = vld [vmem:[#allocation35_spill] sm:$0xff] }
 0x1a0   : > { %v1206_v57 = vsub.f32 1.0, %v1174_v3  ;;  %v1018_v13 = vmul.f32 %v2924_v18, %v986_v4  ;;  %v2029_v48 = vpop.eup %2028  ;;  %v1331_v63 = vadd.f32 1.0, %v1299_v15  ;;  %v1016_v1 = vmul.f32 %v2908_v25, %v984_v14 }
 0x1a1   : > { %v956_v39 = vmul.f32 %v2955_v35, %v924_v46  ;;  %v1382_v33 = vpack.c.bf16 %v1359_v11, %v3299_v43  ;;  %v2031_v22 = vpop.eup %2030  ;;  %v1329_v53 = vadd.f32 1.0, %v1297_v12  ;;  %v1271_v7 = vsub.f32 0.0, %v1207_v29 }
 0x1a2   : > { %v1179_v40 = vmul.f32 %v2029_v48, %v1019_v47  ;;  %v1381_v36 = vpack.c.bf16 %v3301_v31, %v3300_v27  ;;  %v2033_v59 = vpop.eup %2032  ;;  %v1330_v52 = vadd.f32 1.0, %v1298_v10  ;;  %v1269_v16 = vsub.f32 0.0, %v1205_v32  ;;  %v3312_v10 = vld [vmem:[#allocation11_spill] sm:$0xff]  ;;  %v3316_v27 = vld [vmem:[#allocation30_spill] sm:$0xff] }
 0x1a3   : > { %v1177_v2 = vmul.f32 %v2031_v22, %v1017_v17  ;;  %v989_v18 = vadd.f32 0.2548296, %v957_v45  ;;  %v1268_v60 = vsub.f32 0.0, %v1204_v0  ;;  %vm1237_vm8 = vcmp.ge.f32.partialorder %v3302_v56, 0.0  ;;  %v3315_v22 = vld [vmem:[#allocation28_spill] sm:$0xff] }
 0x1a4   : > { %v1270_v25 = vsub.f32 0.0, %v1206_v57  ;;  %v1178_v58 = vmul.f32 %v2033_v59, %v1018_v13  ;;  %1857 = vmatmul.mubr.bf16.gmra.mxu1 %v1381_v36  ;;  %v1363_v54 = vmul.f32 %v1331_v63, %v3303_v61  ;;  %v1176_v30 = vmul.f32 %v2027_v34, %v1016_v1  ;;  %v3313_v1 = vld [vmem:[#allocation39_spill] sm:$0xff]  ;;  %v3317_v59 = vld [vmem:[#allocation25_spill] sm:$0xff] }
 0x1a5   : > { %vm1239_vm9 = vcmp.ge.f32.partialorder %v3304_v9, 0.0  ;;  %v988_v49 = vadd.f32 0.2548296, %v956_v39  ;;  %1860 = vmatprep.mubr.bf16.mxu1 %v1382_v33  ;;  %v1361_v44 = vmul.f32 %v1329_v53, %v3305_v19  ;;  %vm1238_vm10 = vcmp.ge.f32.partialorder %v3306_v62, 0.0  ;;  %v3314_v39 = vld [vmem:[#allocation12_spill] sm:$0xff]  ;;  %v3320_v62 = vld [vmem:[#allocation26_spill] sm:$0xff] }
 0x1a6   : > { %v1303_v24 = vsel %vm1239_vm9, %v1207_v29, %v1271_v7  ;;  %v1211_v6 = vsub.f32 1.0, %v1179_v40  ;;  %v1362_v28 = vmul.f32 %v1330_v52, %v3307_v20  ;;  %v1301_v55 = vsel %vm1237_vm8, %v1205_v32, %v1269_v16  ;;  %v3321_v20 = vld [vmem:[#allocation23_spill] sm:$0xff] }
 0x1a7   : > { %v1209_v41 = vsub.f32 1.0, %v1177_v2  ;;  %v1021_v5 = vmul.f32 %v2945_v37, %v989_v18  ;;  %v1360_v23 = vmul.f32 %v3309_v8, %v3308_v38  ;;  %v1300_v21 = vsel %vm1236_vm7, %v1204_v0, %v1268_v60  ;;  %v3310_v37 = vld [vmem:[#allocation10_spill] sm:$0xff] }
 0x1a8   : > { %v1302_v26 = vsel %vm1238_vm10, %v1206_v57, %v1270_v25  ;;  %v1210_v3 = vsub.f32 1.0, %v1178_v58  ;;  %v1208_v4 = vsub.f32 1.0, %v1176_v30  ;;  %v1335_v50 = vadd.f32 1.0, %v1303_v24 }
 0x1a9   : > { %v1020_v11 = vmul.f32 %v2955_v35, %v988_v49  ;;  %v1384_v14 = vpack.c.bf16 %v1363_v54, %v1362_v28  ;;  %v2035_v46 = vpop.eup %2034  ;;  %v1333_v42 = vadd.f32 1.0, %v1301_v55  ;;  %v1275_v12 = vsub.f32 0.0, %v1211_v6  ;;  %v3318_v54 = vld [vmem:[#allocation38_spill] sm:$0xff]  ;;  %v3319_v49 = vld [vmem:[#allocation24_spill] sm:$0xff] }
 0x1aa   : > { %v1383_v15 = vpack.c.bf16 %v1361_v44, %v1360_v23  ;;  %v1334_v29 = vadd.f32 1.0, %v1302_v26  ;;  %v1273_v47 = vsub.f32 0.0, %v1209_v41  ;;  %v535_v32 = vmul.f32 0.5, %v3310_v37  ;;  %v3323_v23 = vld [vmem:[#allocation36_spill] sm:$0xff] }
 0x1ab   : > { %v1181_v17 = vmul.f32 %v2035_v46, %v1021_v5  ;;  %v2037_v45 = vpop.eup %2036  ;;  %v1332_v34 = vadd.f32 1.0, %v1300_v21  ;;  %v533_v0 = vmul.f32 0.5, %v3311_v51  ;;  %v534_v57 = vmul.f32 0.5, %v3312_v10  ;;  %v3325_v46 = vld [vmem:[#allocation33_spill] sm:$0xff] }
 0x1ac   : > { %v1274_v13 = vsub.f32 0.0, %v1210_v3  ;;  %1861 = vmatmul.mubr.bf16.gmra.mxu1 %v1383_v15  ;;  %v1272_v48 = vsub.f32 0.0, %v1208_v4  ;;  %v1367_v35 = vmul.f32 %v1335_v50, %v535_v32  ;;  %v1180_v63 = vmul.f32 %v2037_v45, %v1020_v11  ;;  %v3324_v11 = vld [vmem:[#allocation32_spill] sm:$0xff] }
 0x1ad   : > { %vm1243_vm11 = vcmp.ge.f32.partialorder %v3313_v1, 0.0  ;;  %1864 = vmatprep.mubr.bf16.mxu1 %v1384_v14  ;;  %v532_v43 = vmul.f32 0.5, %v3314_v39  ;;  %v1365_v33 = vmul.f32 %v1333_v42, %v533_v0  ;;  %vm1241_vm12 = vcmp.ge.f32.partialorder %v3315_v22, 0.0 }
 0x1ae   : > { %v1307_v53 = vsel %vm1243_vm11, %v1211_v6, %v1275_v12  ;;  %v1366_v7 = vmul.f32 %v1334_v29, %v534_v57  ;;  %v1305_v40 = vsel %vm1241_vm12, %v1209_v41, %v1273_v47  ;;  %vm1242_vm13 = vcmp.ge.f32.partialorder %v3316_v27, 0.0  ;;  %v3322_v41 = vld [vmem:[#allocation34_spill] sm:$0xff] }
 0x1af   : > { %v1213_v31 = vsub.f32 1.0, %v1181_v17  ;;  %v1364_v36 = vmul.f32 %v1332_v34, %v532_v43  ;;  %vm1240_vm14 = vcmp.ge.f32.partialorder %v3317_v59, 0.0  ;;  %v1306_v52 = vsel %vm1242_vm13, %v1210_v3, %v1274_v13  ;;  %v3071_v47 = vld [vmem:[%s3183_s4] ss:$0 sm:$0xff] }
 0x1b0   : > { %v1304_v16 = vsel %vm1240_vm14, %v1208_v4, %v1272_v48  ;;  %v1212_v2 = vsub.f32 1.0, %v1180_v63  ;;  %v1339_v18 = vadd.f32 1.0, %v1307_v53  ;;  %v1386_v60 = vpack.c.bf16 %v1367_v35, %v1366_v7 }
 0x1b1   : > { %v1337_v56 = vadd.f32 1.0, %v1305_v40  ;;  %v1385_v25 = vpack.c.bf16 %v1365_v33, %v1364_v36  ;;  %v1338_v58 = vadd.f32 1.0, %v1306_v52  ;;  %v1277_v61 = vsub.f32 0.0, %v1213_v31 }
 0x1b2   : > { %v539_v30 = vmul.f32 0.5, %v3318_v54  ;;  %v1336_v9 = vadd.f32 1.0, %v1304_v16  ;;  %v537_v19 = vmul.f32 0.5, %v3319_v49  ;;  %v1276_v44 = vsub.f32 0.0, %v1212_v2 }
 0x1b3   : > { %v538_v24 = vmul.f32 0.5, %v3320_v62  ;;  %v536_v28 = vmul.f32 0.5, %v3321_v20  ;;  %vm1245_vm15 = vcmp.ge.f32.partialorder %v3322_v41, 0.0  ;;  %vm1244_vm0 = vcmp.ge.f32.partialorder %v3323_v23, 0.0 }
 0x1b4   : > { %1865 = vmatmul.mubr.bf16.gmra.mxu1 %v1385_v25  ;;  %v1371_v6 = vmul.f32 %v1339_v18, %v539_v30  ;;  %v1369_v55 = vmul.f32 %v1337_v56, %v537_v19  ;;  %v1309_v38 = vsel %vm1245_vm15, %v1213_v31, %v1277_v61  ;;  %v1308_v21 = vsel %vm1244_vm0, %v1212_v2, %v1276_v44 }
 0x1b5   : > { %1868 = vmatprep.mubr.bf16.mxu1 %v1386_v60  ;;  %v1370_v5 = vmul.f32 %v1338_v58, %v538_v24  ;;  %v1368_v8 = vmul.f32 %v1336_v9, %v536_v28  ;;  %v1341_v3 = vadd.f32 1.0, %v1309_v38  ;;  %v1340_v50 = vadd.f32 1.0, %v1308_v21 }
 0x1b6   : > { %v541_v14 = vmul.f32 0.5, %v3324_v11  ;;  %v540_v42 = vmul.f32 0.5, %v3325_v46  ;;  %vm1622_vm1 = vcmask 23552  }
 0x1b7   : > { %v1388_v26 = vpack.c.bf16 %v1371_v6, %v1370_v5  ;;  %v1387_v4 = vpack.c.bf16 %v1369_v55, %v1368_v8 }
 0x1b8   : > { %v1373_v12 = vmul.f32 %v1341_v3, %v541_v14  ;;  %v1372_v15 = vmul.f32 %v1340_v50, %v540_v42 }
 0x1ba   : > { %v1389_v29 = vpack.c.bf16 %v1373_v12, %v1372_v15 }
 0x1bc   : > { %1869 = vmatmul.mubr.bf16.gmra.mxu1 %v1387_v4 }
 0x1bd   : > { %1872 = vmatprep.mubr.bf16.mxu1 %v1388_v26 }
 0x1c4   : > { %1873 = vmatmul.mubr.bf16.gmra.mxu1 %v1389_v29 }
 0x232   : > { %v1846_v37 = vpop.f32.mrf.mxu0 }
 0x233   : > { %v1504_v32 = vadd.f32 %v1846_v37, %v3071_v47 }
 0x234   : > { %v1495_v17 = vpop.f32.mrf.mxu0 }
 0x235   : > { %1625 = vst.msk [vmem:[%s3078_s6 + $0x10] sm:$0xff] %vm1622_vm1, %v1504_v32  ;;  %v1496_v45 = vadd.f32 %v3071_v47, %v1495_v17 }
 0x236   : > { %v1847_v34 = vpop.f32.mrf.mxu0 }
 0x237   : > { %1623 = vst.msk [vmem:[%s3078_s6] sm:$0xff] %vm1622_vm1, %v1496_v45  ;;  %v1507_v51 = vadd.f32 %v1847_v34, %v3071_v47 }
 0x238   : > { %v1498_v0 = vpop.f32.mrf.mxu0 }
 0x239   : > { %1626 = vst.msk [vmem:[%s3078_s6 + $0x18] sm:$0xff] %vm1622_vm1, %v1507_v51  ;;  %v1499_v10 = vadd.f32 %v3071_v47, %v1498_v0 }
 0x23b   : > { %1624 = vst.msk [vmem:[%s3078_s6 + $0x8] sm:$0xff] %vm1622_vm1, %v1499_v10 }
 0x253   : > { %v1850_v57 = vpop.f32.mrf.mxu1 }
 0x254   : > { %v1520_v13 = vadd.f32 %v1850_v57, %v3071_v47 }
 0x255   : > { %v1511_v48 = vpop.f32.mrf.mxu1 }
 0x256   : > { %1629 = vst.msk [vmem:[%s3078_s6 + $0x30] sm:$0xff] %vm1622_vm1, %v1520_v13  ;;  %v1512_v35 = vadd.f32 %v3071_v47, %v1511_v48 }
 0x257   : > { %v1851_v63 = vpop.f32.mrf.mxu1 }
 0x258   : > { %1627 = vst.msk [vmem:[%s3078_s6 + $0x20] sm:$0xff] %vm1622_vm1, %v1512_v35  ;;  %v1523_v1 = vadd.f32 %v1851_v63, %v3071_v47 }
 0x259   : > { %v1514_v39 = vpop.f32.mrf.mxu1 }
 0x25a   : > { %1630 = vst.msk [vmem:[%s3078_s6 + $0x38] sm:$0xff] %vm1622_vm1, %v1523_v1  ;;  %v1515_v43 = vadd.f32 %v3071_v47, %v1514_v39 }
 0x25b   : > { %v1854_v33 = vpop.f32.mrf.mxu1 }
 0x25c   : > { %1628 = vst.msk [vmem:[%s3078_s6 + $0x28] sm:$0xff] %vm1622_vm1, %v1515_v43  ;;  %v1536_v22 = vadd.f32 %v1854_v33, %v3071_v47 }
 0x25d   : > { %v1527_v53 = vpop.f32.mrf.mxu1 }
 0x25e   : > { %1633 = vst.msk [vmem:[%s3078_s6 + $0x50] sm:$0xff] %vm1622_vm1, %v1536_v22  ;;  %v1528_v7 = vadd.f32 %v3071_v47, %v1527_v53 }
 0x25f   : > { %v1855_v40 = vpop.f32.mrf.mxu1 }
 0x260   : > { %1631 = vst.msk [vmem:[%s3078_s6 + $0x40] sm:$0xff] %vm1622_vm1, %v1528_v7  ;;  %v1539_v27 = vadd.f32 %v1855_v40, %v3071_v47 }
 0x261   : > { %v1530_v31 = vpop.f32.mrf.mxu1 }
 0x262   : > { %1634 = vst.msk [vmem:[%s3078_s6 + $0x58] sm:$0xff] %vm1622_vm1, %v1539_v27  ;;  %v1531_v36 = vadd.f32 %v3071_v47, %v1530_v31 }
 0x264   : > { %v1858_v59 = vpop.f32.mrf.mxu1  ;;  %1632 = vst.msk [vmem:[%s3078_s6 + $0x48] sm:$0xff] %vm1622_vm1, %v1531_v36 }
 0x265   : > { %v1552_v52 = vadd.f32 %v1858_v59, %v3071_v47 }
 0x266   : > { %v1543_v16 = vpop.f32.mrf.mxu1 }
 0x267   : > { %1637 = vst.msk [vmem:[%s3078_s6 + $0x70] sm:$0xff] %vm1622_vm1, %v1552_v52  ;;  %v1544_v2 = vadd.f32 %v3071_v47, %v1543_v16 }
 0x268   : > { %v1859_v18 = vpop.f32.mrf.mxu1 }
 0x269   : > { %1635 = vst.msk [vmem:[%s3078_s6 + $0x60] sm:$0xff] %vm1622_vm1, %v1544_v2  ;;  %v1555_v60 = vadd.f32 %v1859_v18, %v3071_v47 }
 0x26a   : > { %v1546_v56 = vpop.f32.mrf.mxu1 }
 0x26b   : > { %1638 = vst.msk [vmem:[%s3078_s6 + $0x78] sm:$0xff] %vm1622_vm1, %v1555_v60  ;;  %v1547_v25 = vadd.f32 %v3071_v47, %v1546_v56 }
 0x26c   : > { %v1862_v58 = vpop.f32.mrf.mxu1 }
 0x26d   : > { %1636 = vst.msk [vmem:[%s3078_s6 + $0x68] sm:$0xff] %vm1622_vm1, %v1547_v25  ;;  %v1568_v61 = vadd.f32 %v1862_v58, %v3071_v47 }
 0x26e   : > { %v1559_v54 = vpop.f32.mrf.mxu1 }
 0x26f   : > { %1641 = vst.msk [vmem:[%s3078_s6 + $0x90] sm:$0xff] %vm1622_vm1, %v1568_v61  ;;  %v1560_v30 = vadd.f32 %v3071_v47, %v1559_v54 }
 0x270   : > { %v1863_v9 = vpop.f32.mrf.mxu1 }
 0x271   : > { %1639 = vst.msk [vmem:[%s3078_s6 + $0x80] sm:$0xff] %vm1622_vm1, %v1560_v30  ;;  %v1571_v49 = vadd.f32 %v1863_v9, %v3071_v47 }
 0x272   : > { %v1562_v19 = vpop.f32.mrf.mxu1 }
 0x273   : > { %1642 = vst.msk [vmem:[%s3078_s6 + $0x98] sm:$0xff] %vm1622_vm1, %v1571_v49  ;;  %v1563_v44 = vadd.f32 %v3071_v47, %v1562_v19 }
 0x274   : > { %v1866_v62 = vpop.f32.mrf.mxu1 }
 0x275   : > { %1640 = vst.msk [vmem:[%s3078_s6 + $0x88] sm:$0xff] %vm1622_vm1, %v1563_v44  ;;  %v1584_v24 = vadd.f32 %v1866_v62, %v3071_v47 }
 0x276   : > { %v1575_v6 = vpop.f32.mrf.mxu1 }
 0x277   : > { %1645 = vst.msk [vmem:[%s3078_s6 + $0xb0] sm:$0xff] %vm1622_vm1, %v1584_v24  ;;  %v1576_v20 = vadd.f32 %v3071_v47, %v1575_v6 }
 0x278   : > { %v1867_v28 = vpop.f32.mrf.mxu1 }
 0x279   : > { %1643 = vst.msk [vmem:[%s3078_s6 + $0xa0] sm:$0xff] %vm1622_vm1, %v1576_v20  ;;  %v1587_v55 = vadd.f32 %v1867_v28, %v3071_v47 }
 0x27a   : > { %v1578_v41 = vpop.f32.mrf.mxu1 }
 0x27b   : > { %1646 = vst.msk [vmem:[%s3078_s6 + $0xb8] sm:$0xff] %vm1622_vm1, %v1587_v55  ;;  %v1579_v5 = vadd.f32 %v3071_v47, %v1578_v41 }
 0x27c   : > { %v1870_v38 = vpop.f32.mrf.mxu1 }
 0x27d   : > { %1644 = vst.msk [vmem:[%s3078_s6 + $0xa8] sm:$0xff] %vm1622_vm1, %v1579_v5  ;;  %v1600_v8 = vadd.f32 %v1870_v38, %v3071_v47 }
 0x27e   : > { %v1591_v23 = vpop.f32.mrf.mxu1 }
 0x27f   : > { %1649 = vst.msk [vmem:[%s3078_s6 + $0xd0] sm:$0xff] %vm1622_vm1, %v1600_v8  ;;  %v1592_v21 = vadd.f32 %v3071_v47, %v1591_v23 }
 0x280   : > { %v1871_v26 = vpop.f32.mrf.mxu1 }
 0x281   : > { %1647 = vst.msk [vmem:[%s3078_s6 + $0xc0] sm:$0xff] %vm1622_vm1, %v1592_v21  ;;  %v1603_v3 = vadd.f32 %v1871_v26, %v3071_v47 }
 0x282   : > { %v1594_v4 = vpop.f32.mrf.mxu1 }
 0x283   : > { %1650 = vst.msk [vmem:[%s3078_s6 + $0xd8] sm:$0xff] %vm1622_vm1, %v1603_v3  ;;  %v1595_v50 = vadd.f32 %v3071_v47, %v1594_v4 }
 0x284   : > { %v1874_v11 = vpop.f32.mrf.mxu1 }
 0x285   : > { %1648 = vst.msk [vmem:[%s3078_s6 + $0xc8] sm:$0xff] %vm1622_vm1, %v1595_v50  ;;  %v1616_v14 = vadd.f32 %v1874_v11, %v3071_v47 }
 0x286   : > { %v1607_v46 = vpop.f32.mrf.mxu1 }
 0x287   : > { %1653 = vst.msk [vmem:[%s3078_s6 + $0xf0] sm:$0xff] %vm1622_vm1, %v1616_v14  ;;  %v1608_v42 = vadd.f32 %v3071_v47, %v1607_v46 }
 0x288   : > { %v1875_v12 = vpop.f32.mrf.mxu1 }
 0x289   : > { %1651 = vst.msk [vmem:[%s3078_s6 + $0xe0] sm:$0xff] %vm1622_vm1, %v1608_v42  ;;  %v1619_v15 = vadd.f32 %v1875_v12, %v3071_v47 }
 0x28a   : > { %v1610_v29 = vpop.f32.mrf.mxu1 }
 0x28b   : > { %1654 = vst.msk [vmem:[%s3078_s6 + $0xf8] sm:$0xff] %vm1622_vm1, %v1619_v15  ;;  %v1611_v37 = vadd.f32 %v3071_v47, %v1610_v29 }
 0x28d   : > { %1652 = vst.msk [vmem:[%s3078_s6 + $0xe8] sm:$0xff] %vm1622_vm1, %v1611_v37 }
 0x28e PF: > { %s15_s18 = sadd.s32 1, %s2045_s18  }
 0x28f   : > { %p12_p4 = scmp.ge.s32.totalorder %s15_s18, 4  }
 0x291   :  { %14 = sbr.rel (!%p12_p4) target bundleno = 1 (0x1), region = 70 }

// kernel: ddfno_forward.11
= control target key start
LH: loop header
LB: loop body
LE: loop exit
PB: predicated region body
PF: predicated region fallthrough
CT: control target
= control target key end

     0   :  { %s15765_s21 = smov 0   ;;  %s18578_s0 = inlined_call_operand.vmem [shape: f32[128,2,32], index: 0, kind: input, shape index: {}]   ;;  %s18579_s1 = inlined_call_operand.vmem [shape: f32[128,2,32], index: 1, kind: input, shape index: {}]   ;;  %s18580_s2 = inlined_call_operand.vmem [shape: bf16[128,32,32], index: 2, kind: input, shape index: {}]   ;;  %s18581_s3 = inlined_call_operand.vmem [shape: bf16[128,32,32], index: 3, kind: input, shape index: {}]   ;;  %s18582_s4 = inlined_call_operand.vmem [shape: bf16[128,32,32], index: 4, kind: input, shape index: {}]   ;;  %s18583_s5 = inlined_call_operand.vmem [shape: f32[128,2,32], index: 5, kind: output, shape index: {0}]   ;;  %s18584_s6 = inlined_call_operand.vmem [shape: f32[128,2,32], index: 6, kind: output, shape index: {1}]  }
   0x1 LB: > { %s12539_s22 = sadd.s32 4294967295, %s15726_s21   ;;  %p12543_p0 = scmp.ge.s32.totalorder %s15726_s21, 1  ;;  %s15726_s21 = sphi %s15765_s21, %s17_s21  }
   0x2   : > { %p263_p1 = scmp.lt.s32.totalorder %s15726_s21, 3 }
   0x4   : > { %p264_p2 = pnand %p12543_p0, %p263_p1 }
   0x6   : > { %267 = sbr.rel (%p264_p2) target bundleno = 984 (0x3d8), region = 40 }
   0xb   : > { %s12544_s23 = sshll.u32 %s12539_s22, 6  ;;  %v15728_v0 = vmov 0.0   ;;  %vm15729_vm0 = vmmov 0   ;;  %vm1019_vm1 = vcmask 261120   ;;  %vm12144_vm2 = vcmask 254976  }
   0xc   : > { %13718 = vmatprep.subr.bf16.mxu0 %v15728_v0  ;;  %13726 = vmatprep.subr.bf16.mxu1 %v15728_v0  ;;  %p322_p3 = scmp.lt.s32.totalorder %s12544_s23, 127 }
   0xd   : > { %13722 = vmatprep.mubr.msk.bf16.mxu0 %vm15729_vm0, %v15728_v0  ;;  %13730 = vmatprep.mubr.msk.bf16.mxu1 %vm15729_vm0, %v15728_v0 }
   0xe   : > { %s18931_s23 = smov (!%p322_p3, %s12544_s23), 127 }
   0xf   : > { %s15779_s24 = sshll.u32 %s18931_s23, 4  ;;  %s15781_s25 = sshll.u32 %s18931_s23, 1 }
  0x10   : > { %s15787_s28 = scalar_lea.vmem %s18580_s2, %s15779_s24  ;;  %s15795_s7 = scalar_lea.vmem %s18578_s0, %s15781_s25 }
  0x11   : > { %v15264_v1 = vld [vmem:[%s15787_s28 + $0x8] sm:$0xff]   ;;  %v15265_v2 = vld [vmem:[%s15787_s28 + $0x18] sm:$0xff]   ;;  %s15801_s10 = scalar_lea.vmem %s18579_s1, %s15781_s25  ;;  %v15266_v3 = vld [vmem:[%s15787_s28] sm:$0xff]   ;;  %s16508_s13 = scalar_lea.vmem %s18581_s3, %s15779_s24 }
  0x12   : > { %13719 = vmatpush3.bf16.msra.mxu0 %v15264_v1  ;;  %13727 = vmatpush3.bf16.msra.mxu1 %v15265_v2  ;;  %v15267_v4 = vld [vmem:[%s15787_s28 + $0x10] sm:$0xff]   ;;  %v367_v5 = vld [vmem:[%s15795_s7] sm:$0x3]  ;;  %v368_v7 = vld [vmem:[%s15795_s7 + $0x2] sm:$0x3]  ;;  %s16787_s16 = scalar_lea.vmem %s18582_s4, %s15779_s24  ;;  %s17241_s19 = scalar_lea.vmem %s18583_s5, %s15781_s25 }
  0x13   : > { %13720 = vmatprep.subr.bf16.mxu0 %v15728_v0  ;;  %13728 = vmatprep.subr.bf16.mxu1 %v15728_v0  ;;  %v431_v6 = vld [vmem:[%s15801_s10] sm:$0x3]  ;;  %v495_v8 = vpack.c.bf16 %v367_v5, %v367_v5  ;;  %v432_v10 = vld [vmem:[%s15801_s10 + $0x2] sm:$0x3]  ;;  %v496_v11 = vpack.c.bf16 %v368_v7, %v368_v7  ;;  %v15268_v13 = vld [vmem:[%s15787_s28 + $0x28] sm:$0xff]   ;;  %s18197_s23 = scalar_lea.vmem %s18584_s6, %s15781_s25 }
  0x14   : > { %v15810_v9 = vadd.f32 %v431_v6, %v367_v5  ;;  %v15813_v12 = vadd.f32 %v432_v10, %v368_v7  ;;  %v15269_v14 = vld [vmem:[%s15787_s28 + $0x38] sm:$0xff]   ;;  %v15270_v15 = vld [vmem:[%s15787_s28 + $0x20] sm:$0xff]   ;;  %v15271_v21 = vld [vmem:[%s15787_s28 + $0x30] sm:$0xff]  }
  0x15   : > { %v369_v16 = vld [vmem:[%s15795_s7 + $0x4] sm:$0x3]  ;;  %v370_v19 = vld [vmem:[%s15795_s7 + $0x6] sm:$0x3]  ;;  %v15272_v25 = vld [vmem:[%s15787_s28 + $0x48] sm:$0xff]  }
  0x16   : > { %13721 = vmatpush3.bf16.msra.mxu0 %v15266_v3  ;;  %13729 = vmatpush3.bf16.msra.mxu1 %v15267_v4  ;;  %v433_v17 = vld [vmem:[%s15801_s10 + $0x4] sm:$0x3]  ;;  %v434_v20 = vld [vmem:[%s15801_s10 + $0x6] sm:$0x3]  ;;  %v497_v23 = vpack.c.bf16 %v369_v16, %v369_v16  ;;  %v498_v24 = vpack.c.bf16 %v370_v19, %v370_v19  ;;  %v15273_v26 = vld [vmem:[%s15787_s28 + $0x58] sm:$0xff]  }
  0x17   : > { %13734 = vmatprep.subr.bf16.mxu0 %v15728_v0  ;;  %13742 = vmatprep.subr.bf16.mxu1 %v15728_v0  ;;  %v15824_v18 = vadd.f32 %v433_v17, %v369_v16  ;;  %v15830_v22 = vadd.f32 %v434_v20, %v370_v19  ;;  %v371_v27 = vld [vmem:[%s15795_s7 + $0x8] sm:$0x3]  ;;  %v372_v29 = vld [vmem:[%s15795_s7 + $0xa] sm:$0x3]  ;;  %v15274_v33 = vld [vmem:[%s15787_s28 + $0x40] sm:$0xff]  }
  0x18   : > { %v435_v28 = vld [vmem:[%s15801_s10 + $0x8] sm:$0x3]  ;;  %v436_v31 = vld [vmem:[%s15801_s10 + $0xa] sm:$0x3]  ;;  %v15275_v34 = vld [vmem:[%s15787_s28 + $0x50] sm:$0xff]   ;;  %v499_v38 = vpack.c.bf16 %v371_v27, %v371_v27  ;;  %v500_v41 = vpack.c.bf16 %v372_v29, %v372_v29 }
  0x19   : > { %13723 = vmatmul.mubr.msk.bf16.vlgmr.msra.gmra.mxu0 %vm1019_vm1, %v495_v8  ;;  %13731 = vmatmul.mubr.msk.bf16.vlgmr.msra.gmra.mxu1 %vm1019_vm1, %v496_v11  ;;  %v15844_v30 = vadd.f32 %v435_v28, %v371_v27  ;;  %v15848_v32 = vadd.f32 %v436_v31, %v372_v29  ;;  %v373_v35 = vld [vmem:[%s15795_s7 + $0xc] sm:$0x3]  ;;  %v374_v37 = vld [vmem:[%s15795_s7 + $0xe] sm:$0x3]  ;;  %v15277_v44 = vld [vmem:[%s15787_s28 + $0x78] sm:$0xff]  }
  0x1a   : > { %13735 = vmatpush3.bf16.msra.mxu0 %v15268_v13  ;;  %13743 = vmatpush3.bf16.msra.mxu1 %v15269_v14  ;;  %v437_v36 = vld [vmem:[%s15801_s10 + $0xc] sm:$0x3]  ;;  %v438_v40 = vld [vmem:[%s15801_s10 + $0xe] sm:$0x3]  ;;  %v15278_v45 = vld [vmem:[%s15787_s28 + $0x60] sm:$0xff]   ;;  %v501_v53 = vpack.c.bf16 %v373_v35, %v373_v35  ;;  %v502_v54 = vpack.c.bf16 %v374_v37, %v374_v37 }
  0x1b   : > { %13736 = vmatprep.subr.bf16.mxu0 %v15728_v0  ;;  %13744 = vmatprep.subr.bf16.mxu1 %v15728_v0  ;;  %v15862_v39 = vadd.f32 %v437_v36, %v373_v35  ;;  %v15276_v42 = vld [vmem:[%s15787_s28 + $0x68] sm:$0xff]   ;;  %v15866_v43 = vadd.f32 %v438_v40, %v374_v37  ;;  %v375_v46 = vld [vmem:[%s15795_s7 + $0x10] sm:$0x3]  ;;  %v376_v49 = vld [vmem:[%s15795_s7 + $0x12] sm:$0x3] }
  0x1c   : > { %13738 = vmatprep.mubr.msk.bf16.mxu0 %vm15729_vm0, %v15728_v0  ;;  %13746 = vmatprep.mubr.msk.bf16.mxu1 %vm15729_vm0, %v15728_v0  ;;  %v439_v47 = vld [vmem:[%s15801_s10 + $0x10] sm:$0x3]  ;;  %v440_v50 = vld [vmem:[%s15801_s10 + $0x12] sm:$0x3]  ;;  %v15280_v55 = vld [vmem:[%s15787_s28 + $0x88] sm:$0xff]   ;;  %v503_v5 = vpack.c.bf16 %v375_v46, %v375_v46  ;;  %v504_v8 = vpack.c.bf16 %v376_v49, %v376_v49 }
  0x1d   : > { %v15876_v48 = vadd.f32 %v439_v47, %v375_v46  ;;  %v15279_v51 = vld [vmem:[%s15787_s28 + $0x70] sm:$0xff]   ;;  %v15882_v52 = vadd.f32 %v440_v50, %v376_v49  ;;  %v15281_v56 = vld [vmem:[%s15787_s28 + $0x98] sm:$0xff]   ;;  %v15282_v63 = vld [vmem:[%s15787_s28 + $0x80] sm:$0xff]  }
  0x1e   : > { %13737 = vmatpush3.bf16.msra.mxu0 %v15270_v15  ;;  %13745 = vmatpush3.bf16.msra.mxu1 %v15271_v21  ;;  %v377_v57 = vld [vmem:[%s15795_s7 + $0x14] sm:$0x3]  ;;  %v378_v59 = vld [vmem:[%s15795_s7 + $0x16] sm:$0x3]  ;;  %v15910_v2 = vld [vmem:[%s15795_s7 + $0x18] sm:$0x3] }
  0x1f   : > { %13750 = vmatprep.subr.bf16.mxu0 %v15728_v0  ;;  %13758 = vmatprep.subr.bf16.mxu1 %v15728_v0  ;;  %v441_v58 = vld [vmem:[%s15801_s10 + $0x14] sm:$0x3]  ;;  %v442_v61 = vld [vmem:[%s15801_s10 + $0x16] sm:$0x3]  ;;  %v443_v3 = vld [vmem:[%s15801_s10 + $0x18] sm:$0x3] }
  0x20   : > { %v15896_v60 = vadd.f32 %v441_v58, %v377_v57  ;;  %v15900_v62 = vadd.f32 %v442_v61, %v378_v59  ;;  %v15283_v1 = vld [vmem:[%s15787_s28 + $0x90] sm:$0xff]   ;;  %v15914_v4 = vld [vmem:[%s15795_s7 + $0x1a] sm:$0x3]  ;;  %v15919_v6 = vadd.f32 %v443_v3, %v15910_v2  ;;  %v15284_v10 = vld [vmem:[%s15787_s28 + $0xa8] sm:$0xff]  }
  0x21   : > { %13739 = vmatmul.mubr.msk.bf16.vlgmr.msra.gmra.mxu0 %vm1019_vm1, %v497_v23  ;;  %13747 = vmatmul.mubr.msk.bf16.vlgmr.msra.gmra.mxu1 %vm1019_vm1, %v498_v24  ;;  %v444_v7 = vld [vmem:[%s15801_s10 + $0x1a] sm:$0x3]  ;;  %v15286_v14 = vld [vmem:[%s15787_s28 + $0xa0] sm:$0xff]   ;;  %v15932_v15 = vld [vmem:[%s15795_s7 + $0x1c] sm:$0x3]  ;;  %v505_v24 = vpack.c.bf16 %v377_v57, %v377_v57  ;;  %v508_v46 = vpack.c.bf16 %v15914_v4, %v15914_v4 }
  0x22   : > { %13751 = vmatpush3.bf16.msra.mxu0 %v15272_v25  ;;  %13759 = vmatpush3.bf16.msra.mxu1 %v15273_v26  ;;  %v15924_v11 = vadd.f32 %v444_v7, %v15914_v4  ;;  %v15285_v13 = vld [vmem:[%s15787_s28 + $0xb8] sm:$0xff]   ;;  %v15287_v21 = vld [vmem:[%s15787_s28 + $0xb0] sm:$0xff]   ;;  %v506_v25 = vpack.c.bf16 %v378_v59, %v378_v59  ;;  %v15288_v26 = vld [vmem:[%s15787_s28 + $0xc8] sm:$0xff]   ;;  %v509_v61 = vpack.c.bf16 %v15932_v15, %v15932_v15 }
  0x23   : > { %13752 = vmatprep.subr.bf16.mxu0 %v15728_v0  ;;  %13760 = vmatprep.subr.bf16.mxu1 %v15728_v0  ;;  %v445_v16 = vld [vmem:[%s15801_s10 + $0x1c] sm:$0x3]  ;;  %v15940_v19 = vld [vmem:[%s15795_s7 + $0x1e] sm:$0x3]  ;;  %v15957_v28 = vld [vmem:[%s15795_s7 + $0x20] sm:$0x3] }
  0x24   : > { %13754 = vmatprep.mubr.msk.bf16.mxu0 %vm15729_vm0, %v15728_v0  ;;  %13762 = vmatprep.mubr.msk.bf16.mxu1 %vm15729_vm0, %v15728_v0  ;;  %v15937_v17 = vadd.f32 %v445_v16, %v15932_v15  ;;  %v446_v20 = vld [vmem:[%s15801_s10 + $0x1e] sm:$0x3]  ;;  %v447_v29 = vld [vmem:[%s15801_s10 + $0x20] sm:$0x3]  ;;  %v15961_v31 = vld [vmem:[%s15795_s7 + $0x22] sm:$0x3] }
  0x25   : > { %v15946_v23 = vadd.f32 %v446_v20, %v15940_v19  ;;  %v15289_v27 = vld [vmem:[%s15787_s28 + $0xd8] sm:$0xff]   ;;  %v15290_v36 = vld [vmem:[%s15787_s28 + $0xc0] sm:$0xff]   ;;  %v15291_v37 = vld [vmem:[%s15787_s28 + $0xd0] sm:$0xff]   ;;  %v511_v20 = vpack.c.bf16 %v15957_v28, %v15957_v28 }
  0x26   : > { %13753 = vmatpush3.bf16.msra.mxu0 %v15274_v33  ;;  %13761 = vmatpush3.bf16.msra.mxu1 %v15275_v34  ;;  %v15965_v33 = vadd.f32 %v447_v29, %v15957_v28  ;;  %v448_v34 = vld [vmem:[%s15801_s10 + $0x22] sm:$0x3]  ;;  %v449_v40 = vld [vmem:[%s15801_s10 + $0x24] sm:$0x3]  ;;  %v15292_v47 = vld [vmem:[%s15787_s28 + $0xe8] sm:$0xff]  }
  0x27   : > { %13766 = vmatprep.subr.bf16.mxu0 %v15728_v0  ;;  %13774 = vmatprep.subr.bf16.mxu1 %v15728_v0  ;;  %v15970_v35 = vadd.f32 %v448_v34, %v15961_v31  ;;  %v15293_v50 = vld [vmem:[%s15787_s28 + $0xf8] sm:$0xff]   ;;  %v452_v57 = vld [vmem:[%s15801_s10 + $0x2a] sm:$0x3]  ;;  %v15295_v58 = vld [vmem:[%s15787_s28 + $0xf0] sm:$0xff]  }
  0x28   : > { %v16035_v3 = vld [vmem:[%s15795_s7 + $0x2c] sm:$0x3]  ;;  %v16058_v15 = vld [vmem:[%s15795_s7 + $0x30] sm:$0x3]  ;;  %v15301_v29 = vld [vmem:[%s15787_s28 + $0x138] sm:$0xff]  }
  0x29   : > { %13755 = vmatmul.mubr.msk.bf16.vlgmr.msra.gmra.mxu0 %vm1019_vm1, %v499_v38  ;;  %13763 = vmatmul.mubr.msk.bf16.vlgmr.msra.gmra.mxu1 %vm1019_vm1, %v500_v41  ;;  %18665 = vst [vmem:[#allocation2_spill] sm:$0xff] %v15970_v35  ;;  %v15980_v38 = vld [vmem:[%s15795_s7 + $0x24] sm:$0x3]  ;;  %v15984_v41 = vld [vmem:[%s15795_s7 + $0x26] sm:$0x3] }
  0x2a   : > { %13767 = vmatpush3.bf16.msra.mxu0 %v15276_v42  ;;  %13775 = vmatpush3.bf16.msra.mxu1 %v15277_v44  ;;  %v507_v42 = vpack.c.bf16 %v15910_v2, %v15910_v2  ;;  %v15991_v44 = vadd.f32 %v449_v40, %v15980_v38  ;;  %v15297_v2 = vld [vmem:[%s15787_s28 + $0x118] sm:$0xff]   ;;  %v453_v4 = vld [vmem:[%s15801_s10 + $0x2c] sm:$0x3]  ;;  %v455_v16 = vld [vmem:[%s15801_s10 + $0x30] sm:$0x3] }
  0x2b   : > { %13768 = vmatprep.subr.bf16.mxu0 %v15728_v0  ;;  %13776 = vmatprep.subr.bf16.mxu1 %v15728_v0  ;;  %v16043_v7 = vadd.f32 %v453_v4, %v16035_v3  ;;  %v15302_v28 = vld [vmem:[%s15787_s28 + $0x120] sm:$0xff]   ;;  %v16084_v34 = vld [vmem:[%s15795_s7 + $0x34] sm:$0x3]  ;;  %v458_v40 = vld [vmem:[%s15801_s10 + $0x36] sm:$0x3] }
  0x2c   : > { %13770 = vmatprep.mubr.msk.bf16.mxu0 %vm15729_vm0, %v15728_v0  ;;  %13778 = vmatprep.mubr.msk.bf16.mxu1 %vm15729_vm0, %v15728_v0  ;;  %18666 = vst [vmem:[#allocation3_spill] sm:$0xff] %v15991_v44  ;;  %v461_v4 = vld [vmem:[%s15801_s10 + $0x3c] sm:$0x3] }
  0x2d   : > { %18670 = vst [vmem:[#allocation7_spill] sm:$0xff] %v16043_v7  ;;  %v15423_v7 = vld [vmem:[%s16508_s13 + $0xf0] sm:$0xff]  }
  0x2e   : > { %13769 = vmatpush3.bf16.msra.mxu0 %v15278_v45  ;;  %13777 = vmatpush3.bf16.msra.mxu1 %v15279_v51  ;;  %v450_v45 = vld [vmem:[%s15801_s10 + $0x26] sm:$0x3] }
  0x2f   : > { %13782 = vmatprep.subr.bf16.mxu0 %v15728_v0  ;;  %13790 = vmatprep.subr.bf16.mxu1 %v15728_v0  ;;  %v15998_v49 = vadd.f32 %v450_v45, %v15984_v41  ;;  %v15294_v51 = vld [vmem:[%s15787_s28 + $0xe0] sm:$0xff]  }
  0x31   : > { %13771 = vmatmul.mubr.msk.bf16.vlgmr.msra.gmra.mxu0 %vm1019_vm1, %v501_v53  ;;  %13779 = vmatmul.mubr.msk.bf16.vlgmr.msra.gmra.mxu1 %vm1019_vm1, %v502_v54  ;;  %18667 = vst [vmem:[#allocation4_spill] sm:$0xff] %v15998_v49  ;;  %v16006_v53 = vld [vmem:[%s15795_s7 + $0x28] sm:$0x3] }
  0x32   : > { %13783 = vmatpush3.bf16.msra.mxu0 %v15280_v55  ;;  %13791 = vmatpush3.bf16.msra.mxu1 %v15281_v56  ;;  %v451_v54 = vld [vmem:[%s15801_s10 + $0x28] sm:$0x3]  ;;  %v16014_v56 = vld [vmem:[%s15795_s7 + $0x2a] sm:$0x3] }
  0x33   : > { %13784 = vmatprep.subr.bf16.mxu0 %v15728_v0  ;;  %13792 = vmatprep.subr.bf16.mxu1 %v15728_v0  ;;  %v16011_v55 = vadd.f32 %v451_v54, %v16006_v53  ;;  %v16020_v59 = vadd.f32 %v452_v57, %v16014_v56  ;;  %v16113_v54 = vld [vmem:[%s15795_s7 + $0x38] sm:$0x3] }
  0x34   : > { %13786 = vmatprep.mubr.msk.bf16.mxu0 %vm15729_vm0, %v15728_v0  ;;  %13794 = vmatprep.mubr.msk.bf16.mxu1 %vm15729_vm0, %v15728_v0  ;;  %v459_v57 = vld [vmem:[%s15801_s10 + $0x38] sm:$0x3] }
  0x35   : > { %18668 = vst [vmem:[#allocation5_spill] sm:$0xff] %v16011_v55  ;;  %18669 = vst [vmem:[#allocation6_spill] sm:$0xff] %v16020_v59  ;;  %v15427_v55 = vld [vmem:[%s16508_s13 + $0x110] sm:$0xff]  }
  0x36   : > { %13785 = vmatpush3.bf16.msra.mxu0 %v15282_v63  ;;  %13793 = vmatpush3.bf16.msra.mxu1 %v15283_v1  ;;  %v510_v63 = vpack.c.bf16 %v15940_v19, %v15940_v19  ;;  %v15296_v1 = vld [vmem:[%s15787_s28 + $0x108] sm:$0xff]   ;;  %v16062_v19 = vld [vmem:[%s15795_s7 + $0x32] sm:$0x3] }
  0x37   : > { %13798 = vmatprep.subr.bf16.mxu0 %v15728_v0  ;;  %13806 = vmatprep.subr.bf16.mxu1 %v15728_v0 }
  0x39   : > { %13787 = vmatmul.mubr.msk.bf16.vlgmr.msra.gmra.mxu0 %vm1019_vm1, %v503_v5  ;;  %13795 = vmatmul.mubr.msk.bf16.vlgmr.msra.gmra.mxu1 %vm1019_vm1, %v504_v8  ;;  %v16039_v5 = vld [vmem:[%s15795_s7 + $0x2e] sm:$0x3] }
  0x3a   : > { %13799 = vmatpush3.bf16.msra.mxu0 %v15284_v10  ;;  %13807 = vmatpush3.bf16.msra.mxu1 %v15285_v13  ;;  %v454_v8 = vld [vmem:[%s15801_s10 + $0x2e] sm:$0x3]  ;;  %v15298_v13 = vld [vmem:[%s15787_s28 + $0x100] sm:$0xff]  }
  0x3b   : > { %13800 = vmatprep.subr.bf16.mxu0 %v15728_v0  ;;  %13808 = vmatprep.subr.bf16.mxu1 %v15728_v0  ;;  %v16048_v10 = vadd.f32 %v454_v8, %v16039_v5  ;;  %v16140_v8 = vld [vmem:[%s15795_s7 + $0x3e] sm:$0x3] }
  0x3c   : > { %13802 = vmatprep.mubr.msk.bf16.mxu0 %vm15729_vm0, %v15728_v0  ;;  %13810 = vmatprep.mubr.msk.bf16.mxu1 %vm15729_vm0, %v15728_v0 }
  0x3d   : > { %18671 = vst [vmem:[#allocation8_spill] sm:$0xff] %v16048_v10 }
  0x3e   : > { %13801 = vmatpush3.bf16.msra.mxu0 %v15286_v14  ;;  %13809 = vmatpush3.bf16.msra.mxu1 %v15287_v21  ;;  %v15299_v14 = vld [vmem:[%s15787_s28 + $0x110] sm:$0xff]   ;;  %v16069_v21 = vadd.f32 %v455_v16, %v16058_v15  ;;  %v462_v16 = vld [vmem:[%s15801_s10 + $0x3e] sm:$0x3] }
  0x3f   : > { %13814 = vmatprep.subr.bf16.mxu0 %v15728_v0  ;;  %13822 = vmatprep.subr.bf16.mxu1 %v15728_v0 }
  0x40   : > { %18672 = vst [vmem:[#allocation9_spill] sm:$0xff] %v16069_v21  ;;  %v15419_v21 = vld [vmem:[%s16508_s13 + $0xd0] sm:$0xff]  }
  0x41   : > { %13803 = vmatmul.mubr.msk.bf16.vlgmr.msra.gmra.mxu0 %vm1019_vm1, %v505_v24  ;;  %13811 = vmatmul.mubr.msk.bf16.vlgmr.msra.gmra.mxu1 %vm1019_vm1, %v506_v25  ;;  %v456_v24 = vld [vmem:[%s15801_s10 + $0x32] sm:$0x3]  ;;  %v512_v25 = vpack.c.bf16 %v15961_v31, %v15961_v31 }
  0x42   : > { %13815 = vmatpush3.bf16.msra.mxu0 %v15288_v26  ;;  %13823 = vmatpush3.bf16.msra.mxu1 %v15289_v27  ;;  %v15300_v26 = vld [vmem:[%s15787_s28 + $0x128] sm:$0xff]   ;;  %v16076_v27 = vadd.f32 %v456_v24, %v16062_v19 }
  0x43   : > { %13816 = vmatprep.subr.bf16.mxu0 %v15728_v0  ;;  %13824 = vmatprep.subr.bf16.mxu1 %v15728_v0  ;;  %v15308_v24 = vld [vmem:[%s15787_s28 + $0x168] sm:$0xff]  }
  0x44   : > { %13818 = vmatprep.mubr.msk.bf16.mxu0 %vm15729_vm0, %v15728_v0  ;;  %13826 = vmatprep.mubr.msk.bf16.mxu1 %vm15729_vm0, %v15728_v0  ;;  %18673 = vst [vmem:[#allocation10_spill] sm:$0xff] %v16076_v27 }
  0x46   : > { %13817 = vmatpush3.bf16.msra.mxu0 %v15290_v36  ;;  %13825 = vmatpush3.bf16.msra.mxu1 %v15291_v37  ;;  %v457_v36 = vld [vmem:[%s15801_s10 + $0x34] sm:$0x3]  ;;  %v16092_v37 = vld [vmem:[%s15795_s7 + $0x36] sm:$0x3] }
  0x47   : > { %13830 = vmatprep.subr.bf16.mxu0 %v15728_v0  ;;  %13838 = vmatprep.subr.bf16.mxu1 %v15728_v0  ;;  %v16089_v31 = vadd.f32 %v457_v36, %v16084_v34  ;;  %v16098_v45 = vadd.f32 %v458_v40, %v16092_v37  ;;  %v16170_v36 = vld [vmem:[%s15795_s7 + $0x42] sm:$0x3] }
  0x48   : > { %v464_v40 = vld [vmem:[%s15801_s10 + $0x42] sm:$0x3] }
  0x49   : > { %13819 = vmatmul.mubr.msk.bf16.vlgmr.msra.gmra.mxu0 %vm1019_vm1, %v507_v42  ;;  %13827 = vmatmul.mubr.msk.bf16.vlgmr.msra.gmra.mxu1 %vm1019_vm1, %v508_v46  ;;  %18674 = vst [vmem:[#allocation11_spill] sm:$0xff] %v16089_v31  ;;  %v15303_v42 = vld [vmem:[%s15787_s28 + $0x130] sm:$0xff]   ;;  %18675 = vst [vmem:[#allocation12_spill] sm:$0xff] %v16098_v45  ;;  %v513_v46 = vpack.c.bf16 %v15980_v38, %v15980_v38  ;;  %v16121_v38 = vadd.f32 %v459_v57, %v16113_v54  ;;  %v15313_v57 = vld [vmem:[%s15787_s28 + $0x198] sm:$0xff]  }
  0x4a   : > { %13831 = vmatpush3.bf16.msra.mxu0 %v15292_v47  ;;  %13839 = vmatpush3.bf16.msra.mxu1 %v15293_v50  ;;  %v514_v47 = vpack.c.bf16 %v15984_v41, %v15984_v41  ;;  %v15304_v50 = vld [vmem:[%s15787_s28 + $0x148] sm:$0xff]   ;;  %v460_v41 = vld [vmem:[%s15801_s10 + $0x3a] sm:$0x3]  ;;  %v15415_v31 = vld [vmem:[%s16508_s13 + $0xb0] sm:$0xff]  }
  0x4b   : > { %13832 = vmatprep.subr.bf16.mxu0 %v15728_v0  ;;  %13840 = vmatprep.subr.bf16.mxu1 %v15728_v0  ;;  %18676 = vst [vmem:[#allocation13_spill] sm:$0xff] %v16121_v38  ;;  %v15411_v38 = vld [vmem:[%s16508_s13 + $0x90] sm:$0xff]  }
  0x4c   : > { %13834 = vmatprep.mubr.msk.bf16.mxu0 %vm15729_vm0, %v15728_v0  ;;  %13842 = vmatprep.mubr.msk.bf16.mxu1 %vm15729_vm0, %v15728_v0 }
  0x4e   : > { %13833 = vmatpush3.bf16.msra.mxu0 %v15294_v51  ;;  %13841 = vmatpush3.bf16.msra.mxu1 %v15295_v58  ;;  %v15305_v51 = vld [vmem:[%s15787_s28 + $0x158] sm:$0xff]  }
  0x4f   : > { %13846 = vmatprep.subr.bf16.mxu0 %v15728_v0  ;;  %13854 = vmatprep.subr.bf16.mxu1 %v15728_v0  ;;  %v16117_v58 = vld [vmem:[%s15795_s7 + $0x3a] sm:$0x3] }
  0x51   : > { %13835 = vmatmul.mubr.msk.bf16.vlgmr.msra.gmra.mxu0 %vm1019_vm1, %v509_v61  ;;  %13843 = vmatmul.mubr.msk.bf16.vlgmr.msra.gmra.mxu1 %vm1019_vm1, %v510_v63  ;;  %v16126_v61 = vadd.f32 %v460_v41, %v16117_v58  ;;  %v15306_v63 = vld [vmem:[%s15787_s28 + $0x140] sm:$0xff]  }
  0x52   : > { %13847 = vmatpush3.bf16.msra.mxu0 %v15296_v1  ;;  %13855 = vmatpush3.bf16.msra.mxu1 %v15297_v2  ;;  %v15307_v1 = vld [vmem:[%s15787_s28 + $0x150] sm:$0xff]   ;;  %v16136_v2 = vld [vmem:[%s15795_s7 + $0x3c] sm:$0x3]  ;;  %v16191_v41 = vld [vmem:[%s15795_s7 + $0x44] sm:$0x3] }
  0x53   : > { %13848 = vmatprep.subr.bf16.mxu0 %v15728_v0  ;;  %13856 = vmatprep.subr.bf16.mxu1 %v15728_v0  ;;  %18677 = vst [vmem:[#allocation14_spill] sm:$0xff] %v16126_v61 }
  0x54   : > { %13850 = vmatprep.mubr.msk.bf16.mxu0 %vm15729_vm0, %v15728_v0  ;;  %13858 = vmatprep.mubr.msk.bf16.mxu1 %vm15729_vm0, %v15728_v0 }
  0x56   : > { %13849 = vmatpush3.bf16.msra.mxu0 %v15298_v13  ;;  %13857 = vmatpush3.bf16.msra.mxu1 %v15299_v14  ;;  %v515_v13 = vpack.c.bf16 %v16006_v53, %v16006_v53  ;;  %v16147_v14 = vadd.f32 %v461_v4, %v16136_v2  ;;  %v15310_v53 = vld [vmem:[%s15787_s28 + $0x160] sm:$0xff]  }
  0x57   : > { %13862 = vmatprep.subr.bf16.mxu0 %v15728_v0  ;;  %13870 = vmatprep.subr.bf16.mxu1 %v15728_v0 }
  0x58   : > { %18678 = vst [vmem:[#allocation15_spill] sm:$0xff] %v16147_v14  ;;  %v15407_v14 = vld [vmem:[%s16508_s13 + $0x70] sm:$0xff]  }
  0x59   : > { %13851 = vmatmul.mubr.msk.bf16.vlgmr.msra.gmra.mxu0 %vm1019_vm1, %v511_v20  ;;  %13859 = vmatmul.mubr.msk.bf16.vlgmr.msra.gmra.mxu1 %vm1019_vm1, %v512_v25  ;;  %v516_v20 = vpack.c.bf16 %v16014_v56, %v16014_v56  ;;  %v16154_v25 = vadd.f32 %v462_v16, %v16140_v8  ;;  %v15315_v16 = vld [vmem:[%s15787_s28 + $0x190] sm:$0xff]  }
  0x5a   : > { %13863 = vmatpush3.bf16.msra.mxu0 %v15300_v26  ;;  %13871 = vmatpush3.bf16.msra.mxu1 %v15301_v29  ;;  %v15309_v26 = vld [vmem:[%s15787_s28 + $0x178] sm:$0xff]   ;;  %v16162_v29 = vld [vmem:[%s15795_s7 + $0x40] sm:$0x3] }
  0x5b   : > { %13864 = vmatprep.subr.bf16.mxu0 %v15728_v0  ;;  %13872 = vmatprep.subr.bf16.mxu1 %v15728_v0  ;;  %18679 = vst [vmem:[#allocation16_spill] sm:$0xff] %v16154_v25 }
  0x5c   : > { %13866 = vmatprep.mubr.msk.bf16.mxu0 %vm15729_vm0, %v15728_v0  ;;  %13874 = vmatprep.mubr.msk.bf16.mxu1 %vm15729_vm0, %v15728_v0 }
  0x5e   : > { %13865 = vmatpush3.bf16.msra.mxu0 %v15302_v28  ;;  %13873 = vmatpush3.bf16.msra.mxu1 %v15303_v42  ;;  %v463_v28 = vld [vmem:[%s15801_s10 + $0x40] sm:$0x3]  ;;  %v15311_v42 = vld [vmem:[%s15787_s28 + $0x170] sm:$0xff]  }
  0x5f   : > { %13878 = vmatprep.subr.bf16.mxu0 %v15728_v0  ;;  %13886 = vmatprep.subr.bf16.mxu1 %v15728_v0  ;;  %v16167_v56 = vadd.f32 %v463_v28, %v16162_v29 }
  0x61   : > { %13867 = vmatmul.mubr.msk.bf16.vlgmr.msra.gmra.mxu0 %vm1019_vm1, %v513_v46  ;;  %13875 = vmatmul.mubr.msk.bf16.vlgmr.msra.gmra.mxu1 %vm1019_vm1, %v514_v47  ;;  %18680 = vst [vmem:[#allocation17_spill] sm:$0xff] %v16167_v56  ;;  %v16176_v46 = vadd.f32 %v464_v40, %v16170_v36  ;;  %v517_v47 = vpack.c.bf16 %v16035_v3, %v16035_v3  ;;  %v468_v40 = vld [vmem:[%s15801_s10 + $0x4a] sm:$0x3]  ;;  %v15403_v56 = vld [vmem:[%s16508_s13 + $0x50] sm:$0xff]  }
  0x62   : > { %13879 = vmatpush3.bf16.msra.mxu0 %v15304_v50  ;;  %13887 = vmatpush3.bf16.msra.mxu1 %v15305_v51  ;;  %v518_v50 = vpack.c.bf16 %v16039_v5, %v16039_v5  ;;  %v15312_v51 = vld [vmem:[%s15787_s28 + $0x188] sm:$0xff]   ;;  %v466_v5 = vld [vmem:[%s15801_s10 + $0x46] sm:$0x3] }
  0x63   : > { %13880 = vmatprep.subr.bf16.mxu0 %v15728_v0  ;;  %13888 = vmatprep.subr.bf16.mxu1 %v15728_v0  ;;  %18681 = vst [vmem:[#allocation18_spill] sm:$0xff] %v16176_v46  ;;  %v15341_v46 = vld [vmem:[%s15787_s28 + $0x278] sm:$0xff]  }
  0x64   : > { %13882 = vmatprep.mubr.msk.bf16.mxu0 %vm15729_vm0, %v15728_v0  ;;  %13890 = vmatprep.mubr.msk.bf16.mxu1 %vm15729_vm0, %v15728_v0 }
  0x66   : > { %13881 = vmatpush3.bf16.msra.mxu0 %v15306_v63  ;;  %13889 = vmatpush3.bf16.msra.mxu1 %v15307_v1  ;;  %v465_v63 = vld [vmem:[%s15801_s10 + $0x44] sm:$0x3]  ;;  %v16195_v1 = vld [vmem:[%s15795_s7 + $0x46] sm:$0x3] }
  0x67   : > { %13894 = vmatprep.subr.bf16.mxu0 %v15728_v0  ;;  %13902 = vmatprep.subr.bf16.mxu1 %v15728_v0  ;;  %v16199_v3 = vadd.f32 %v465_v63, %v16191_v41  ;;  %v16204_v4 = vadd.f32 %v466_v5, %v16195_v1  ;;  %v469_v63 = vld [vmem:[%s15801_s10 + $0x4c] sm:$0x3]  ;;  %v16248_v5 = vld [vmem:[%s15795_s7 + $0x4e] sm:$0x3] }
  0x69   : > { %13883 = vmatmul.mubr.msk.bf16.vlgmr.msra.gmra.mxu0 %vm1019_vm1, %v515_v13  ;;  %13891 = vmatmul.mubr.msk.bf16.vlgmr.msra.gmra.mxu1 %vm1019_vm1, %v516_v20  ;;  %18682 = vst [vmem:[#allocation19_spill] sm:$0xff] %v16199_v3  ;;  %18683 = vst [vmem:[#allocation20_spill] sm:$0xff] %v16204_v4  ;;  %v15314_v13 = vld [vmem:[%s15787_s28 + $0x180] sm:$0xff]   ;;  %v16214_v20 = vld [vmem:[%s15795_s7 + $0x48] sm:$0x3] }
  0x6a   : > { %13895 = vmatpush3.bf16.msra.mxu0 %v15308_v24  ;;  %13903 = vmatpush3.bf16.msra.mxu1 %v15309_v26  ;;  %v467_v24 = vld [vmem:[%s15801_s10 + $0x48] sm:$0x3]  ;;  %v16218_v26 = vld [vmem:[%s15795_s7 + $0x4a] sm:$0x3]  ;;  %v15333_v4 = vld [vmem:[%s15787_s28 + $0x238] sm:$0xff]  }
  0x6b   : > { %13896 = vmatprep.subr.bf16.mxu0 %v15728_v0  ;;  %13904 = vmatprep.subr.bf16.mxu1 %v15728_v0  ;;  %v16225_v28 = vadd.f32 %v467_v24, %v16214_v20 }
  0x6c   : > { %13898 = vmatprep.mubr.msk.bf16.mxu0 %vm15729_vm0, %v15728_v0  ;;  %13906 = vmatprep.mubr.msk.bf16.mxu1 %vm15729_vm0, %v15728_v0 }
  0x6d   : > { %18684 = vst [vmem:[#allocation21_spill] sm:$0xff] %v16225_v28 }
  0x6e   : > { %13897 = vmatpush3.bf16.msra.mxu0 %v15310_v53  ;;  %13905 = vmatpush3.bf16.msra.mxu1 %v15311_v42  ;;  %v519_v53 = vpack.c.bf16 %v16058_v15, %v16058_v15  ;;  %v520_v42 = vpack.c.bf16 %v16062_v19, %v16062_v19  ;;  %v15318_v15 = vld [vmem:[%s15787_s28 + $0x1a0] sm:$0xff]  }
  0x6f   : > { %13910 = vmatprep.subr.bf16.mxu0 %v15728_v0  ;;  %13918 = vmatprep.subr.bf16.mxu1 %v15728_v0 }
  0x71   : > { %13899 = vmatmul.mubr.msk.bf16.vlgmr.msra.gmra.mxu0 %vm1019_vm1, %v517_v47  ;;  %13907 = vmatmul.mubr.msk.bf16.vlgmr.msra.gmra.mxu1 %vm1019_vm1, %v518_v50  ;;  %v15316_v47 = vld [vmem:[%s15787_s28 + $0x1a8] sm:$0xff]   ;;  %v16232_v50 = vadd.f32 %v468_v40, %v16218_v26  ;;  %v522_v40 = vpack.c.bf16 %v16092_v37, %v16092_v37  ;;  %v472_v37 = vld [vmem:[%s15801_s10 + $0x52] sm:$0x3] }
  0x72   : > { %13911 = vmatpush3.bf16.msra.mxu0 %v15312_v51  ;;  %13919 = vmatpush3.bf16.msra.mxu1 %v15313_v57  ;;  %v15317_v51 = vld [vmem:[%s15787_s28 + $0x1b8] sm:$0xff]   ;;  %v16240_v57 = vld [vmem:[%s15795_s7 + $0x4c] sm:$0x3] }
  0x73   : > { %13912 = vmatprep.subr.bf16.mxu0 %v15728_v0  ;;  %13920 = vmatprep.subr.bf16.mxu1 %v15728_v0  ;;  %18685 = vst [vmem:[#allocation22_spill] sm:$0xff] %v16232_v50  ;;  %v16245_v19 = vadd.f32 %v469_v63, %v16240_v57  ;;  %v471_v63 = vld [vmem:[%s15801_s10 + $0x50] sm:$0x3]  ;;  %v15325_v50 = vld [vmem:[%s15787_s28 + $0x1f8] sm:$0xff]  }
  0x74   : > { %13914 = vmatprep.mubr.msk.bf16.mxu0 %vm15729_vm0, %v15728_v0  ;;  %13922 = vmatprep.mubr.msk.bf16.mxu1 %vm15729_vm0, %v15728_v0 }
  0x75   : > { %18686 = vst [vmem:[#allocation23_spill] sm:$0xff] %v16245_v19 }
  0x76   : > { %13913 = vmatpush3.bf16.msra.mxu0 %v15314_v13  ;;  %13921 = vmatpush3.bf16.msra.mxu1 %v15315_v16  ;;  %v470_v13 = vld [vmem:[%s15801_s10 + $0x4e] sm:$0x3]  ;;  %v15319_v16 = vld [vmem:[%s15787_s28 + $0x1b0] sm:$0xff]  }
  0x77   : > { %13926 = vmatprep.subr.bf16.mxu0 %v15728_v0  ;;  %13934 = vmatprep.subr.bf16.mxu1 %v15728_v0  ;;  %v16254_v24 = vadd.f32 %v470_v13, %v16248_v5  ;;  %v16273_v13 = vld [vmem:[%s15795_s7 + $0x52] sm:$0x3] }
  0x79   : > { %13915 = vmatmul.mubr.msk.bf16.vlgmr.msra.gmra.mxu0 %vm1019_vm1, %v519_v53  ;;  %13923 = vmatmul.mubr.msk.bf16.vlgmr.msra.gmra.mxu1 %vm1019_vm1, %v520_v42  ;;  %18687 = vst [vmem:[#allocation24_spill] sm:$0xff] %v16254_v24  ;;  %v521_v53 = vpack.c.bf16 %v16084_v34, %v16084_v34  ;;  %v15320_v42 = vld [vmem:[%s15787_s28 + $0x1c8] sm:$0xff]   ;;  %v15323_v24 = vld [vmem:[%s15787_s28 + $0x1d0] sm:$0xff]  }
  0x7a   : > { %13927 = vmatpush3.bf16.msra.mxu0 %v15316_v47  ;;  %13935 = vmatpush3.bf16.msra.mxu1 %v15317_v51  ;;  %v15321_v47 = vld [vmem:[%s15787_s28 + $0x1d8] sm:$0xff]   ;;  %v16269_v51 = vld [vmem:[%s15795_s7 + $0x50] sm:$0x3] }
  0x7b   : > { %13928 = vmatprep.subr.bf16.mxu0 %v15728_v0  ;;  %13936 = vmatprep.subr.bf16.mxu1 %v15728_v0  ;;  %v16277_v34 = vadd.f32 %v471_v63, %v16269_v51  ;;  %v473_v63 = vld [vmem:[%s15801_s10 + $0x54] sm:$0x3] }
  0x7c   : > { %13930 = vmatprep.mubr.msk.bf16.mxu0 %vm15729_vm0, %v15728_v0  ;;  %13938 = vmatprep.mubr.msk.bf16.mxu1 %vm15729_vm0, %v15728_v0 }
  0x7d   : > { %18688 = vst [vmem:[#allocation25_spill] sm:$0xff] %v16277_v34  ;;  %v15324_v34 = vld [vmem:[%s15787_s28 + $0x1e8] sm:$0xff]  }
  0x7e   : > { %13929 = vmatpush3.bf16.msra.mxu0 %v15318_v15  ;;  %13937 = vmatpush3.bf16.msra.mxu1 %v15319_v16  ;;  %v16282_v15 = vadd.f32 %v472_v37, %v16273_v13  ;;  %v15322_v16 = vld [vmem:[%s15787_s28 + $0x1c0] sm:$0xff]   ;;  %v16296_v37 = vld [vmem:[%s15795_s7 + $0x56] sm:$0x3] }
  0x7f   : > { %13942 = vmatprep.subr.bf16.mxu0 %v15728_v0  ;;  %13950 = vmatprep.subr.bf16.mxu1 %v15728_v0 }
  0x80   : > { %18689 = vst [vmem:[#allocation26_spill] sm:$0xff] %v16282_v15  ;;  %v524_v15 = vpack.c.bf16 %v16117_v58, %v16117_v58 }
  0x81   : > { %13931 = vmatmul.mubr.msk.bf16.vlgmr.msra.gmra.mxu0 %vm1019_vm1, %v521_v53  ;;  %13939 = vmatmul.mubr.msk.bf16.vlgmr.msra.gmra.mxu1 %vm1019_vm1, %v522_v40  ;;  %v16292_v53 = vld [vmem:[%s15795_s7 + $0x54] sm:$0x3]  ;;  %v523_v40 = vpack.c.bf16 %v16113_v54, %v16113_v54  ;;  %v15326_v54 = vld [vmem:[%s15787_s28 + $0x1e0] sm:$0xff]  }
  0x82   : > { %13943 = vmatpush3.bf16.msra.mxu0 %v15320_v42  ;;  %13951 = vmatpush3.bf16.msra.mxu1 %v15321_v47  ;;  %v16303_v42 = vadd.f32 %v473_v63, %v16292_v53  ;;  %v474_v47 = vld [vmem:[%s15801_s10 + $0x56] sm:$0x3]  ;;  %v16318_v63 = vld [vmem:[%s15795_s7 + $0x58] sm:$0x3] }
  0x83   : > { %13944 = vmatprep.subr.bf16.mxu0 %v15728_v0  ;;  %13952 = vmatprep.subr.bf16.mxu1 %v15728_v0  ;;  %v16310_v19 = vadd.f32 %v474_v47, %v16296_v37  ;;  %v476_v47 = vld [vmem:[%s15801_s10 + $0x5a] sm:$0x3] }
  0x84   : > { %13946 = vmatprep.mubr.msk.bf16.mxu0 %vm15729_vm0, %v15728_v0  ;;  %13954 = vmatprep.mubr.msk.bf16.mxu1 %vm15729_vm0, %v15728_v0  ;;  %18690 = vst [vmem:[#allocation27_spill] sm:$0xff] %v16303_v42  ;;  %v15331_v42 = vld [vmem:[%s15787_s28 + $0x210] sm:$0xff]  }
  0x85   : > { %18691 = vst [vmem:[#allocation28_spill] sm:$0xff] %v16310_v19 }
  0x86   : > { %13945 = vmatpush3.bf16.msra.mxu0 %v15322_v16  ;;  %13953 = vmatpush3.bf16.msra.mxu1 %v15323_v24  ;;  %v475_v16 = vld [vmem:[%s15801_s10 + $0x58] sm:$0x3]  ;;  %v16326_v24 = vld [vmem:[%s15795_s7 + $0x5a] sm:$0x3] }
  0x87   : > { %13958 = vmatprep.subr.bf16.mxu0 %v15728_v0  ;;  %13966 = vmatprep.subr.bf16.mxu1 %v15728_v0  ;;  %v16323_v58 = vadd.f32 %v475_v16, %v16318_v63  ;;  %v16332_v19 = vadd.f32 %v476_v47, %v16326_v24  ;;  %v15329_v16 = vld [vmem:[%s15787_s28 + $0x218] sm:$0xff]  }
  0x88   : > { %v16347_v47 = vld [vmem:[%s15795_s7 + $0x5c] sm:$0x3] }
  0x89   : > { %13947 = vmatmul.mubr.msk.bf16.vlgmr.msra.gmra.mxu0 %vm1019_vm1, %v523_v40  ;;  %13955 = vmatmul.mubr.msk.bf16.vlgmr.msra.gmra.mxu1 %vm1019_vm1, %v524_v15  ;;  %18692 = vst [vmem:[#allocation29_spill] sm:$0xff] %v16323_v58  ;;  %v15327_v40 = vld [vmem:[%s15787_s28 + $0x1f0] sm:$0xff]   ;;  %18693 = vst [vmem:[#allocation30_spill] sm:$0xff] %v16332_v19  ;;  %v15328_v15 = vld [vmem:[%s15787_s28 + $0x208] sm:$0xff]  }
  0x8a   : > { %13959 = vmatpush3.bf16.msra.mxu0 %v15324_v34  ;;  %13967 = vmatpush3.bf16.msra.mxu1 %v15325_v50  ;;  %v525_v34 = vpack.c.bf16 %v16136_v2, %v16136_v2  ;;  %v526_v50 = vpack.c.bf16 %v16140_v8, %v16140_v8  ;;  %v477_v19 = vld [vmem:[%s15801_s10 + $0x5c] sm:$0x3]  ;;  %v16351_v58 = vld [vmem:[%s15795_s7 + $0x5e] sm:$0x3] }
  0x8b   : > { %13960 = vmatprep.subr.bf16.mxu0 %v15728_v0  ;;  %13968 = vmatprep.subr.bf16.mxu1 %v15728_v0  ;;  %v16355_v2 = vadd.f32 %v477_v19, %v16347_v47  ;;  %v478_v8 = vld [vmem:[%s15801_s10 + $0x5e] sm:$0x3]  ;;  %v16370_v19 = vld [vmem:[%s15795_s7 + $0x60] sm:$0x3] }
  0x8c   : > { %13962 = vmatprep.mubr.msk.bf16.mxu0 %vm15729_vm0, %v15728_v0  ;;  %13970 = vmatprep.mubr.msk.bf16.mxu1 %vm15729_vm0, %v15728_v0 }
  0x8d   : > { %18694 = vst [vmem:[#allocation31_spill] sm:$0xff] %v16355_v2  ;;  %v15332_v2 = vld [vmem:[%s15787_s28 + $0x228] sm:$0xff]  }
  0x8e   : > { %13961 = vmatpush3.bf16.msra.mxu0 %v15326_v54  ;;  %13969 = vmatpush3.bf16.msra.mxu1 %v15327_v40  ;;  %v16360_v54 = vadd.f32 %v478_v8, %v16351_v58  ;;  %v15330_v40 = vld [vmem:[%s15787_s28 + $0x200] sm:$0xff]  }
  0x8f   : > { %13974 = vmatprep.subr.bf16.mxu0 %v15728_v0  ;;  %13982 = vmatprep.subr.bf16.mxu1 %v15728_v0  ;;  %v16374_v8 = vld [vmem:[%s15795_s7 + $0x62] sm:$0x3] }
  0x90   : > { %18695 = vst [vmem:[#allocation32_spill] sm:$0xff] %v16360_v54  ;;  %v528_v54 = vpack.c.bf16 %v16170_v36, %v16170_v36 }
  0x91   : > { %13963 = vmatmul.mubr.msk.bf16.vlgmr.msra.gmra.mxu0 %vm1019_vm1, %v525_v34  ;;  %13971 = vmatmul.mubr.msk.bf16.vlgmr.msra.gmra.mxu1 %vm1019_vm1, %v526_v50  ;;  %v479_v34 = vld [vmem:[%s15801_s10 + $0x60] sm:$0x3]  ;;  %v527_v50 = vpack.c.bf16 %v16162_v29, %v16162_v29 }
  0x92   : > { %13975 = vmatpush3.bf16.msra.mxu0 %v15328_v15  ;;  %13983 = vmatpush3.bf16.msra.mxu1 %v15329_v16  ;;  %v16381_v15 = vadd.f32 %v479_v34, %v16370_v19  ;;  %v480_v16 = vld [vmem:[%s15801_s10 + $0x62] sm:$0x3]  ;;  %v16396_v34 = vld [vmem:[%s15795_s7 + $0x64] sm:$0x3] }
  0x93   : > { %13976 = vmatprep.subr.bf16.mxu0 %v15728_v0  ;;  %13984 = vmatprep.subr.bf16.mxu1 %v15728_v0  ;;  %v16388_v28 = vadd.f32 %v480_v16, %v16374_v8  ;;  %v15334_v29 = vld [vmem:[%s15787_s28 + $0x220] sm:$0xff]  }
  0x94   : > { %13978 = vmatprep.mubr.msk.bf16.mxu0 %vm15729_vm0, %v15728_v0  ;;  %13986 = vmatprep.mubr.msk.bf16.mxu1 %vm15729_vm0, %v15728_v0  ;;  %18696 = vst [vmem:[#allocation33_spill] sm:$0xff] %v16381_v15  ;;  %v482_v16 = vld [vmem:[%s15801_s10 + $0x66] sm:$0x3]  ;;  %v15339_v15 = vld [vmem:[%s15787_s28 + $0x250] sm:$0xff]  }
  0x95   : > { %18697 = vst [vmem:[#allocation34_spill] sm:$0xff] %v16388_v28 }
  0x96   : > { %13977 = vmatpush3.bf16.msra.mxu0 %v15330_v40  ;;  %13985 = vmatpush3.bf16.msra.mxu1 %v15331_v42  ;;  %v481_v40 = vld [vmem:[%s15801_s10 + $0x64] sm:$0x3]  ;;  %v16404_v42 = vld [vmem:[%s15795_s7 + $0x66] sm:$0x3] }
  0x97   : > { %13990 = vmatprep.subr.bf16.mxu0 %v15728_v0  ;;  %13998 = vmatprep.subr.bf16.mxu1 %v15728_v0  ;;  %v16401_v36 = vadd.f32 %v481_v40, %v16396_v34  ;;  %v16410_v28 = vadd.f32 %v482_v16, %v16404_v42  ;;  %v15337_v40 = vld [vmem:[%s15787_s28 + $0x258] sm:$0xff]   ;;  %v16425_v16 = vld [vmem:[%s15795_s7 + $0x68] sm:$0x3] }
  0x99   : > { %13979 = vmatmul.mubr.msk.bf16.vlgmr.msra.gmra.mxu0 %vm1019_vm1, %v527_v50  ;;  %13987 = vmatmul.mubr.msk.bf16.vlgmr.msra.gmra.mxu1 %vm1019_vm1, %v528_v54  ;;  %18698 = vst [vmem:[#allocation35_spill] sm:$0xff] %v16401_v36  ;;  %v15335_v50 = vld [vmem:[%s15787_s28 + $0x230] sm:$0xff]   ;;  %18699 = vst [vmem:[#allocation36_spill] sm:$0xff] %v16410_v28  ;;  %v15336_v54 = vld [vmem:[%s15787_s28 + $0x248] sm:$0xff]  }
  0x9a   : > { %13991 = vmatpush3.bf16.msra.mxu0 %v15332_v2  ;;  %13999 = vmatpush3.bf16.msra.mxu1 %v15333_v4  ;;  %v529_v2 = vpack.c.bf16 %v16191_v41, %v16191_v41  ;;  %v530_v4 = vpack.c.bf16 %v16195_v1, %v16195_v1  ;;  %v483_v28 = vld [vmem:[%s15801_s10 + $0x68] sm:$0x3]  ;;  %v16429_v36 = vld [vmem:[%s15795_s7 + $0x6a] sm:$0x3] }
  0x9b   : > { %13992 = vmatprep.subr.bf16.mxu0 %v15728_v0  ;;  %14000 = vmatprep.subr.bf16.mxu1 %v15728_v0  ;;  %v16433_v41 = vadd.f32 %v483_v28, %v16425_v16  ;;  %v484_v1 = vld [vmem:[%s15801_s10 + $0x6a] sm:$0x3]  ;;  %v16448_v28 = vld [vmem:[%s15795_s7 + $0x6c] sm:$0x3] }
  0x9c   : > { %13994 = vmatprep.mubr.msk.bf16.mxu0 %vm15729_vm0, %v15728_v0  ;;  %14002 = vmatprep.mubr.msk.bf16.mxu1 %vm15729_vm0, %v15728_v0 }
  0x9d   : > { %18700 = vst [vmem:[#allocation37_spill] sm:$0xff] %v16433_v41  ;;  %v15340_v41 = vld [vmem:[%s15787_s28 + $0x268] sm:$0xff]  }
  0x9e   : > { %13993 = vmatpush3.bf16.msra.mxu0 %v15334_v29  ;;  %14001 = vmatpush3.bf16.msra.mxu1 %v15335_v50  ;;  %v16438_v29 = vadd.f32 %v484_v1, %v16429_v36  ;;  %v15338_v50 = vld [vmem:[%s15787_s28 + $0x240] sm:$0xff]   ;;  %v16452_v1 = vld [vmem:[%s15795_s7 + $0x6e] sm:$0x3] }
  0x9f   : > { %14006 = vmatprep.subr.bf16.mxu0 %v15728_v0  ;;  %14014 = vmatprep.subr.bf16.mxu1 %v15728_v0 }
  0xa0   : > { %18701 = vst [vmem:[#allocation38_spill] sm:$0xff] %v16438_v29  ;;  %v532_v29 = vpack.c.bf16 %v16218_v26, %v16218_v26  ;;  %v15343_v26 = vld [vmem:[%s15787_s28 + $0x270] sm:$0xff]  }
  0xa1   : > { %13995 = vmatmul.mubr.msk.bf16.vlgmr.msra.gmra.mxu0 %vm1019_vm1, %v529_v2  ;;  %14003 = vmatmul.mubr.msk.bf16.vlgmr.msra.gmra.mxu1 %vm1019_vm1, %v530_v4  ;;  %v485_v2 = vld [vmem:[%s15801_s10 + $0x6c] sm:$0x3]  ;;  %v531_v4 = vpack.c.bf16 %v16214_v20, %v16214_v20  ;;  %v15342_v20 = vld [vmem:[%s15787_s28 + $0x260] sm:$0xff]  }
  0xa2   : > { %14007 = vmatpush3.bf16.msra.mxu0 %v15336_v54  ;;  %14015 = vmatpush3.bf16.msra.mxu1 %v15337_v40  ;;  %v16459_v54 = vadd.f32 %v485_v2, %v16448_v28  ;;  %v486_v40 = vld [vmem:[%s15801_s10 + $0x6e] sm:$0x3]  ;;  %v536_v2 = vpack.c.bf16 %v16273_v13, %v16273_v13  ;;  %v15351_v13 = vld [vmem:[%s15787_s28 + $0x2b0] sm:$0xff]  }
  0xa3   : > { %14008 = vmatprep.subr.bf16.mxu0 %v15728_v0  ;;  %14016 = vmatprep.subr.bf16.mxu1 %v15728_v0  ;;  %v16466_v3 = vadd.f32 %v486_v40, %v16452_v1  ;;  %v15349_v40 = vld [vmem:[%s15787_s28 + $0x2b8] sm:$0xff]  }
  0xa4   : > { %14010 = vmatprep.mubr.msk.bf16.mxu0 %vm15729_vm0, %v15728_v0  ;;  %14018 = vmatprep.mubr.msk.bf16.mxu1 %vm15729_vm0, %v15728_v0  ;;  %18702 = vst [vmem:[#allocation39_spill] sm:$0xff] %v16459_v54 }
  0xa5   : > { %18703 = vst [vmem:[#allocation40_spill] sm:$0xff] %v16466_v3  ;;  %v15399_v3 = vld [vmem:[%s16508_s13 + $0x30] sm:$0xff]  }
  0xa6   : > { %14009 = vmatpush3.bf16.msra.mxu0 %v15338_v50  ;;  %14017 = vmatpush3.bf16.msra.mxu1 %v15339_v15  ;;  %v533_v15 = vpack.c.bf16 %v16240_v57, %v16240_v57  ;;  %v15346_v57 = vld [vmem:[%s15787_s28 + $0x280] sm:$0xff]   ;;  %v535_v50 = vpack.c.bf16 %v16269_v51, %v16269_v51 }
  0xa7   : > { %14022 = vmatprep.subr.bf16.mxu0 %v15728_v0  ;;  %14030 = vmatprep.subr.bf16.mxu1 %v15728_v0  ;;  %v15350_v51 = vld [vmem:[%s15787_s28 + $0x2a0] sm:$0xff]  }
  0xa9   : > { %14011 = vmatmul.mubr.msk.bf16.vlgmr.msra.gmra.mxu0 %vm1019_vm1, %v531_v4  ;;  %14019 = vmatmul.mubr.msk.bf16.vlgmr.msra.gmra.mxu1 %vm1019_vm1, %v532_v29  ;;  %v15345_v29 = vld [vmem:[%s15787_s28 + $0x298] sm:$0xff]   ;;  %v15348_v4 = vld [vmem:[%s15787_s28 + $0x2a8] sm:$0xff]  }
  0xaa   : > { %14023 = vmatpush3.bf16.msra.mxu0 %v15340_v41  ;;  %14031 = vmatpush3.bf16.msra.mxu1 %v15341_v46  ;;  %v534_v46 = vpack.c.bf16 %v16248_v5, %v16248_v5  ;;  %v15344_v41 = vld [vmem:[%s15787_s28 + $0x288] sm:$0xff]   ;;  %v15347_v5 = vld [vmem:[%s15787_s28 + $0x290] sm:$0xff]  }
  0xab   : > { %14024 = vmatprep.subr.bf16.mxu0 %v15728_v0  ;;  %14032 = vmatprep.subr.bf16.mxu1 %v15728_v0 }
  0xac   : > { %14026 = vmatprep.mubr.msk.bf16.mxu0 %vm15729_vm0, %v15728_v0  ;;  %14034 = vmatprep.mubr.msk.bf16.mxu1 %vm15729_vm0, %v15728_v0 }
  0xae   : > { %14025 = vmatpush3.bf16.msra.mxu0 %v15342_v20  ;;  %14033 = vmatpush3.bf16.msra.mxu1 %v15343_v26  ;;  %v537_v20 = vpack.c.bf16 %v16292_v53, %v16292_v53  ;;  %v538_v26 = vpack.c.bf16 %v16296_v37, %v16296_v37  ;;  %v15355_v53 = vld [vmem:[%s15787_s28 + $0x2d0] sm:$0xff]   ;;  %v539_v37 = vpack.c.bf16 %v16318_v63, %v16318_v63 }
  0xaf   : > { %14038 = vmatprep.subr.bf16.mxu0 %v15728_v0  ;;  %14046 = vmatprep.subr.bf16.mxu1 %v15728_v0  ;;  %v15359_v63 = vld [vmem:[%s15787_s28 + $0x2f0] sm:$0xff]  }
  0xb1   : > { %14027 = vmatmul.mubr.msk.bf16.vlgmr.msra.gmra.mxu0 %vm1019_vm1, %v533_v15  ;;  %14035 = vmatmul.mubr.msk.bf16.vlgmr.msra.gmra.mxu1 %vm1019_vm1, %v534_v46  ;;  %v15352_v15 = vld [vmem:[%s15787_s28 + $0x2c8] sm:$0xff]   ;;  %v15353_v46 = vld [vmem:[%s15787_s28 + $0x2d8] sm:$0xff]  }
  0xb2   : > { %14039 = vmatpush3.bf16.msra.mxu0 %v15344_v41  ;;  %14047 = vmatpush3.bf16.msra.mxu1 %v15345_v29  ;;  %v15354_v41 = vld [vmem:[%s15787_s28 + $0x2c0] sm:$0xff]   ;;  %v540_v29 = vpack.c.bf16 %v16326_v24, %v16326_v24  ;;  %v541_v24 = vpack.c.bf16 %v16347_v47, %v16347_v47  ;;  %v15363_v47 = vld [vmem:[%s15787_s28 + $0x310] sm:$0xff]  }
  0xb3   : > { %14040 = vmatprep.subr.bf16.mxu0 %v15728_v0  ;;  %14048 = vmatprep.subr.bf16.mxu1 %v15728_v0 }
  0xb4   : > { %14042 = vmatprep.mubr.msk.bf16.mxu0 %vm15729_vm0, %v15728_v0  ;;  %14050 = vmatprep.mubr.msk.bf16.mxu1 %vm15729_vm0, %v15728_v0 }
  0xb6   : > { %14041 = vmatpush3.bf16.msra.mxu0 %v15346_v57  ;;  %14049 = vmatpush3.bf16.msra.mxu1 %v15347_v5  ;;  %v15356_v57 = vld [vmem:[%s15787_s28 + $0x2e8] sm:$0xff]   ;;  %v15357_v5 = vld [vmem:[%s15787_s28 + $0x2f8] sm:$0xff]  }
  0xb7   : > { %14054 = vmatprep.subr.bf16.mxu0 %v15728_v0  ;;  %14062 = vmatprep.subr.bf16.mxu1 %v15728_v0 }
  0xb9   : > { %14043 = vmatmul.mubr.msk.bf16.vlgmr.msra.gmra.mxu0 %vm1019_vm1, %v535_v50  ;;  %14051 = vmatmul.mubr.msk.bf16.vlgmr.msra.gmra.mxu1 %vm1019_vm1, %v536_v2  ;;  %v15358_v50 = vld [vmem:[%s15787_s28 + $0x2e0] sm:$0xff]   ;;  %v542_v2 = vpack.c.bf16 %v16351_v58, %v16351_v58  ;;  %v543_v58 = vpack.c.bf16 %v16370_v19, %v16370_v19 }
  0xba   : > { %14055 = vmatpush3.bf16.msra.mxu0 %v15348_v4  ;;  %14063 = vmatpush3.bf16.msra.mxu1 %v15349_v40  ;;  %v15360_v4 = vld [vmem:[%s15787_s28 + $0x308] sm:$0xff]   ;;  %v15361_v40 = vld [vmem:[%s15787_s28 + $0x318] sm:$0xff]   ;;  %v15366_v19 = vld [vmem:[%s15787_s28 + $0x320] sm:$0xff]  }
  0xbb   : > { %14056 = vmatprep.subr.bf16.mxu0 %v15728_v0  ;;  %14064 = vmatprep.subr.bf16.mxu1 %v15728_v0 }
  0xbc   : > { %14058 = vmatprep.mubr.msk.bf16.mxu0 %vm15729_vm0, %v15728_v0  ;;  %14066 = vmatprep.mubr.msk.bf16.mxu1 %vm15729_vm0, %v15728_v0 }
  0xbe   : > { %14057 = vmatpush3.bf16.msra.mxu0 %v15350_v51  ;;  %14065 = vmatpush3.bf16.msra.mxu1 %v15351_v13  ;;  %v15362_v51 = vld [vmem:[%s15787_s28 + $0x300] sm:$0xff]   ;;  %v544_v13 = vpack.c.bf16 %v16374_v8, %v16374_v8 }
  0xbf   : > { %14070 = vmatprep.subr.bf16.mxu0 %v15728_v0  ;;  %14078 = vmatprep.subr.bf16.mxu1 %v15728_v0 }
  0xc1   : > { %14059 = vmatmul.mubr.msk.bf16.vlgmr.msra.gmra.mxu0 %vm1019_vm1, %v537_v20  ;;  %14067 = vmatmul.mubr.msk.bf16.vlgmr.msra.gmra.mxu1 %vm1019_vm1, %v538_v26  ;;  %v15364_v20 = vld [vmem:[%s15787_s28 + $0x328] sm:$0xff]   ;;  %v15365_v26 = vld [vmem:[%s15787_s28 + $0x338] sm:$0xff]  }
  0xc2   : > { %14071 = vmatpush3.bf16.msra.mxu0 %v15352_v15  ;;  %14079 = vmatpush3.bf16.msra.mxu1 %v15353_v46 }
  0xc3   : > { %14072 = vmatprep.subr.bf16.mxu0 %v15728_v0  ;;  %14080 = vmatprep.subr.bf16.mxu1 %v15728_v0 }
  0xc4   : > { %14074 = vmatprep.mubr.msk.bf16.mxu0 %vm15729_vm0, %v15728_v0  ;;  %14082 = vmatprep.mubr.msk.bf16.mxu1 %vm15729_vm0, %v15728_v0 }
  0xc6   : > { %14073 = vmatpush3.bf16.msra.mxu0 %v15354_v41  ;;  %14081 = vmatpush3.bf16.msra.mxu1 %v15355_v53  ;;  %v15367_v41 = vld [vmem:[%s15787_s28 + $0x330] sm:$0xff]  }
  0xc7   : > { %14086 = vmatprep.subr.bf16.mxu0 %v15728_v0  ;;  %14094 = vmatprep.subr.bf16.mxu1 %v15728_v0 }
  0xc9   : > { %14075 = vmatmul.mubr.msk.bf16.vlgmr.msra.gmra.mxu0 %vm1019_vm1, %v539_v37  ;;  %14083 = vmatmul.mubr.msk.bf16.vlgmr.msra.gmra.mxu1 %vm1019_vm1, %v540_v29  ;;  %v545_v29 = vpack.c.bf16 %v16396_v34, %v16396_v34  ;;  %v15370_v34 = vld [vmem:[%s15787_s28 + $0x340] sm:$0xff]  }
  0xca   : > { %14087 = vmatpush3.bf16.msra.mxu0 %v15356_v57  ;;  %14095 = vmatpush3.bf16.msra.mxu1 %v15357_v5  ;;  %v546_v5 = vpack.c.bf16 %v16404_v42, %v16404_v42 }
  0xcb   : > { %14088 = vmatprep.subr.bf16.mxu0 %v15728_v0  ;;  %14096 = vmatprep.subr.bf16.mxu1 %v15728_v0 }
  0xcc   : > { %14090 = vmatprep.mubr.msk.bf16.mxu0 %vm15729_vm0, %v15728_v0  ;;  %14098 = vmatprep.mubr.msk.bf16.mxu1 %vm15729_vm0, %v15728_v0 }
  0xce   : > { %14089 = vmatpush3.bf16.msra.mxu0 %v15358_v50  ;;  %14097 = vmatpush3.bf16.msra.mxu1 %v15359_v63  ;;  %v15368_v50 = vld [vmem:[%s15787_s28 + $0x348] sm:$0xff]  }
  0xcf   : > { %14102 = vmatprep.subr.bf16.mxu0 %v15728_v0  ;;  %14110 = vmatprep.subr.bf16.mxu1 %v15728_v0 }
  0xd1   : > { %14091 = vmatmul.mubr.msk.bf16.vlgmr.msra.gmra.mxu0 %vm1019_vm1, %v541_v24  ;;  %14099 = vmatmul.mubr.msk.bf16.vlgmr.msra.gmra.mxu1 %vm1019_vm1, %v542_v2  ;;  %v15369_v24 = vld [vmem:[%s15787_s28 + $0x358] sm:$0xff]  }
  0xd2   : > { %14103 = vmatpush3.bf16.msra.mxu0 %v15360_v4  ;;  %14111 = vmatpush3.bf16.msra.mxu1 %v15361_v40  ;;  %v15371_v40 = vld [vmem:[%s15787_s28 + $0x350] sm:$0xff]  }
  0xd3   : > { %14104 = vmatprep.subr.bf16.mxu0 %v15728_v0  ;;  %14112 = vmatprep.subr.bf16.mxu1 %v15728_v0 }
  0xd4   : > { %14106 = vmatprep.mubr.msk.bf16.mxu0 %vm15729_vm0, %v15728_v0  ;;  %14114 = vmatprep.mubr.msk.bf16.mxu1 %vm15729_vm0, %v15728_v0 }
  0xd6   : > { %14105 = vmatpush3.bf16.msra.mxu0 %v15362_v51  ;;  %14113 = vmatpush3.bf16.msra.mxu1 %v15363_v47 }
  0xd7   : > { %14118 = vmatprep.subr.bf16.mxu0 %v15728_v0  ;;  %14126 = vmatprep.subr.bf16.mxu1 %v15728_v0 }
  0xd9   : > { %v16585_v15 = vpop.f32.mrf.mxu0  ;;  %14107 = vmatmul.mubr.msk.bf16.vlgmr.msra.gmra.mxu0 %vm1019_vm1, %v543_v58  ;;  %v16588_v46 = vpop.f32.mrf.mxu1  ;;  %14115 = vmatmul.mubr.msk.bf16.vlgmr.msra.gmra.mxu1 %vm1019_vm1, %v544_v13  ;;  %v547_v13 = vpack.c.bf16 %v16425_v16, %v16425_v16  ;;  %v15374_v16 = vld [vmem:[%s15787_s28 + $0x360] sm:$0xff]  }
  0xda   : > { %14119 = vmatpush3.bf16.msra.mxu0 %v15364_v20  ;;  %14127 = vmatpush3.bf16.msra.mxu1 %v15365_v26  ;;  %v15372_v20 = vld [vmem:[%s15787_s28 + $0x368] sm:$0xff]   ;;  %v15373_v26 = vld [vmem:[%s15787_s28 + $0x378] sm:$0xff]  }
  0xdb   : > { %v13724_v8 = vpop.f32.mrf.mxu0  ;;  %14120 = vmatprep.subr.bf16.mxu0 %v15728_v0  ;;  %v13732_v53 = vpop.f32.mrf.mxu1  ;;  %14128 = vmatprep.subr.bf16.mxu1 %v15728_v0 }
  0xdc   : > { %14122 = vmatprep.mubr.msk.bf16.mxu0 %vm15729_vm0, %v15728_v0  ;;  %14130 = vmatprep.mubr.msk.bf16.mxu1 %vm15729_vm0, %v15728_v0  ;;  %v548_v8 = vpack.c.bf16 %v16429_v36, %v16429_v36 }
  0xdd   : > { %v1060_v37 = vpop.f32.mrf.mxu0  ;;  %v1115_v57 = vpop.f32.mrf.mxu1 }
  0xde   : > { %14121 = vmatpush3.bf16.msra.mxu0 %v15366_v19  ;;  %14129 = vmatpush3.bf16.msra.mxu1 %v15367_v41 }
  0xdf   : > { %v13725_v63 = vpop.f32.mrf.mxu0  ;;  %14134 = vmatprep.subr.bf16.mxu0 %v15728_v0  ;;  %v13733_v2 = vpop.f32.mrf.mxu1  ;;  %14142 = vmatprep.subr.bf16.mxu1 %v15728_v0 }
  0xe0   : > { %v549_v63 = vpack.c.bf16 %v16448_v28, %v16448_v28  ;;  %v15377_v2 = vld [vmem:[%s15787_s28 + $0x398] sm:$0xff]   ;;  %v15379_v28 = vld [vmem:[%s15787_s28 + $0x390] sm:$0xff]  }
  0xe1   : > { %v16607_v4 = vpop.f32.mrf.mxu0  ;;  %14123 = vmatmul.mubr.msk.bf16.vlgmr.msra.gmra.mxu0 %vm1019_vm1, %v545_v29  ;;  %v16612_v51 = vpop.f32.mrf.mxu1  ;;  %14131 = vmatmul.mubr.msk.bf16.vlgmr.msra.gmra.mxu1 %vm1019_vm1, %v546_v5  ;;  %v15375_v29 = vld [vmem:[%s15787_s28 + $0x370] sm:$0xff]  }
  0xe2   : > { %14135 = vmatpush3.bf16.msra.mxu0 %v15368_v50  ;;  %14143 = vmatpush3.bf16.msra.mxu1 %v15369_v24  ;;  %v15376_v24 = vld [vmem:[%s15787_s28 + $0x388] sm:$0xff]  }
  0xe3   : > { %v13740_v42 = vpop.f32.mrf.mxu0  ;;  %14136 = vmatprep.subr.bf16.mxu0 %v15728_v0  ;;  %v13748_v47 = vpop.f32.mrf.mxu1  ;;  %14144 = vmatprep.subr.bf16.mxu1 %v15728_v0 }
  0xe4   : > { %14138 = vmatprep.mubr.msk.bf16.mxu0 %vm15729_vm0, %v15728_v0  ;;  %14146 = vmatprep.mubr.msk.bf16.mxu1 %vm15729_vm0, %v15728_v0 }
  0xe5   : > { %v1170_v58 = vpop.f32.mrf.mxu0  ;;  %v1225_v19 = vpop.f32.mrf.mxu1 }
  0xe6   : > { %14137 = vmatpush3.bf16.msra.mxu0 %v15370_v34  ;;  %14145 = vmatpush3.bf16.msra.mxu1 %v15371_v40  ;;  %v550_v40 = vpack.c.bf16 %v16452_v1, %v16452_v1  ;;  %v15378_v58 = vld [vmem:[%s15787_s28 + $0x380] sm:$0xff]  }
  0xe7   : > { %v13741_v41 = vpop.f32.mrf.mxu0  ;;  %14150 = vmatprep.subr.bf16.mxu0 %v15728_v0  ;;  %v13749_v53 = vpop.f32.mrf.mxu1  ;;  %14158 = vmatprep.subr.bf16.mxu1 %v15728_v0 }
  0xe9   : > { %v16629_v37 = vpop.f32.mrf.mxu0  ;;  %14139 = vmatmul.mubr.msk.bf16.vlgmr.msra.gmra.mxu0 %vm1019_vm1, %v547_v13  ;;  %v16634_v57 = vpop.f32.mrf.mxu1  ;;  %14147 = vmatmul.mubr.msk.bf16.vlgmr.msra.gmra.mxu1 %vm1019_vm1, %v548_v8 }
  0xea   : > { %14151 = vmatpush3.bf16.msra.mxu0 %v15372_v20  ;;  %14159 = vmatpush3.bf16.msra.mxu1 %v15373_v26  ;;  %v423_v20 = vld [vmem:[%s15795_s7 + $0x70] sm:$0x3]  ;;  %v424_v26 = vld [vmem:[%s15795_s7 + $0x72] sm:$0x3] }
  0xeb   : > { %v13756_v36 = vpop.f32.mrf.mxu0  ;;  %14152 = vmatprep.subr.bf16.mxu0 %v15728_v0  ;;  %v13764_v5 = vpop.f32.mrf.mxu1  ;;  %14160 = vmatprep.subr.bf16.mxu1 %v15728_v0  ;;  %v551_v53 = vpack.c.bf16 %v423_v20, %v423_v20 }
  0xec   : > { %14154 = vmatprep.mubr.msk.bf16.mxu0 %vm15729_vm0, %v15728_v0  ;;  %14162 = vmatprep.mubr.msk.bf16.mxu1 %vm15729_vm0, %v15728_v0  ;;  %v552_v5 = vpack.c.bf16 %v424_v26, %v424_v26 }
  0xed   : > { %v1280_v50 = vpop.f32.mrf.mxu0  ;;  %v1335_v34 = vpop.f32.mrf.mxu1 }
  0xee   : > { %14153 = vmatpush3.bf16.msra.mxu0 %v15374_v16  ;;  %14161 = vmatpush3.bf16.msra.mxu1 %v15375_v29  ;;  %v15380_v16 = vld [vmem:[%s15787_s28 + $0x3a8] sm:$0xff]   ;;  %v15381_v29 = vld [vmem:[%s15787_s28 + $0x3b8] sm:$0xff]   ;;  %v15383_v34 = vld [vmem:[%s15787_s28 + $0x3b0] sm:$0xff]  }
  0xef   : > { %v13757_v42 = vpop.f32.mrf.mxu0  ;;  %14166 = vmatprep.subr.bf16.mxu0 %v15728_v0  ;;  %v13765_v47 = vpop.f32.mrf.mxu1  ;;  %14174 = vmatprep.subr.bf16.mxu1 %v15728_v0 }
  0xf0   : > { %v426_v42 = vld [vmem:[%s15795_s7 + $0x76] sm:$0x3] }
  0xf1   : > { %v16652_v13 = vpop.f32.mrf.mxu0  ;;  %14155 = vmatmul.mubr.msk.bf16.vlgmr.msra.gmra.mxu0 %vm1019_vm1, %v549_v63  ;;  %v16658_v19 = vpop.f32.mrf.mxu1  ;;  %14163 = vmatmul.mubr.msk.bf16.vlgmr.msra.gmra.mxu1 %vm1019_vm1, %v550_v40  ;;  %v425_v40 = vld [vmem:[%s15795_s7 + $0x74] sm:$0x3] }
  0xf2   : > { %18704 = vst [vmem:[#allocation41_spill] sm:$0xff] %v16658_v19  ;;  %14167 = vmatpush3.bf16.msra.mxu0 %v15376_v24  ;;  %14175 = vmatpush3.bf16.msra.mxu1 %v15377_v2  ;;  %v15382_v24 = vld [vmem:[%s15787_s28 + $0x3a0] sm:$0xff]   ;;  %v553_v26 = vpack.c.bf16 %v425_v40, %v425_v40  ;;  %v428_v40 = vld [vmem:[%s15795_s7 + $0x7a] sm:$0x3] }
  0xf3   : > { %v13772_v1 = vpop.f32.mrf.mxu0  ;;  %14168 = vmatprep.subr.bf16.mxu0 %v15728_v0  ;;  %v13780_v8 = vpop.f32.mrf.mxu1  ;;  %14176 = vmatprep.subr.bf16.mxu1 %v15728_v0 }
  0xf4   : > { %14170 = vmatprep.mubr.msk.bf16.mxu0 %vm15729_vm0, %v15728_v0  ;;  %14178 = vmatprep.mubr.msk.bf16.mxu1 %vm15729_vm0, %v15728_v0  ;;  %v15384_v1 = vld [vmem:[%s15787_s28 + $0x3c8] sm:$0xff]   ;;  %v15385_v8 = vld [vmem:[%s15787_s28 + $0x3d8] sm:$0xff]  }
  0xf5   : > { %v1390_v41 = vpop.f32.mrf.mxu0  ;;  %v1445_v36 = vpop.f32.mrf.mxu1 }
  0xf6   : > { %14169 = vmatpush3.bf16.msra.mxu0 %v15378_v58  ;;  %14177 = vmatpush3.bf16.msra.mxu1 %v15379_v28  ;;  %v15386_v36 = vld [vmem:[%s15787_s28 + $0x3c0] sm:$0xff]  }
  0xf7   : > { %v13773_v50 = vpop.f32.mrf.mxu0  ;;  %14182 = vmatprep.subr.bf16.mxu0 %v15728_v0  ;;  %v13781_v63 = vpop.f32.mrf.mxu1  ;;  %14190 = vmatprep.subr.bf16.mxu1 %v15728_v0 }
  0xf8   : > { %v15387_v50 = vld [vmem:[%s15787_s28 + $0x3d0] sm:$0xff]   ;;  %v427_v63 = vld [vmem:[%s15795_s7 + $0x78] sm:$0x3] }
  0xf9   : > { %v16672_v2 = vpop.f32.mrf.mxu0  ;;  %14171 = vmatmul.mubr.msk.bf16.vlgmr.msra.gmra.mxu0 %vm1019_vm1, %v551_v53  ;;  %v16678_v47 = vpop.f32.mrf.mxu1  ;;  %14179 = vmatmul.mubr.msk.bf16.vlgmr.msra.gmra.mxu1 %vm1019_vm1, %v552_v5  ;;  %v554_v53 = vpack.c.bf16 %v426_v42, %v426_v42 }
  0xfa   : > { %14183 = vmatpush3.bf16.msra.mxu0 %v15380_v16  ;;  %14191 = vmatpush3.bf16.msra.mxu1 %v15381_v29 }
  0xfb   : > { %v13788_v58 = vpop.f32.mrf.mxu0  ;;  %14184 = vmatprep.subr.bf16.mxu0 %v15728_v0  ;;  %v13796_v28 = vpop.f32.mrf.mxu1  ;;  %14192 = vmatprep.subr.bf16.mxu1 %v15728_v0 }
  0xfc   : > { %14186 = vmatprep.mubr.msk.bf16.mxu0 %vm15729_vm0, %v15728_v0  ;;  %14194 = vmatprep.mubr.msk.bf16.mxu1 %vm15729_vm0, %v15728_v0  ;;  %v555_v28 = vpack.c.bf16 %v427_v63, %v427_v63  ;;  %v15391_v63 = vld [vmem:[%s15787_s28 + $0x3f0] sm:$0xff]  }
  0xfd   : > { %v1500_v20 = vpop.f32.mrf.mxu0  ;;  %v1555_v41 = vpop.f32.mrf.mxu1 }
  0xfe   : > { %14185 = vmatpush3.bf16.msra.mxu0 %v15382_v24  ;;  %14193 = vmatpush3.bf16.msra.mxu1 %v15383_v34  ;;  %v15388_v20 = vld [vmem:[%s15787_s28 + $0x3e8] sm:$0xff]  }
  0xff   : > { %v13789_v16 = vpop.f32.mrf.mxu0  ;;  %14198 = vmatprep.subr.bf16.mxu0 %v15728_v0  ;;  %v13797_v29 = vpop.f32.mrf.mxu1  ;;  %14206 = vmatprep.subr.bf16.mxu1 %v15728_v0 }
 0x100   : > { %v15390_v16 = vld [vmem:[%s15787_s28 + $0x3e0] sm:$0xff]  }
 0x101   : > { %v16692_v5 = vpop.f32.mrf.mxu0  ;;  %14187 = vmatmul.mubr.msk.bf16.vlgmr.msra.gmra.mxu0 %vm1019_vm1, %v553_v26  ;;  %v16698_v58 = vpop.f32.mrf.mxu1  ;;  %14195 = vmatmul.mubr.msk.bf16.vlgmr.msra.gmra.mxu1 %vm1019_vm1, %v554_v53  ;;  %v15389_v26 = vld [vmem:[%s15787_s28 + $0x3f8] sm:$0xff]  }
 0x102   : > { %14199 = vmatpush3.bf16.msra.mxu0 %v15384_v1  ;;  %14207 = vmatpush3.bf16.msra.mxu1 %v15385_v8  ;;  %v556_v8 = vpack.c.bf16 %v428_v40, %v428_v40 }
 0x103   : > { %v13804_v24 = vpop.f32.mrf.mxu0  ;;  %14200 = vmatprep.subr.bf16.mxu0 %v15728_v0  ;;  %v13812_v34 = vpop.f32.mrf.mxu1  ;;  %14208 = vmatprep.subr.bf16.mxu1 %v15728_v0 }
 0x104   : > { %14202 = vmatprep.mubr.msk.bf16.mxu0 %vm15729_vm0, %v15728_v0  ;;  %14210 = vmatprep.mubr.msk.bf16.mxu1 %vm15729_vm0, %v15728_v0  ;;  %v429_v24 = vld [vmem:[%s15795_s7 + $0x7c] sm:$0x3]  ;;  %v430_v34 = vld [vmem:[%s15795_s7 + $0x7e] sm:$0x3] }
 0x105   : > { %v1610_v42 = vpop.f32.mrf.mxu0  ;;  %v1665_v1 = vpop.f32.mrf.mxu1 }
 0x106   : > { %14201 = vmatpush3.bf16.msra.mxu0 %v15386_v36  ;;  %14209 = vmatpush3.bf16.msra.mxu1 %v15387_v50  ;;  %v15392_v1 = vld [vmem:[%s16508_s13 + $0x8] sm:$0xff]  }
 0x107   : > { %v13805_v41 = vpop.f32.mrf.mxu0  ;;  %14214 = vmatprep.subr.bf16.mxu0 %v15728_v0  ;;  %v13813_v53 = vpop.f32.mrf.mxu1  ;;  %14222 = vmatprep.subr.bf16.mxu1 %v15728_v0 }
 0x109   : > { %v16712_v29 = vpop.f32.mrf.mxu0  ;;  %14203 = vmatmul.mubr.msk.bf16.vlgmr.msra.gmra.mxu0 %vm1019_vm1, %v555_v28  ;;  %v16718_v42 = vpop.f32.mrf.mxu1  ;;  %14211 = vmatmul.mubr.msk.bf16.vlgmr.msra.gmra.mxu1 %vm1019_vm1, %v556_v8  ;;  %v557_v28 = vpack.c.bf16 %v429_v24, %v429_v24  ;;  %v15393_v8 = vld [vmem:[%s16508_s13 + $0x18] sm:$0xff]   ;;  %v15395_v24 = vld [vmem:[%s16508_s13 + $0x10] sm:$0xff]  }
 0x10a   : > { %14215 = vmatpush3.bf16.msra.mxu0 %v15388_v20  ;;  %14223 = vmatpush3.bf16.msra.mxu1 %v15389_v26  ;;  %v558_v26 = vpack.c.bf16 %v430_v34, %v430_v34  ;;  %v15648_v34 = vld [vmem:[%s15801_s10] sm:$0x3] }
 0x10b   : > { %v13820_v36 = vpop.f32.mrf.mxu0  ;;  %14216 = vmatprep.subr.bf16.mxu0 %v15728_v0  ;;  %v13828_v50 = vpop.f32.mrf.mxu1  ;;  %14224 = vmatprep.subr.bf16.mxu1 %v15728_v0 }
 0x10c   : > { %14218 = vmatprep.mubr.msk.bf16.mxu0 %vm15729_vm0, %v15728_v0  ;;  %14226 = vmatprep.mubr.msk.bf16.mxu1 %vm15729_vm0, %v15728_v0  ;;  %v15394_v50 = vld [vmem:[%s16508_s13] sm:$0xff]  }
 0x10d   : > { %v1720_v40 = vpop.f32.mrf.mxu0  ;;  %v1775_v20 = vpop.f32.mrf.mxu1 }
 0x10e   : > { %14217 = vmatpush3.bf16.msra.mxu0 %v15390_v16  ;;  %14225 = vmatpush3.bf16.msra.mxu1 %v15391_v63 }
 0x10f   : > { %v13821_v41 = vpop.f32.mrf.mxu0  ;;  %14230 = vmatprep.subr.bf16.mxu0 %v15728_v0  ;;  %v13829_v53 = vpop.f32.mrf.mxu1  ;;  %14238 = vmatprep.subr.bf16.mxu1 %v15728_v0 }
 0x111   : > { %v16731_v36 = vpop.f32.mrf.mxu0  ;;  %14219 = vmatmul.mubr.msk.bf16.vlgmr.msra.gmra.mxu0 %vm1019_vm1, %v557_v28  ;;  %v16736_v40 = vpop.f32.mrf.mxu1  ;;  %14227 = vmatmul.mubr.msk.bf16.vlgmr.msra.gmra.mxu1 %vm1019_vm1, %v558_v26  ;;  %v559_v28 = vpack.c.bf16 %v15648_v34, %v15648_v34  ;;  %v15396_v26 = vld [vmem:[%s16508_s13 + $0x28] sm:$0xff]  }
 0x112   : > { %14231 = vmatpush3.bf16.msra.mxu0 %v15392_v1  ;;  %14239 = vmatpush3.bf16.msra.mxu1 %v15393_v8  ;;  %v15397_v1 = vld [vmem:[%s16508_s13 + $0x38] sm:$0xff]   ;;  %v15649_v8 = vld [vmem:[%s15801_s10 + $0x2] sm:$0x3] }
 0x113   : > { %v13836_v16 = vpop.f32.mrf.mxu0  ;;  %14232 = vmatprep.subr.bf16.mxu0 %v15728_v0  ;;  %v13844_v63 = vpop.f32.mrf.mxu1  ;;  %14240 = vmatprep.subr.bf16.mxu1 %v15728_v0  ;;  %v560_v41 = vpack.c.bf16 %v15649_v8, %v15649_v8 }
 0x114   : > { %14234 = vmatprep.mubr.msk.bf16.mxu0 %vm15729_vm0, %v15728_v0  ;;  %14242 = vmatprep.mubr.msk.bf16.mxu1 %vm15729_vm0, %v15728_v0 }
 0x115   : > { %v1830_v20 = vpop.f32.mrf.mxu0  ;;  %v1885_v53 = vpop.f32.mrf.mxu1 }
 0x116   : > { %14233 = vmatpush3.bf16.msra.mxu0 %v15394_v50  ;;  %14241 = vmatpush3.bf16.msra.mxu1 %v15395_v24  ;;  %v15398_v20 = vld [vmem:[%s16508_s13 + $0x20] sm:$0xff]  }
 0x117   : > { %v13837_v16 = vpop.f32.mrf.mxu0  ;;  %14246 = vmatprep.subr.bf16.mxu0 %v15728_v0  ;;  %v13845_v63 = vpop.f32.mrf.mxu1  ;;  %14254 = vmatprep.subr.bf16.mxu1 %v15728_v0 }
 0x119   : > { %v16751_v34 = vpop.f32.mrf.mxu0  ;;  %14235 = vmatmul.mubr.msk.bf16.vlgmr.msra.gmra.mxu0 %vm1019_vm1, %v559_v28  ;;  %v16756_v8 = vpop.f32.mrf.mxu1  ;;  %14243 = vmatmul.mubr.msk.bf16.vlgmr.msra.gmra.mxu1 %vm1019_vm1, %v560_v41  ;;  %v15650_v28 = vld [vmem:[%s15801_s10 + $0x4] sm:$0x3]  ;;  %v15400_v41 = vld [vmem:[%s16508_s13 + $0x48] sm:$0xff]  }
 0x11a   : > { %14247 = vmatpush3.bf16.msra.mxu0 %v15396_v26  ;;  %14255 = vmatpush3.bf16.msra.mxu1 %v15397_v1  ;;  %v561_v53 = vpack.c.bf16 %v15650_v28, %v15650_v28  ;;  %v15401_v26 = vld [vmem:[%s16508_s13 + $0x58] sm:$0xff]   ;;  %v15651_v1 = vld [vmem:[%s15801_s10 + $0x6] sm:$0x3] }
 0x11b   : > { %v13852_v50 = vpop.f32.mrf.mxu0  ;;  %14248 = vmatprep.subr.bf16.mxu0 %v15728_v0  ;;  %v13860_v24 = vpop.f32.mrf.mxu1  ;;  %14256 = vmatprep.subr.bf16.mxu1 %v15728_v0  ;;  %v562_v63 = vpack.c.bf16 %v15651_v1, %v15651_v1 }
 0x11c   : > { %14250 = vmatprep.mubr.msk.bf16.mxu0 %vm15729_vm0, %v15728_v0  ;;  %14258 = vmatprep.mubr.msk.bf16.mxu1 %vm15729_vm0, %v15728_v0 }
 0x11d   : > { %v1940_v16 = vpop.f32.mrf.mxu0  ;;  %v1995_v50 = vpop.f32.mrf.mxu1 }
 0x11e   : > { %14249 = vmatpush3.bf16.msra.mxu0 %v15398_v20  ;;  %14257 = vmatpush3.bf16.msra.mxu1 %v15399_v3  ;;  %v15402_v16 = vld [vmem:[%s16508_s13 + $0x40] sm:$0xff]   ;;  %v15652_v20 = vld [vmem:[%s15801_s10 + $0x8] sm:$0x3]  ;;  %v15653_v50 = vld [vmem:[%s15801_s10 + $0xa] sm:$0x3] }
 0x11f   : > { %v13853_v24 = vpop.f32.mrf.mxu0  ;;  %14262 = vmatprep.subr.bf16.mxu0 %v15728_v0  ;;  %v13861_v54 = vpop.f32.mrf.mxu1  ;;  %14270 = vmatprep.subr.bf16.mxu1 %v15728_v0 }
 0x120   : > { %v564_v24 = vpack.c.bf16 %v15653_v50, %v15653_v50 }
 0x121   : > { %v16771_v28 = vpop.f32.mrf.mxu0  ;;  %14251 = vmatmul.mubr.msk.bf16.vlgmr.msra.gmra.mxu0 %vm1019_vm1, %v561_v53  ;;  %v16776_v1 = vpop.f32.mrf.mxu1  ;;  %14259 = vmatmul.mubr.msk.bf16.vlgmr.msra.gmra.mxu1 %vm1019_vm1, %v562_v63  ;;  %v563_v53 = vpack.c.bf16 %v15652_v20, %v15652_v20 }
 0x122   : > { %14263 = vmatpush3.bf16.msra.mxu0 %v15400_v41  ;;  %14271 = vmatpush3.bf16.msra.mxu1 %v15401_v26  ;;  %v15404_v41 = vld [vmem:[%s16508_s13 + $0x68] sm:$0xff]   ;;  %v15405_v26 = vld [vmem:[%s16508_s13 + $0x78] sm:$0xff]  }
 0x123   : > { %v13868_v3 = vpop.f32.mrf.mxu0  ;;  %14264 = vmatprep.subr.bf16.mxu0 %v15728_v0  ;;  %v13876_v54 = vpop.f32.mrf.mxu1  ;;  %14272 = vmatprep.subr.bf16.mxu1 %v15728_v0 }
 0x124   : > { %14266 = vmatprep.mubr.msk.bf16.mxu0 %vm15729_vm0, %v15728_v0  ;;  %14274 = vmatprep.mubr.msk.bf16.mxu1 %vm15729_vm0, %v15728_v0 }
 0x125   : > { %v2050_v63 = vpop.f32.mrf.mxu0  ;;  %v2105_v3 = vpop.f32.mrf.mxu1 }
 0x126   : > { %14265 = vmatpush3.bf16.msra.mxu0 %v15402_v16  ;;  %14273 = vmatpush3.bf16.msra.mxu1 %v15403_v56  ;;  %v15406_v63 = vld [vmem:[%s16508_s13 + $0x60] sm:$0xff]   ;;  %v15654_v16 = vld [vmem:[%s15801_s10 + $0xc] sm:$0x3] }
 0x127   : > { %v13869_v54 = vpop.f32.mrf.mxu0  ;;  %14278 = vmatprep.subr.bf16.mxu0 %v15728_v0  ;;  %v13877_v25 = vpop.f32.mrf.mxu1  ;;  %14286 = vmatprep.subr.bf16.mxu1 %v15728_v0 }
 0x129   : > { %v16797_v20 = vpop.f32.mrf.mxu0  ;;  %14267 = vmatmul.mubr.msk.bf16.vlgmr.msra.gmra.mxu0 %vm1019_vm1, %v563_v53  ;;  %v16802_v50 = vpop.f32.mrf.mxu1  ;;  %14275 = vmatmul.mubr.msk.bf16.vlgmr.msra.gmra.mxu1 %vm1019_vm1, %v564_v24  ;;  %v565_v53 = vpack.c.bf16 %v15654_v16, %v15654_v16  ;;  %v15408_v24 = vld [vmem:[%s16508_s13 + $0x88] sm:$0xff]  }
 0x12a   : > { %14279 = vmatpush3.bf16.msra.mxu0 %v15404_v41  ;;  %14287 = vmatpush3.bf16.msra.mxu1 %v15405_v26  ;;  %v15409_v41 = vld [vmem:[%s16508_s13 + $0x98] sm:$0xff]   ;;  %v15655_v26 = vld [vmem:[%s15801_s10 + $0xe] sm:$0x3] }
 0x12b   : > { %v13884_v56 = vpop.f32.mrf.mxu0  ;;  %14280 = vmatprep.subr.bf16.mxu0 %v15728_v0  ;;  %v13892_v25 = vpop.f32.mrf.mxu1  ;;  %14288 = vmatprep.subr.bf16.mxu1 %v15728_v0  ;;  %v566_v54 = vpack.c.bf16 %v15655_v26, %v15655_v26 }
 0x12c   : > { %14282 = vmatprep.mubr.msk.bf16.mxu0 %vm15729_vm0, %v15728_v0  ;;  %14290 = vmatprep.mubr.msk.bf16.mxu1 %vm15729_vm0, %v15728_v0 }
 0x12d   : > { %v2160_v3 = vpop.f32.mrf.mxu0  ;;  %v2215_v56 = vpop.f32.mrf.mxu1 }
 0x12e   : > { %14281 = vmatpush3.bf16.msra.mxu0 %v15406_v63  ;;  %14289 = vmatpush3.bf16.msra.mxu1 %v15407_v14  ;;  %v15410_v3 = vld [vmem:[%s16508_s13 + $0x80] sm:$0xff]   ;;  %v15656_v63 = vld [vmem:[%s15801_s10 + $0x10] sm:$0x3] }
 0x12f   : > { %v13885_v25 = vpop.f32.mrf.mxu0  ;;  %14294 = vmatprep.subr.bf16.mxu0 %v15728_v0  ;;  %v13893_v61 = vpop.f32.mrf.mxu1  ;;  %14302 = vmatprep.subr.bf16.mxu1 %v15728_v0 }
 0x131   : > { %v16817_v16 = vpop.f32.mrf.mxu0  ;;  %14283 = vmatmul.mubr.msk.bf16.vlgmr.msra.gmra.mxu0 %vm1019_vm1, %v565_v53  ;;  %v16822_v26 = vpop.f32.mrf.mxu1  ;;  %14291 = vmatmul.mubr.msk.bf16.vlgmr.msra.gmra.mxu1 %vm1019_vm1, %v566_v54  ;;  %v567_v53 = vpack.c.bf16 %v15656_v63, %v15656_v63  ;;  %v15412_v54 = vld [vmem:[%s16508_s13 + $0xa8] sm:$0xff]  }
 0x132   : > { %14295 = vmatpush3.bf16.msra.mxu0 %v15408_v24  ;;  %14303 = vmatpush3.bf16.msra.mxu1 %v15409_v41  ;;  %v15413_v24 = vld [vmem:[%s16508_s13 + $0xb8] sm:$0xff]   ;;  %v15657_v41 = vld [vmem:[%s15801_s10 + $0x12] sm:$0x3] }
 0x133   : > { %v13900_v14 = vpop.f32.mrf.mxu0  ;;  %14296 = vmatprep.subr.bf16.mxu0 %v15728_v0  ;;  %v13908_v61 = vpop.f32.mrf.mxu1  ;;  %14304 = vmatprep.subr.bf16.mxu1 %v15728_v0  ;;  %v568_v25 = vpack.c.bf16 %v15657_v41, %v15657_v41 }
 0x134   : > { %14298 = vmatprep.mubr.msk.bf16.mxu0 %vm15729_vm0, %v15728_v0  ;;  %14306 = vmatprep.mubr.msk.bf16.mxu1 %vm15729_vm0, %v15728_v0 }
 0x135   : > { %v2270_v56 = vpop.f32.mrf.mxu0  ;;  %v2325_v14 = vpop.f32.mrf.mxu1 }
 0x136   : > { %14297 = vmatpush3.bf16.msra.mxu0 %v15410_v3  ;;  %14305 = vmatpush3.bf16.msra.mxu1 %v15411_v38  ;;  %v15414_v56 = vld [vmem:[%s16508_s13 + $0xa0] sm:$0xff]   ;;  %v15658_v3 = vld [vmem:[%s15801_s10 + $0x14] sm:$0x3] }
 0x137   : > { %v13901_v61 = vpop.f32.mrf.mxu0  ;;  %14310 = vmatprep.subr.bf16.mxu0 %v15728_v0  ;;  %v13909_v45 = vpop.f32.mrf.mxu1  ;;  %14318 = vmatprep.subr.bf16.mxu1 %v15728_v0 }
 0x139   : > { %v16837_v63 = vpop.f32.mrf.mxu0  ;;  %14299 = vmatmul.mubr.msk.bf16.vlgmr.msra.gmra.mxu0 %vm1019_vm1, %v567_v53  ;;  %v16842_v41 = vpop.f32.mrf.mxu1  ;;  %14307 = vmatmul.mubr.msk.bf16.vlgmr.msra.gmra.mxu1 %vm1019_vm1, %v568_v25  ;;  %v569_v53 = vpack.c.bf16 %v15658_v3, %v15658_v3  ;;  %v15416_v25 = vld [vmem:[%s16508_s13 + $0xc8] sm:$0xff]  }
 0x13a   : > { %14311 = vmatpush3.bf16.msra.mxu0 %v15412_v54  ;;  %14319 = vmatpush3.bf16.msra.mxu1 %v15413_v24  ;;  %v15417_v54 = vld [vmem:[%s16508_s13 + $0xd8] sm:$0xff]   ;;  %v15659_v24 = vld [vmem:[%s15801_s10 + $0x16] sm:$0x3] }
 0x13b   : > { %v13916_v38 = vpop.f32.mrf.mxu0  ;;  %14312 = vmatprep.subr.bf16.mxu0 %v15728_v0  ;;  %v13924_v45 = vpop.f32.mrf.mxu1  ;;  %14320 = vmatprep.subr.bf16.mxu1 %v15728_v0  ;;  %v570_v61 = vpack.c.bf16 %v15659_v24, %v15659_v24 }
 0x13c   : > { %14314 = vmatprep.mubr.msk.bf16.mxu0 %vm15729_vm0, %v15728_v0  ;;  %14322 = vmatprep.mubr.msk.bf16.mxu1 %vm15729_vm0, %v15728_v0 }
 0x13d   : > { %v2380_v14 = vpop.f32.mrf.mxu0  ;;  %v2435_v38 = vpop.f32.mrf.mxu1 }
 0x13e   : > { %14313 = vmatpush3.bf16.msra.mxu0 %v15414_v56  ;;  %14321 = vmatpush3.bf16.msra.mxu1 %v15415_v31  ;;  %v15418_v14 = vld [vmem:[%s16508_s13 + $0xc0] sm:$0xff]   ;;  %v15660_v56 = vld [vmem:[%s15801_s10 + $0x18] sm:$0x3] }
 0x13f   : > { %v13917_v45 = vpop.f32.mrf.mxu0  ;;  %14326 = vmatprep.subr.bf16.mxu0 %v15728_v0  ;;  %v13925_v27 = vpop.f32.mrf.mxu1  ;;  %14334 = vmatprep.subr.bf16.mxu1 %v15728_v0 }
 0x141   : > { %v16857_v3 = vpop.f32.mrf.mxu0  ;;  %14315 = vmatmul.mubr.msk.bf16.vlgmr.msra.gmra.mxu0 %vm1019_vm1, %v569_v53  ;;  %v16862_v24 = vpop.f32.mrf.mxu1  ;;  %14323 = vmatmul.mubr.msk.bf16.vlgmr.msra.gmra.mxu1 %vm1019_vm1, %v570_v61  ;;  %v571_v53 = vpack.c.bf16 %v15660_v56, %v15660_v56  ;;  %v15420_v61 = vld [vmem:[%s16508_s13 + $0xe8] sm:$0xff]  }
 0x142   : > { %14327 = vmatpush3.bf16.msra.mxu0 %v15416_v25  ;;  %14335 = vmatpush3.bf16.msra.mxu1 %v15417_v54  ;;  %v15421_v25 = vld [vmem:[%s16508_s13 + $0xf8] sm:$0xff]  }
 0x143   : > { %v13932_v31 = vpop.f32.mrf.mxu0  ;;  %14328 = vmatprep.subr.bf16.mxu0 %v15728_v0  ;;  %v13940_v27 = vpop.f32.mrf.mxu1  ;;  %14336 = vmatprep.subr.bf16.mxu1 %v15728_v0  ;;  %v15661_v54 = vld [vmem:[%s15801_s10 + $0x1a] sm:$0x3] }
 0x144   : > { %14330 = vmatprep.mubr.msk.bf16.mxu0 %vm15729_vm0, %v15728_v0  ;;  %14338 = vmatprep.mubr.msk.bf16.mxu1 %vm15729_vm0, %v15728_v0  ;;  %v572_v45 = vpack.c.bf16 %v15661_v54, %v15661_v54 }
 0x145   : > { %v2490_v38 = vpop.f32.mrf.mxu0  ;;  %v2545_v31 = vpop.f32.mrf.mxu1 }
 0x146   : > { %14329 = vmatpush3.bf16.msra.mxu0 %v15418_v14  ;;  %14337 = vmatpush3.bf16.msra.mxu1 %v15419_v21  ;;  %v15422_v38 = vld [vmem:[%s16508_s13 + $0xe0] sm:$0xff]   ;;  %v15662_v14 = vld [vmem:[%s15801_s10 + $0x1c] sm:$0x3] }
 0x147   : > { %v13933_v27 = vpop.f32.mrf.mxu0  ;;  %14342 = vmatprep.subr.bf16.mxu0 %v15728_v0  ;;  %v13941_v10 = vpop.f32.mrf.mxu1  ;;  %14350 = vmatprep.subr.bf16.mxu1 %v15728_v0 }
 0x149   : > { %v16877_v56 = vpop.f32.mrf.mxu0  ;;  %14331 = vmatmul.mubr.msk.bf16.vlgmr.msra.gmra.mxu0 %vm1019_vm1, %v571_v53  ;;  %v16882_v54 = vpop.f32.mrf.mxu1  ;;  %14339 = vmatmul.mubr.msk.bf16.vlgmr.msra.gmra.mxu1 %vm1019_vm1, %v572_v45  ;;  %v573_v53 = vpack.c.bf16 %v15662_v14, %v15662_v14  ;;  %v15424_v45 = vld [vmem:[%s16508_s13 + $0x108] sm:$0xff]  }
 0x14a   : > { %14343 = vmatpush3.bf16.msra.mxu0 %v15420_v61  ;;  %14351 = vmatpush3.bf16.msra.mxu1 %v15421_v25  ;;  %v15425_v61 = vld [vmem:[%s16508_s13 + $0x118] sm:$0xff]  }
 0x14b   : > { %v13948_v21 = vpop.f32.mrf.mxu0  ;;  %14344 = vmatprep.subr.bf16.mxu0 %v15728_v0  ;;  %v13956_v10 = vpop.f32.mrf.mxu1  ;;  %14352 = vmatprep.subr.bf16.mxu1 %v15728_v0  ;;  %v15663_v25 = vld [vmem:[%s15801_s10 + $0x1e] sm:$0x3] }
 0x14c   : > { %14346 = vmatprep.mubr.msk.bf16.mxu0 %vm15729_vm0, %v15728_v0  ;;  %14354 = vmatprep.mubr.msk.bf16.mxu1 %vm15729_vm0, %v15728_v0  ;;  %v574_v27 = vpack.c.bf16 %v15663_v25, %v15663_v25 }
 0x14d   : > { %v2600_v31 = vpop.f32.mrf.mxu0  ;;  %v2655_v21 = vpop.f32.mrf.mxu1 }
 0x14e   : > { %14345 = vmatpush3.bf16.msra.mxu0 %v15422_v38  ;;  %14353 = vmatpush3.bf16.msra.mxu1 %v15423_v7  ;;  %v15426_v31 = vld [vmem:[%s16508_s13 + $0x100] sm:$0xff]  }
 0x14f   : > { %v13949_v10 = vpop.f32.mrf.mxu0  ;;  %14358 = vmatprep.subr.bf16.mxu0 %v15728_v0  ;;  %v13957_v59 = vpop.f32.mrf.mxu1  ;;  %14366 = vmatprep.subr.bf16.mxu1 %v15728_v0  ;;  %v15664_v38 = vld [vmem:[%s15801_s10 + $0x20] sm:$0x3] }
 0x150   : > { %v15428_v10 = vld [vmem:[%s16508_s13 + $0x128] sm:$0xff]  }
 0x151   : > { %v16897_v14 = vpop.f32.mrf.mxu0  ;;  %14347 = vmatmul.mubr.msk.bf16.vlgmr.msra.gmra.mxu0 %vm1019_vm1, %v573_v53  ;;  %v16902_v25 = vpop.f32.mrf.mxu1  ;;  %14355 = vmatmul.mubr.msk.bf16.vlgmr.msra.gmra.mxu1 %vm1019_vm1, %v574_v27  ;;  %v575_v53 = vpack.c.bf16 %v15664_v38, %v15664_v38  ;;  %v15429_v27 = vld [vmem:[%s16508_s13 + $0x138] sm:$0xff]  }
 0x152   : > { %14359 = vmatpush3.bf16.msra.mxu0 %v15424_v45  ;;  %14367 = vmatpush3.bf16.msra.mxu1 %v15425_v61  ;;  %v15665_v45 = vld [vmem:[%s15801_s10 + $0x22] sm:$0x3] }
 0x153   : > { %v13964_v7 = vpop.f32.mrf.mxu0  ;;  %14360 = vmatprep.subr.bf16.mxu0 %v15728_v0  ;;  %v13972_v59 = vpop.f32.mrf.mxu1  ;;  %14368 = vmatprep.subr.bf16.mxu1 %v15728_v0  ;;  %v576_v61 = vpack.c.bf16 %v15665_v45, %v15665_v45 }
 0x154   : > { %14362 = vmatprep.mubr.msk.bf16.mxu0 %vm15729_vm0, %v15728_v0  ;;  %14370 = vmatprep.mubr.msk.bf16.mxu1 %vm15729_vm0, %v15728_v0 }
 0x155   : > { %v2710_v21 = vpop.f32.mrf.mxu0  ;;  %v2765_v7 = vpop.f32.mrf.mxu1 }
 0x156   : > { %14361 = vmatpush3.bf16.msra.mxu0 %v15426_v31  ;;  %14369 = vmatpush3.bf16.msra.mxu1 %v15427_v55  ;;  %v15430_v21 = vld [vmem:[%s16508_s13 + $0x120] sm:$0xff]   ;;  %v15431_v55 = vld [vmem:[%s16508_s13 + $0x130] sm:$0xff]  }
 0x157   : > { %v13965_v59 = vpop.f32.mrf.mxu0  ;;  %14374 = vmatprep.subr.bf16.mxu0 %v15728_v0  ;;  %v13973_v49 = vpop.f32.mrf.mxu1  ;;  %14382 = vmatprep.subr.bf16.mxu1 %v15728_v0 }
 0x159   : > { %v16917_v38 = vpop.f32.mrf.mxu0  ;;  %14363 = vmatmul.mubr.msk.bf16.vlgmr.msra.gmra.mxu0 %vm1019_vm1, %v575_v53  ;;  %v16921_v44 = vpop.f32.mrf.mxu1  ;;  %14371 = vmatmul.mubr.msk.bf16.vlgmr.msra.gmra.mxu1 %vm1019_vm1, %v576_v61  ;;  %v15666_v53 = vld [vmem:[%s15801_s10 + $0x24] sm:$0x3]  ;;  %v15433_v61 = vld [vmem:[%s16508_s13 + $0x158] sm:$0xff]  }
 0x15a   : > { %18705 = vst [vmem:[#allocation42_spill] sm:$0xff] %v16917_v38  ;;  %18706 = vst [vmem:[#allocation43_spill] sm:$0xff] %v16921_v44  ;;  %14375 = vmatpush3.bf16.msra.mxu0 %v15428_v10  ;;  %14383 = vmatpush3.bf16.msra.mxu1 %v15429_v27  ;;  %v577_v45 = vpack.c.bf16 %v15666_v53, %v15666_v53  ;;  %v15432_v10 = vld [vmem:[%s16508_s13 + $0x148] sm:$0xff]   ;;  %v15667_v27 = vld [vmem:[%s15801_s10 + $0x26] sm:$0x3] }
 0x15b   : > { %v13980_v31 = vpop.f32.mrf.mxu0  ;;  %14376 = vmatprep.subr.bf16.mxu0 %v15728_v0  ;;  %v13988_v49 = vpop.f32.mrf.mxu1  ;;  %14384 = vmatprep.subr.bf16.mxu1 %v15728_v0  ;;  %v578_v59 = vpack.c.bf16 %v15667_v27, %v15667_v27  ;;  %v15435_v38 = vld [vmem:[%s16508_s13 + $0x150] sm:$0xff]  }
 0x15c   : > { %14378 = vmatprep.mubr.msk.bf16.mxu0 %vm15729_vm0, %v15728_v0  ;;  %14386 = vmatprep.mubr.msk.bf16.mxu1 %vm15729_vm0, %v15728_v0 }
 0x15d   : > { %v2820_v7 = vpop.f32.mrf.mxu0  ;;  %v2875_v31 = vpop.f32.mrf.mxu1 }
 0x15e   : > { %14377 = vmatpush3.bf16.msra.mxu0 %v15430_v21  ;;  %14385 = vmatpush3.bf16.msra.mxu1 %v15431_v55  ;;  %v15434_v7 = vld [vmem:[%s16508_s13 + $0x140] sm:$0xff]   ;;  %v15668_v55 = vld [vmem:[%s15801_s10 + $0x28] sm:$0x3] }
 0x15f   : > { %v13981_v49 = vpop.f32.mrf.mxu0  ;;  %14390 = vmatprep.subr.bf16.mxu0 %v15728_v0  ;;  %v13989_v44 = vpop.f32.mrf.mxu1  ;;  %14398 = vmatprep.subr.bf16.mxu1 %v15728_v0 }
 0x161   : > { %v16937_v53 = vpop.f32.mrf.mxu0  ;;  %14379 = vmatmul.mubr.msk.bf16.vlgmr.msra.gmra.mxu0 %vm1019_vm1, %v577_v45  ;;  %v16942_v27 = vpop.f32.mrf.mxu1  ;;  %14387 = vmatmul.mubr.msk.bf16.vlgmr.msra.gmra.mxu1 %vm1019_vm1, %v578_v59  ;;  %v579_v45 = vpack.c.bf16 %v15668_v55, %v15668_v55  ;;  %v15436_v59 = vld [vmem:[%s16508_s13 + $0x168] sm:$0xff]  }
 0x162   : > { %18707 = vst [vmem:[#allocation44_spill] sm:$0xff] %v16937_v53  ;;  %18708 = vst [vmem:[#allocation45_spill] sm:$0xff] %v16942_v27  ;;  %14391 = vmatpush3.bf16.msra.mxu0 %v15432_v10  ;;  %14399 = vmatpush3.bf16.msra.mxu1 %v15433_v61  ;;  %v15437_v10 = vld [vmem:[%s16508_s13 + $0x178] sm:$0xff]   ;;  %v15669_v61 = vld [vmem:[%s15801_s10 + $0x2a] sm:$0x3] }
 0x163   : > { %v13996_v21 = vpop.f32.mrf.mxu0  ;;  %14392 = vmatprep.subr.bf16.mxu0 %v15728_v0  ;;  %v14004_v44 = vpop.f32.mrf.mxu1  ;;  %14400 = vmatprep.subr.bf16.mxu1 %v15728_v0  ;;  %v580_v49 = vpack.c.bf16 %v15669_v61, %v15669_v61  ;;  %v15439_v53 = vld [vmem:[%s16508_s13 + $0x170] sm:$0xff]  }
 0x164   : > { %14394 = vmatprep.mubr.msk.bf16.mxu0 %vm15729_vm0, %v15728_v0  ;;  %14402 = vmatprep.mubr.msk.bf16.mxu1 %vm15729_vm0, %v15728_v0 }
 0x165   : > { %v2930_v31 = vpop.f32.mrf.mxu0  ;;  %v2985_v21 = vpop.f32.mrf.mxu1 }
 0x166   : > { %14393 = vmatpush3.bf16.msra.mxu0 %v15434_v7  ;;  %14401 = vmatpush3.bf16.msra.mxu1 %v15435_v38  ;;  %v15438_v31 = vld [vmem:[%s16508_s13 + $0x160] sm:$0xff]  }
 0x167   : > { %v13997_v44 = vpop.f32.mrf.mxu0  ;;  %14406 = vmatprep.subr.bf16.mxu0 %v15728_v0  ;;  %v14005_v27 = vpop.f32.mrf.mxu1  ;;  %14414 = vmatprep.subr.bf16.mxu1 %v15728_v0 }
 0x168   : > { %v15670_v27 = vld [vmem:[%s15801_s10 + $0x2c] sm:$0x3] }
 0x169   : > { %v16957_v55 = vpop.f32.mrf.mxu0  ;;  %14395 = vmatmul.mubr.msk.bf16.vlgmr.msra.gmra.mxu0 %vm1019_vm1, %v579_v45  ;;  %v16962_v61 = vpop.f32.mrf.mxu1  ;;  %14403 = vmatmul.mubr.msk.bf16.vlgmr.msra.gmra.mxu1 %vm1019_vm1, %v580_v49  ;;  %v581_v45 = vpack.c.bf16 %v15670_v27, %v15670_v27  ;;  %v15440_v49 = vld [vmem:[%s16508_s13 + $0x188] sm:$0xff]  }
 0x16a   : > { %18709 = vst [vmem:[#allocation46_spill] sm:$0xff] %v16957_v55  ;;  %18710 = vst [vmem:[#allocation47_spill] sm:$0xff] %v16962_v61  ;;  %14407 = vmatpush3.bf16.msra.mxu0 %v15436_v59  ;;  %14415 = vmatpush3.bf16.msra.mxu1 %v15437_v10  ;;  %v15441_v59 = vld [vmem:[%s16508_s13 + $0x198] sm:$0xff]   ;;  %v15671_v10 = vld [vmem:[%s15801_s10 + $0x2e] sm:$0x3] }
 0x16b   : > { %v14012_v38 = vpop.f32.mrf.mxu0  ;;  %14408 = vmatprep.subr.bf16.mxu0 %v15728_v0  ;;  %v14020_v7 = vpop.f32.mrf.mxu1  ;;  %14416 = vmatprep.subr.bf16.mxu1 %v15728_v0  ;;  %v582_v44 = vpack.c.bf16 %v15671_v10, %v15671_v10  ;;  %v15443_v55 = vld [vmem:[%s16508_s13 + $0x190] sm:$0xff]  }
 0x16c   : > { %14410 = vmatprep.mubr.msk.bf16.mxu0 %vm15729_vm0, %v15728_v0  ;;  %14418 = vmatprep.mubr.msk.bf16.mxu1 %vm15729_vm0, %v15728_v0 }
 0x16d   : > { %v3040_v21 = vpop.f32.mrf.mxu0  ;;  %v3095_v38 = vpop.f32.mrf.mxu1 }
 0x16e   : > { %14409 = vmatpush3.bf16.msra.mxu0 %v15438_v31  ;;  %14417 = vmatpush3.bf16.msra.mxu1 %v15439_v53  ;;  %v15442_v21 = vld [vmem:[%s16508_s13 + $0x180] sm:$0xff]  }
 0x16f   : > { %v14013_v7 = vpop.f32.mrf.mxu0  ;;  %14422 = vmatprep.subr.bf16.mxu0 %v15728_v0  ;;  %v14021_v61 = vpop.f32.mrf.mxu1  ;;  %14430 = vmatprep.subr.bf16.mxu1 %v15728_v0 }
 0x170   : > { %v15672_v61 = vld [vmem:[%s15801_s10 + $0x30] sm:$0x3] }
 0x171   : > { %v16977_v27 = vpop.f32.mrf.mxu0  ;;  %14411 = vmatmul.mubr.msk.bf16.vlgmr.msra.gmra.mxu0 %vm1019_vm1, %v581_v45  ;;  %v16982_v35 = vpop.f32.mrf.mxu1  ;;  %14419 = vmatmul.mubr.msk.bf16.vlgmr.msra.gmra.mxu1 %vm1019_vm1, %v582_v44  ;;  %v583_v45 = vpack.c.bf16 %v15672_v61, %v15672_v61 }
 0x172   : > { %18711 = vst [vmem:[#allocation48_spill] sm:$0xff] %v16977_v27  ;;  %18712 = vst [vmem:[#allocation49_spill] sm:$0xff] %v16982_v35  ;;  %14423 = vmatpush3.bf16.msra.mxu0 %v15440_v49  ;;  %14431 = vmatpush3.bf16.msra.mxu1 %v15441_v59  ;;  %v15444_v49 = vld [vmem:[%s16508_s13 + $0x1a8] sm:$0xff]   ;;  %v15673_v59 = vld [vmem:[%s15801_s10 + $0x32] sm:$0x3] }
 0x173   : > { %v14028_v53 = vpop.f32.mrf.mxu0  ;;  %14424 = vmatprep.subr.bf16.mxu0 %v15728_v0  ;;  %v14036_v31 = vpop.f32.mrf.mxu1  ;;  %14432 = vmatprep.subr.bf16.mxu1 %v15728_v0  ;;  %v584_v44 = vpack.c.bf16 %v15673_v59, %v15673_v59  ;;  %v15447_v35 = vld [vmem:[%s16508_s13 + $0x1b0] sm:$0xff]  }
 0x174   : > { %14426 = vmatprep.mubr.msk.bf16.mxu0 %vm15729_vm0, %v15728_v0  ;;  %14434 = vmatprep.mubr.msk.bf16.mxu1 %vm15729_vm0, %v15728_v0  ;;  %v15445_v53 = vld [vmem:[%s16508_s13 + $0x1b8] sm:$0xff]  }
 0x175   : > { %v3150_v10 = vpop.f32.mrf.mxu0  ;;  %v3205_v38 = vpop.f32.mrf.mxu1 }
 0x176   : > { %14425 = vmatpush3.bf16.msra.mxu0 %v15442_v21  ;;  %14433 = vmatpush3.bf16.msra.mxu1 %v15443_v55  ;;  %v15446_v10 = vld [vmem:[%s16508_s13 + $0x1a0] sm:$0xff]  }
 0x177   : > { %v14029_v7 = vpop.f32.mrf.mxu0  ;;  %14438 = vmatprep.subr.bf16.mxu0 %v15728_v0  ;;  %v14037_v31 = vpop.f32.mrf.mxu1  ;;  %14446 = vmatprep.subr.bf16.mxu1 %v15728_v0 }
 0x179   : > { %v16997_v61 = vpop.f32.mrf.mxu0  ;;  %14427 = vmatmul.mubr.msk.bf16.vlgmr.msra.gmra.mxu0 %vm1019_vm1, %v583_v45  ;;  %v17002_v59 = vpop.f32.mrf.mxu1  ;;  %14435 = vmatmul.mubr.msk.bf16.vlgmr.msra.gmra.mxu1 %vm1019_vm1, %v584_v44  ;;  %v15674_v45 = vld [vmem:[%s15801_s10 + $0x34] sm:$0x3]  ;;  %v15675_v44 = vld [vmem:[%s15801_s10 + $0x36] sm:$0x3] }
 0x17a   : > { %18713 = vst [vmem:[#allocation50_spill] sm:$0xff] %v16997_v61  ;;  %18714 = vst [vmem:[#allocation51_spill] sm:$0xff] %v17002_v59  ;;  %14439 = vmatpush3.bf16.msra.mxu0 %v15444_v49  ;;  %14447 = vmatpush3.bf16.msra.mxu1 %v15445_v53  ;;  %v585_v38 = vpack.c.bf16 %v15674_v45, %v15674_v45  ;;  %v15448_v49 = vld [vmem:[%s16508_s13 + $0x1c8] sm:$0xff]   ;;  %v586_v53 = vpack.c.bf16 %v15675_v44, %v15675_v44  ;;  %v15451_v61 = vld [vmem:[%s16508_s13 + $0x1d0] sm:$0xff]  }
 0x17b   : > { %v14044_v55 = vpop.f32.mrf.mxu0  ;;  %14440 = vmatprep.subr.bf16.mxu0 %v15728_v0  ;;  %v14052_v21 = vpop.f32.mrf.mxu1  ;;  %14448 = vmatprep.subr.bf16.mxu1 %v15728_v0 }
 0x17c   : > { %14442 = vmatprep.mubr.msk.bf16.mxu0 %vm15729_vm0, %v15728_v0  ;;  %14450 = vmatprep.mubr.msk.bf16.mxu1 %vm15729_vm0, %v15728_v0  ;;  %v15449_v21 = vld [vmem:[%s16508_s13 + $0x1d8] sm:$0xff]  }
 0x17d   : > { %v3260_v7 = vpop.f32.mrf.mxu0  ;;  %v3315_v31 = vpop.f32.mrf.mxu1 }
 0x17e   : > { %14441 = vmatpush3.bf16.msra.mxu0 %v15446_v10  ;;  %14449 = vmatpush3.bf16.msra.mxu1 %v15447_v35  ;;  %v15450_v7 = vld [vmem:[%s16508_s13 + $0x1c0] sm:$0xff]  }
 0x17f   : > { %v14045_v55 = vpop.f32.mrf.mxu0  ;;  %14454 = vmatprep.subr.bf16.mxu0 %v15728_v0  ;;  %v14053_v59 = vpop.f32.mrf.mxu1  ;;  %14462 = vmatprep.subr.bf16.mxu1 %v15728_v0 }
 0x180   : > { %v15676_v59 = vld [vmem:[%s15801_s10 + $0x38] sm:$0x3] }
 0x181   : > { %v17017_v45 = vpop.f32.mrf.mxu0  ;;  %14443 = vmatmul.mubr.msk.bf16.vlgmr.msra.gmra.mxu0 %vm1019_vm1, %v585_v38  ;;  %v17022_v44 = vpop.f32.mrf.mxu1  ;;  %14451 = vmatmul.mubr.msk.bf16.vlgmr.msra.gmra.mxu1 %vm1019_vm1, %v586_v53  ;;  %v587_v38 = vpack.c.bf16 %v15676_v59, %v15676_v59  ;;  %v15677_v53 = vld [vmem:[%s15801_s10 + $0x3a] sm:$0x3] }
 0x182   : > { %18715 = vst [vmem:[#allocation52_spill] sm:$0xff] %v17017_v45  ;;  %18716 = vst [vmem:[#allocation53_spill] sm:$0xff] %v17022_v44  ;;  %14455 = vmatpush3.bf16.msra.mxu0 %v15448_v49  ;;  %14463 = vmatpush3.bf16.msra.mxu1 %v15449_v21  ;;  %v15452_v49 = vld [vmem:[%s16508_s13 + $0x1e8] sm:$0xff]   ;;  %v588_v55 = vpack.c.bf16 %v15677_v53, %v15677_v53  ;;  %v15455_v45 = vld [vmem:[%s16508_s13 + $0x1f0] sm:$0xff]  }
 0x183   : > { %v14060_v35 = vpop.f32.mrf.mxu0  ;;  %14456 = vmatprep.subr.bf16.mxu0 %v15728_v0  ;;  %v14068_v10 = vpop.f32.mrf.mxu1  ;;  %14464 = vmatprep.subr.bf16.mxu1 %v15728_v0 }
 0x184   : > { %14458 = vmatprep.mubr.msk.bf16.mxu0 %vm15729_vm0, %v15728_v0  ;;  %14466 = vmatprep.mubr.msk.bf16.mxu1 %vm15729_vm0, %v15728_v0  ;;  %v15453_v10 = vld [vmem:[%s16508_s13 + $0x1f8] sm:$0xff]  }
 0x185   : > { %v3370_v31 = vpop.f32.mrf.mxu0  ;;  %v3425_v21 = vpop.f32.mrf.mxu1 }
 0x186   : > { %14457 = vmatpush3.bf16.msra.mxu0 %v15450_v7  ;;  %14465 = vmatpush3.bf16.msra.mxu1 %v15451_v61  ;;  %v15454_v31 = vld [vmem:[%s16508_s13 + $0x1e0] sm:$0xff]  }
 0x187   : > { %v14061_v35 = vpop.f32.mrf.mxu0  ;;  %14470 = vmatprep.subr.bf16.mxu0 %v15728_v0  ;;  %v14069_v44 = vpop.f32.mrf.mxu1  ;;  %14478 = vmatprep.subr.bf16.mxu1 %v15728_v0 }
 0x188   : > { %v15678_v44 = vld [vmem:[%s15801_s10 + $0x3c] sm:$0x3]  ;;  %v15456_v35 = vld [vmem:[%s16508_s13 + $0x208] sm:$0xff]  }
 0x189   : > { %v17037_v59 = vpop.f32.mrf.mxu0  ;;  %14459 = vmatmul.mubr.msk.bf16.vlgmr.msra.gmra.mxu0 %vm1019_vm1, %v587_v38  ;;  %v17042_v53 = vpop.f32.mrf.mxu1  ;;  %14467 = vmatmul.mubr.msk.bf16.vlgmr.msra.gmra.mxu1 %vm1019_vm1, %v588_v55  ;;  %v589_v38 = vpack.c.bf16 %v15678_v44, %v15678_v44 }
 0x18a   : > { %18717 = vst [vmem:[#allocation54_spill] sm:$0xff] %v17037_v59  ;;  %18718 = vst [vmem:[#allocation55_spill] sm:$0xff] %v17042_v53  ;;  %14471 = vmatpush3.bf16.msra.mxu0 %v15452_v49  ;;  %14479 = vmatpush3.bf16.msra.mxu1 %v15453_v10  ;;  %v15679_v49 = vld [vmem:[%s15801_s10 + $0x3e] sm:$0x3] }
 0x18b   : > { %v14076_v61 = vpop.f32.mrf.mxu0  ;;  %14472 = vmatprep.subr.bf16.mxu0 %v15728_v0  ;;  %v14084_v7 = vpop.f32.mrf.mxu1  ;;  %14480 = vmatprep.subr.bf16.mxu1 %v15728_v0  ;;  %v590_v55 = vpack.c.bf16 %v15679_v49, %v15679_v49  ;;  %v15459_v49 = vld [vmem:[%s16508_s13 + $0x210] sm:$0xff]  }
 0x18c   : > { %14474 = vmatprep.mubr.msk.bf16.mxu0 %vm15729_vm0, %v15728_v0  ;;  %14482 = vmatprep.mubr.msk.bf16.mxu1 %vm15729_vm0, %v15728_v0  ;;  %v15457_v7 = vld [vmem:[%s16508_s13 + $0x218] sm:$0xff]  }
 0x18d   : > { %v3480_v21 = vpop.f32.mrf.mxu0  ;;  %v3535_v10 = vpop.f32.mrf.mxu1 }
 0x18e   : > { %14473 = vmatpush3.bf16.msra.mxu0 %v15454_v31  ;;  %14481 = vmatpush3.bf16.msra.mxu1 %v15455_v45  ;;  %v15458_v31 = vld [vmem:[%s16508_s13 + $0x200] sm:$0xff]  }
 0x18f   : > { %v14077_v61 = vpop.f32.mrf.mxu0  ;;  %14486 = vmatprep.subr.bf16.mxu0 %v15728_v0  ;;  %v14085_v53 = vpop.f32.mrf.mxu1  ;;  %14494 = vmatprep.subr.bf16.mxu1 %v15728_v0 }
 0x191   : > { %v17057_v44 = vpop.f32.mrf.mxu0  ;;  %14475 = vmatmul.mubr.msk.bf16.vlgmr.msra.gmra.mxu0 %vm1019_vm1, %v589_v38  ;;  %v17060_v21 = vpop.f32.mrf.mxu1  ;;  %14483 = vmatmul.mubr.msk.bf16.vlgmr.msra.gmra.mxu1 %vm1019_vm1, %v590_v55  ;;  %v15680_v38 = vld [vmem:[%s15801_s10 + $0x40] sm:$0x3] }
 0x192   : > { %18719 = vst [vmem:[#allocation56_spill] sm:$0xff] %v17057_v44  ;;  %18720 = vst [vmem:[#allocation57_spill] sm:$0xff] %v17060_v21  ;;  %14487 = vmatpush3.bf16.msra.mxu0 %v15456_v35  ;;  %14495 = vmatpush3.bf16.msra.mxu1 %v15457_v7  ;;  %v591_v10 = vpack.c.bf16 %v15680_v38, %v15680_v38  ;;  %v15681_v35 = vld [vmem:[%s15801_s10 + $0x42] sm:$0x3]  ;;  %v15461_v21 = vld [vmem:[%s16508_s13 + $0x238] sm:$0xff]  }
 0x193   : > { %v14092_v45 = vpop.f32.mrf.mxu0  ;;  %14488 = vmatprep.subr.bf16.mxu0 %v15728_v0  ;;  %v14100_v53 = vpop.f32.mrf.mxu1  ;;  %14496 = vmatprep.subr.bf16.mxu1 %v15728_v0  ;;  %v592_v55 = vpack.c.bf16 %v15681_v35, %v15681_v35  ;;  %v15463_v35 = vld [vmem:[%s16508_s13 + $0x230] sm:$0xff]  }
 0x194   : > { %14490 = vmatprep.mubr.msk.bf16.mxu0 %vm15729_vm0, %v15728_v0  ;;  %14498 = vmatprep.mubr.msk.bf16.mxu1 %vm15729_vm0, %v15728_v0  ;;  %v15460_v45 = vld [vmem:[%s16508_s13 + $0x228] sm:$0xff]  }
 0x195   : > { %v3590_v61 = vpop.f32.mrf.mxu0  ;;  %v3645_v7 = vpop.f32.mrf.mxu1 }
 0x196   : > { %14489 = vmatpush3.bf16.msra.mxu0 %v15458_v31  ;;  %14497 = vmatpush3.bf16.msra.mxu1 %v15459_v49  ;;  %v15462_v31 = vld [vmem:[%s16508_s13 + $0x220] sm:$0xff]  }
 0x197   : > { %v14093_v53 = vpop.f32.mrf.mxu0  ;;  %14502 = vmatprep.subr.bf16.mxu0 %v15728_v0  ;;  %v14101_v44 = vpop.f32.mrf.mxu1  ;;  %14510 = vmatprep.subr.bf16.mxu1 %v15728_v0 }
 0x199   : > { %v17077_v38 = vpop.f32.mrf.mxu0  ;;  %14491 = vmatmul.mubr.msk.bf16.vlgmr.msra.gmra.mxu0 %vm1019_vm1, %v591_v10  ;;  %v17080_v61 = vpop.f32.mrf.mxu1  ;;  %14499 = vmatmul.mubr.msk.bf16.vlgmr.msra.gmra.mxu1 %vm1019_vm1, %v592_v55  ;;  %v15682_v10 = vld [vmem:[%s15801_s10 + $0x44] sm:$0x3]  ;;  %v15683_v55 = vld [vmem:[%s15801_s10 + $0x46] sm:$0x3] }
 0x19a   : > { %18721 = vst [vmem:[#allocation58_spill] sm:$0xff] %v17077_v38  ;;  %18722 = vst [vmem:[#allocation59_spill] sm:$0xff] %v17080_v61  ;;  %14503 = vmatpush3.bf16.msra.mxu0 %v15460_v45  ;;  %14511 = vmatpush3.bf16.msra.mxu1 %v15461_v21  ;;  %v593_v7 = vpack.c.bf16 %v15682_v10, %v15682_v10  ;;  %v594_v21 = vpack.c.bf16 %v15683_v55, %v15683_v55  ;;  %v15465_v61 = vld [vmem:[%s16508_s13 + $0x258] sm:$0xff]   ;;  %v15467_v55 = vld [vmem:[%s16508_s13 + $0x250] sm:$0xff]  }
 0x19b   : > { %v14108_v49 = vpop.f32.mrf.mxu0  ;;  %14504 = vmatprep.subr.bf16.mxu0 %v15728_v0  ;;  %v14116_v44 = vpop.f32.mrf.mxu1  ;;  %14512 = vmatprep.subr.bf16.mxu1 %v15728_v0 }
 0x19c   : > { %14506 = vmatprep.mubr.msk.bf16.mxu0 %vm15729_vm0, %v15728_v0  ;;  %14514 = vmatprep.mubr.msk.bf16.mxu1 %vm15729_vm0, %v15728_v0  ;;  %v15464_v49 = vld [vmem:[%s16508_s13 + $0x248] sm:$0xff]  }
 0x19d   : > { %v3700_v53 = vpop.f32.mrf.mxu0  ;;  %v3755_v45 = vpop.f32.mrf.mxu1 }
 0x19e   : > { %14505 = vmatpush3.bf16.msra.mxu0 %v15462_v31  ;;  %14513 = vmatpush3.bf16.msra.mxu1 %v15463_v35  ;;  %v15466_v31 = vld [vmem:[%s16508_s13 + $0x240] sm:$0xff]  }
 0x19f   : > { %v14109_v44 = vpop.f32.mrf.mxu0  ;;  %14518 = vmatprep.subr.bf16.mxu0 %v15728_v0  ;;  %v14117_v38 = vpop.f32.mrf.mxu1  ;;  %14526 = vmatprep.subr.bf16.mxu1 %v15728_v0 }
 0x1a1   : > { %v17097_v10 = vpop.f32.mrf.mxu0  ;;  %14507 = vmatmul.mubr.msk.bf16.vlgmr.msra.gmra.mxu0 %vm1019_vm1, %v593_v7  ;;  %v17100_v53 = vpop.f32.mrf.mxu1  ;;  %14515 = vmatmul.mubr.msk.bf16.vlgmr.msra.gmra.mxu1 %vm1019_vm1, %v594_v21  ;;  %v15684_v7 = vld [vmem:[%s15801_s10 + $0x48] sm:$0x3]  ;;  %v15685_v21 = vld [vmem:[%s15801_s10 + $0x4a] sm:$0x3] }
 0x1a2   : > { %18723 = vst [vmem:[#allocation60_spill] sm:$0xff] %v17097_v10  ;;  %18724 = vst [vmem:[#allocation61_spill] sm:$0xff] %v17100_v53  ;;  %14519 = vmatpush3.bf16.msra.mxu0 %v15464_v49  ;;  %14527 = vmatpush3.bf16.msra.mxu1 %v15465_v61  ;;  %v595_v45 = vpack.c.bf16 %v15684_v7, %v15684_v7  ;;  %v596_v61 = vpack.c.bf16 %v15685_v21, %v15685_v21  ;;  %v15469_v53 = vld [vmem:[%s16508_s13 + $0x278] sm:$0xff]   ;;  %v15471_v21 = vld [vmem:[%s16508_s13 + $0x270] sm:$0xff]  }
 0x1a3   : > { %v14124_v35 = vpop.f32.mrf.mxu0  ;;  %14520 = vmatprep.subr.bf16.mxu0 %v15728_v0  ;;  %v14132_v38 = vpop.f32.mrf.mxu1  ;;  %14528 = vmatprep.subr.bf16.mxu1 %v15728_v0 }
 0x1a4   : > { %14522 = vmatprep.mubr.msk.bf16.mxu0 %vm15729_vm0, %v15728_v0  ;;  %14530 = vmatprep.mubr.msk.bf16.mxu1 %vm15729_vm0, %v15728_v0  ;;  %v15468_v35 = vld [vmem:[%s16508_s13 + $0x268] sm:$0xff]  }
 0x1a5   : > { %v3810_v44 = vpop.f32.mrf.mxu0  ;;  %v3865_v49 = vpop.f32.mrf.mxu1 }
 0x1a6   : > { %14521 = vmatpush3.bf16.msra.mxu0 %v15466_v31  ;;  %14529 = vmatpush3.bf16.msra.mxu1 %v15467_v55  ;;  %v15470_v31 = vld [vmem:[%s16508_s13 + $0x260] sm:$0xff]  }
 0x1a7   : > { %v14125_v38 = vpop.f32.mrf.mxu0  ;;  %14534 = vmatprep.subr.bf16.mxu0 %v15728_v0  ;;  %v14133_v10 = vpop.f32.mrf.mxu1  ;;  %14542 = vmatprep.subr.bf16.mxu1 %v15728_v0 }
 0x1a9   : > { %v17117_v7 = vpop.f32.mrf.mxu0  ;;  %14523 = vmatmul.mubr.msk.bf16.vlgmr.msra.gmra.mxu0 %vm1019_vm1, %v595_v45  ;;  %v17120_v44 = vpop.f32.mrf.mxu1  ;;  %14531 = vmatmul.mubr.msk.bf16.vlgmr.msra.gmra.mxu1 %vm1019_vm1, %v596_v61  ;;  %v15686_v45 = vld [vmem:[%s15801_s10 + $0x4c] sm:$0x3]  ;;  %v15687_v61 = vld [vmem:[%s15801_s10 + $0x4e] sm:$0x3] }
 0x1aa   : > { %18725 = vst [vmem:[#allocation62_spill] sm:$0xff] %v17117_v7  ;;  %18726 = vst [vmem:[#allocation63_spill] sm:$0xff] %v17120_v44  ;;  %14535 = vmatpush3.bf16.msra.mxu0 %v15468_v35  ;;  %14543 = vmatpush3.bf16.msra.mxu1 %v15469_v53  ;;  %v597_v49 = vpack.c.bf16 %v15686_v45, %v15686_v45  ;;  %v598_v53 = vpack.c.bf16 %v15687_v61, %v15687_v61  ;;  %v15473_v44 = vld [vmem:[%s16508_s13 + $0x298] sm:$0xff]   ;;  %v15475_v61 = vld [vmem:[%s16508_s13 + $0x290] sm:$0xff]  }
 0x1ab   : > { %v14140_v55 = vpop.f32.mrf.mxu0  ;;  %14536 = vmatprep.subr.bf16.mxu0 %v15728_v0  ;;  %v14148_v10 = vpop.f32.mrf.mxu1  ;;  %14544 = vmatprep.subr.bf16.mxu1 %v15728_v0 }
 0x1ac   : > { %14538 = vmatprep.mubr.msk.bf16.mxu0 %vm15729_vm0, %v15728_v0  ;;  %14546 = vmatprep.mubr.msk.bf16.mxu1 %vm15729_vm0, %v15728_v0  ;;  %v15472_v55 = vld [vmem:[%s16508_s13 + $0x288] sm:$0xff]  }
 0x1ad   : > { %v3920_v38 = vpop.f32.mrf.mxu0  ;;  %v3975_v35 = vpop.f32.mrf.mxu1 }
 0x1ae   : > { %14537 = vmatpush3.bf16.msra.mxu0 %v15470_v31  ;;  %14545 = vmatpush3.bf16.msra.mxu1 %v15471_v21  ;;  %v15474_v31 = vld [vmem:[%s16508_s13 + $0x280] sm:$0xff]  }
 0x1af   : > { %v14141_v10 = vpop.f32.mrf.mxu0  ;;  %14550 = vmatprep.subr.bf16.mxu0 %v15728_v0  ;;  %v14149_v7 = vpop.f32.mrf.mxu1  ;;  %14558 = vmatprep.subr.bf16.mxu1 %v15728_v0 }
 0x1b1   : > { %v17137_v45 = vpop.f32.mrf.mxu0  ;;  %14539 = vmatmul.mubr.msk.bf16.vlgmr.msra.gmra.mxu0 %vm1019_vm1, %v597_v49  ;;  %v17140_v38 = vpop.f32.mrf.mxu1  ;;  %14547 = vmatmul.mubr.msk.bf16.vlgmr.msra.gmra.mxu1 %vm1019_vm1, %v598_v53  ;;  %v15688_v49 = vld [vmem:[%s15801_s10 + $0x50] sm:$0x3]  ;;  %v15689_v53 = vld [vmem:[%s15801_s10 + $0x52] sm:$0x3] }
 0x1b2   : > { %18727 = vst [vmem:[#allocation64_spill] sm:$0xff] %v17137_v45  ;;  %18728 = vst [vmem:[#allocation65_spill] sm:$0xff] %v17140_v38  ;;  %14551 = vmatpush3.bf16.msra.mxu0 %v15472_v55  ;;  %14559 = vmatpush3.bf16.msra.mxu1 %v15473_v44  ;;  %v599_v35 = vpack.c.bf16 %v15688_v49, %v15688_v49  ;;  %v600_v44 = vpack.c.bf16 %v15689_v53, %v15689_v53  ;;  %v15477_v38 = vld [vmem:[%s16508_s13 + $0x2b8] sm:$0xff]   ;;  %v15479_v53 = vld [vmem:[%s16508_s13 + $0x2b0] sm:$0xff]  }
 0x1b3   : > { %v14156_v21 = vpop.f32.mrf.mxu0  ;;  %14552 = vmatprep.subr.bf16.mxu0 %v15728_v0  ;;  %v14164_v7 = vpop.f32.mrf.mxu1  ;;  %14560 = vmatprep.subr.bf16.mxu1 %v15728_v0 }
 0x1b4   : > { %14554 = vmatprep.mubr.msk.bf16.mxu0 %vm15729_vm0, %v15728_v0  ;;  %14562 = vmatprep.mubr.msk.bf16.mxu1 %vm15729_vm0, %v15728_v0  ;;  %v15476_v21 = vld [vmem:[%s16508_s13 + $0x2a8] sm:$0xff]  }
 0x1b5   : > { %v4030_v10 = vpop.f32.mrf.mxu0  ;;  %v4085_v55 = vpop.f32.mrf.mxu1 }
 0x1b6   : > { %14553 = vmatpush3.bf16.msra.mxu0 %v15474_v31  ;;  %14561 = vmatpush3.bf16.msra.mxu1 %v15475_v61  ;;  %v15478_v31 = vld [vmem:[%s16508_s13 + $0x2a0] sm:$0xff]  }
 0x1b7   : > { %v14157_v7 = vpop.f32.mrf.mxu0  ;;  %14566 = vmatprep.subr.bf16.mxu0 %v15728_v0  ;;  %v14165_v45 = vpop.f32.mrf.mxu1  ;;  %14574 = vmatprep.subr.bf16.mxu1 %v15728_v0 }
 0x1b9   : > { %v17157_v49 = vpop.f32.mrf.mxu0  ;;  %14555 = vmatmul.mubr.msk.bf16.vlgmr.msra.gmra.mxu0 %vm1019_vm1, %v599_v35  ;;  %v17160_v10 = vpop.f32.mrf.mxu1  ;;  %14563 = vmatmul.mubr.msk.bf16.vlgmr.msra.gmra.mxu1 %vm1019_vm1, %v600_v44  ;;  %v15690_v35 = vld [vmem:[%s15801_s10 + $0x54] sm:$0x3]  ;;  %v15691_v44 = vld [vmem:[%s15801_s10 + $0x56] sm:$0x3] }
 0x1ba   : > { %18729 = vst [vmem:[#allocation66_spill] sm:$0xff] %v17157_v49  ;;  %18730 = vst [vmem:[#allocation67_spill] sm:$0xff] %v17160_v10  ;;  %14567 = vmatpush3.bf16.msra.mxu0 %v15476_v21  ;;  %14575 = vmatpush3.bf16.msra.mxu1 %v15477_v38  ;;  %v601_v55 = vpack.c.bf16 %v15690_v35, %v15690_v35  ;;  %v602_v38 = vpack.c.bf16 %v15691_v44, %v15691_v44  ;;  %v15481_v10 = vld [vmem:[%s16508_s13 + $0x2d8] sm:$0xff]   ;;  %v15483_v44 = vld [vmem:[%s16508_s13 + $0x2d0] sm:$0xff]  }
 0x1bb   : > { %v14172_v61 = vpop.f32.mrf.mxu0  ;;  %14568 = vmatprep.subr.bf16.mxu0 %v15728_v0  ;;  %v14180_v45 = vpop.f32.mrf.mxu1  ;;  %14576 = vmatprep.subr.bf16.mxu1 %v15728_v0 }
 0x1bc   : > { %14570 = vmatprep.mubr.msk.bf16.mxu0 %vm15729_vm0, %v15728_v0  ;;  %14578 = vmatprep.mubr.msk.bf16.mxu1 %vm15729_vm0, %v15728_v0  ;;  %v15480_v61 = vld [vmem:[%s16508_s13 + $0x2c8] sm:$0xff]  }
 0x1bd   : > { %v4140_v7 = vpop.f32.mrf.mxu0  ;;  %v4195_v21 = vpop.f32.mrf.mxu1 }
 0x1be   : > { %14569 = vmatpush3.bf16.msra.mxu0 %v15478_v31  ;;  %14577 = vmatpush3.bf16.msra.mxu1 %v15479_v53  ;;  %v15482_v31 = vld [vmem:[%s16508_s13 + $0x2c0] sm:$0xff]  }
 0x1bf   : > { %v14173_v45 = vpop.f32.mrf.mxu0  ;;  %14582 = vmatprep.subr.bf16.mxu0 %v15728_v0  ;;  %v14181_v49 = vpop.f32.mrf.mxu1  ;;  %14590 = vmatprep.subr.bf16.mxu1 %v15728_v0 }
 0x1c1   : > { %v17177_v35 = vpop.f32.mrf.mxu0  ;;  %14571 = vmatmul.mubr.msk.bf16.vlgmr.msra.gmra.mxu0 %vm1019_vm1, %v601_v55  ;;  %v17180_v7 = vpop.f32.mrf.mxu1  ;;  %14579 = vmatmul.mubr.msk.bf16.vlgmr.msra.gmra.mxu1 %vm1019_vm1, %v602_v38  ;;  %v15692_v55 = vld [vmem:[%s15801_s10 + $0x58] sm:$0x3]  ;;  %v15693_v38 = vld [vmem:[%s15801_s10 + $0x5a] sm:$0x3] }
 0x1c2   : > { %18731 = vst [vmem:[#allocation68_spill] sm:$0xff] %v17177_v35  ;;  %18732 = vst [vmem:[#allocation69_spill] sm:$0xff] %v17180_v7  ;;  %14583 = vmatpush3.bf16.msra.mxu0 %v15480_v61  ;;  %14591 = vmatpush3.bf16.msra.mxu1 %v15481_v10  ;;  %v603_v21 = vpack.c.bf16 %v15692_v55, %v15692_v55  ;;  %v604_v10 = vpack.c.bf16 %v15693_v38, %v15693_v38  ;;  %v15485_v7 = vld [vmem:[%s16508_s13 + $0x2f8] sm:$0xff]   ;;  %v15487_v38 = vld [vmem:[%s16508_s13 + $0x2f0] sm:$0xff]  }
 0x1c3   : > { %v14188_v53 = vpop.f32.mrf.mxu0  ;;  %14584 = vmatprep.subr.bf16.mxu0 %v15728_v0  ;;  %v14196_v49 = vpop.f32.mrf.mxu1  ;;  %14592 = vmatprep.subr.bf16.mxu1 %v15728_v0 }
 0x1c4   : > { %14586 = vmatprep.mubr.msk.bf16.mxu0 %vm15729_vm0, %v15728_v0  ;;  %14594 = vmatprep.mubr.msk.bf16.mxu1 %vm15729_vm0, %v15728_v0  ;;  %v15484_v53 = vld [vmem:[%s16508_s13 + $0x2e8] sm:$0xff]  }
 0x1c5   : > { %v4250_v45 = vpop.f32.mrf.mxu0  ;;  %v4305_v61 = vpop.f32.mrf.mxu1 }
 0x1c6   : > { %14585 = vmatpush3.bf16.msra.mxu0 %v15482_v31  ;;  %14593 = vmatpush3.bf16.msra.mxu1 %v15483_v44  ;;  %v15486_v31 = vld [vmem:[%s16508_s13 + $0x2e0] sm:$0xff]  }
 0x1c7   : > { %v14189_v49 = vpop.f32.mrf.mxu0  ;;  %14598 = vmatprep.subr.bf16.mxu0 %v15728_v0  ;;  %v14197_v35 = vpop.f32.mrf.mxu1  ;;  %14606 = vmatprep.subr.bf16.mxu1 %v15728_v0 }
 0x1c9   : > { %v17197_v55 = vpop.f32.mrf.mxu0  ;;  %14587 = vmatmul.mubr.msk.bf16.vlgmr.msra.gmra.mxu0 %vm1019_vm1, %v603_v21  ;;  %v17200_v45 = vpop.f32.mrf.mxu1  ;;  %14595 = vmatmul.mubr.msk.bf16.vlgmr.msra.gmra.mxu1 %vm1019_vm1, %v604_v10  ;;  %v15694_v21 = vld [vmem:[%s15801_s10 + $0x5c] sm:$0x3]  ;;  %v15695_v10 = vld [vmem:[%s15801_s10 + $0x5e] sm:$0x3] }
 0x1ca   : > { %18733 = vst [vmem:[#allocation70_spill] sm:$0xff] %v17197_v55  ;;  %18734 = vst [vmem:[#allocation71_spill] sm:$0xff] %v17200_v45  ;;  %14599 = vmatpush3.bf16.msra.mxu0 %v15484_v53  ;;  %14607 = vmatpush3.bf16.msra.mxu1 %v15485_v7  ;;  %v605_v61 = vpack.c.bf16 %v15694_v21, %v15694_v21  ;;  %v606_v7 = vpack.c.bf16 %v15695_v10, %v15695_v10  ;;  %v15489_v45 = vld [vmem:[%s16508_s13 + $0x318] sm:$0xff]   ;;  %v15491_v10 = vld [vmem:[%s16508_s13 + $0x310] sm:$0xff]  }
 0x1cb   : > { %v14204_v44 = vpop.f32.mrf.mxu0  ;;  %14600 = vmatprep.subr.bf16.mxu0 %v15728_v0  ;;  %v14212_v35 = vpop.f32.mrf.mxu1  ;;  %14608 = vmatprep.subr.bf16.mxu1 %v15728_v0 }
 0x1cc   : > { %14602 = vmatprep.mubr.msk.bf16.mxu0 %vm15729_vm0, %v15728_v0  ;;  %14610 = vmatprep.mubr.msk.bf16.mxu1 %vm15729_vm0, %v15728_v0  ;;  %v15488_v44 = vld [vmem:[%s16508_s13 + $0x308] sm:$0xff]  }
 0x1cd   : > { %v4360_v49 = vpop.f32.mrf.mxu0  ;;  %v4415_v53 = vpop.f32.mrf.mxu1 }
 0x1ce   : > { %14601 = vmatpush3.bf16.msra.mxu0 %v15486_v31  ;;  %14609 = vmatpush3.bf16.msra.mxu1 %v15487_v38  ;;  %v15490_v31 = vld [vmem:[%s16508_s13 + $0x300] sm:$0xff]  }
 0x1cf   : > { %v14205_v35 = vpop.f32.mrf.mxu0  ;;  %14614 = vmatprep.subr.bf16.mxu0 %v15728_v0  ;;  %v14213_v55 = vpop.f32.mrf.mxu1  ;;  %14622 = vmatprep.subr.bf16.mxu1 %v15728_v0 }
 0x1d1   : > { %v17217_v21 = vpop.f32.mrf.mxu0  ;;  %14603 = vmatmul.mubr.msk.bf16.vlgmr.msra.gmra.mxu0 %vm1019_vm1, %v605_v61  ;;  %v17220_v49 = vpop.f32.mrf.mxu1  ;;  %14611 = vmatmul.mubr.msk.bf16.vlgmr.msra.gmra.mxu1 %vm1019_vm1, %v606_v7  ;;  %v15696_v61 = vld [vmem:[%s15801_s10 + $0x60] sm:$0x3]  ;;  %v15697_v7 = vld [vmem:[%s15801_s10 + $0x62] sm:$0x3] }
 0x1d2   : > { %18735 = vst [vmem:[#allocation72_spill] sm:$0xff] %v17217_v21  ;;  %18736 = vst [vmem:[#allocation73_spill] sm:$0xff] %v17220_v49  ;;  %14615 = vmatpush3.bf16.msra.mxu0 %v15488_v44  ;;  %14623 = vmatpush3.bf16.msra.mxu1 %v15489_v45  ;;  %v607_v53 = vpack.c.bf16 %v15696_v61, %v15696_v61  ;;  %v608_v45 = vpack.c.bf16 %v15697_v7, %v15697_v7  ;;  %v15493_v49 = vld [vmem:[%s16508_s13 + $0x338] sm:$0xff]  }
 0x1d3   : > { %v14220_v38 = vpop.f32.mrf.mxu0  ;;  %14616 = vmatprep.subr.bf16.mxu0 %v15728_v0  ;;  %v14228_v55 = vpop.f32.mrf.mxu1  ;;  %14624 = vmatprep.subr.bf16.mxu1 %v15728_v0 }
 0x1d4   : > { %14618 = vmatprep.mubr.msk.bf16.mxu0 %vm15729_vm0, %v15728_v0  ;;  %14626 = vmatprep.mubr.msk.bf16.mxu1 %vm15729_vm0, %v15728_v0  ;;  %v15492_v38 = vld [vmem:[%s16508_s13 + $0x328] sm:$0xff]  }
 0x1d5   : > { %v4470_v35 = vpop.f32.mrf.mxu0  ;;  %v4525_v44 = vpop.f32.mrf.mxu1 }
 0x1d6   : > { %14617 = vmatpush3.bf16.msra.mxu0 %v15490_v31  ;;  %14625 = vmatpush3.bf16.msra.mxu1 %v15491_v10 }
 0x1d7   : > { %v14221_v55 = vpop.f32.mrf.mxu0  ;;  %14630 = vmatprep.subr.bf16.mxu0 %v15728_v0  ;;  %v14229_v21 = vpop.f32.mrf.mxu1  ;;  %14638 = vmatprep.subr.bf16.mxu1 %v15728_v0 }
 0x1d8   : > { %v15494_v21 = vld [vmem:[%s16508_s13 + $0x320] sm:$0xff]  }
 0x1d9   : > { %v17243_v61 = vpop.f32.mrf.mxu0  ;;  %14619 = vmatmul.mubr.msk.bf16.vlgmr.msra.gmra.mxu0 %vm1019_vm1, %v607_v53  ;;  %v17248_v10 = vpop.f32.mrf.mxu1  ;;  %14627 = vmatmul.mubr.msk.bf16.vlgmr.msra.gmra.mxu1 %vm1019_vm1, %v608_v45  ;;  %v15495_v53 = vld [vmem:[%s16508_s13 + $0x330] sm:$0xff]   ;;  %v15698_v45 = vld [vmem:[%s15801_s10 + $0x64] sm:$0x3] }
 0x1da   : > { %18737 = vst [vmem:[#allocation74_spill] sm:$0xff] %v17243_v61  ;;  %v12080_v31 = vsub.f32 %v16585_v15, %v17243_v61  ;;  %18738 = vst [vmem:[#allocation75_spill] sm:$0xff] %v17248_v10  ;;  %14631 = vmatpush3.bf16.msra.mxu0 %v15492_v38  ;;  %v12081_v35 = vsub.f32 %v16588_v46, %v17248_v10  ;;  %14639 = vmatpush3.bf16.msra.mxu1 %v15493_v49  ;;  %v15699_v49 = vld [vmem:[%s15801_s10 + $0x66] sm:$0x3]  ;;  %v15497_v61 = vld [vmem:[%s16508_s13 + $0x358] sm:$0xff]  }
 0x1db   : > { %v14236_v7 = vpop.f32.mrf.mxu0  ;;  %14632 = vmatprep.subr.bf16.mxu0 %v15728_v0  ;;  %v14244_v44 = vpop.f32.mrf.mxu1  ;;  %14640 = vmatprep.subr.bf16.mxu1 %v15728_v0  ;;  %v609_v38 = vpack.c.bf16 %v15698_v45, %v15698_v45 }
 0x1dc   : > { %12145 = vst.msk [vmem:[%s17241_s19] sm:$0x3] %vm12144_vm2, %v12080_v31  ;;  %14634 = vmatprep.mubr.msk.bf16.mxu0 %vm15729_vm0, %v15728_v0  ;;  %12146 = vst.msk [vmem:[%s17241_s19 + $0x2] sm:$0x3] %vm12144_vm2, %v12081_v35  ;;  %14642 = vmatprep.mubr.msk.bf16.mxu1 %vm15729_vm0, %v15728_v0  ;;  %v610_v7 = vpack.c.bf16 %v15699_v49, %v15699_v49  ;;  %v15496_v31 = vld [vmem:[%s16508_s13 + $0x348] sm:$0xff]  }
 0x1dd   : > { %v4836_v55 = vpop.f32.mrf.mxu0  ;;  %v4891_v10 = vpop.f32.mrf.mxu1 }
 0x1de   : > { %14633 = vmatpush3.bf16.msra.mxu0 %v15494_v21  ;;  %14641 = vmatpush3.bf16.msra.mxu1 %v15495_v53  ;;  %v15498_v53 = vld [vmem:[%s16508_s13 + $0x340] sm:$0xff]  }
 0x1df   : > { %v14237_v44 = vpop.f32.mrf.mxu0  ;;  %14646 = vmatprep.subr.bf16.mxu0 %v15728_v0  ;;  %v14245_v45 = vpop.f32.mrf.mxu1  ;;  %14654 = vmatprep.subr.bf16.mxu1 %v15728_v0 }
 0x1e1   : > { %v17271_v35 = vpop.f32.mrf.mxu0  ;;  %14635 = vmatmul.mubr.msk.bf16.vlgmr.msra.gmra.mxu0 %vm1019_vm1, %v609_v38  ;;  %v17276_v21 = vpop.f32.mrf.mxu1  ;;  %14643 = vmatmul.mubr.msk.bf16.vlgmr.msra.gmra.mxu1 %vm1019_vm1, %v610_v7  ;;  %v15499_v38 = vld [vmem:[%s16508_s13 + $0x350] sm:$0xff]   ;;  %v15700_v7 = vld [vmem:[%s15801_s10 + $0x68] sm:$0x3] }
 0x1e2   : > { %18739 = vst [vmem:[#allocation76_spill] sm:$0xff] %v17271_v35  ;;  %v12082_v10 = vsub.f32 %v16607_v4, %v17271_v35  ;;  %18740 = vst [vmem:[#allocation77_spill] sm:$0xff] %v17276_v21  ;;  %14647 = vmatpush3.bf16.msra.mxu0 %v15496_v31  ;;  %v12083_v55 = vsub.f32 %v16612_v51, %v17276_v21  ;;  %14655 = vmatpush3.bf16.msra.mxu1 %v15497_v61  ;;  %v15701_v61 = vld [vmem:[%s15801_s10 + $0x6a] sm:$0x3]  ;;  %v15501_v35 = vld [vmem:[%s16508_s13 + $0x378] sm:$0xff]  }
 0x1e3   : > { %v14252_v49 = vpop.f32.mrf.mxu0  ;;  %14648 = vmatprep.subr.bf16.mxu0 %v15728_v0  ;;  %v14260_v44 = vpop.f32.mrf.mxu1  ;;  %14656 = vmatprep.subr.bf16.mxu1 %v15728_v0  ;;  %v611_v31 = vpack.c.bf16 %v15700_v7, %v15700_v7 }
 0x1e4   : > { %12147 = vst.msk [vmem:[%s17241_s19 + $0x4] sm:$0x3] %vm12144_vm2, %v12082_v10  ;;  %14650 = vmatprep.mubr.msk.bf16.mxu0 %vm15729_vm0, %v15728_v0  ;;  %12148 = vst.msk [vmem:[%s17241_s19 + $0x6] sm:$0x3] %vm12144_vm2, %v12083_v55  ;;  %14658 = vmatprep.mubr.msk.bf16.mxu1 %vm15729_vm0, %v15728_v0  ;;  %v612_v49 = vpack.c.bf16 %v15701_v61, %v15701_v61  ;;  %v15500_v10 = vld [vmem:[%s16508_s13 + $0x368] sm:$0xff]  }
 0x1e5   : > { %v4946_v45 = vpop.f32.mrf.mxu0  ;;  %v5001_v21 = vpop.f32.mrf.mxu1 }
 0x1e6   : > { %14649 = vmatpush3.bf16.msra.mxu0 %v15498_v53  ;;  %14657 = vmatpush3.bf16.msra.mxu1 %v15499_v38  ;;  %v15502_v38 = vld [vmem:[%s16508_s13 + $0x360] sm:$0xff]  }
 0x1e7   : > { %v14253_v44 = vpop.f32.mrf.mxu0  ;;  %14662 = vmatprep.subr.bf16.mxu0 %v15728_v0  ;;  %v14261_v7 = vpop.f32.mrf.mxu1  ;;  %14670 = vmatprep.subr.bf16.mxu1 %v15728_v0 }
 0x1e9   : > { %v17299_v55 = vpop.f32.mrf.mxu0  ;;  %14651 = vmatmul.mubr.msk.bf16.vlgmr.msra.gmra.mxu0 %vm1019_vm1, %v611_v31  ;;  %v17304_v53 = vpop.f32.mrf.mxu1  ;;  %14659 = vmatmul.mubr.msk.bf16.vlgmr.msra.gmra.mxu1 %vm1019_vm1, %v612_v49  ;;  %v15503_v31 = vld [vmem:[%s16508_s13 + $0x370] sm:$0xff]   ;;  %v15702_v49 = vld [vmem:[%s15801_s10 + $0x6c] sm:$0x3] }
 0x1ea   : > { %18741 = vst [vmem:[#allocation78_spill] sm:$0xff] %v17299_v55  ;;  %v12084_v21 = vsub.f32 %v16629_v37, %v17299_v55  ;;  %18742 = vst [vmem:[#allocation79_spill] sm:$0xff] %v17304_v53  ;;  %14663 = vmatpush3.bf16.msra.mxu0 %v15500_v10  ;;  %v12085_v45 = vsub.f32 %v16634_v57, %v17304_v53  ;;  %14671 = vmatpush3.bf16.msra.mxu1 %v15501_v35  ;;  %v15703_v35 = vld [vmem:[%s15801_s10 + $0x6e] sm:$0x3]  ;;  %v15505_v55 = vld [vmem:[%s16508_s13 + $0x398] sm:$0xff]  }
 0x1eb   : > { %v14268_v61 = vpop.f32.mrf.mxu0  ;;  %14664 = vmatprep.subr.bf16.mxu0 %v15728_v0  ;;  %v14276_v44 = vpop.f32.mrf.mxu1  ;;  %14672 = vmatprep.subr.bf16.mxu1 %v15728_v0  ;;  %v613_v10 = vpack.c.bf16 %v15702_v49, %v15702_v49 }
 0x1ec   : > { %12149 = vst.msk [vmem:[%s17241_s19 + $0x8] sm:$0x3] %vm12144_vm2, %v12084_v21  ;;  %14666 = vmatprep.mubr.msk.bf16.mxu0 %vm15729_vm0, %v15728_v0  ;;  %12150 = vst.msk [vmem:[%s17241_s19 + $0xa] sm:$0x3] %vm12144_vm2, %v12085_v45  ;;  %14674 = vmatprep.mubr.msk.bf16.mxu1 %vm15729_vm0, %v15728_v0  ;;  %v614_v61 = vpack.c.bf16 %v15703_v35, %v15703_v35  ;;  %v15504_v21 = vld [vmem:[%s16508_s13 + $0x388] sm:$0xff]  }
 0x1ed   : > { %v5056_v7 = vpop.f32.mrf.mxu0  ;;  %v5111_v53 = vpop.f32.mrf.mxu1 }
 0x1ee   : > { %14665 = vmatpush3.bf16.msra.mxu0 %v15502_v38  ;;  %14673 = vmatpush3.bf16.msra.mxu1 %v15503_v31  ;;  %v15506_v31 = vld [vmem:[%s16508_s13 + $0x380] sm:$0xff]   ;;  %v487_v7 = vld [vmem:[%s15801_s10 + $0x70] sm:$0x3] }
 0x1ef   : > { %v14269_v44 = vpop.f32.mrf.mxu0  ;;  %14678 = vmatprep.subr.bf16.mxu0 %v15728_v0  ;;  %v14277_v49 = vpop.f32.mrf.mxu1  ;;  %14686 = vmatprep.subr.bf16.mxu1 %v15728_v0 }
 0x1f0   : > { %v488_v49 = vld [vmem:[%s15801_s10 + $0x72] sm:$0x3] }
 0x1f1   : > { %v17327_v45 = vpop.f32.mrf.mxu0  ;;  %14667 = vmatmul.mubr.msk.bf16.vlgmr.msra.gmra.mxu0 %vm1019_vm1, %v613_v10  ;;  %v17332_v38 = vpop.f32.mrf.mxu1  ;;  %14675 = vmatmul.mubr.msk.bf16.vlgmr.msra.gmra.mxu1 %vm1019_vm1, %v614_v61  ;;  %v15507_v10 = vld [vmem:[%s16508_s13 + $0x390] sm:$0xff]  }
 0x1f2   : > { %18743 = vst [vmem:[#allocation80_spill] sm:$0xff] %v17327_v45  ;;  %v12086_v53 = vsub.f32 %v16652_v13, %v17327_v45  ;;  %18744 = vst [vmem:[#allocation81_spill] sm:$0xff] %v17332_v38  ;;  %14679 = vmatpush3.bf16.msra.mxu0 %v15504_v21  ;;  %v12087_v35 = vsub.f32 %v16658_v19, %v17332_v38  ;;  %14687 = vmatpush3.bf16.msra.mxu1 %v15505_v55  ;;  %v15508_v38 = vld [vmem:[%s16508_s13 + $0x3a8] sm:$0xff]  }
 0x1f3   : > { %v14284_v44 = vpop.f32.mrf.mxu0  ;;  %14680 = vmatprep.subr.bf16.mxu0 %v15728_v0  ;;  %v14292_v45 = vpop.f32.mrf.mxu1  ;;  %14688 = vmatprep.subr.bf16.mxu1 %v15728_v0  ;;  %v615_v55 = vpack.c.bf16 %v487_v7, %v487_v7 }
 0x1f4   : > { %12151 = vst.msk [vmem:[%s17241_s19 + $0xc] sm:$0x3] %vm12144_vm2, %v12086_v53  ;;  %14682 = vmatprep.mubr.msk.bf16.mxu0 %vm15729_vm0, %v15728_v0  ;;  %12152 = vst.msk [vmem:[%s17241_s19 + $0xe] sm:$0x3] %vm12144_vm2, %v12087_v35  ;;  %14690 = vmatprep.mubr.msk.bf16.mxu1 %vm15729_vm0, %v15728_v0  ;;  %v616_v44 = vpack.c.bf16 %v488_v49, %v488_v49  ;;  %v15509_v53 = vld [vmem:[%s16508_s13 + $0x3b8] sm:$0xff]  }
 0x1f5   : > { %v5166_v61 = vpop.f32.mrf.mxu0  ;;  %v5221_v21 = vpop.f32.mrf.mxu1  ;;  %v489_v49 = vld [vmem:[%s15801_s10 + $0x74] sm:$0x3] }
 0x1f6   : > { %14681 = vmatpush3.bf16.msra.mxu0 %v15506_v31  ;;  %14689 = vmatpush3.bf16.msra.mxu1 %v15507_v10  ;;  %v15510_v10 = vld [vmem:[%s16508_s13 + $0x3a0] sm:$0xff]   ;;  %v490_v21 = vld [vmem:[%s15801_s10 + $0x76] sm:$0x3] }
 0x1f7   : > { %v14285_v45 = vpop.f32.mrf.mxu0  ;;  %14694 = vmatprep.subr.bf16.mxu0 %v15728_v0  ;;  %v14293_v19 = vpop.f32.mrf.mxu1  ;;  %14702 = vmatprep.subr.bf16.mxu1 %v15728_v0 }
 0x1f9   : > { %v17355_v35 = vpop.f32.mrf.mxu0  ;;  %14683 = vmatmul.mubr.msk.bf16.vlgmr.msra.gmra.mxu0 %vm1019_vm1, %v615_v55  ;;  %v17360_v7 = vpop.f32.mrf.mxu1  ;;  %14691 = vmatmul.mubr.msk.bf16.vlgmr.msra.gmra.mxu1 %vm1019_vm1, %v616_v44  ;;  %v15511_v55 = vld [vmem:[%s16508_s13 + $0x3b0] sm:$0xff]   ;;  %v617_v44 = vpack.c.bf16 %v489_v49, %v489_v49 }
 0x1fa   : > { %18745 = vst [vmem:[#allocation82_spill] sm:$0xff] %v17355_v35  ;;  %v12088_v31 = vsub.f32 %v16672_v2, %v17355_v35  ;;  %18746 = vst [vmem:[#allocation83_spill] sm:$0xff] %v17360_v7  ;;  %14695 = vmatpush3.bf16.msra.mxu0 %v15508_v38  ;;  %v12089_v19 = vsub.f32 %v16678_v47, %v17360_v7  ;;  %14703 = vmatpush3.bf16.msra.mxu1 %v15509_v53  ;;  %v15512_v7 = vld [vmem:[%s16508_s13 + $0x3c8] sm:$0xff]  }
 0x1fb   : > { %v14300_v61 = vpop.f32.mrf.mxu0  ;;  %14696 = vmatprep.subr.bf16.mxu0 %v15728_v0  ;;  %v14308_v45 = vpop.f32.mrf.mxu1  ;;  %14704 = vmatprep.subr.bf16.mxu1 %v15728_v0 }
 0x1fc   : > { %12153 = vst.msk [vmem:[%s17241_s19 + $0x10] sm:$0x3] %vm12144_vm2, %v12088_v31  ;;  %14698 = vmatprep.mubr.msk.bf16.mxu0 %vm15729_vm0, %v15728_v0  ;;  %12154 = vst.msk [vmem:[%s17241_s19 + $0x12] sm:$0x3] %vm12144_vm2, %v12089_v19  ;;  %14706 = vmatprep.mubr.msk.bf16.mxu1 %vm15729_vm0, %v15728_v0  ;;  %v618_v61 = vpack.c.bf16 %v490_v21, %v490_v21  ;;  %v15513_v45 = vld [vmem:[%s16508_s13 + $0x3d8] sm:$0xff]  }
 0x1fd   : > { %v5276_v38 = vpop.f32.mrf.mxu0  ;;  %v5331_v53 = vpop.f32.mrf.mxu1  ;;  %v491_v21 = vld [vmem:[%s15801_s10 + $0x78] sm:$0x3] }
 0x1fe   : > { %14697 = vmatpush3.bf16.msra.mxu0 %v15510_v10  ;;  %14705 = vmatpush3.bf16.msra.mxu1 %v15511_v55  ;;  %v15514_v55 = vld [vmem:[%s16508_s13 + $0x3c0] sm:$0xff]   ;;  %v492_v53 = vld [vmem:[%s15801_s10 + $0x7a] sm:$0x3] }
 0x1ff   : > { %v14301_v31 = vpop.f32.mrf.mxu0  ;;  %14710 = vmatprep.subr.bf16.mxu0 %v15728_v0  ;;  %v14309_v35 = vpop.f32.mrf.mxu1  ;;  %14718 = vmatprep.subr.bf16.mxu1 %v15728_v0 }
 0x201   : > { %v17383_v19 = vpop.f32.mrf.mxu0  ;;  %14699 = vmatmul.mubr.msk.bf16.vlgmr.msra.gmra.mxu0 %vm1019_vm1, %v617_v44  ;;  %v17388_v49 = vpop.f32.mrf.mxu1  ;;  %14707 = vmatmul.mubr.msk.bf16.vlgmr.msra.gmra.mxu1 %vm1019_vm1, %v618_v61  ;;  %v15515_v44 = vld [vmem:[%s16508_s13 + $0x3d0] sm:$0xff]   ;;  %v619_v61 = vpack.c.bf16 %v491_v21, %v491_v21 }
 0x202   : > { %18747 = vst [vmem:[#allocation84_spill] sm:$0xff] %v17383_v19  ;;  %v12090_v10 = vsub.f32 %v16692_v5, %v17383_v19  ;;  %18748 = vst [vmem:[#allocation85_spill] sm:$0xff] %v17388_v49  ;;  %14711 = vmatpush3.bf16.msra.mxu0 %v15512_v7  ;;  %v12091_v35 = vsub.f32 %v16698_v58, %v17388_v49  ;;  %14719 = vmatpush3.bf16.msra.mxu1 %v15513_v45  ;;  %v15516_v49 = vld [vmem:[%s16508_s13 + $0x3e8] sm:$0xff]  }
 0x203   : > { %v14316_v38 = vpop.f32.mrf.mxu0  ;;  %14712 = vmatprep.subr.bf16.mxu0 %v15728_v0  ;;  %v14324_v31 = vpop.f32.mrf.mxu1  ;;  %14720 = vmatprep.subr.bf16.mxu1 %v15728_v0 }
 0x204   : > { %12155 = vst.msk [vmem:[%s17241_s19 + $0x14] sm:$0x3] %vm12144_vm2, %v12090_v10  ;;  %14714 = vmatprep.mubr.msk.bf16.mxu0 %vm15729_vm0, %v15728_v0  ;;  %12156 = vst.msk [vmem:[%s17241_s19 + $0x16] sm:$0x3] %vm12144_vm2, %v12091_v35  ;;  %14722 = vmatprep.mubr.msk.bf16.mxu1 %vm15729_vm0, %v15728_v0  ;;  %v620_v38 = vpack.c.bf16 %v492_v53, %v492_v53  ;;  %v15517_v31 = vld [vmem:[%s16508_s13 + $0x3f8] sm:$0xff]  }
 0x205   : > { %v5386_v7 = vpop.f32.mrf.mxu0  ;;  %v5441_v45 = vpop.f32.mrf.mxu1  ;;  %v493_v53 = vld [vmem:[%s15801_s10 + $0x7c] sm:$0x3] }
 0x206   : > { %14713 = vmatpush3.bf16.msra.mxu0 %v15514_v55  ;;  %14721 = vmatpush3.bf16.msra.mxu1 %v15515_v44  ;;  %v15518_v44 = vld [vmem:[%s16508_s13 + $0x3e0] sm:$0xff]   ;;  %v494_v45 = vld [vmem:[%s15801_s10 + $0x7e] sm:$0x3] }
 0x207   : > { %v14317_v10 = vpop.f32.mrf.mxu0  ;;  %14726 = vmatprep.subr.bf16.mxu0 %v15728_v0  ;;  %v14325_v19 = vpop.f32.mrf.mxu1  ;;  %14734 = vmatprep.subr.bf16.mxu1 %v15728_v0 }
 0x209   : > { %v17411_v35 = vpop.f32.mrf.mxu0  ;;  %14715 = vmatmul.mubr.msk.bf16.vlgmr.msra.gmra.mxu0 %vm1019_vm1, %v619_v61  ;;  %v17416_v21 = vpop.f32.mrf.mxu1  ;;  %14723 = vmatmul.mubr.msk.bf16.vlgmr.msra.gmra.mxu1 %vm1019_vm1, %v620_v38  ;;  %v15519_v61 = vld [vmem:[%s16508_s13 + $0x3f0] sm:$0xff]   ;;  %v621_v38 = vpack.c.bf16 %v493_v53, %v493_v53 }
 0x20a   : > { %18749 = vst [vmem:[#allocation86_spill] sm:$0xff] %v17411_v35  ;;  %v12092_v55 = vsub.f32 %v16712_v29, %v17411_v35  ;;  %18750 = vst [vmem:[#allocation87_spill] sm:$0xff] %v17416_v21  ;;  %14727 = vmatpush3.bf16.msra.mxu0 %v15516_v49  ;;  %v12093_v19 = vsub.f32 %v16718_v42, %v17416_v21  ;;  %14735 = vmatpush3.bf16.msra.mxu1 %v15517_v31  ;;  %v15520_v21 = vld [vmem:[%s16787_s16 + $0x8] sm:$0xff]  }
 0x20b   : > { %v14332_v7 = vpop.f32.mrf.mxu0  ;;  %14728 = vmatprep.subr.bf16.mxu0 %v15728_v0  ;;  %v14340_v10 = vpop.f32.mrf.mxu1  ;;  %14736 = vmatprep.subr.bf16.mxu1 %v15728_v0 }
 0x20c   : > { %12157 = vst.msk [vmem:[%s17241_s19 + $0x18] sm:$0x3] %vm12144_vm2, %v12092_v55  ;;  %14730 = vmatprep.mubr.msk.bf16.mxu0 %vm15729_vm0, %v15728_v0  ;;  %12158 = vst.msk [vmem:[%s17241_s19 + $0x1a] sm:$0x3] %vm12144_vm2, %v12093_v19  ;;  %14738 = vmatprep.mubr.msk.bf16.mxu1 %vm15729_vm0, %v15728_v0  ;;  %v622_v7 = vpack.c.bf16 %v494_v45, %v494_v45  ;;  %v15521_v10 = vld [vmem:[%s16787_s16 + $0x18] sm:$0xff]  }
 0x20d   : > { %v5496_v49 = vpop.f32.mrf.mxu0  ;;  %v5551_v31 = vpop.f32.mrf.mxu1 }
 0x20e   : > { %14729 = vmatpush3.bf16.msra.mxu0 %v15518_v44  ;;  %14737 = vmatpush3.bf16.msra.mxu1 %v15519_v61  ;;  %v15522_v61 = vld [vmem:[%s16787_s16] sm:$0xff]   ;;  %v15523_v49 = vld [vmem:[%s16787_s16 + $0x10] sm:$0xff]  }
 0x20f   : > { %v14333_v55 = vpop.f32.mrf.mxu0  ;;  %14742 = vmatprep.subr.bf16.mxu0 %v15728_v0  ;;  %v14341_v35 = vpop.f32.mrf.mxu1  ;;  %14750 = vmatprep.subr.bf16.mxu1 %v15728_v0 }
 0x211   : > { %v17439_v19 = vpop.f32.mrf.mxu0  ;;  %14731 = vmatmul.mubr.msk.bf16.vlgmr.msra.gmra.mxu0 %vm1019_vm1, %v621_v38  ;;  %v17444_v53 = vpop.f32.mrf.mxu1  ;;  %14739 = vmatmul.mubr.msk.bf16.vlgmr.msra.gmra.mxu1 %vm1019_vm1, %v622_v7  ;;  %v688_v7 = vpack.c.bf16 %v15813_v12, %v15813_v12 }
 0x212   : > { %v12094_v44 = vsub.f32 %v16731_v36, %v17439_v19  ;;  %14743 = vmatpush3.bf16.msra.mxu0 %v15520_v21  ;;  %v12095_v45 = vsub.f32 %v16736_v40, %v17444_v53  ;;  %14751 = vmatpush3.bf16.msra.mxu1 %v15521_v10  ;;  %v687_v21 = vpack.c.bf16 %v15810_v9, %v15810_v9  ;;  %v15524_v10 = vld [vmem:[%s16787_s16 + $0x28] sm:$0xff]   ;;  %v15525_v9 = vld [vmem:[%s16787_s16 + $0x38] sm:$0xff]  }
 0x213   : > { %v14348_v35 = vpop.f32.mrf.mxu0  ;;  %14744 = vmatprep.subr.bf16.mxu0 %v15728_v0  ;;  %v14356_v38 = vpop.f32.mrf.mxu1  ;;  %14752 = vmatprep.subr.bf16.mxu1 %v15728_v0 }
 0x214   : > { %12159 = vst.msk [vmem:[%s17241_s19 + $0x1c] sm:$0x3] %vm12144_vm2, %v12094_v44  ;;  %14746 = vmatprep.mubr.msk.bf16.mxu0 %vm15729_vm0, %v15728_v0  ;;  %12160 = vst.msk [vmem:[%s17241_s19 + $0x1e] sm:$0x3] %vm12144_vm2, %v12095_v45  ;;  %14754 = vmatprep.mubr.msk.bf16.mxu1 %vm15729_vm0, %v15728_v0 }
 0x215   : > { %v5606_v31 = vpop.f32.mrf.mxu0  ;;  %v5661_v55 = vpop.f32.mrf.mxu1 }
 0x216   : > { %14745 = vmatpush3.bf16.msra.mxu0 %v15522_v61  ;;  %14753 = vmatpush3.bf16.msra.mxu1 %v15523_v49  ;;  %v15526_v49 = vld [vmem:[%s16787_s16 + $0x20] sm:$0xff]   ;;  %v15527_v55 = vld [vmem:[%s16787_s16 + $0x30] sm:$0xff]  }
 0x217   : > { %v14349_v44 = vpop.f32.mrf.mxu0  ;;  %14758 = vmatprep.subr.bf16.mxu0 %v15728_v0  ;;  %v14357_v35 = vpop.f32.mrf.mxu1  ;;  %14766 = vmatprep.subr.bf16.mxu1 %v15728_v0 }
 0x218   : > { %v690_v44 = vpack.c.bf16 %v15830_v22, %v15830_v22  ;;  %v15528_v35 = vld [vmem:[%s16787_s16 + $0x48] sm:$0xff]  }
 0x219   : > { %v17469_v45 = vpop.f32.mrf.mxu0  ;;  %14747 = vmatmul.mubr.msk.bf16.vlgmr.msra.gmra.mxu0 %vm1019_vm1, %v687_v21  ;;  %v17474_v61 = vpop.f32.mrf.mxu1  ;;  %14755 = vmatmul.mubr.msk.bf16.vlgmr.msra.gmra.mxu1 %vm1019_vm1, %v688_v7  ;;  %v689_v7 = vpack.c.bf16 %v15824_v18, %v15824_v18  ;;  %v15529_v18 = vld [vmem:[%s16787_s16 + $0x58] sm:$0xff]  }
 0x21a   : > { %v12096_v12 = vsub.f32 %v16751_v34, %v17469_v45  ;;  %14759 = vmatpush3.bf16.msra.mxu0 %v15524_v10  ;;  %v12097_v38 = vsub.f32 %v16756_v8, %v17474_v61  ;;  %14767 = vmatpush3.bf16.msra.mxu1 %v15525_v9 }
 0x21b   : > { %v14364_v31 = vpop.f32.mrf.mxu0  ;;  %14760 = vmatprep.subr.bf16.mxu0 %v15728_v0  ;;  %v14372_v21 = vpop.f32.mrf.mxu1  ;;  %14768 = vmatprep.subr.bf16.mxu1 %v15728_v0 }
 0x21c   : > { %12161 = vst.msk [vmem:[%s17241_s19 + $0x20] sm:$0x3] %vm12144_vm2, %v12096_v12  ;;  %14762 = vmatprep.mubr.msk.bf16.mxu0 %vm15729_vm0, %v15728_v0  ;;  %12162 = vst.msk [vmem:[%s17241_s19 + $0x22] sm:$0x3] %vm12144_vm2, %v12097_v38  ;;  %14770 = vmatprep.mubr.msk.bf16.mxu1 %vm15729_vm0, %v15728_v0 }
 0x21d   : > { %v5716_v10 = vpop.f32.mrf.mxu0  ;;  %v5771_v9 = vpop.f32.mrf.mxu1 }
 0x21e   : > { %14761 = vmatpush3.bf16.msra.mxu0 %v15526_v49  ;;  %14769 = vmatpush3.bf16.msra.mxu1 %v15527_v55  ;;  %v15530_v55 = vld [vmem:[%s16787_s16 + $0x40] sm:$0xff]   ;;  %v15531_v9 = vld [vmem:[%s16787_s16 + $0x50] sm:$0xff]  }
 0x21f   : > { %v14365_v12 = vpop.f32.mrf.mxu0  ;;  %14774 = vmatprep.subr.bf16.mxu0 %v15728_v0  ;;  %v14373_v31 = vpop.f32.mrf.mxu1  ;;  %14782 = vmatprep.subr.bf16.mxu1 %v15728_v0 }
 0x220   : > { %v692_v12 = vpack.c.bf16 %v15848_v32, %v15848_v32  ;;  %v15532_v31 = vld [vmem:[%s16787_s16 + $0x68] sm:$0xff]  }
 0x221   : > { %v17499_v38 = vpop.f32.mrf.mxu0  ;;  %14763 = vmatmul.mubr.msk.bf16.vlgmr.msra.gmra.mxu0 %vm1019_vm1, %v689_v7  ;;  %v17504_v49 = vpop.f32.mrf.mxu1  ;;  %14771 = vmatmul.mubr.msk.bf16.vlgmr.msra.gmra.mxu1 %vm1019_vm1, %v690_v44  ;;  %v691_v44 = vpack.c.bf16 %v15844_v30, %v15844_v30  ;;  %v15533_v30 = vld [vmem:[%s16787_s16 + $0x78] sm:$0xff]  }
 0x222   : > { %v12098_v22 = vsub.f32 %v16771_v28, %v17499_v38  ;;  %14775 = vmatpush3.bf16.msra.mxu0 %v15528_v35  ;;  %v12099_v21 = vsub.f32 %v16776_v1, %v17504_v49  ;;  %14783 = vmatpush3.bf16.msra.mxu1 %v15529_v18 }
 0x223   : > { %v14380_v10 = vpop.f32.mrf.mxu0  ;;  %14776 = vmatprep.subr.bf16.mxu0 %v15728_v0  ;;  %v14388_v7 = vpop.f32.mrf.mxu1  ;;  %14784 = vmatprep.subr.bf16.mxu1 %v15728_v0 }
 0x224   : > { %12163 = vst.msk [vmem:[%s17241_s19 + $0x24] sm:$0x3] %vm12144_vm2, %v12098_v22  ;;  %14778 = vmatprep.mubr.msk.bf16.mxu0 %vm15729_vm0, %v15728_v0  ;;  %12164 = vst.msk [vmem:[%s17241_s19 + $0x26] sm:$0x3] %vm12144_vm2, %v12099_v21  ;;  %14786 = vmatprep.mubr.msk.bf16.mxu1 %vm15729_vm0, %v15728_v0 }
 0x225   : > { %v5826_v35 = vpop.f32.mrf.mxu0  ;;  %v5881_v18 = vpop.f32.mrf.mxu1 }
 0x226   : > { %14777 = vmatpush3.bf16.msra.mxu0 %v15530_v55  ;;  %14785 = vmatpush3.bf16.msra.mxu1 %v15531_v9  ;;  %v15534_v9 = vld [vmem:[%s16787_s16 + $0x60] sm:$0xff]   ;;  %v15535_v18 = vld [vmem:[%s16787_s16 + $0x70] sm:$0xff]  }
 0x227   : > { %v14381_v22 = vpop.f32.mrf.mxu0  ;;  %14790 = vmatprep.subr.bf16.mxu0 %v15728_v0  ;;  %v14389_v10 = vpop.f32.mrf.mxu1  ;;  %14798 = vmatprep.subr.bf16.mxu1 %v15728_v0 }
 0x228   : > { %v694_v22 = vpack.c.bf16 %v15866_v43, %v15866_v43  ;;  %v15536_v10 = vld [vmem:[%s16787_s16 + $0x88] sm:$0xff]  }
 0x229   : > { %v17529_v21 = vpop.f32.mrf.mxu0  ;;  %14779 = vmatmul.mubr.msk.bf16.vlgmr.msra.gmra.mxu0 %vm1019_vm1, %v691_v44  ;;  %v17534_v55 = vpop.f32.mrf.mxu1  ;;  %14787 = vmatmul.mubr.msk.bf16.vlgmr.msra.gmra.mxu1 %vm1019_vm1, %v692_v12  ;;  %v693_v12 = vpack.c.bf16 %v15862_v39, %v15862_v39  ;;  %v15537_v39 = vld [vmem:[%s16787_s16 + $0x98] sm:$0xff]  }
 0x22a   : > { %v12100_v32 = vsub.f32 %v16797_v20, %v17529_v21  ;;  %14791 = vmatpush3.bf16.msra.mxu0 %v15532_v31  ;;  %v12101_v7 = vsub.f32 %v16802_v50, %v17534_v55  ;;  %14799 = vmatpush3.bf16.msra.mxu1 %v15533_v30 }
 0x22b   : > { %v14396_v35 = vpop.f32.mrf.mxu0  ;;  %14792 = vmatprep.subr.bf16.mxu0 %v15728_v0  ;;  %v14404_v44 = vpop.f32.mrf.mxu1  ;;  %14800 = vmatprep.subr.bf16.mxu1 %v15728_v0 }
 0x22c   : > { %12165 = vst.msk [vmem:[%s17241_s19 + $0x28] sm:$0x3] %vm12144_vm2, %v12100_v32  ;;  %14794 = vmatprep.mubr.msk.bf16.mxu0 %vm15729_vm0, %v15728_v0  ;;  %12166 = vst.msk [vmem:[%s17241_s19 + $0x2a] sm:$0x3] %vm12144_vm2, %v12101_v7  ;;  %14802 = vmatprep.mubr.msk.bf16.mxu1 %vm15729_vm0, %v15728_v0 }
 0x22d   : > { %v5936_v31 = vpop.f32.mrf.mxu0  ;;  %v5991_v30 = vpop.f32.mrf.mxu1 }
 0x22e   : > { %14793 = vmatpush3.bf16.msra.mxu0 %v15534_v9  ;;  %14801 = vmatpush3.bf16.msra.mxu1 %v15535_v18  ;;  %v15538_v18 = vld [vmem:[%s16787_s16 + $0x80] sm:$0xff]   ;;  %v15539_v30 = vld [vmem:[%s16787_s16 + $0x90] sm:$0xff]  }
 0x22f   : > { %v14397_v32 = vpop.f32.mrf.mxu0  ;;  %14806 = vmatprep.subr.bf16.mxu0 %v15728_v0  ;;  %v14405_v35 = vpop.f32.mrf.mxu1  ;;  %14814 = vmatprep.subr.bf16.mxu1 %v15728_v0 }
 0x230   : > { %v696_v32 = vpack.c.bf16 %v15882_v52, %v15882_v52  ;;  %v15540_v35 = vld [vmem:[%s16787_s16 + $0xa8] sm:$0xff]  }
 0x231   : > { %v17559_v7 = vpop.f32.mrf.mxu0  ;;  %14795 = vmatmul.mubr.msk.bf16.vlgmr.msra.gmra.mxu0 %vm1019_vm1, %v693_v12  ;;  %v17564_v9 = vpop.f32.mrf.mxu1  ;;  %14803 = vmatmul.mubr.msk.bf16.vlgmr.msra.gmra.mxu1 %vm1019_vm1, %v694_v22  ;;  %v695_v22 = vpack.c.bf16 %v15876_v48, %v15876_v48  ;;  %v15541_v48 = vld [vmem:[%s16787_s16 + $0xb8] sm:$0xff]  }
 0x232   : > { %v12102_v43 = vsub.f32 %v16817_v16, %v17559_v7  ;;  %14807 = vmatpush3.bf16.msra.mxu0 %v15536_v10  ;;  %v12103_v44 = vsub.f32 %v16822_v26, %v17564_v9  ;;  %14815 = vmatpush3.bf16.msra.mxu1 %v15537_v39 }
 0x233   : > { %v14412_v31 = vpop.f32.mrf.mxu0  ;;  %14808 = vmatprep.subr.bf16.mxu0 %v15728_v0  ;;  %v14420_v12 = vpop.f32.mrf.mxu1  ;;  %14816 = vmatprep.subr.bf16.mxu1 %v15728_v0 }
 0x234   : > { %12167 = vst.msk [vmem:[%s17241_s19 + $0x2c] sm:$0x3] %vm12144_vm2, %v12102_v43  ;;  %14810 = vmatprep.mubr.msk.bf16.mxu0 %vm15729_vm0, %v15728_v0  ;;  %12168 = vst.msk [vmem:[%s17241_s19 + $0x2e] sm:$0x3] %vm12144_vm2, %v12103_v44  ;;  %14818 = vmatprep.mubr.msk.bf16.mxu1 %vm15729_vm0, %v15728_v0 }
 0x235   : > { %v6046_v10 = vpop.f32.mrf.mxu0  ;;  %v6101_v39 = vpop.f32.mrf.mxu1 }
 0x236   : > { %14809 = vmatpush3.bf16.msra.mxu0 %v15538_v18  ;;  %14817 = vmatpush3.bf16.msra.mxu1 %v15539_v30  ;;  %v15542_v30 = vld [vmem:[%s16787_s16 + $0xa0] sm:$0xff]   ;;  %v15543_v39 = vld [vmem:[%s16787_s16 + $0xb0] sm:$0xff]  }
 0x237   : > { %v14413_v43 = vpop.f32.mrf.mxu0  ;;  %14822 = vmatprep.subr.bf16.mxu0 %v15728_v0  ;;  %v14421_v31 = vpop.f32.mrf.mxu1  ;;  %14830 = vmatprep.subr.bf16.mxu1 %v15728_v0 }
 0x238   : > { %v698_v43 = vpack.c.bf16 %v15900_v62, %v15900_v62  ;;  %v15544_v31 = vld [vmem:[%s16787_s16 + $0xc8] sm:$0xff]  }
 0x239   : > { %v17589_v44 = vpop.f32.mrf.mxu0  ;;  %14811 = vmatmul.mubr.msk.bf16.vlgmr.msra.gmra.mxu0 %vm1019_vm1, %v695_v22  ;;  %v17594_v18 = vpop.f32.mrf.mxu1  ;;  %14819 = vmatmul.mubr.msk.bf16.vlgmr.msra.gmra.mxu1 %vm1019_vm1, %v696_v32  ;;  %v697_v32 = vpack.c.bf16 %v15896_v60, %v15896_v60  ;;  %v15545_v60 = vld [vmem:[%s16787_s16 + $0xd8] sm:$0xff]  }
 0x23a   : > { %v12104_v52 = vsub.f32 %v16837_v63, %v17589_v44  ;;  %14823 = vmatpush3.bf16.msra.mxu0 %v15540_v35  ;;  %v12105_v12 = vsub.f32 %v16842_v41, %v17594_v18  ;;  %14831 = vmatpush3.bf16.msra.mxu1 %v15541_v48 }
 0x23b   : > { %v14428_v10 = vpop.f32.mrf.mxu0  ;;  %14824 = vmatprep.subr.bf16.mxu0 %v15728_v0  ;;  %v14436_v22 = vpop.f32.mrf.mxu1  ;;  %14832 = vmatprep.subr.bf16.mxu1 %v15728_v0 }
 0x23c   : > { %12169 = vst.msk [vmem:[%s17241_s19 + $0x30] sm:$0x3] %vm12144_vm2, %v12104_v52  ;;  %14826 = vmatprep.mubr.msk.bf16.mxu0 %vm15729_vm0, %v15728_v0  ;;  %12170 = vst.msk [vmem:[%s17241_s19 + $0x32] sm:$0x3] %vm12144_vm2, %v12105_v12  ;;  %14834 = vmatprep.mubr.msk.bf16.mxu1 %vm15729_vm0, %v15728_v0 }
 0x23d   : > { %v6156_v35 = vpop.f32.mrf.mxu0  ;;  %v6211_v48 = vpop.f32.mrf.mxu1 }
 0x23e   : > { %14825 = vmatpush3.bf16.msra.mxu0 %v15542_v30  ;;  %14833 = vmatpush3.bf16.msra.mxu1 %v15543_v39  ;;  %v15546_v39 = vld [vmem:[%s16787_s16 + $0xc0] sm:$0xff]   ;;  %v15547_v48 = vld [vmem:[%s16787_s16 + $0xd0] sm:$0xff]  }
 0x23f   : > { %v14429_v52 = vpop.f32.mrf.mxu0  ;;  %14838 = vmatprep.subr.bf16.mxu0 %v15728_v0  ;;  %v14437_v10 = vpop.f32.mrf.mxu1  ;;  %14846 = vmatprep.subr.bf16.mxu1 %v15728_v0 }
 0x240   : > { %v700_v52 = vpack.c.bf16 %v15924_v11, %v15924_v11  ;;  %v15548_v10 = vld [vmem:[%s16787_s16 + $0xe8] sm:$0xff]  }
 0x241   : > { %v17619_v12 = vpop.f32.mrf.mxu0  ;;  %14827 = vmatmul.mubr.msk.bf16.vlgmr.msra.gmra.mxu0 %vm1019_vm1, %v697_v32  ;;  %v17624_v30 = vpop.f32.mrf.mxu1  ;;  %14835 = vmatmul.mubr.msk.bf16.vlgmr.msra.gmra.mxu1 %vm1019_vm1, %v698_v43  ;;  %v699_v43 = vpack.c.bf16 %v15919_v6, %v15919_v6  ;;  %v15549_v6 = vld [vmem:[%s16787_s16 + $0xf8] sm:$0xff]  }
 0x242   : > { %v12106_v62 = vsub.f32 %v16857_v3, %v17619_v12  ;;  %14839 = vmatpush3.bf16.msra.mxu0 %v15544_v31  ;;  %v12107_v22 = vsub.f32 %v16862_v24, %v17624_v30  ;;  %14847 = vmatpush3.bf16.msra.mxu1 %v15545_v60 }
 0x243   : > { %v14444_v35 = vpop.f32.mrf.mxu0  ;;  %14840 = vmatprep.subr.bf16.mxu0 %v15728_v0  ;;  %v14452_v32 = vpop.f32.mrf.mxu1  ;;  %14848 = vmatprep.subr.bf16.mxu1 %v15728_v0 }
 0x244   : > { %12171 = vst.msk [vmem:[%s17241_s19 + $0x34] sm:$0x3] %vm12144_vm2, %v12106_v62  ;;  %14842 = vmatprep.mubr.msk.bf16.mxu0 %vm15729_vm0, %v15728_v0  ;;  %12172 = vst.msk [vmem:[%s17241_s19 + $0x36] sm:$0x3] %vm12144_vm2, %v12107_v22  ;;  %14850 = vmatprep.mubr.msk.bf16.mxu1 %vm15729_vm0, %v15728_v0 }
 0x245   : > { %v6266_v31 = vpop.f32.mrf.mxu0  ;;  %v6321_v60 = vpop.f32.mrf.mxu1 }
 0x246   : > { %14841 = vmatpush3.bf16.msra.mxu0 %v15546_v39  ;;  %14849 = vmatpush3.bf16.msra.mxu1 %v15547_v48  ;;  %v15550_v48 = vld [vmem:[%s16787_s16 + $0xe0] sm:$0xff]   ;;  %v15551_v60 = vld [vmem:[%s16787_s16 + $0xf0] sm:$0xff]  }
 0x247   : > { %v14445_v62 = vpop.f32.mrf.mxu0  ;;  %14854 = vmatprep.subr.bf16.mxu0 %v15728_v0  ;;  %v14453_v35 = vpop.f32.mrf.mxu1  ;;  %14862 = vmatprep.subr.bf16.mxu1 %v15728_v0 }
 0x248   : > { %v702_v62 = vpack.c.bf16 %v15946_v23, %v15946_v23  ;;  %v15552_v35 = vld [vmem:[%s16787_s16 + $0x108] sm:$0xff]  }
 0x249   : > { %v17649_v22 = vpop.f32.mrf.mxu0  ;;  %14843 = vmatmul.mubr.msk.bf16.vlgmr.msra.gmra.mxu0 %vm1019_vm1, %v699_v43  ;;  %v17654_v39 = vpop.f32.mrf.mxu1  ;;  %14851 = vmatmul.mubr.msk.bf16.vlgmr.msra.gmra.mxu1 %vm1019_vm1, %v700_v52  ;;  %v701_v52 = vpack.c.bf16 %v15937_v17, %v15937_v17  ;;  %v15553_v17 = vld [vmem:[%s16787_s16 + $0x118] sm:$0xff]  }
 0x24a   : > { %v12108_v11 = vsub.f32 %v16877_v56, %v17649_v22  ;;  %14855 = vmatpush3.bf16.msra.mxu0 %v15548_v10  ;;  %v12109_v32 = vsub.f32 %v16882_v54, %v17654_v39  ;;  %14863 = vmatpush3.bf16.msra.mxu1 %v15549_v6 }
 0x24b   : > { %v14460_v31 = vpop.f32.mrf.mxu0  ;;  %14856 = vmatprep.subr.bf16.mxu0 %v15728_v0  ;;  %v14468_v43 = vpop.f32.mrf.mxu1  ;;  %14864 = vmatprep.subr.bf16.mxu1 %v15728_v0 }
 0x24c   : > { %12173 = vst.msk [vmem:[%s17241_s19 + $0x38] sm:$0x3] %vm12144_vm2, %v12108_v11  ;;  %14858 = vmatprep.mubr.msk.bf16.mxu0 %vm15729_vm0, %v15728_v0  ;;  %12174 = vst.msk [vmem:[%s17241_s19 + $0x3a] sm:$0x3] %vm12144_vm2, %v12109_v32  ;;  %14866 = vmatprep.mubr.msk.bf16.mxu1 %vm15729_vm0, %v15728_v0 }
 0x24d   : > { %v6376_v10 = vpop.f32.mrf.mxu0  ;;  %v6431_v6 = vpop.f32.mrf.mxu1 }
 0x24e   : > { %14857 = vmatpush3.bf16.msra.mxu0 %v15550_v48  ;;  %14865 = vmatpush3.bf16.msra.mxu1 %v15551_v60  ;;  %v15554_v60 = vld [vmem:[%s16787_s16 + $0x100] sm:$0xff]   ;;  %v15555_v6 = vld [vmem:[%s16787_s16 + $0x110] sm:$0xff]  }
 0x24f   : > { %v14461_v11 = vpop.f32.mrf.mxu0  ;;  %14870 = vmatprep.subr.bf16.mxu0 %v15728_v0  ;;  %v14469_v31 = vpop.f32.mrf.mxu1  ;;  %14878 = vmatprep.subr.bf16.mxu1 %v15728_v0 }
 0x250   : > { %v18752_v11 = vld [vmem:[#allocation2_spill] sm:$0xff] }
 0x251   : > { %v17679_v32 = vpop.f32.mrf.mxu0  ;;  %14859 = vmatmul.mubr.msk.bf16.vlgmr.msra.gmra.mxu0 %vm1019_vm1, %v701_v52  ;;  %v17684_v48 = vpop.f32.mrf.mxu1  ;;  %14867 = vmatmul.mubr.msk.bf16.vlgmr.msra.gmra.mxu1 %vm1019_vm1, %v702_v62  ;;  %v703_v62 = vpack.c.bf16 %v15965_v33, %v15965_v33  ;;  %v15557_v33 = vld [vmem:[%s16787_s16 + $0x138] sm:$0xff]  }
 0x252   : > { %v12110_v23 = vsub.f32 %v16897_v14, %v17679_v32  ;;  %18751 = vst [vmem:[#allocation88_spill] sm:$0xff] %v17684_v48  ;;  %14871 = vmatpush3.bf16.msra.mxu0 %v15552_v35  ;;  %v12111_v43 = vsub.f32 %v16902_v25, %v17684_v48  ;;  %14879 = vmatpush3.bf16.msra.mxu1 %v15553_v17  ;;  %v15559_v48 = vld [vmem:[%s16787_s16 + $0x130] sm:$0xff]  }
 0x253   : > { %v14476_v10 = vpop.f32.mrf.mxu0  ;;  %14872 = vmatprep.subr.bf16.mxu0 %v15728_v0  ;;  %v14484_v52 = vpop.f32.mrf.mxu1  ;;  %14880 = vmatprep.subr.bf16.mxu1 %v15728_v0  ;;  %v704_v17 = vpack.c.bf16 %v18752_v11, %v18752_v11 }
 0x254   : > { %12175 = vst.msk [vmem:[%s17241_s19 + $0x3c] sm:$0x3] %vm12144_vm2, %v12110_v23  ;;  %14874 = vmatprep.mubr.msk.bf16.mxu0 %vm15729_vm0, %v15728_v0  ;;  %12176 = vst.msk [vmem:[%s17241_s19 + $0x3e] sm:$0x3] %vm12144_vm2, %v12111_v43  ;;  %14882 = vmatprep.mubr.msk.bf16.mxu1 %vm15729_vm0, %v15728_v0  ;;  %v15556_v23 = vld [vmem:[%s16787_s16 + $0x128] sm:$0xff]  }
 0x255   : > { %v6486_v35 = vpop.f32.mrf.mxu0  ;;  %v6541_v31 = vpop.f32.mrf.mxu1 }
 0x256   : > { %14873 = vmatpush3.bf16.msra.mxu0 %v15554_v60  ;;  %14881 = vmatpush3.bf16.msra.mxu1 %v15555_v6  ;;  %v18754_v35 = vld [vmem:[#allocation42_spill] sm:$0xff]  ;;  %v18756_v31 = vld [vmem:[#allocation43_spill] sm:$0xff] }
 0x257   : > { %v14477_v10 = vpop.f32.mrf.mxu0  ;;  %14886 = vmatprep.subr.bf16.mxu0 %v15728_v0  ;;  %v14485_v52 = vpop.f32.mrf.mxu1  ;;  %14894 = vmatprep.subr.bf16.mxu1 %v15728_v0  ;;  %v15558_v6 = vld [vmem:[%s16787_s16 + $0x120] sm:$0xff]  }
 0x259   : > { %v17709_v43 = vpop.f32.mrf.mxu0  ;;  %14875 = vmatmul.mubr.msk.bf16.vlgmr.msra.gmra.mxu0 %vm1019_vm1, %v703_v62  ;;  %v17714_v60 = vpop.f32.mrf.mxu1  ;;  %14883 = vmatmul.mubr.msk.bf16.vlgmr.msra.gmra.mxu1 %vm1019_vm1, %v704_v17  ;;  %v18757_v17 = vld [vmem:[#allocation3_spill] sm:$0xff] }
 0x25a   : > { %18753 = vst [vmem:[#allocation2_spill] sm:$0xff] %v17709_v43  ;;  %v12112_v11 = vsub.f32 %v18754_v35, %v17709_v43  ;;  %18755 = vst [vmem:[#allocation89_spill] sm:$0xff] %v17714_v60  ;;  %14887 = vmatpush3.bf16.msra.mxu0 %v15556_v23  ;;  %v12113_v10 = vsub.f32 %v18756_v31, %v17714_v60  ;;  %14895 = vmatpush3.bf16.msra.mxu1 %v15557_v33  ;;  %v18758_v33 = vld [vmem:[#allocation4_spill] sm:$0xff] }
 0x25b   : > { %v14492_v52 = vpop.f32.mrf.mxu0  ;;  %14888 = vmatprep.subr.bf16.mxu0 %v15728_v0  ;;  %v14500_v62 = vpop.f32.mrf.mxu1  ;;  %14896 = vmatprep.subr.bf16.mxu1 %v15728_v0  ;;  %v705_v23 = vpack.c.bf16 %v18757_v17, %v18757_v17  ;;  %v15561_v17 = vld [vmem:[%s16787_s16 + $0x158] sm:$0xff]   ;;  %v15563_v35 = vld [vmem:[%s16787_s16 + $0x150] sm:$0xff]  }
 0x25c   : > { %12177 = vst.msk [vmem:[%s17241_s19 + $0x40] sm:$0x3] %vm12144_vm2, %v12112_v11  ;;  %14890 = vmatprep.mubr.msk.bf16.mxu0 %vm15729_vm0, %v15728_v0  ;;  %12178 = vst.msk [vmem:[%s17241_s19 + $0x42] sm:$0x3] %vm12144_vm2, %v12113_v10  ;;  %14898 = vmatprep.mubr.msk.bf16.mxu1 %vm15729_vm0, %v15728_v0  ;;  %v706_v52 = vpack.c.bf16 %v18758_v33, %v18758_v33  ;;  %v15560_v62 = vld [vmem:[%s16787_s16 + $0x148] sm:$0xff]   ;;  %v18760_v10 = vld [vmem:[#allocation44_spill] sm:$0xff] }
 0x25d   : > { %v6596_v60 = vpop.f32.mrf.mxu0  ;;  %v6651_v11 = vpop.f32.mrf.mxu1 }
 0x25e   : > { %14889 = vmatpush3.bf16.msra.mxu0 %v15558_v6  ;;  %14897 = vmatpush3.bf16.msra.mxu1 %v15559_v48  ;;  %v15562_v48 = vld [vmem:[%s16787_s16 + $0x140] sm:$0xff]  }
 0x25f   : > { %v14493_v43 = vpop.f32.mrf.mxu0  ;;  %14902 = vmatprep.subr.bf16.mxu0 %v15728_v0  ;;  %v14501_v31 = vpop.f32.mrf.mxu1  ;;  %14910 = vmatprep.subr.bf16.mxu1 %v15728_v0 }
 0x260   : > { %v18762_v43 = vld [vmem:[#allocation45_spill] sm:$0xff] }
 0x261   : > { %v17739_v60 = vpop.f32.mrf.mxu0  ;;  %14891 = vmatmul.mubr.msk.bf16.vlgmr.msra.gmra.mxu0 %vm1019_vm1, %v705_v23  ;;  %v17744_v6 = vpop.f32.mrf.mxu1  ;;  %14899 = vmatmul.mubr.msk.bf16.vlgmr.msra.gmra.mxu1 %vm1019_vm1, %v706_v52  ;;  %v18763_v52 = vld [vmem:[#allocation5_spill] sm:$0xff] }
 0x262   : > { %18759 = vst [vmem:[#allocation3_spill] sm:$0xff] %v17739_v60  ;;  %v12114_v33 = vsub.f32 %v18760_v10, %v17739_v60  ;;  %18761 = vst [vmem:[#allocation4_spill] sm:$0xff] %v17744_v6  ;;  %14903 = vmatpush3.bf16.msra.mxu0 %v15560_v62  ;;  %v12115_v11 = vsub.f32 %v18762_v43, %v17744_v6  ;;  %14911 = vmatpush3.bf16.msra.mxu1 %v15561_v17  ;;  %v18764_v17 = vld [vmem:[#allocation6_spill] sm:$0xff]  ;;  %v15567_v10 = vld [vmem:[%s16787_s16 + $0x170] sm:$0xff]  }
 0x263   : > { %v14508_v31 = vpop.f32.mrf.mxu0  ;;  %14904 = vmatprep.subr.bf16.mxu0 %v15728_v0  ;;  %v14516_v23 = vpop.f32.mrf.mxu1  ;;  %14912 = vmatprep.subr.bf16.mxu1 %v15728_v0  ;;  %v707_v62 = vpack.c.bf16 %v18763_v52, %v18763_v52  ;;  %v15565_v52 = vld [vmem:[%s16787_s16 + $0x178] sm:$0xff]  }
 0x264   : > { %12179 = vst.msk [vmem:[%s17241_s19 + $0x44] sm:$0x3] %vm12144_vm2, %v12114_v33  ;;  %14906 = vmatprep.mubr.msk.bf16.mxu0 %vm15729_vm0, %v15728_v0  ;;  %12180 = vst.msk [vmem:[%s17241_s19 + $0x46] sm:$0x3] %vm12144_vm2, %v12115_v11  ;;  %14914 = vmatprep.mubr.msk.bf16.mxu1 %vm15729_vm0, %v15728_v0  ;;  %v708_v31 = vpack.c.bf16 %v18764_v17, %v18764_v17  ;;  %v15564_v23 = vld [vmem:[%s16787_s16 + $0x168] sm:$0xff]   ;;  %v18766_v11 = vld [vmem:[#allocation46_spill] sm:$0xff] }
 0x265   : > { %v6706_v6 = vpop.f32.mrf.mxu0  ;;  %v6761_v33 = vpop.f32.mrf.mxu1 }
 0x266   : > { %14905 = vmatpush3.bf16.msra.mxu0 %v15562_v48  ;;  %14913 = vmatpush3.bf16.msra.mxu1 %v15563_v35  ;;  %v15566_v35 = vld [vmem:[%s16787_s16 + $0x160] sm:$0xff]  }
 0x267   : > { %v14509_v60 = vpop.f32.mrf.mxu0  ;;  %14918 = vmatprep.subr.bf16.mxu0 %v15728_v0  ;;  %v14517_v43 = vpop.f32.mrf.mxu1  ;;  %14926 = vmatprep.subr.bf16.mxu1 %v15728_v0 }
 0x268   : > { %v18768_v60 = vld [vmem:[#allocation47_spill] sm:$0xff] }
 0x269   : > { %v17769_v6 = vpop.f32.mrf.mxu0  ;;  %14907 = vmatmul.mubr.msk.bf16.vlgmr.msra.gmra.mxu0 %vm1019_vm1, %v707_v62  ;;  %v17774_v48 = vpop.f32.mrf.mxu1  ;;  %14915 = vmatmul.mubr.msk.bf16.vlgmr.msra.gmra.mxu1 %vm1019_vm1, %v708_v31  ;;  %v18769_v31 = vld [vmem:[#allocation7_spill] sm:$0xff] }
 0x26a   : > { %18765 = vst [vmem:[#allocation5_spill] sm:$0xff] %v17769_v6  ;;  %v12116_v17 = vsub.f32 %v18766_v11, %v17769_v6  ;;  %18767 = vst [vmem:[#allocation6_spill] sm:$0xff] %v17774_v48  ;;  %14919 = vmatpush3.bf16.msra.mxu0 %v15564_v23  ;;  %v12117_v33 = vsub.f32 %v18768_v60, %v17774_v48  ;;  %14927 = vmatpush3.bf16.msra.mxu1 %v15565_v52  ;;  %v18770_v52 = vld [vmem:[#allocation8_spill] sm:$0xff] }
 0x26b   : > { %v14524_v43 = vpop.f32.mrf.mxu0  ;;  %14920 = vmatprep.subr.bf16.mxu0 %v15728_v0  ;;  %v14532_v62 = vpop.f32.mrf.mxu1  ;;  %14928 = vmatprep.subr.bf16.mxu1 %v15728_v0  ;;  %v709_v23 = vpack.c.bf16 %v18769_v31, %v18769_v31  ;;  %v15569_v31 = vld [vmem:[%s16787_s16 + $0x198] sm:$0xff]  }
 0x26c   : > { %12181 = vst.msk [vmem:[%s17241_s19 + $0x48] sm:$0x3] %vm12144_vm2, %v12116_v17  ;;  %14922 = vmatprep.mubr.msk.bf16.mxu0 %vm15729_vm0, %v15728_v0  ;;  %12182 = vst.msk [vmem:[%s17241_s19 + $0x4a] sm:$0x3] %vm12144_vm2, %v12117_v33  ;;  %14930 = vmatprep.mubr.msk.bf16.mxu1 %vm15729_vm0, %v15728_v0  ;;  %v710_v43 = vpack.c.bf16 %v18770_v52, %v18770_v52  ;;  %v15568_v62 = vld [vmem:[%s16787_s16 + $0x188] sm:$0xff]  }
 0x26d   : > { %v6816_v48 = vpop.f32.mrf.mxu0  ;;  %v6871_v17 = vpop.f32.mrf.mxu1 }
 0x26e   : > { %14921 = vmatpush3.bf16.msra.mxu0 %v15566_v35  ;;  %14929 = vmatpush3.bf16.msra.mxu1 %v15567_v10  ;;  %v15570_v10 = vld [vmem:[%s16787_s16 + $0x180] sm:$0xff]   ;;  %v15571_v17 = vld [vmem:[%s16787_s16 + $0x190] sm:$0xff]  }
 0x26f   : > { %v14525_v6 = vpop.f32.mrf.mxu0  ;;  %14934 = vmatprep.subr.bf16.mxu0 %v15728_v0  ;;  %v14533_v60 = vpop.f32.mrf.mxu1  ;;  %14942 = vmatprep.subr.bf16.mxu1 %v15728_v0 }
 0x270   : > { %v18773_v6 = vld [vmem:[#allocation49_spill] sm:$0xff] }
 0x271   : > { %v17799_v48 = vpop.f32.mrf.mxu0  ;;  %14923 = vmatmul.mubr.msk.bf16.vlgmr.msra.gmra.mxu0 %vm1019_vm1, %v709_v23  ;;  %v17804_v35 = vpop.f32.mrf.mxu1  ;;  %14931 = vmatmul.mubr.msk.bf16.vlgmr.msra.gmra.mxu1 %vm1019_vm1, %v710_v43  ;;  %v18774_v43 = vld [vmem:[#allocation9_spill] sm:$0xff] }
 0x272   : > { %18771 = vst [vmem:[#allocation46_spill] sm:$0xff] %v17799_v48  ;;  %v12118_v33 = vsub.f32 %v16977_v27, %v17799_v48  ;;  %18772 = vst [vmem:[#allocation7_spill] sm:$0xff] %v17804_v35  ;;  %14935 = vmatpush3.bf16.msra.mxu0 %v15568_v62  ;;  %v12119_v52 = vsub.f32 %v18773_v6, %v17804_v35  ;;  %14943 = vmatpush3.bf16.msra.mxu1 %v15569_v31  ;;  %v18775_v31 = vld [vmem:[#allocation10_spill] sm:$0xff]  ;;  %v15575_v27 = vld [vmem:[%s16787_s16 + $0x1b0] sm:$0xff]  }
 0x273   : > { %v14540_v60 = vpop.f32.mrf.mxu0  ;;  %14936 = vmatprep.subr.bf16.mxu0 %v15728_v0  ;;  %v14548_v23 = vpop.f32.mrf.mxu1  ;;  %14944 = vmatprep.subr.bf16.mxu1 %v15728_v0  ;;  %v711_v62 = vpack.c.bf16 %v18774_v43, %v18774_v43  ;;  %v15573_v43 = vld [vmem:[%s16787_s16 + $0x1b8] sm:$0xff]  }
 0x274   : > { %12183 = vst.msk [vmem:[%s17241_s19 + $0x4c] sm:$0x3] %vm12144_vm2, %v12118_v33  ;;  %14938 = vmatprep.mubr.msk.bf16.mxu0 %vm15729_vm0, %v15728_v0  ;;  %12184 = vst.msk [vmem:[%s17241_s19 + $0x4e] sm:$0x3] %vm12144_vm2, %v12119_v52  ;;  %14946 = vmatprep.mubr.msk.bf16.mxu1 %vm15729_vm0, %v15728_v0  ;;  %v712_v60 = vpack.c.bf16 %v18775_v31, %v18775_v31  ;;  %v15572_v23 = vld [vmem:[%s16787_s16 + $0x1a8] sm:$0xff]   ;;  %v18777_v52 = vld [vmem:[#allocation50_spill] sm:$0xff] }
 0x275   : > { %v6926_v35 = vpop.f32.mrf.mxu0  ;;  %v6981_v33 = vpop.f32.mrf.mxu1 }
 0x276   : > { %14937 = vmatpush3.bf16.msra.mxu0 %v15570_v10  ;;  %14945 = vmatpush3.bf16.msra.mxu1 %v15571_v17  ;;  %v18779_v17 = vld [vmem:[#allocation51_spill] sm:$0xff] }
 0x277   : > { %v14541_v48 = vpop.f32.mrf.mxu0  ;;  %14950 = vmatprep.subr.bf16.mxu0 %v15728_v0  ;;  %v14549_v6 = vpop.f32.mrf.mxu1  ;;  %14958 = vmatprep.subr.bf16.mxu1 %v15728_v0 }
 0x278   : > { %v15574_v48 = vld [vmem:[%s16787_s16 + $0x1a0] sm:$0xff]  }
 0x279   : > { %v17829_v35 = vpop.f32.mrf.mxu0  ;;  %14939 = vmatmul.mubr.msk.bf16.vlgmr.msra.gmra.mxu0 %vm1019_vm1, %v711_v62  ;;  %v17834_v10 = vpop.f32.mrf.mxu1  ;;  %14947 = vmatmul.mubr.msk.bf16.vlgmr.msra.gmra.mxu1 %vm1019_vm1, %v712_v60  ;;  %v18780_v60 = vld [vmem:[#allocation11_spill] sm:$0xff] }
 0x27a   : > { %18776 = vst [vmem:[#allocation8_spill] sm:$0xff] %v17829_v35  ;;  %v12120_v31 = vsub.f32 %v18777_v52, %v17829_v35  ;;  %18778 = vst [vmem:[#allocation9_spill] sm:$0xff] %v17834_v10  ;;  %14951 = vmatpush3.bf16.msra.mxu0 %v15572_v23  ;;  %v12121_v33 = vsub.f32 %v18779_v17, %v17834_v10  ;;  %14959 = vmatpush3.bf16.msra.mxu1 %v15573_v43  ;;  %v18781_v43 = vld [vmem:[#allocation12_spill] sm:$0xff] }
 0x27b   : > { %v14556_v6 = vpop.f32.mrf.mxu0  ;;  %14952 = vmatprep.subr.bf16.mxu0 %v15728_v0  ;;  %v14564_v62 = vpop.f32.mrf.mxu1  ;;  %14960 = vmatprep.subr.bf16.mxu1 %v15728_v0  ;;  %v713_v23 = vpack.c.bf16 %v18780_v60, %v18780_v60  ;;  %v15577_v60 = vld [vmem:[%s16787_s16 + $0x1d8] sm:$0xff]   ;;  %v15579_v52 = vld [vmem:[%s16787_s16 + $0x1d0] sm:$0xff]  }
 0x27c   : > { %12185 = vst.msk [vmem:[%s17241_s19 + $0x50] sm:$0x3] %vm12144_vm2, %v12120_v31  ;;  %14954 = vmatprep.mubr.msk.bf16.mxu0 %vm15729_vm0, %v15728_v0  ;;  %12186 = vst.msk [vmem:[%s17241_s19 + $0x52] sm:$0x3] %vm12144_vm2, %v12121_v33  ;;  %14962 = vmatprep.mubr.msk.bf16.mxu1 %vm15729_vm0, %v15728_v0  ;;  %v714_v6 = vpack.c.bf16 %v18781_v43, %v18781_v43  ;;  %v15576_v62 = vld [vmem:[%s16787_s16 + $0x1c8] sm:$0xff]   ;;  %v18783_v33 = vld [vmem:[#allocation52_spill] sm:$0xff] }
 0x27d   : > { %v7036_v10 = vpop.f32.mrf.mxu0  ;;  %v7091_v31 = vpop.f32.mrf.mxu1 }
 0x27e   : > { %14953 = vmatpush3.bf16.msra.mxu0 %v15574_v48  ;;  %14961 = vmatpush3.bf16.msra.mxu1 %v15575_v27  ;;  %v15578_v27 = vld [vmem:[%s16787_s16 + $0x1c0] sm:$0xff]  }
 0x27f   : > { %v14557_v35 = vpop.f32.mrf.mxu0  ;;  %14966 = vmatprep.subr.bf16.mxu0 %v15728_v0  ;;  %v14565_v17 = vpop.f32.mrf.mxu1  ;;  %14974 = vmatprep.subr.bf16.mxu1 %v15728_v0 }
 0x280   : > { %v18785_v35 = vld [vmem:[#allocation53_spill] sm:$0xff] }
 0x281   : > { %v17859_v10 = vpop.f32.mrf.mxu0  ;;  %14955 = vmatmul.mubr.msk.bf16.vlgmr.msra.gmra.mxu0 %vm1019_vm1, %v713_v23  ;;  %v17864_v48 = vpop.f32.mrf.mxu1  ;;  %14963 = vmatmul.mubr.msk.bf16.vlgmr.msra.gmra.mxu1 %vm1019_vm1, %v714_v6  ;;  %v18786_v6 = vld [vmem:[#allocation13_spill] sm:$0xff] }
 0x282   : > { %18782 = vst [vmem:[#allocation10_spill] sm:$0xff] %v17859_v10  ;;  %v12122_v43 = vsub.f32 %v18783_v33, %v17859_v10  ;;  %18784 = vst [vmem:[#allocation11_spill] sm:$0xff] %v17864_v48  ;;  %14967 = vmatpush3.bf16.msra.mxu0 %v15576_v62  ;;  %v12123_v31 = vsub.f32 %v18785_v35, %v17864_v48  ;;  %14975 = vmatpush3.bf16.msra.mxu1 %v15577_v60  ;;  %v18787_v60 = vld [vmem:[#allocation14_spill] sm:$0xff] }
 0x283   : > { %v14572_v17 = vpop.f32.mrf.mxu0  ;;  %14968 = vmatprep.subr.bf16.mxu0 %v15728_v0  ;;  %v14580_v23 = vpop.f32.mrf.mxu1  ;;  %14976 = vmatprep.subr.bf16.mxu1 %v15728_v0  ;;  %v715_v62 = vpack.c.bf16 %v18786_v6, %v18786_v6  ;;  %v15581_v6 = vld [vmem:[%s16787_s16 + $0x1f8] sm:$0xff]  }
 0x284   : > { %12187 = vst.msk [vmem:[%s17241_s19 + $0x54] sm:$0x3] %vm12144_vm2, %v12122_v43  ;;  %14970 = vmatprep.mubr.msk.bf16.mxu0 %vm15729_vm0, %v15728_v0  ;;  %12188 = vst.msk [vmem:[%s17241_s19 + $0x56] sm:$0x3] %vm12144_vm2, %v12123_v31  ;;  %14978 = vmatprep.mubr.msk.bf16.mxu1 %vm15729_vm0, %v15728_v0  ;;  %v716_v17 = vpack.c.bf16 %v18787_v60, %v18787_v60  ;;  %v15580_v23 = vld [vmem:[%s16787_s16 + $0x1e8] sm:$0xff]  }
 0x285   : > { %v7146_v48 = vpop.f32.mrf.mxu0  ;;  %v7201_v43 = vpop.f32.mrf.mxu1 }
 0x286   : > { %14969 = vmatpush3.bf16.msra.mxu0 %v15578_v27  ;;  %14977 = vmatpush3.bf16.msra.mxu1 %v15579_v52  ;;  %v15582_v52 = vld [vmem:[%s16787_s16 + $0x1e0] sm:$0xff]   ;;  %v15583_v43 = vld [vmem:[%s16787_s16 + $0x1f0] sm:$0xff]  }
 0x287   : > { %v14573_v10 = vpop.f32.mrf.mxu0  ;;  %14982 = vmatprep.subr.bf16.mxu0 %v15728_v0  ;;  %v14581_v35 = vpop.f32.mrf.mxu1  ;;  %14990 = vmatprep.subr.bf16.mxu1 %v15728_v0 }
 0x288   : > { %v18790_v10 = vld [vmem:[#allocation55_spill] sm:$0xff] }
 0x289   : > { %v17889_v48 = vpop.f32.mrf.mxu0  ;;  %14971 = vmatmul.mubr.msk.bf16.vlgmr.msra.gmra.mxu0 %vm1019_vm1, %v715_v62  ;;  %v17894_v27 = vpop.f32.mrf.mxu1  ;;  %14979 = vmatmul.mubr.msk.bf16.vlgmr.msra.gmra.mxu1 %vm1019_vm1, %v716_v17  ;;  %v18791_v17 = vld [vmem:[#allocation15_spill] sm:$0xff] }
 0x28a   : > { %18788 = vst [vmem:[#allocation12_spill] sm:$0xff] %v17889_v48  ;;  %v12124_v31 = vsub.f32 %v17037_v59, %v17889_v48  ;;  %18789 = vst [vmem:[#allocation52_spill] sm:$0xff] %v17894_v27  ;;  %14983 = vmatpush3.bf16.msra.mxu0 %v15580_v23  ;;  %v12125_v60 = vsub.f32 %v18790_v10, %v17894_v27  ;;  %14991 = vmatpush3.bf16.msra.mxu1 %v15581_v6  ;;  %v18792_v6 = vld [vmem:[#allocation16_spill] sm:$0xff] }
 0x28b   : > { %v14588_v35 = vpop.f32.mrf.mxu0  ;;  %14984 = vmatprep.subr.bf16.mxu0 %v15728_v0  ;;  %v14596_v62 = vpop.f32.mrf.mxu1  ;;  %14992 = vmatprep.subr.bf16.mxu1 %v15728_v0  ;;  %v717_v23 = vpack.c.bf16 %v18791_v17, %v18791_v17  ;;  %v15585_v17 = vld [vmem:[%s16787_s16 + $0x218] sm:$0xff]   ;;  %v15587_v59 = vld [vmem:[%s16787_s16 + $0x210] sm:$0xff]  }
 0x28c   : > { %12189 = vst.msk [vmem:[%s17241_s19 + $0x58] sm:$0x3] %vm12144_vm2, %v12124_v31  ;;  %14986 = vmatprep.mubr.msk.bf16.mxu0 %vm15729_vm0, %v15728_v0  ;;  %12190 = vst.msk [vmem:[%s17241_s19 + $0x5a] sm:$0x3] %vm12144_vm2, %v12125_v60  ;;  %14994 = vmatprep.mubr.msk.bf16.mxu1 %vm15729_vm0, %v15728_v0  ;;  %v718_v35 = vpack.c.bf16 %v18792_v6, %v18792_v6  ;;  %v15584_v62 = vld [vmem:[%s16787_s16 + $0x208] sm:$0xff]   ;;  %v18794_v60 = vld [vmem:[#allocation56_spill] sm:$0xff] }
 0x28d   : > { %v7256_v27 = vpop.f32.mrf.mxu0  ;;  %v7311_v31 = vpop.f32.mrf.mxu1 }
 0x28e   : > { %14985 = vmatpush3.bf16.msra.mxu0 %v15582_v52  ;;  %14993 = vmatpush3.bf16.msra.mxu1 %v15583_v43  ;;  %v18796_v43 = vld [vmem:[#allocation57_spill] sm:$0xff] }
 0x28f   : > { %v14589_v48 = vpop.f32.mrf.mxu0  ;;  %14998 = vmatprep.subr.bf16.mxu0 %v15728_v0  ;;  %v14597_v10 = vpop.f32.mrf.mxu1  ;;  %15006 = vmatprep.subr.bf16.mxu1 %v15728_v0 }
 0x290   : > { %v15586_v48 = vld [vmem:[%s16787_s16 + $0x200] sm:$0xff]  }
 0x291   : > { %v17919_v27 = vpop.f32.mrf.mxu0  ;;  %14987 = vmatmul.mubr.msk.bf16.vlgmr.msra.gmra.mxu0 %vm1019_vm1, %v717_v23  ;;  %v17924_v52 = vpop.f32.mrf.mxu1  ;;  %14995 = vmatmul.mubr.msk.bf16.vlgmr.msra.gmra.mxu1 %vm1019_vm1, %v718_v35  ;;  %v18797_v35 = vld [vmem:[#allocation17_spill] sm:$0xff] }
 0x292   : > { %18793 = vst [vmem:[#allocation13_spill] sm:$0xff] %v17919_v27  ;;  %v12126_v6 = vsub.f32 %v18794_v60, %v17919_v27  ;;  %18795 = vst [vmem:[#allocation14_spill] sm:$0xff] %v17924_v52  ;;  %14999 = vmatpush3.bf16.msra.mxu0 %v15584_v62  ;;  %v12127_v31 = vsub.f32 %v18796_v43, %v17924_v52  ;;  %15007 = vmatpush3.bf16.msra.mxu1 %v15585_v17  ;;  %v18798_v17 = vld [vmem:[#allocation18_spill] sm:$0xff]  ;;  %v15591_v60 = vld [vmem:[%s16787_s16 + $0x230] sm:$0xff]  }
 0x293   : > { %v14604_v10 = vpop.f32.mrf.mxu0  ;;  %15000 = vmatprep.subr.bf16.mxu0 %v15728_v0  ;;  %v14612_v23 = vpop.f32.mrf.mxu1  ;;  %15008 = vmatprep.subr.bf16.mxu1 %v15728_v0  ;;  %v719_v62 = vpack.c.bf16 %v18797_v35, %v18797_v35  ;;  %v15589_v35 = vld [vmem:[%s16787_s16 + $0x238] sm:$0xff]  }
 0x294   : > { %12191 = vst.msk [vmem:[%s17241_s19 + $0x5c] sm:$0x3] %vm12144_vm2, %v12126_v6  ;;  %15002 = vmatprep.mubr.msk.bf16.mxu0 %vm15729_vm0, %v15728_v0  ;;  %12192 = vst.msk [vmem:[%s17241_s19 + $0x5e] sm:$0x3] %vm12144_vm2, %v12127_v31  ;;  %15010 = vmatprep.mubr.msk.bf16.mxu1 %vm15729_vm0, %v15728_v0  ;;  %v720_v10 = vpack.c.bf16 %v18798_v17, %v18798_v17  ;;  %v15588_v23 = vld [vmem:[%s16787_s16 + $0x228] sm:$0xff]   ;;  %v18800_v31 = vld [vmem:[#allocation58_spill] sm:$0xff] }
 0x295   : > { %v7366_v52 = vpop.f32.mrf.mxu0  ;;  %v7421_v6 = vpop.f32.mrf.mxu1 }
 0x296   : > { %15001 = vmatpush3.bf16.msra.mxu0 %v15586_v48  ;;  %15009 = vmatpush3.bf16.msra.mxu1 %v15587_v59  ;;  %v15590_v59 = vld [vmem:[%s16787_s16 + $0x220] sm:$0xff]  }
 0x297   : > { %v14605_v27 = vpop.f32.mrf.mxu0  ;;  %15014 = vmatprep.subr.bf16.mxu0 %v15728_v0  ;;  %v14613_v43 = vpop.f32.mrf.mxu1  ;;  %15022 = vmatprep.subr.bf16.mxu1 %v15728_v0 }
 0x298   : > { %v18802_v27 = vld [vmem:[#allocation59_spill] sm:$0xff] }
 0x299   : > { %v17949_v52 = vpop.f32.mrf.mxu0  ;;  %15003 = vmatmul.mubr.msk.bf16.vlgmr.msra.gmra.mxu0 %vm1019_vm1, %v719_v62  ;;  %v17954_v48 = vpop.f32.mrf.mxu1  ;;  %15011 = vmatmul.mubr.msk.bf16.vlgmr.msra.gmra.mxu1 %vm1019_vm1, %v720_v10  ;;  %v18803_v10 = vld [vmem:[#allocation19_spill] sm:$0xff] }
 0x29a   : > { %18799 = vst [vmem:[#allocation15_spill] sm:$0xff] %v17949_v52  ;;  %v12128_v17 = vsub.f32 %v18800_v31, %v17949_v52  ;;  %18801 = vst [vmem:[#allocation16_spill] sm:$0xff] %v17954_v48  ;;  %15015 = vmatpush3.bf16.msra.mxu0 %v15588_v23  ;;  %v12129_v6 = vsub.f32 %v18802_v27, %v17954_v48  ;;  %15023 = vmatpush3.bf16.msra.mxu1 %v15589_v35  ;;  %v18804_v35 = vld [vmem:[#allocation20_spill] sm:$0xff] }
 0x29b   : > { %v14620_v43 = vpop.f32.mrf.mxu0  ;;  %15016 = vmatprep.subr.bf16.mxu0 %v15728_v0  ;;  %v14628_v62 = vpop.f32.mrf.mxu1  ;;  %15024 = vmatprep.subr.bf16.mxu1 %v15728_v0  ;;  %v721_v23 = vpack.c.bf16 %v18803_v10, %v18803_v10  ;;  %v15593_v10 = vld [vmem:[%s16787_s16 + $0x258] sm:$0xff]   ;;  %v15595_v31 = vld [vmem:[%s16787_s16 + $0x250] sm:$0xff]  }
 0x29c   : > { %12193 = vst.msk [vmem:[%s17241_s19 + $0x60] sm:$0x3] %vm12144_vm2, %v12128_v17  ;;  %15018 = vmatprep.mubr.msk.bf16.mxu0 %vm15729_vm0, %v15728_v0  ;;  %12194 = vst.msk [vmem:[%s17241_s19 + $0x62] sm:$0x3] %vm12144_vm2, %v12129_v6  ;;  %15026 = vmatprep.mubr.msk.bf16.mxu1 %vm15729_vm0, %v15728_v0  ;;  %v722_v43 = vpack.c.bf16 %v18804_v35, %v18804_v35  ;;  %v15592_v62 = vld [vmem:[%s16787_s16 + $0x248] sm:$0xff]   ;;  %v18806_v6 = vld [vmem:[#allocation60_spill] sm:$0xff] }
 0x29d   : > { %v7476_v48 = vpop.f32.mrf.mxu0  ;;  %v7531_v17 = vpop.f32.mrf.mxu1 }
 0x29e   : > { %15017 = vmatpush3.bf16.msra.mxu0 %v15590_v59  ;;  %15025 = vmatpush3.bf16.msra.mxu1 %v15591_v60  ;;  %v15594_v60 = vld [vmem:[%s16787_s16 + $0x240] sm:$0xff]  }
 0x29f   : > { %v14621_v52 = vpop.f32.mrf.mxu0  ;;  %15030 = vmatprep.subr.bf16.mxu0 %v15728_v0  ;;  %v14629_v27 = vpop.f32.mrf.mxu1  ;;  %15038 = vmatprep.subr.bf16.mxu1 %v15728_v0 }
 0x2a0   : > { %v18808_v52 = vld [vmem:[#allocation61_spill] sm:$0xff] }
 0x2a1   : > { %v17979_v48 = vpop.f32.mrf.mxu0  ;;  %15019 = vmatmul.mubr.msk.bf16.vlgmr.msra.gmra.mxu0 %vm1019_vm1, %v721_v23  ;;  %v17984_v59 = vpop.f32.mrf.mxu1  ;;  %15027 = vmatmul.mubr.msk.bf16.vlgmr.msra.gmra.mxu1 %vm1019_vm1, %v722_v43  ;;  %v18809_v43 = vld [vmem:[#allocation21_spill] sm:$0xff] }
 0x2a2   : > { %18805 = vst [vmem:[#allocation17_spill] sm:$0xff] %v17979_v48  ;;  %v12130_v35 = vsub.f32 %v18806_v6, %v17979_v48  ;;  %18807 = vst [vmem:[#allocation18_spill] sm:$0xff] %v17984_v59  ;;  %15031 = vmatpush3.bf16.msra.mxu0 %v15592_v62  ;;  %v12131_v17 = vsub.f32 %v18808_v52, %v17984_v59  ;;  %15039 = vmatpush3.bf16.msra.mxu1 %v15593_v10  ;;  %v18810_v10 = vld [vmem:[#allocation22_spill] sm:$0xff]  ;;  %v15599_v6 = vld [vmem:[%s16787_s16 + $0x270] sm:$0xff]  }
 0x2a3   : > { %v14636_v27 = vpop.f32.mrf.mxu0  ;;  %15032 = vmatprep.subr.bf16.mxu0 %v15728_v0  ;;  %v14644_v23 = vpop.f32.mrf.mxu1  ;;  %15040 = vmatprep.subr.bf16.mxu1 %v15728_v0  ;;  %v723_v62 = vpack.c.bf16 %v18809_v43, %v18809_v43  ;;  %v15597_v43 = vld [vmem:[%s16787_s16 + $0x278] sm:$0xff]  }
 0x2a4   : > { %12195 = vst.msk [vmem:[%s17241_s19 + $0x64] sm:$0x3] %vm12144_vm2, %v12130_v35  ;;  %15034 = vmatprep.mubr.msk.bf16.mxu0 %vm15729_vm0, %v15728_v0  ;;  %12196 = vst.msk [vmem:[%s17241_s19 + $0x66] sm:$0x3] %vm12144_vm2, %v12131_v17  ;;  %15042 = vmatprep.mubr.msk.bf16.mxu1 %vm15729_vm0, %v15728_v0  ;;  %v724_v27 = vpack.c.bf16 %v18810_v10, %v18810_v10  ;;  %v15596_v23 = vld [vmem:[%s16787_s16 + $0x268] sm:$0xff]   ;;  %v18812_v17 = vld [vmem:[#allocation62_spill] sm:$0xff] }
 0x2a5   : > { %v7586_v59 = vpop.f32.mrf.mxu0  ;;  %v7641_v35 = vpop.f32.mrf.mxu1 }
 0x2a6   : > { %15033 = vmatpush3.bf16.msra.mxu0 %v15594_v60  ;;  %15041 = vmatpush3.bf16.msra.mxu1 %v15595_v31  ;;  %v15598_v31 = vld [vmem:[%s16787_s16 + $0x260] sm:$0xff]  }
 0x2a7   : > { %v14637_v48 = vpop.f32.mrf.mxu0  ;;  %15046 = vmatprep.subr.bf16.mxu0 %v15728_v0  ;;  %v14645_v52 = vpop.f32.mrf.mxu1  ;;  %15054 = vmatprep.subr.bf16.mxu1 %v15728_v0 }
 0x2a8   : > { %v18814_v48 = vld [vmem:[#allocation63_spill] sm:$0xff] }
 0x2a9   : > { %v18009_v59 = vpop.f32.mrf.mxu0  ;;  %15035 = vmatmul.mubr.msk.bf16.vlgmr.msra.gmra.mxu0 %vm1019_vm1, %v723_v62  ;;  %v18014_v60 = vpop.f32.mrf.mxu1  ;;  %15043 = vmatmul.mubr.msk.bf16.vlgmr.msra.gmra.mxu1 %vm1019_vm1, %v724_v27  ;;  %v18815_v27 = vld [vmem:[#allocation23_spill] sm:$0xff] }
 0x2aa   : > { %18811 = vst [vmem:[#allocation19_spill] sm:$0xff] %v18009_v59  ;;  %v12132_v10 = vsub.f32 %v18812_v17, %v18009_v59  ;;  %18813 = vst [vmem:[#allocation20_spill] sm:$0xff] %v18014_v60  ;;  %15047 = vmatpush3.bf16.msra.mxu0 %v15596_v23  ;;  %v12133_v35 = vsub.f32 %v18814_v48, %v18014_v60  ;;  %15055 = vmatpush3.bf16.msra.mxu1 %v15597_v43  ;;  %v18816_v43 = vld [vmem:[#allocation24_spill] sm:$0xff] }
 0x2ab   : > { %v14652_v52 = vpop.f32.mrf.mxu0  ;;  %15048 = vmatprep.subr.bf16.mxu0 %v15728_v0  ;;  %v14660_v62 = vpop.f32.mrf.mxu1  ;;  %15056 = vmatprep.subr.bf16.mxu1 %v15728_v0  ;;  %v725_v23 = vpack.c.bf16 %v18815_v27, %v18815_v27  ;;  %v15601_v27 = vld [vmem:[%s16787_s16 + $0x298] sm:$0xff]   ;;  %v15603_v17 = vld [vmem:[%s16787_s16 + $0x290] sm:$0xff]  }
 0x2ac   : > { %12197 = vst.msk [vmem:[%s17241_s19 + $0x68] sm:$0x3] %vm12144_vm2, %v12132_v10  ;;  %15050 = vmatprep.mubr.msk.bf16.mxu0 %vm15729_vm0, %v15728_v0  ;;  %12198 = vst.msk [vmem:[%s17241_s19 + $0x6a] sm:$0x3] %vm12144_vm2, %v12133_v35  ;;  %15058 = vmatprep.mubr.msk.bf16.mxu1 %vm15729_vm0, %v15728_v0  ;;  %v726_v52 = vpack.c.bf16 %v18816_v43, %v18816_v43  ;;  %v15600_v62 = vld [vmem:[%s16787_s16 + $0x288] sm:$0xff]   ;;  %v18818_v35 = vld [vmem:[#allocation64_spill] sm:$0xff] }
 0x2ad   : > { %v7696_v60 = vpop.f32.mrf.mxu0  ;;  %v7751_v10 = vpop.f32.mrf.mxu1 }
 0x2ae   : > { %15049 = vmatpush3.bf16.msra.mxu0 %v15598_v31  ;;  %15057 = vmatpush3.bf16.msra.mxu1 %v15599_v6  ;;  %v15602_v6 = vld [vmem:[%s16787_s16 + $0x280] sm:$0xff]  }
 0x2af   : > { %v14653_v59 = vpop.f32.mrf.mxu0  ;;  %15062 = vmatprep.subr.bf16.mxu0 %v15728_v0  ;;  %v14661_v48 = vpop.f32.mrf.mxu1  ;;  %15070 = vmatprep.subr.bf16.mxu1 %v15728_v0 }
 0x2b0   : > { %v18820_v59 = vld [vmem:[#allocation65_spill] sm:$0xff] }
 0x2b1   : > { %v18039_v60 = vpop.f32.mrf.mxu0  ;;  %15051 = vmatmul.mubr.msk.bf16.vlgmr.msra.gmra.mxu0 %vm1019_vm1, %v725_v23  ;;  %v18044_v31 = vpop.f32.mrf.mxu1  ;;  %15059 = vmatmul.mubr.msk.bf16.vlgmr.msra.gmra.mxu1 %vm1019_vm1, %v726_v52  ;;  %v18821_v52 = vld [vmem:[#allocation25_spill] sm:$0xff] }
 0x2b2   : > { %18817 = vst [vmem:[#allocation21_spill] sm:$0xff] %v18039_v60  ;;  %v12134_v43 = vsub.f32 %v18818_v35, %v18039_v60  ;;  %18819 = vst [vmem:[#allocation22_spill] sm:$0xff] %v18044_v31  ;;  %15063 = vmatpush3.bf16.msra.mxu0 %v15600_v62  ;;  %v12135_v10 = vsub.f32 %v18820_v59, %v18044_v31  ;;  %15071 = vmatpush3.bf16.msra.mxu1 %v15601_v27  ;;  %v18822_v27 = vld [vmem:[#allocation26_spill] sm:$0xff]  ;;  %v15607_v35 = vld [vmem:[%s16787_s16 + $0x2b0] sm:$0xff]  }
 0x2b3   : > { %v14668_v48 = vpop.f32.mrf.mxu0  ;;  %15064 = vmatprep.subr.bf16.mxu0 %v15728_v0  ;;  %v14676_v23 = vpop.f32.mrf.mxu1  ;;  %15072 = vmatprep.subr.bf16.mxu1 %v15728_v0  ;;  %v727_v62 = vpack.c.bf16 %v18821_v52, %v18821_v52  ;;  %v15605_v52 = vld [vmem:[%s16787_s16 + $0x2b8] sm:$0xff]  }
 0x2b4   : > { %12199 = vst.msk [vmem:[%s17241_s19 + $0x6c] sm:$0x3] %vm12144_vm2, %v12134_v43  ;;  %15066 = vmatprep.mubr.msk.bf16.mxu0 %vm15729_vm0, %v15728_v0  ;;  %12200 = vst.msk [vmem:[%s17241_s19 + $0x6e] sm:$0x3] %vm12144_vm2, %v12135_v10  ;;  %15074 = vmatprep.mubr.msk.bf16.mxu1 %vm15729_vm0, %v15728_v0  ;;  %v728_v48 = vpack.c.bf16 %v18822_v27, %v18822_v27  ;;  %v15604_v23 = vld [vmem:[%s16787_s16 + $0x2a8] sm:$0xff]   ;;  %v18824_v10 = vld [vmem:[#allocation66_spill] sm:$0xff] }
 0x2b5   : > { %v7806_v31 = vpop.f32.mrf.mxu0  ;;  %v7861_v43 = vpop.f32.mrf.mxu1 }
 0x2b6   : > { %15065 = vmatpush3.bf16.msra.mxu0 %v15602_v6  ;;  %15073 = vmatpush3.bf16.msra.mxu1 %v15603_v17  ;;  %v15606_v17 = vld [vmem:[%s16787_s16 + $0x2a0] sm:$0xff]  }
 0x2b7   : > { %v14669_v60 = vpop.f32.mrf.mxu0  ;;  %15078 = vmatprep.subr.bf16.mxu0 %v15728_v0  ;;  %v14677_v59 = vpop.f32.mrf.mxu1  ;;  %15086 = vmatprep.subr.bf16.mxu1 %v15728_v0 }
 0x2b8   : > { %v18826_v60 = vld [vmem:[#allocation67_spill] sm:$0xff] }
 0x2b9   : > { %v18069_v31 = vpop.f32.mrf.mxu0  ;;  %15067 = vmatmul.mubr.msk.bf16.vlgmr.msra.gmra.mxu0 %vm1019_vm1, %v727_v62  ;;  %v18074_v6 = vpop.f32.mrf.mxu1  ;;  %15075 = vmatmul.mubr.msk.bf16.vlgmr.msra.gmra.mxu1 %vm1019_vm1, %v728_v48  ;;  %v18827_v48 = vld [vmem:[#allocation27_spill] sm:$0xff] }
 0x2ba   : > { %18823 = vst [vmem:[#allocation23_spill] sm:$0xff] %v18069_v31  ;;  %v12136_v27 = vsub.f32 %v18824_v10, %v18069_v31  ;;  %18825 = vst [vmem:[#allocation24_spill] sm:$0xff] %v18074_v6  ;;  %15079 = vmatpush3.bf16.msra.mxu0 %v15604_v23  ;;  %v12137_v43 = vsub.f32 %v18826_v60, %v18074_v6  ;;  %15087 = vmatpush3.bf16.msra.mxu1 %v15605_v52  ;;  %v18828_v52 = vld [vmem:[#allocation28_spill] sm:$0xff] }
 0x2bb   : > { %v14684_v59 = vpop.f32.mrf.mxu0  ;;  %15080 = vmatprep.subr.bf16.mxu0 %v15728_v0  ;;  %v14692_v62 = vpop.f32.mrf.mxu1  ;;  %15088 = vmatprep.subr.bf16.mxu1 %v15728_v0  ;;  %v729_v23 = vpack.c.bf16 %v18827_v48, %v18827_v48  ;;  %v15609_v48 = vld [vmem:[%s16787_s16 + $0x2d8] sm:$0xff]   ;;  %v15611_v10 = vld [vmem:[%s16787_s16 + $0x2d0] sm:$0xff]  }
 0x2bc   : > { %12201 = vst.msk [vmem:[%s17241_s19 + $0x70] sm:$0x3] %vm12144_vm2, %v12136_v27  ;;  %15082 = vmatprep.mubr.msk.bf16.mxu0 %vm15729_vm0, %v15728_v0  ;;  %12202 = vst.msk [vmem:[%s17241_s19 + $0x72] sm:$0x3] %vm12144_vm2, %v12137_v43  ;;  %15090 = vmatprep.mubr.msk.bf16.mxu1 %vm15729_vm0, %v15728_v0  ;;  %v730_v59 = vpack.c.bf16 %v18828_v52, %v18828_v52  ;;  %v15608_v62 = vld [vmem:[%s16787_s16 + $0x2c8] sm:$0xff]   ;;  %v18830_v43 = vld [vmem:[#allocation68_spill] sm:$0xff] }
 0x2bd   : > { %v7916_v6 = vpop.f32.mrf.mxu0  ;;  %v7971_v27 = vpop.f32.mrf.mxu1 }
 0x2be   : > { %15081 = vmatpush3.bf16.msra.mxu0 %v15606_v17  ;;  %15089 = vmatpush3.bf16.msra.mxu1 %v15607_v35  ;;  %v15610_v35 = vld [vmem:[%s16787_s16 + $0x2c0] sm:$0xff]  }
 0x2bf   : > { %v14685_v31 = vpop.f32.mrf.mxu0  ;;  %15094 = vmatprep.subr.bf16.mxu0 %v15728_v0  ;;  %v14693_v60 = vpop.f32.mrf.mxu1  ;;  %15102 = vmatprep.subr.bf16.mxu1 %v15728_v0 }
 0x2c0   : > { %v18832_v31 = vld [vmem:[#allocation69_spill] sm:$0xff] }
 0x2c1   : > { %v18099_v6 = vpop.f32.mrf.mxu0  ;;  %15083 = vmatmul.mubr.msk.bf16.vlgmr.msra.gmra.mxu0 %vm1019_vm1, %v729_v23  ;;  %v18104_v17 = vpop.f32.mrf.mxu1  ;;  %15091 = vmatmul.mubr.msk.bf16.vlgmr.msra.gmra.mxu1 %vm1019_vm1, %v730_v59  ;;  %v18833_v59 = vld [vmem:[#allocation29_spill] sm:$0xff] }
 0x2c2   : > { %18829 = vst [vmem:[#allocation25_spill] sm:$0xff] %v18099_v6  ;;  %v12138_v52 = vsub.f32 %v18830_v43, %v18099_v6  ;;  %18831 = vst [vmem:[#allocation26_spill] sm:$0xff] %v18104_v17  ;;  %15095 = vmatpush3.bf16.msra.mxu0 %v15608_v62  ;;  %v12139_v27 = vsub.f32 %v18832_v31, %v18104_v17  ;;  %15103 = vmatpush3.bf16.msra.mxu1 %v15609_v48  ;;  %v18834_v48 = vld [vmem:[#allocation30_spill] sm:$0xff]  ;;  %v15615_v43 = vld [vmem:[%s16787_s16 + $0x2f0] sm:$0xff]  }
 0x2c3   : > { %v14700_v60 = vpop.f32.mrf.mxu0  ;;  %15096 = vmatprep.subr.bf16.mxu0 %v15728_v0  ;;  %v14708_v23 = vpop.f32.mrf.mxu1  ;;  %15104 = vmatprep.subr.bf16.mxu1 %v15728_v0  ;;  %v731_v62 = vpack.c.bf16 %v18833_v59, %v18833_v59  ;;  %v15613_v59 = vld [vmem:[%s16787_s16 + $0x2f8] sm:$0xff]  }
 0x2c4   : > { %12203 = vst.msk [vmem:[%s17241_s19 + $0x74] sm:$0x3] %vm12144_vm2, %v12138_v52  ;;  %15098 = vmatprep.mubr.msk.bf16.mxu0 %vm15729_vm0, %v15728_v0  ;;  %12204 = vst.msk [vmem:[%s17241_s19 + $0x76] sm:$0x3] %vm12144_vm2, %v12139_v27  ;;  %15106 = vmatprep.mubr.msk.bf16.mxu1 %vm15729_vm0, %v15728_v0  ;;  %v732_v60 = vpack.c.bf16 %v18834_v48, %v18834_v48  ;;  %v15612_v23 = vld [vmem:[%s16787_s16 + $0x2e8] sm:$0xff]   ;;  %v18836_v27 = vld [vmem:[#allocation70_spill] sm:$0xff] }
 0x2c5   : > { %v8026_v17 = vpop.f32.mrf.mxu0  ;;  %v8081_v52 = vpop.f32.mrf.mxu1 }
 0x2c6   : > { %15097 = vmatpush3.bf16.msra.mxu0 %v15610_v35  ;;  %15105 = vmatpush3.bf16.msra.mxu1 %v15611_v10  ;;  %v15614_v10 = vld [vmem:[%s16787_s16 + $0x2e0] sm:$0xff]  }
 0x2c7   : > { %v14701_v6 = vpop.f32.mrf.mxu0  ;;  %15110 = vmatprep.subr.bf16.mxu0 %v15728_v0  ;;  %v14709_v31 = vpop.f32.mrf.mxu1  ;;  %15118 = vmatprep.subr.bf16.mxu1 %v15728_v0 }
 0x2c8   : > { %v18838_v6 = vld [vmem:[#allocation71_spill] sm:$0xff] }
 0x2c9   : > { %v18129_v17 = vpop.f32.mrf.mxu0  ;;  %15099 = vmatmul.mubr.msk.bf16.vlgmr.msra.gmra.mxu0 %vm1019_vm1, %v731_v62  ;;  %v18134_v35 = vpop.f32.mrf.mxu1  ;;  %15107 = vmatmul.mubr.msk.bf16.vlgmr.msra.gmra.mxu1 %vm1019_vm1, %v732_v60  ;;  %v18839_v60 = vld [vmem:[#allocation31_spill] sm:$0xff] }
 0x2ca   : > { %18835 = vst [vmem:[#allocation27_spill] sm:$0xff] %v18129_v17  ;;  %v12140_v48 = vsub.f32 %v18836_v27, %v18129_v17  ;;  %18837 = vst [vmem:[#allocation28_spill] sm:$0xff] %v18134_v35  ;;  %15111 = vmatpush3.bf16.msra.mxu0 %v15612_v23  ;;  %v12141_v52 = vsub.f32 %v18838_v6, %v18134_v35  ;;  %15119 = vmatpush3.bf16.msra.mxu1 %v15613_v59  ;;  %v18840_v59 = vld [vmem:[#allocation32_spill] sm:$0xff] }
 0x2cb   : > { %v14716_v31 = vpop.f32.mrf.mxu0  ;;  %15112 = vmatprep.subr.bf16.mxu0 %v15728_v0  ;;  %v14724_v62 = vpop.f32.mrf.mxu1  ;;  %15120 = vmatprep.subr.bf16.mxu1 %v15728_v0  ;;  %v733_v23 = vpack.c.bf16 %v18839_v60, %v18839_v60  ;;  %v15617_v60 = vld [vmem:[%s16787_s16 + $0x318] sm:$0xff]   ;;  %v15619_v27 = vld [vmem:[%s16787_s16 + $0x310] sm:$0xff]  }
 0x2cc   : > { %12205 = vst.msk [vmem:[%s17241_s19 + $0x78] sm:$0x3] %vm12144_vm2, %v12140_v48  ;;  %15114 = vmatprep.mubr.msk.bf16.mxu0 %vm15729_vm0, %v15728_v0  ;;  %12206 = vst.msk [vmem:[%s17241_s19 + $0x7a] sm:$0x3] %vm12144_vm2, %v12141_v52  ;;  %15122 = vmatprep.mubr.msk.bf16.mxu1 %vm15729_vm0, %v15728_v0  ;;  %v734_v31 = vpack.c.bf16 %v18840_v59, %v18840_v59  ;;  %v15616_v62 = vld [vmem:[%s16787_s16 + $0x308] sm:$0xff]   ;;  %v18842_v52 = vld [vmem:[#allocation72_spill] sm:$0xff] }
 0x2cd   : > { %v8136_v35 = vpop.f32.mrf.mxu0  ;;  %v8191_v48 = vpop.f32.mrf.mxu1 }
 0x2ce   : > { %15113 = vmatpush3.bf16.msra.mxu0 %v15614_v10  ;;  %15121 = vmatpush3.bf16.msra.mxu1 %v15615_v43  ;;  %v15618_v43 = vld [vmem:[%s16787_s16 + $0x300] sm:$0xff]  }
 0x2cf   : > { %v14717_v17 = vpop.f32.mrf.mxu0  ;;  %15126 = vmatprep.subr.bf16.mxu0 %v15728_v0  ;;  %v14725_v6 = vpop.f32.mrf.mxu1  ;;  %15134 = vmatprep.subr.bf16.mxu1 %v15728_v0 }
 0x2d0   : > { %v18844_v17 = vld [vmem:[#allocation73_spill] sm:$0xff] }
 0x2d1   : > { %v18159_v35 = vpop.f32.mrf.mxu0  ;;  %15115 = vmatmul.mubr.msk.bf16.vlgmr.msra.gmra.mxu0 %vm1019_vm1, %v733_v23  ;;  %v18164_v10 = vpop.f32.mrf.mxu1  ;;  %15123 = vmatmul.mubr.msk.bf16.vlgmr.msra.gmra.mxu1 %vm1019_vm1, %v734_v31  ;;  %v18845_v31 = vld [vmem:[#allocation33_spill] sm:$0xff] }
 0x2d2   : > { %18841 = vst [vmem:[#allocation29_spill] sm:$0xff] %v18159_v35  ;;  %v12142_v59 = vsub.f32 %v18842_v52, %v18159_v35  ;;  %18843 = vst [vmem:[#allocation30_spill] sm:$0xff] %v18164_v10  ;;  %15127 = vmatpush3.bf16.msra.mxu0 %v15616_v62  ;;  %v12143_v48 = vsub.f32 %v18844_v17, %v18164_v10  ;;  %15135 = vmatpush3.bf16.msra.mxu1 %v15617_v60  ;;  %v18846_v60 = vld [vmem:[#allocation34_spill] sm:$0xff] }
 0x2d3   : > { %v14732_v6 = vpop.f32.mrf.mxu0  ;;  %15128 = vmatprep.subr.bf16.mxu0 %v15728_v0  ;;  %v14740_v23 = vpop.f32.mrf.mxu1  ;;  %15136 = vmatprep.subr.bf16.mxu1 %v15728_v0  ;;  %v735_v62 = vpack.c.bf16 %v18845_v31, %v18845_v31  ;;  %v15621_v31 = vld [vmem:[%s16787_s16 + $0x338] sm:$0xff]  }
 0x2d4   : > { %12207 = vst.msk [vmem:[%s17241_s19 + $0x7c] sm:$0x3] %vm12144_vm2, %v12142_v59  ;;  %15130 = vmatprep.mubr.msk.bf16.mxu0 %vm15729_vm0, %v15728_v0  ;;  %12208 = vst.msk [vmem:[%s17241_s19 + $0x7e] sm:$0x3] %vm12144_vm2, %v12143_v48  ;;  %15138 = vmatprep.mubr.msk.bf16.mxu1 %vm15729_vm0, %v15728_v0  ;;  %v736_v6 = vpack.c.bf16 %v18846_v60, %v18846_v60  ;;  %v15620_v23 = vld [vmem:[%s16787_s16 + $0x328] sm:$0xff]  }
 0x2d5   : > { %v8246_v10 = vpop.f32.mrf.mxu0  ;;  %v8301_v59 = vpop.f32.mrf.mxu1 }
 0x2d6   : > { %15129 = vmatpush3.bf16.msra.mxu0 %v15618_v43  ;;  %15137 = vmatpush3.bf16.msra.mxu1 %v15619_v27  ;;  %v15622_v43 = vld [vmem:[%s16787_s16 + $0x320] sm:$0xff]   ;;  %v18848_v59 = vld [vmem:[#allocation35_spill] sm:$0xff] }
 0x2d7   : > { %v14733_v35 = vpop.f32.mrf.mxu0  ;;  %15142 = vmatprep.subr.bf16.mxu0 %v15728_v0  ;;  %v14741_v17 = vpop.f32.mrf.mxu1  ;;  %15150 = vmatprep.subr.bf16.mxu1 %v15728_v0 }
 0x2d8   : > { %v18847_v17 = vld [vmem:[#allocation74_spill] sm:$0xff] }
 0x2d9   : > { %v8609_v10 = vpop.f32.mrf.mxu0  ;;  %15131 = vmatmul.mubr.msk.bf16.vlgmr.msra.gmra.mxu0 %vm1019_vm1, %v735_v62  ;;  %v8664_v60 = vpop.f32.mrf.mxu1  ;;  %15139 = vmatmul.mubr.msk.bf16.vlgmr.msra.gmra.mxu1 %vm1019_vm1, %v736_v6 }
 0x2da   : > { %v12209_v48 = vsub.f32 %v8609_v10, %v16585_v15  ;;  %15143 = vmatpush3.bf16.msra.mxu0 %v15620_v23  ;;  %v12210_v27 = vsub.f32 %v8664_v60, %v16588_v46  ;;  %15151 = vmatpush3.bf16.msra.mxu1 %v15621_v31  ;;  %v15623_v15 = vld [vmem:[%s16787_s16 + $0x330] sm:$0xff]   ;;  %v737_v23 = vpack.c.bf16 %v18848_v59, %v18848_v59  ;;  %v18849_v46 = vld [vmem:[#allocation75_spill] sm:$0xff] }
 0x2db   : > { %v14748_v35 = vpop.f32.mrf.mxu0  ;;  %15144 = vmatprep.subr.bf16.mxu0 %v15728_v0  ;;  %v14756_v6 = vpop.f32.mrf.mxu1  ;;  %15152 = vmatprep.subr.bf16.mxu1 %v15728_v0  ;;  %v18850_v60 = vld [vmem:[#allocation36_spill] sm:$0xff] }
 0x2dc   : > { %v12273_v62 = vsub.f32 %v12209_v48, %v18847_v17  ;;  %15146 = vmatprep.mubr.msk.bf16.mxu0 %vm15729_vm0, %v15728_v0  ;;  %v12274_v31 = vsub.f32 %v12210_v27, %v18849_v46  ;;  %15154 = vmatprep.mubr.msk.bf16.mxu1 %vm15729_vm0, %v15728_v0  ;;  %v738_v35 = vpack.c.bf16 %v18850_v60, %v18850_v60  ;;  %v15624_v17 = vld [vmem:[%s16787_s16 + $0x348] sm:$0xff]   ;;  %v15625_v27 = vld [vmem:[%s16787_s16 + $0x358] sm:$0xff]   ;;  %v15627_v60 = vld [vmem:[%s16787_s16 + $0x350] sm:$0xff]  }
 0x2dd   : > { %v8612_v10 = vpop.f32.mrf.mxu0  ;;  %v8667_v48 = vpop.f32.mrf.mxu1 }
 0x2de   : > { %12337 = vst.msk [vmem:[%s18197_s23] sm:$0x3] %vm12144_vm2, %v12273_v62  ;;  %15145 = vmatpush3.bf16.msra.mxu0 %v15622_v43  ;;  %12338 = vst.msk [vmem:[%s18197_s23 + $0x2] sm:$0x3] %vm12144_vm2, %v12274_v31  ;;  %15153 = vmatpush3.bf16.msra.mxu1 %v15623_v15  ;;  %v15626_v43 = vld [vmem:[%s16787_s16 + $0x340] sm:$0xff]   ;;  %v18851_v48 = vld [vmem:[#allocation76_spill] sm:$0xff] }
 0x2df   : > { %v14749_v6 = vpop.f32.mrf.mxu0  ;;  %15158 = vmatprep.subr.bf16.mxu0 %v15728_v0  ;;  %v14757_v59 = vpop.f32.mrf.mxu1  ;;  %15166 = vmatprep.subr.bf16.mxu1 %v15728_v0 }
 0x2e0   : > { %v18854_v59 = vld [vmem:[#allocation38_spill] sm:$0xff] }
 0x2e1   : > { %v8719_v46 = vpop.f32.mrf.mxu0  ;;  %15147 = vmatmul.mubr.msk.bf16.vlgmr.msra.gmra.mxu0 %vm1019_vm1, %v737_v23  ;;  %v8774_v10 = vpop.f32.mrf.mxu1  ;;  %15155 = vmatmul.mubr.msk.bf16.vlgmr.msra.gmra.mxu1 %vm1019_vm1, %v738_v35 }
 0x2e2   : > { %v12211_v62 = vsub.f32 %v8719_v46, %v16607_v4  ;;  %15159 = vmatpush3.bf16.msra.mxu0 %v15624_v17  ;;  %v12212_v15 = vsub.f32 %v8774_v10, %v16612_v51  ;;  %15167 = vmatpush3.bf16.msra.mxu1 %v15625_v27  ;;  %v18852_v4 = vld [vmem:[#allocation37_spill] sm:$0xff]  ;;  %v740_v46 = vpack.c.bf16 %v18854_v59, %v18854_v59  ;;  %v15628_v10 = vld [vmem:[%s16787_s16 + $0x368] sm:$0xff]  }
 0x2e3   : > { %v14764_v31 = vpop.f32.mrf.mxu0  ;;  %15160 = vmatprep.subr.bf16.mxu0 %v15728_v0  ;;  %v14772_v23 = vpop.f32.mrf.mxu1  ;;  %15168 = vmatprep.subr.bf16.mxu1 %v15728_v0  ;;  %v739_v35 = vpack.c.bf16 %v18852_v4, %v18852_v4  ;;  %v18853_v51 = vld [vmem:[#allocation77_spill] sm:$0xff] }
 0x2e4   : > { %v12275_v6 = vsub.f32 %v12211_v62, %v18851_v48  ;;  %15162 = vmatprep.mubr.msk.bf16.mxu0 %vm15729_vm0, %v15728_v0  ;;  %v12276_v17 = vsub.f32 %v12212_v15, %v18853_v51  ;;  %15170 = vmatprep.mubr.msk.bf16.mxu1 %vm15729_vm0, %v15728_v0  ;;  %v15629_v15 = vld [vmem:[%s16787_s16 + $0x378] sm:$0xff]  }
 0x2e5   : > { %v8722_v27 = vpop.f32.mrf.mxu0  ;;  %v8777_v62 = vpop.f32.mrf.mxu1 }
 0x2e6   : > { %12339 = vst.msk [vmem:[%s18197_s23 + $0x4] sm:$0x3] %vm12144_vm2, %v12275_v6  ;;  %15161 = vmatpush3.bf16.msra.mxu0 %v15626_v43  ;;  %12340 = vst.msk [vmem:[%s18197_s23 + $0x6] sm:$0x3] %vm12144_vm2, %v12276_v17  ;;  %15169 = vmatpush3.bf16.msra.mxu1 %v15627_v60  ;;  %v15630_v43 = vld [vmem:[%s16787_s16 + $0x360] sm:$0xff]   ;;  %v15631_v17 = vld [vmem:[%s16787_s16 + $0x370] sm:$0xff]  }
 0x2e7   : > { %v14765_v31 = vpop.f32.mrf.mxu0  ;;  %15174 = vmatprep.subr.bf16.mxu0 %v15728_v0  ;;  %v14773_v48 = vpop.f32.mrf.mxu1  ;;  %15182 = vmatprep.subr.bf16.mxu1 %v15728_v0  ;;  %v18855_v27 = vld [vmem:[#allocation78_spill] sm:$0xff] }
 0x2e8   : > { %v18858_v31 = vld [vmem:[#allocation40_spill] sm:$0xff] }
 0x2e9   : > { %v8829_v23 = vpop.f32.mrf.mxu0  ;;  %15163 = vmatmul.mubr.msk.bf16.vlgmr.msra.gmra.mxu0 %vm1019_vm1, %v739_v35  ;;  %v8884_v4 = vpop.f32.mrf.mxu1  ;;  %15171 = vmatmul.mubr.msk.bf16.vlgmr.msra.gmra.mxu1 %vm1019_vm1, %v740_v46 }
 0x2ea   : > { %v12213_v6 = vsub.f32 %v8829_v23, %v16629_v37  ;;  %15175 = vmatpush3.bf16.msra.mxu0 %v15628_v10  ;;  %v12214_v60 = vsub.f32 %v8884_v4, %v16634_v57  ;;  %15183 = vmatpush3.bf16.msra.mxu1 %v15629_v15  ;;  %v18856_v37 = vld [vmem:[#allocation39_spill] sm:$0xff]  ;;  %v742_v15 = vpack.c.bf16 %v18858_v31, %v18858_v31  ;;  %v15633_v4 = vld [vmem:[%s16787_s16 + $0x398] sm:$0xff]  }
 0x2eb   : > { %v14780_v51 = vpop.f32.mrf.mxu0  ;;  %15176 = vmatprep.subr.bf16.mxu0 %v15728_v0  ;;  %v14788_v35 = vpop.f32.mrf.mxu1  ;;  %15184 = vmatprep.subr.bf16.mxu1 %v15728_v0  ;;  %v741_v46 = vpack.c.bf16 %v18856_v37, %v18856_v37  ;;  %v18857_v57 = vld [vmem:[#allocation79_spill] sm:$0xff]  ;;  %v18859_v31 = vld [vmem:[#allocation41_spill] sm:$0xff] }
 0x2ec   : > { %v12277_v59 = vsub.f32 %v12213_v6, %v18855_v27  ;;  %15178 = vmatprep.mubr.msk.bf16.mxu0 %vm15729_vm0, %v15728_v0  ;;  %v12278_v62 = vsub.f32 %v12214_v60, %v18857_v57  ;;  %15186 = vmatprep.mubr.msk.bf16.mxu1 %vm15729_vm0, %v15728_v0  ;;  %v15632_v23 = vld [vmem:[%s16787_s16 + $0x388] sm:$0xff]   ;;  %v15704_v27 = vld [vmem:[%s15795_s7 + $0x70] sm:$0x3]  ;;  %v15706_v57 = vld [vmem:[%s15795_s7 + $0x72] sm:$0x3] }
 0x2ed   : > { %v8832_v10 = vpop.f32.mrf.mxu0  ;;  %v8887_v48 = vpop.f32.mrf.mxu1 }
 0x2ee   : > { %12341 = vst.msk [vmem:[%s18197_s23 + $0x8] sm:$0x3] %vm12144_vm2, %v12277_v59  ;;  %15177 = vmatpush3.bf16.msra.mxu0 %v15630_v43  ;;  %12342 = vst.msk [vmem:[%s18197_s23 + $0xa] sm:$0x3] %vm12144_vm2, %v12278_v62  ;;  %15185 = vmatpush3.bf16.msra.mxu1 %v15631_v17  ;;  %v15705_v43 = vld [vmem:[%s15801_s10 + $0x70] sm:$0x3] }
 0x2ef   : > { %v14781_v6 = vpop.f32.mrf.mxu0  ;;  %15190 = vmatprep.subr.bf16.mxu0 %v15728_v0  ;;  %v14789_v60 = vpop.f32.mrf.mxu1  ;;  %15198 = vmatprep.subr.bf16.mxu1 %v15728_v0  ;;  %v679_v59 = vadd.f32 %v15705_v43, %v15704_v27  ;;  %v15634_v17 = vld [vmem:[%s16787_s16 + $0x380] sm:$0xff]   ;;  %v15707_v62 = vld [vmem:[%s15801_s10 + $0x72] sm:$0x3] }
 0x2f0   : > { %v680_v10 = vadd.f32 %v15707_v62, %v15706_v57  ;;  %v15635_v6 = vld [vmem:[%s16787_s16 + $0x390] sm:$0xff]   ;;  %v15637_v62 = vld [vmem:[%s16787_s16 + $0x3b8] sm:$0xff]  }
 0x2f1   : > { %v8939_v51 = vpop.f32.mrf.mxu0  ;;  %15179 = vmatmul.mubr.msk.bf16.vlgmr.msra.gmra.mxu0 %vm1019_vm1, %v741_v46  ;;  %v8994_v37 = vpop.f32.mrf.mxu1  ;;  %15187 = vmatmul.mubr.msk.bf16.vlgmr.msra.gmra.mxu1 %vm1019_vm1, %v742_v15  ;;  %v18860_v60 = vld [vmem:[#allocation80_spill] sm:$0xff]  ;;  %v18861_v15 = vld [vmem:[#allocation81_spill] sm:$0xff] }
 0x2f2   : > { %v12215_v35 = vsub.f32 %v8939_v51, %v16652_v13  ;;  %15191 = vmatpush3.bf16.msra.mxu0 %v15632_v23  ;;  %v12216_v48 = vsub.f32 %v8994_v37, %v18859_v31  ;;  %15199 = vmatpush3.bf16.msra.mxu1 %v15633_v4  ;;  %v743_v4 = vpack.c.bf16 %v679_v59, %v679_v59  ;;  %v15636_v37 = vld [vmem:[%s16787_s16 + $0x3a8] sm:$0xff]  }
 0x2f3   : > { %v14796_v46 = vpop.f32.mrf.mxu0  ;;  %15192 = vmatprep.subr.bf16.mxu0 %v15728_v0  ;;  %v14804_v51 = vpop.f32.mrf.mxu1  ;;  %15200 = vmatprep.subr.bf16.mxu1 %v15728_v0 }
 0x2f4   : > { %v12279_v13 = vsub.f32 %v12215_v35, %v18860_v60  ;;  %15194 = vmatprep.mubr.msk.bf16.mxu0 %vm15729_vm0, %v15728_v0  ;;  %v12280_v23 = vsub.f32 %v12216_v48, %v18861_v15  ;;  %15202 = vmatprep.mubr.msk.bf16.mxu1 %vm15729_vm0, %v15728_v0  ;;  %v744_v35 = vpack.c.bf16 %v680_v10, %v680_v10  ;;  %v15709_v10 = vld [vmem:[%s15801_s10 + $0x74] sm:$0x3]  ;;  %v15711_v51 = vld [vmem:[%s15801_s10 + $0x76] sm:$0x3] }
 0x2f5   : > { %v8942_v27 = vpop.f32.mrf.mxu0  ;;  %v8997_v43 = vpop.f32.mrf.mxu1 }
 0x2f6   : > { %12343 = vst.msk [vmem:[%s18197_s23 + $0xc] sm:$0x3] %vm12144_vm2, %v12279_v13  ;;  %15193 = vmatpush3.bf16.msra.mxu0 %v15634_v17  ;;  %12344 = vst.msk [vmem:[%s18197_s23 + $0xe] sm:$0x3] %vm12144_vm2, %v12280_v23  ;;  %15201 = vmatpush3.bf16.msra.mxu1 %v15635_v6  ;;  %v15708_v17 = vld [vmem:[%s15795_s7 + $0x74] sm:$0x3] }
 0x2f7   : > { %v14797_v57 = vpop.f32.mrf.mxu0  ;;  %15206 = vmatprep.subr.bf16.mxu0 %v15728_v0  ;;  %v14805_v31 = vpop.f32.mrf.mxu1  ;;  %15214 = vmatprep.subr.bf16.mxu1 %v15728_v0  ;;  %v681_v48 = vadd.f32 %v15709_v10, %v15708_v17  ;;  %v15638_v6 = vld [vmem:[%s16787_s16 + $0x3a0] sm:$0xff]   ;;  %v15710_v13 = vld [vmem:[%s15795_s7 + $0x76] sm:$0x3]  ;;  %v15640_v17 = vld [vmem:[%s16787_s16 + $0x3c8] sm:$0xff]  }
 0x2f8   : > { %v682_v15 = vadd.f32 %v15711_v51, %v15710_v13  ;;  %v18862_v43 = vld [vmem:[#allocation82_spill] sm:$0xff]  ;;  %v15713_v13 = vld [vmem:[%s15801_s10 + $0x78] sm:$0x3] }
 0x2f9   : > { %v9049_v59 = vpop.f32.mrf.mxu0  ;;  %15195 = vmatmul.mubr.msk.bf16.vlgmr.msra.gmra.mxu0 %vm1019_vm1, %v743_v4  ;;  %v9104_v60 = vpop.f32.mrf.mxu1  ;;  %15203 = vmatmul.mubr.msk.bf16.vlgmr.msra.gmra.mxu1 %vm1019_vm1, %v744_v35  ;;  %v15639_v4 = vld [vmem:[%s16787_s16 + $0x3b0] sm:$0xff]   ;;  %v18863_v35 = vld [vmem:[#allocation83_spill] sm:$0xff] }
 0x2fa   : > { %v12217_v46 = vsub.f32 %v9049_v59, %v16672_v2  ;;  %15207 = vmatpush3.bf16.msra.mxu0 %v15636_v37  ;;  %v12218_v23 = vsub.f32 %v9104_v60, %v16678_v47  ;;  %15215 = vmatpush3.bf16.msra.mxu1 %v15637_v62  ;;  %v745_v47 = vpack.c.bf16 %v681_v48, %v681_v48 }
 0x2fb   : > { %v14812_v27 = vpop.f32.mrf.mxu0  ;;  %15208 = vmatprep.subr.bf16.mxu0 %v15728_v0  ;;  %v14820_v57 = vpop.f32.mrf.mxu1  ;;  %15216 = vmatprep.subr.bf16.mxu1 %v15728_v0  ;;  %v746_v59 = vpack.c.bf16 %v682_v15, %v682_v15 }
 0x2fc   : > { %v12281_v2 = vsub.f32 %v12217_v46, %v18862_v43  ;;  %15210 = vmatprep.mubr.msk.bf16.mxu0 %vm15729_vm0, %v15728_v0  ;;  %v12282_v37 = vsub.f32 %v12218_v23, %v18863_v35  ;;  %15218 = vmatprep.mubr.msk.bf16.mxu1 %vm15729_vm0, %v15728_v0  ;;  %v15641_v46 = vld [vmem:[%s16787_s16 + $0x3d8] sm:$0xff]   ;;  %v15642_v27 = vld [vmem:[%s16787_s16 + $0x3c0] sm:$0xff]  }
 0x2fd   : > { %v9052_v31 = vpop.f32.mrf.mxu0  ;;  %v9107_v62 = vpop.f32.mrf.mxu1  ;;  %v15715_v43 = vld [vmem:[%s15801_s10 + $0x7a] sm:$0x3] }
 0x2fe   : > { %12345 = vst.msk [vmem:[%s18197_s23 + $0x10] sm:$0x3] %vm12144_vm2, %v12281_v2  ;;  %15209 = vmatpush3.bf16.msra.mxu0 %v15638_v6  ;;  %12346 = vst.msk [vmem:[%s18197_s23 + $0x12] sm:$0x3] %vm12144_vm2, %v12282_v37  ;;  %15217 = vmatpush3.bf16.msra.mxu1 %v15639_v4  ;;  %v15712_v6 = vld [vmem:[%s15795_s7 + $0x78] sm:$0x3] }
 0x2ff   : > { %v14813_v10 = vpop.f32.mrf.mxu0  ;;  %15222 = vmatprep.subr.bf16.mxu0 %v15728_v0  ;;  %v14821_v60 = vpop.f32.mrf.mxu1  ;;  %15230 = vmatprep.subr.bf16.mxu1 %v15728_v0  ;;  %v683_v51 = vadd.f32 %v15713_v13, %v15712_v6  ;;  %v15714_v4 = vld [vmem:[%s15795_s7 + $0x7a] sm:$0x3]  ;;  %v15643_v37 = vld [vmem:[%s16787_s16 + $0x3d0] sm:$0xff]  }
 0x300   : > { %v684_v2 = vadd.f32 %v15715_v43, %v15714_v4  ;;  %v18864_v31 = vld [vmem:[#allocation84_spill] sm:$0xff]  ;;  %v18865_v62 = vld [vmem:[#allocation85_spill] sm:$0xff]  ;;  %v15644_v60 = vld [vmem:[%s16787_s16 + $0x3e8] sm:$0xff]  }
 0x301   : > { %v9159_v48 = vpop.f32.mrf.mxu0  ;;  %15211 = vmatmul.mubr.msk.bf16.vlgmr.msra.gmra.mxu0 %vm1019_vm1, %v745_v47  ;;  %v9214_v23 = vpop.f32.mrf.mxu1  ;;  %15219 = vmatmul.mubr.msk.bf16.vlgmr.msra.gmra.mxu1 %vm1019_vm1, %v746_v59  ;;  %v15645_v6 = vld [vmem:[%s16787_s16 + $0x3f8] sm:$0xff]  }
 0x302   : > { %v12219_v15 = vsub.f32 %v9159_v48, %v16692_v5  ;;  %15223 = vmatpush3.bf16.msra.mxu0 %v15640_v17  ;;  %v12220_v57 = vsub.f32 %v9214_v23, %v16698_v58  ;;  %15231 = vmatpush3.bf16.msra.mxu1 %v15641_v46  ;;  %v747_v58 = vpack.c.bf16 %v683_v51, %v683_v51  ;;  %v15717_v23 = vld [vmem:[%s15801_s10 + $0x7c] sm:$0x3] }
 0x303   : > { %v14828_v35 = vpop.f32.mrf.mxu0  ;;  %15224 = vmatprep.subr.bf16.mxu0 %v15728_v0  ;;  %v14836_v47 = vpop.f32.mrf.mxu1  ;;  %15232 = vmatprep.subr.bf16.mxu1 %v15728_v0  ;;  %v748_v46 = vpack.c.bf16 %v684_v2, %v684_v2  ;;  %v15646_v2 = vld [vmem:[%s16787_s16 + $0x3e0] sm:$0xff]  }
 0x304   : > { %v12283_v5 = vsub.f32 %v12219_v15, %v18864_v31  ;;  %15226 = vmatprep.mubr.msk.bf16.mxu0 %vm15729_vm0, %v15728_v0  ;;  %v12284_v59 = vsub.f32 %v12220_v57, %v18865_v62  ;;  %15234 = vmatprep.mubr.msk.bf16.mxu1 %vm15729_vm0, %v15728_v0  ;;  %v15716_v15 = vld [vmem:[%s15795_s7 + $0x7c] sm:$0x3]  ;;  %v15718_v57 = vld [vmem:[%s15795_s7 + $0x7e] sm:$0x3]  ;;  %v15647_v47 = vld [vmem:[%s16787_s16 + $0x3f0] sm:$0xff]  }
 0x305   : > { %v9162_v17 = vpop.f32.mrf.mxu0  ;;  %v9217_v10 = vpop.f32.mrf.mxu1  ;;  %v15719_v35 = vld [vmem:[%s15801_s10 + $0x7e] sm:$0x3]  ;;  %v18866_v62 = vld [vmem:[#allocation86_spill] sm:$0xff] }
 0x306   : > { %12347 = vst.msk [vmem:[%s18197_s23 + $0x14] sm:$0x3] %vm12144_vm2, %v12283_v5  ;;  %15225 = vmatpush3.bf16.msra.mxu0 %v15642_v27  ;;  %12348 = vst.msk [vmem:[%s18197_s23 + $0x16] sm:$0x3] %vm12144_vm2, %v12284_v59  ;;  %15233 = vmatpush3.bf16.msra.mxu1 %v15643_v37  ;;  %v685_v27 = vadd.f32 %v15717_v23, %v15716_v15  ;;  %v686_v37 = vadd.f32 %v15719_v35, %v15718_v57  ;;  %v18867_v17 = vld [vmem:[#allocation87_spill] sm:$0xff] }
 0x307   : > { %v14829_v48 = vpop.f32.mrf.mxu0  ;;  %15238 = vmatprep.subr.bf16.mxu0 %v15728_v0  ;;  %v14837_v13 = vpop.f32.mrf.mxu1  ;;  %15246 = vmatprep.subr.bf16.mxu1 %v15728_v0 }
 0x309   : > { %v9269_v51 = vpop.f32.mrf.mxu0  ;;  %15227 = vmatmul.mubr.msk.bf16.vlgmr.msra.gmra.mxu0 %vm1019_vm1, %v747_v58  ;;  %v9324_v43 = vpop.f32.mrf.mxu1  ;;  %15235 = vmatmul.mubr.msk.bf16.vlgmr.msra.gmra.mxu1 %vm1019_vm1, %v748_v46 }
 0x30a   : > { %v12221_v4 = vsub.f32 %v9269_v51, %v16712_v29  ;;  %15239 = vmatpush3.bf16.msra.mxu0 %v15644_v60  ;;  %v12222_v31 = vsub.f32 %v9324_v43, %v16718_v42  ;;  %15247 = vmatpush3.bf16.msra.mxu1 %v15645_v6  ;;  %v749_v42 = vpack.c.bf16 %v685_v27, %v685_v27 }
 0x30b   : > { %v14844_v5 = vpop.f32.mrf.mxu0  ;;  %15240 = vmatprep.subr.bf16.mxu0 %v15728_v0  ;;  %v14852_v29 = vpop.f32.mrf.mxu1  ;;  %15248 = vmatprep.subr.bf16.mxu1 %v15728_v0  ;;  %v750_v60 = vpack.c.bf16 %v686_v37, %v686_v37 }
 0x30c   : > { %v12285_v59 = vsub.f32 %v12221_v4, %v18866_v62  ;;  %15242 = vmatprep.mubr.msk.bf16.mxu0 %vm15729_vm0, %v15728_v0  ;;  %v12286_v58 = vsub.f32 %v12222_v31, %v18867_v17  ;;  %15250 = vmatprep.mubr.msk.bf16.mxu1 %vm15729_vm0, %v15728_v0 }
 0x30d   : > { %v9272_v10 = vpop.f32.mrf.mxu0  ;;  %v9327_v46 = vpop.f32.mrf.mxu1 }
 0x30e   : > { %12349 = vst.msk [vmem:[%s18197_s23 + $0x18] sm:$0x3] %vm12144_vm2, %v12285_v59  ;;  %15241 = vmatpush3.bf16.msra.mxu0 %v15646_v2  ;;  %12350 = vst.msk [vmem:[%s18197_s23 + $0x1a] sm:$0x3] %vm12144_vm2, %v12286_v58  ;;  %15249 = vmatpush3.bf16.msra.mxu1 %v15647_v47 }
 0x30f   : > { %v14845_v48 = vpop.f32.mrf.mxu0  ;;  %v14853_v6 = vpop.f32.mrf.mxu1 }
 0x311   : > { %v9379_v13 = vpop.f32.mrf.mxu0  ;;  %15243 = vmatmul.mubr.msk.bf16.vlgmr.msra.gmra.mxu0 %vm1019_vm1, %v749_v42  ;;  %v9434_v15 = vpop.f32.mrf.mxu1  ;;  %15251 = vmatmul.mubr.msk.bf16.vlgmr.msra.gmra.mxu1 %vm1019_vm1, %v750_v60 }
 0x312   : > { %v12223_v51 = vsub.f32 %v9379_v13, %v16731_v36  ;;  %v12224_v0 = vsub.f32 %v9434_v15, %v16736_v40 }
 0x313   : > { %v14860_v23 = vpop.f32.mrf.mxu0  ;;  %v14868_v4 = vpop.f32.mrf.mxu1 }
 0x314   : > { %v12287_v27 = vsub.f32 %v12223_v51, %v17439_v19  ;;  %v12288_v43 = vsub.f32 %v12224_v0, %v17444_v53 }
 0x315   : > { %v9382_v2 = vpop.f32.mrf.mxu0  ;;  %v9437_v57 = vpop.f32.mrf.mxu1 }
 0x316   : > { %12351 = vst.msk [vmem:[%s18197_s23 + $0x1c] sm:$0x3] %vm12144_vm2, %v12287_v27  ;;  %12352 = vst.msk [vmem:[%s18197_s23 + $0x1e] sm:$0x3] %vm12144_vm2, %v12288_v43 }
 0x317   : > { %v14861_v36 = vpop.f32.mrf.mxu0  ;;  %v14869_v35 = vpop.f32.mrf.mxu1 }
 0x319   : > { %v9489_v37 = vpop.f32.mrf.mxu0  ;;  %v9544_v40 = vpop.f32.mrf.mxu1 }
 0x31a   : > { %v12225_v31 = vsub.f32 %v9489_v37, %v16751_v34  ;;  %v12226_v5 = vsub.f32 %v9544_v40, %v16756_v8 }
 0x31b   : > { %v14876_v19 = vpop.f32.mrf.mxu0  ;;  %v14884_v53 = vpop.f32.mrf.mxu1 }
 0x31c   : > { %v12289_v47 = vsub.f32 %v12225_v31, %v17469_v45  ;;  %v12290_v62 = vsub.f32 %v12226_v5, %v17474_v61 }
 0x31d   : > { %v9492_v59 = vpop.f32.mrf.mxu0  ;;  %v9547_v29 = vpop.f32.mrf.mxu1 }
 0x31e   : > { %12353 = vst.msk [vmem:[%s18197_s23 + $0x20] sm:$0x3] %vm12144_vm2, %v12289_v47  ;;  %12354 = vst.msk [vmem:[%s18197_s23 + $0x22] sm:$0x3] %vm12144_vm2, %v12290_v62 }
 0x31f   : > { %v14877_v17 = vpop.f32.mrf.mxu0  ;;  %v14885_v58 = vpop.f32.mrf.mxu1 }
 0x321   : > { %v9599_v34 = vpop.f32.mrf.mxu0  ;;  %v9654_v8 = vpop.f32.mrf.mxu1 }
 0x322   : > { %v12227_v10 = vsub.f32 %v9599_v34, %v16771_v28  ;;  %v12228_v42 = vsub.f32 %v9654_v8, %v16776_v1 }
 0x323   : > { %v14892_v45 = vpop.f32.mrf.mxu0  ;;  %v14900_v61 = vpop.f32.mrf.mxu1 }
 0x324   : > { %v12291_v46 = vsub.f32 %v12227_v10, %v17499_v38  ;;  %v12292_v60 = vsub.f32 %v12228_v42, %v17504_v49 }
 0x325   : > { %v9602_v48 = vpop.f32.mrf.mxu0  ;;  %v9657_v6 = vpop.f32.mrf.mxu1 }
 0x326   : > { %12355 = vst.msk [vmem:[%s18197_s23 + $0x24] sm:$0x3] %vm12144_vm2, %v12291_v46  ;;  %12356 = vst.msk [vmem:[%s18197_s23 + $0x26] sm:$0x3] %vm12144_vm2, %v12292_v60 }
 0x327   : > { %v14893_v13 = vpop.f32.mrf.mxu0  ;;  %v14901_v51 = vpop.f32.mrf.mxu1 }
 0x329   : > { %v9709_v28 = vpop.f32.mrf.mxu0  ;;  %v9764_v1 = vpop.f32.mrf.mxu1 }
 0x32a   : > { %v12229_v15 = vsub.f32 %v9709_v28, %v16797_v20  ;;  %v12230_v0 = vsub.f32 %v9764_v1, %v16802_v50 }
 0x32b   : > { %v14908_v38 = vpop.f32.mrf.mxu0  ;;  %v14916_v49 = vpop.f32.mrf.mxu1 }
 0x32c   : > { %v12293_v23 = vsub.f32 %v12229_v15, %v17529_v21  ;;  %v12294_v27 = vsub.f32 %v12230_v0, %v17534_v55 }
 0x32d   : > { %v9712_v4 = vpop.f32.mrf.mxu0  ;;  %v9767_v43 = vpop.f32.mrf.mxu1 }
 0x32e   : > { %12357 = vst.msk [vmem:[%s18197_s23 + $0x28] sm:$0x3] %vm12144_vm2, %v12293_v23  ;;  %12358 = vst.msk [vmem:[%s18197_s23 + $0x2a] sm:$0x3] %vm12144_vm2, %v12294_v27  ;;  %v18868_v43 = vld [vmem:[#allocation88_spill] sm:$0xff] }
 0x32f   : > { %v14909_v2 = vpop.f32.mrf.mxu0  ;;  %v14917_v57 = vpop.f32.mrf.mxu1 }
 0x331   : > { %v9819_v20 = vpop.f32.mrf.mxu0  ;;  %v9874_v50 = vpop.f32.mrf.mxu1 }
 0x332   : > { %v12231_v36 = vsub.f32 %v9819_v20, %v16817_v16  ;;  %v12232_v35 = vsub.f32 %v9874_v50, %v16822_v26 }
 0x333   : > { %v14924_v21 = vpop.f32.mrf.mxu0  ;;  %v14932_v55 = vpop.f32.mrf.mxu1 }
 0x334   : > { %v12295_v37 = vsub.f32 %v12231_v36, %v17559_v7  ;;  %v12296_v31 = vsub.f32 %v12232_v35, %v17564_v9  ;;  %v18869_v35 = vld [vmem:[#allocation42_spill] sm:$0xff] }
 0x335   : > { %v9822_v40 = vpop.f32.mrf.mxu0  ;;  %v9877_v5 = vpop.f32.mrf.mxu1 }
 0x336   : > { %12359 = vst.msk [vmem:[%s18197_s23 + $0x2c] sm:$0x3] %vm12144_vm2, %v12295_v37  ;;  %12360 = vst.msk [vmem:[%s18197_s23 + $0x2e] sm:$0x3] %vm12144_vm2, %v12296_v31  ;;  %v18870_v37 = vld [vmem:[#allocation43_spill] sm:$0xff]  ;;  %v18871_v31 = vld [vmem:[#allocation2_spill] sm:$0xff] }
 0x337   : > { %v14925_v19 = vpop.f32.mrf.mxu0  ;;  %v14933_v47 = vpop.f32.mrf.mxu1 }
 0x338   : > { %v18872_v19 = vld [vmem:[#allocation89_spill] sm:$0xff] }
 0x339   : > { %v9929_v16 = vpop.f32.mrf.mxu0  ;;  %v9984_v26 = vpop.f32.mrf.mxu1 }
 0x33a   : > { %v12233_v53 = vsub.f32 %v9929_v16, %v16837_v63  ;;  %v12234_v62 = vsub.f32 %v9984_v26, %v16842_v41 }
 0x33b   : > { %v14940_v7 = vpop.f32.mrf.mxu0  ;;  %v14948_v9 = vpop.f32.mrf.mxu1 }
 0x33c   : > { %v12297_v59 = vsub.f32 %v12233_v53, %v17589_v44  ;;  %v12298_v29 = vsub.f32 %v12234_v62, %v17594_v18 }
 0x33d   : > { %v9932_v17 = vpop.f32.mrf.mxu0  ;;  %v9987_v58 = vpop.f32.mrf.mxu1 }
 0x33e   : > { %12361 = vst.msk [vmem:[%s18197_s23 + $0x30] sm:$0x3] %vm12144_vm2, %v12297_v59  ;;  %12362 = vst.msk [vmem:[%s18197_s23 + $0x32] sm:$0x3] %vm12144_vm2, %v12298_v29  ;;  %v18873_v59 = vld [vmem:[#allocation44_spill] sm:$0xff]  ;;  %v18874_v17 = vld [vmem:[#allocation45_spill] sm:$0xff] }
 0x33f   : > { %v14941_v34 = vpop.f32.mrf.mxu0  ;;  %v14949_v10 = vpop.f32.mrf.mxu1 }
 0x340   : > { %v18875_v10 = vld [vmem:[#allocation3_spill] sm:$0xff] }
 0x341   : > { %v10039_v63 = vpop.f32.mrf.mxu0  ;;  %v10094_v41 = vpop.f32.mrf.mxu1 }
 0x342   : > { %v12235_v8 = vsub.f32 %v10039_v63, %v16857_v3  ;;  %v12236_v42 = vsub.f32 %v10094_v41, %v16862_v24  ;;  %v18876_v41 = vld [vmem:[#allocation4_spill] sm:$0xff] }
 0x343   : > { %v14956_v44 = vpop.f32.mrf.mxu0  ;;  %v14964_v18 = vpop.f32.mrf.mxu1 }
 0x344   : > { %v12299_v45 = vsub.f32 %v12235_v8, %v17619_v12  ;;  %v12300_v46 = vsub.f32 %v12236_v42, %v17624_v30 }
 0x345   : > { %v10042_v61 = vpop.f32.mrf.mxu0  ;;  %v10097_v60 = vpop.f32.mrf.mxu1 }
 0x346   : > { %12363 = vst.msk [vmem:[%s18197_s23 + $0x34] sm:$0x3] %vm12144_vm2, %v12299_v45  ;;  %12364 = vst.msk [vmem:[%s18197_s23 + $0x36] sm:$0x3] %vm12144_vm2, %v12300_v46 }
 0x347   : > { %v14957_v48 = vpop.f32.mrf.mxu0  ;;  %v14965_v6 = vpop.f32.mrf.mxu1 }
 0x348   : > { %v18877_v6 = vld [vmem:[#allocation47_spill] sm:$0xff] }
 0x349   : > { %v10149_v3 = vpop.f32.mrf.mxu0  ;;  %v10204_v24 = vpop.f32.mrf.mxu1 }
 0x34a   : > { %v12237_v13 = vsub.f32 %v10149_v3, %v16877_v56  ;;  %v12238_v51 = vsub.f32 %v10204_v24, %v16882_v54  ;;  %v18878_v24 = vld [vmem:[#allocation5_spill] sm:$0xff] }
 0x34b   : > { %v14972_v12 = vpop.f32.mrf.mxu0  ;;  %v14980_v30 = vpop.f32.mrf.mxu1 }
 0x34c   : > { %v12301_v28 = vsub.f32 %v12237_v13, %v17649_v22  ;;  %v12302_v15 = vsub.f32 %v12238_v51, %v17654_v39 }
 0x34d   : > { %v10152_v1 = vpop.f32.mrf.mxu0  ;;  %v10207_v0 = vpop.f32.mrf.mxu1 }
 0x34e   : > { %12365 = vst.msk [vmem:[%s18197_s23 + $0x38] sm:$0x3] %vm12144_vm2, %v12301_v28  ;;  %12366 = vst.msk [vmem:[%s18197_s23 + $0x3a] sm:$0x3] %vm12144_vm2, %v12302_v15  ;;  %v18879_v28 = vld [vmem:[#allocation6_spill] sm:$0xff] }
 0x34f   : > { %v14973_v38 = vpop.f32.mrf.mxu0  ;;  %v14981_v23 = vpop.f32.mrf.mxu1 }
 0x350   : > { %v18880_v23 = vld [vmem:[#allocation48_spill] sm:$0xff] }
 0x351   : > { %v10259_v56 = vpop.f32.mrf.mxu0  ;;  %v10314_v54 = vpop.f32.mrf.mxu1 }
 0x352   : > { %v12239_v49 = vsub.f32 %v10259_v56, %v16897_v14  ;;  %v12240_v27 = vsub.f32 %v10314_v54, %v16902_v25  ;;  %v18881_v54 = vld [vmem:[#allocation49_spill] sm:$0xff] }
 0x353   : > { %v14988_v22 = vpop.f32.mrf.mxu0  ;;  %v14996_v39 = vpop.f32.mrf.mxu1 }
 0x354   : > { %v12303_v4 = vsub.f32 %v12239_v49, %v17679_v32  ;;  %v12304_v2 = vsub.f32 %v12240_v27, %v18868_v43 }
 0x355   : > { %v10262_v57 = vpop.f32.mrf.mxu0  ;;  %v10317_v20 = vpop.f32.mrf.mxu1 }
 0x356   : > { %12367 = vst.msk [vmem:[%s18197_s23 + $0x3c] sm:$0x3] %vm12144_vm2, %v12303_v4  ;;  %12368 = vst.msk [vmem:[%s18197_s23 + $0x3e] sm:$0x3] %vm12144_vm2, %v12304_v2  ;;  %v18882_v4 = vld [vmem:[#allocation46_spill] sm:$0xff]  ;;  %v18883_v2 = vld [vmem:[#allocation7_spill] sm:$0xff] }
 0x357   : > { %v14989_v36 = vpop.f32.mrf.mxu0  ;;  %v14997_v50 = vpop.f32.mrf.mxu1 }
 0x359   : > { %v10369_v14 = vpop.f32.mrf.mxu0  ;;  %v10424_v25 = vpop.f32.mrf.mxu1 }
 0x35a   : > { %v12241_v21 = vsub.f32 %v10369_v14, %v18869_v35  ;;  %v12242_v55 = vsub.f32 %v10424_v25, %v18870_v37 }
 0x35b   : > { %v15004_v32 = vpop.f32.mrf.mxu0  ;;  %v15012_v5 = vpop.f32.mrf.mxu1 }
 0x35c   : > { %v12305_v40 = vsub.f32 %v12241_v21, %v18871_v31  ;;  %v12306_v47 = vsub.f32 %v12242_v55, %v18872_v19  ;;  %v18884_v21 = vld [vmem:[#allocation50_spill] sm:$0xff]  ;;  %v18885_v55 = vld [vmem:[#allocation51_spill] sm:$0xff] }
 0x35d   : > { %v10372_v16 = vpop.f32.mrf.mxu0  ;;  %v10427_v53 = vpop.f32.mrf.mxu1 }
 0x35e   : > { %12369 = vst.msk [vmem:[%s18197_s23 + $0x40] sm:$0x3] %vm12144_vm2, %v12305_v40  ;;  %12370 = vst.msk [vmem:[%s18197_s23 + $0x42] sm:$0x3] %vm12144_vm2, %v12306_v47  ;;  %v18886_v40 = vld [vmem:[#allocation8_spill] sm:$0xff]  ;;  %v18887_v47 = vld [vmem:[#allocation9_spill] sm:$0xff] }
 0x35f   : > { %v15005_v26 = vpop.f32.mrf.mxu0  ;;  %v15013_v62 = vpop.f32.mrf.mxu1 }
 0x361   : > { %v10479_v7 = vpop.f32.mrf.mxu0  ;;  %v10534_v29 = vpop.f32.mrf.mxu1 }
 0x362   : > { %v12243_v9 = vsub.f32 %v10479_v7, %v18873_v59  ;;  %v12244_v58 = vsub.f32 %v10534_v29, %v18874_v17  ;;  %v18888_v17 = vld [vmem:[#allocation53_spill] sm:$0xff] }
 0x363   : > { %v15020_v34 = vpop.f32.mrf.mxu0  ;;  %v15028_v8 = vpop.f32.mrf.mxu1 }
 0x364   : > { %v12307_v63 = vsub.f32 %v12243_v9, %v18875_v10  ;;  %v12308_v42 = vsub.f32 %v12244_v58, %v18876_v41  ;;  %v18889_v10 = vld [vmem:[#allocation10_spill] sm:$0xff]  ;;  %v18890_v41 = vld [vmem:[#allocation11_spill] sm:$0xff] }
 0x365   : > { %v10482_v44 = vpop.f32.mrf.mxu0  ;;  %v10537_v45 = vpop.f32.mrf.mxu1 }
 0x366   : > { %12371 = vst.msk [vmem:[%s18197_s23 + $0x44] sm:$0x3] %vm12144_vm2, %v12307_v63  ;;  %12372 = vst.msk [vmem:[%s18197_s23 + $0x46] sm:$0x3] %vm12144_vm2, %v12308_v42 }
 0x367   : > { %v15021_v18 = vpop.f32.mrf.mxu0  ;;  %v15029_v46 = vpop.f32.mrf.mxu1 }
 0x369   : > { %v10589_v61 = vpop.f32.mrf.mxu0  ;;  %v10644_v48 = vpop.f32.mrf.mxu1 }
 0x36a   : > { %v12245_v60 = vsub.f32 %v10589_v61, %v18766_v11  ;;  %v12246_v3 = vsub.f32 %v10644_v48, %v18877_v6  ;;  %v18891_v61 = vld [vmem:[#allocation54_spill] sm:$0xff]  ;;  %v18892_v6 = vld [vmem:[#allocation55_spill] sm:$0xff] }
 0x36b   : > { %v15036_v13 = vpop.f32.mrf.mxu0  ;;  %v15044_v12 = vpop.f32.mrf.mxu1 }
 0x36c   : > { %v12309_v51 = vsub.f32 %v12245_v60, %v18878_v24  ;;  %v12310_v30 = vsub.f32 %v12246_v3, %v18879_v28  ;;  %v18893_v24 = vld [vmem:[#allocation12_spill] sm:$0xff] }
 0x36d   : > { %v10592_v15 = vpop.f32.mrf.mxu0  ;;  %v10647_v1 = vpop.f32.mrf.mxu1  ;;  %v18894_v28 = vld [vmem:[#allocation52_spill] sm:$0xff] }
 0x36e   : > { %12373 = vst.msk [vmem:[%s18197_s23 + $0x48] sm:$0x3] %vm12144_vm2, %v12309_v51  ;;  %12374 = vst.msk [vmem:[%s18197_s23 + $0x4a] sm:$0x3] %vm12144_vm2, %v12310_v30 }
 0x36f   : > { %v15037_v0 = vpop.f32.mrf.mxu0  ;;  %v15045_v38 = vpop.f32.mrf.mxu1 }
 0x371   : > { %v10699_v11 = vpop.f32.mrf.mxu0  ;;  %v10754_v49 = vpop.f32.mrf.mxu1 }
 0x372   : > { %v12247_v56 = vsub.f32 %v10699_v11, %v18880_v23  ;;  %v12248_v27 = vsub.f32 %v10754_v49, %v18881_v54  ;;  %v18895_v23 = vld [vmem:[#allocation56_spill] sm:$0xff]  ;;  %v18896_v54 = vld [vmem:[#allocation57_spill] sm:$0xff] }
 0x373   : > { %v15052_v22 = vpop.f32.mrf.mxu0  ;;  %v15060_v43 = vpop.f32.mrf.mxu1 }
 0x374   : > { %v12311_v39 = vsub.f32 %v12247_v56, %v18882_v4  ;;  %v12312_v57 = vsub.f32 %v12248_v27, %v18883_v2  ;;  %v18897_v4 = vld [vmem:[#allocation13_spill] sm:$0xff]  ;;  %v18898_v2 = vld [vmem:[#allocation14_spill] sm:$0xff] }
 0x375   : > { %v10702_v20 = vpop.f32.mrf.mxu0  ;;  %v10757_v36 = vpop.f32.mrf.mxu1 }
 0x376   : > { %12375 = vst.msk [vmem:[%s18197_s23 + $0x4c] sm:$0x3] %vm12144_vm2, %v12311_v39  ;;  %12376 = vst.msk [vmem:[%s18197_s23 + $0x4e] sm:$0x3] %vm12144_vm2, %v12312_v57 }
 0x377   : > { %v15053_v50 = vpop.f32.mrf.mxu0  ;;  %v15061_v14 = vpop.f32.mrf.mxu1 }
 0x379   : > { %v10809_v35 = vpop.f32.mrf.mxu0  ;;  %v10864_v37 = vpop.f32.mrf.mxu1 }
 0x37a   : > { %v12249_v25 = vsub.f32 %v10809_v35, %v18884_v21  ;;  %v12250_v32 = vsub.f32 %v10864_v37, %v18885_v55  ;;  %v18899_v21 = vld [vmem:[#allocation58_spill] sm:$0xff]  ;;  %v18900_v55 = vld [vmem:[#allocation59_spill] sm:$0xff] }
 0x37b   : > { %v15068_v31 = vpop.f32.mrf.mxu0  ;;  %v15076_v19 = vpop.f32.mrf.mxu1 }
 0x37c   : > { %v12313_v5 = vsub.f32 %v12249_v25, %v18886_v40  ;;  %v12314_v16 = vsub.f32 %v12250_v32, %v18887_v47  ;;  %v18901_v40 = vld [vmem:[#allocation15_spill] sm:$0xff]  ;;  %v18902_v47 = vld [vmem:[#allocation16_spill] sm:$0xff] }
 0x37d   : > { %v10812_v53 = vpop.f32.mrf.mxu0  ;;  %v10867_v26 = vpop.f32.mrf.mxu1 }
 0x37e   : > { %12377 = vst.msk [vmem:[%s18197_s23 + $0x50] sm:$0x3] %vm12144_vm2, %v12313_v5  ;;  %12378 = vst.msk [vmem:[%s18197_s23 + $0x52] sm:$0x3] %vm12144_vm2, %v12314_v16 }
 0x37f   : > { %v15069_v62 = vpop.f32.mrf.mxu0  ;;  %v15077_v7 = vpop.f32.mrf.mxu1 }
 0x381   : > { %v10919_v59 = vpop.f32.mrf.mxu0  ;;  %v10974_v29 = vpop.f32.mrf.mxu1 }
 0x382   : > { %v12251_v9 = vsub.f32 %v10919_v59, %v18783_v33  ;;  %v12252_v58 = vsub.f32 %v10974_v29, %v18888_v17 }
 0x383   : > { %v15084_v34 = vpop.f32.mrf.mxu0  ;;  %v15092_v8 = vpop.f32.mrf.mxu1 }
 0x384   : > { %v12315_v63 = vsub.f32 %v12251_v9, %v18889_v10  ;;  %v12316_v42 = vsub.f32 %v12252_v58, %v18890_v41  ;;  %v18903_v9 = vld [vmem:[#allocation60_spill] sm:$0xff]  ;;  %v18904_v58 = vld [vmem:[#allocation61_spill] sm:$0xff] }
 0x385   : > { %v10922_v44 = vpop.f32.mrf.mxu0  ;;  %v10977_v45 = vpop.f32.mrf.mxu1 }
 0x386   : > { %12379 = vst.msk [vmem:[%s18197_s23 + $0x54] sm:$0x3] %vm12144_vm2, %v12315_v63  ;;  %12380 = vst.msk [vmem:[%s18197_s23 + $0x56] sm:$0x3] %vm12144_vm2, %v12316_v42  ;;  %v18905_v63 = vld [vmem:[#allocation17_spill] sm:$0xff]  ;;  %v18906_v42 = vld [vmem:[#allocation18_spill] sm:$0xff] }
 0x387   : > { %v15085_v18 = vpop.f32.mrf.mxu0  ;;  %v15093_v46 = vpop.f32.mrf.mxu1 }
 0x389   : > { %v11029_v33 = vpop.f32.mrf.mxu0  ;;  %v11084_v48 = vpop.f32.mrf.mxu1 }
 0x38a   : > { %v12253_v60 = vsub.f32 %v11029_v33, %v18891_v61  ;;  %v12254_v3 = vsub.f32 %v11084_v48, %v18892_v6 }
 0x38b   : > { %v15100_v13 = vpop.f32.mrf.mxu0  ;;  %v15108_v12 = vpop.f32.mrf.mxu1 }
 0x38c   : > { %v12317_v51 = vsub.f32 %v12253_v60, %v18893_v24  ;;  %v12318_v30 = vsub.f32 %v12254_v3, %v18894_v28  ;;  %v18907_v60 = vld [vmem:[#allocation62_spill] sm:$0xff]  ;;  %v18908_v3 = vld [vmem:[#allocation63_spill] sm:$0xff] }
 0x38d   : > { %v11032_v15 = vpop.f32.mrf.mxu0  ;;  %v11087_v1 = vpop.f32.mrf.mxu1 }
 0x38e   : > { %12381 = vst.msk [vmem:[%s18197_s23 + $0x58] sm:$0x3] %vm12144_vm2, %v12317_v51  ;;  %12382 = vst.msk [vmem:[%s18197_s23 + $0x5a] sm:$0x3] %vm12144_vm2, %v12318_v30  ;;  %v18909_v51 = vld [vmem:[#allocation19_spill] sm:$0xff]  ;;  %v18910_v30 = vld [vmem:[#allocation20_spill] sm:$0xff] }
 0x38f   : > { %v15101_v0 = vpop.f32.mrf.mxu0  ;;  %v15109_v38 = vpop.f32.mrf.mxu1 }
 0x391   : > { %v11139_v11 = vpop.f32.mrf.mxu0  ;;  %v11194_v49 = vpop.f32.mrf.mxu1 }
 0x392   : > { %v12255_v56 = vsub.f32 %v11139_v11, %v18895_v23  ;;  %v12256_v27 = vsub.f32 %v11194_v49, %v18896_v54 }
 0x393   : > { %v15116_v22 = vpop.f32.mrf.mxu0  ;;  %v15124_v43 = vpop.f32.mrf.mxu1 }
 0x394   : > { %v12319_v39 = vsub.f32 %v12255_v56, %v18897_v4  ;;  %v12320_v57 = vsub.f32 %v12256_v27, %v18898_v2  ;;  %v18911_v56 = vld [vmem:[#allocation64_spill] sm:$0xff]  ;;  %v18912_v27 = vld [vmem:[#allocation65_spill] sm:$0xff] }
 0x395   : > { %v11142_v20 = vpop.f32.mrf.mxu0  ;;  %v11197_v36 = vpop.f32.mrf.mxu1 }
 0x396   : > { %12383 = vst.msk [vmem:[%s18197_s23 + $0x5c] sm:$0x3] %vm12144_vm2, %v12319_v39  ;;  %12384 = vst.msk [vmem:[%s18197_s23 + $0x5e] sm:$0x3] %vm12144_vm2, %v12320_v57  ;;  %v18913_v39 = vld [vmem:[#allocation21_spill] sm:$0xff]  ;;  %v18914_v57 = vld [vmem:[#allocation22_spill] sm:$0xff] }
 0x397   : > { %v15117_v50 = vpop.f32.mrf.mxu0  ;;  %v15125_v14 = vpop.f32.mrf.mxu1 }
 0x399   : > { %v11249_v35 = vpop.f32.mrf.mxu0  ;;  %v11304_v37 = vpop.f32.mrf.mxu1 }
 0x39a   : > { %v12257_v25 = vsub.f32 %v11249_v35, %v18899_v21  ;;  %v12258_v32 = vsub.f32 %v11304_v37, %v18900_v55 }
 0x39b   : > { %v15132_v31 = vpop.f32.mrf.mxu0  ;;  %v15140_v19 = vpop.f32.mrf.mxu1 }
 0x39c   : > { %v12321_v5 = vsub.f32 %v12257_v25, %v18901_v40  ;;  %v12322_v16 = vsub.f32 %v12258_v32, %v18902_v47  ;;  %v18915_v25 = vld [vmem:[#allocation66_spill] sm:$0xff]  ;;  %v18916_v32 = vld [vmem:[#allocation67_spill] sm:$0xff] }
 0x39d   : > { %v11252_v53 = vpop.f32.mrf.mxu0  ;;  %v11307_v26 = vpop.f32.mrf.mxu1 }
 0x39e   : > { %12385 = vst.msk [vmem:[%s18197_s23 + $0x60] sm:$0x3] %vm12144_vm2, %v12321_v5  ;;  %12386 = vst.msk [vmem:[%s18197_s23 + $0x62] sm:$0x3] %vm12144_vm2, %v12322_v16  ;;  %v18917_v5 = vld [vmem:[#allocation23_spill] sm:$0xff]  ;;  %v18918_v16 = vld [vmem:[#allocation24_spill] sm:$0xff] }
 0x39f   : > { %v15133_v62 = vpop.f32.mrf.mxu0  ;;  %v15141_v7 = vpop.f32.mrf.mxu1 }
 0x3a1   : > { %v11359_v59 = vpop.f32.mrf.mxu0  ;;  %v11414_v17 = vpop.f32.mrf.mxu1 }
 0x3a2   : > { %v12259_v29 = vsub.f32 %v11359_v59, %v18903_v9  ;;  %v12260_v34 = vsub.f32 %v11414_v17, %v18904_v58 }
 0x3a3   : > { %v15148_v10 = vpop.f32.mrf.mxu0  ;;  %v15156_v41 = vpop.f32.mrf.mxu1 }
 0x3a4   : > { %v12323_v8 = vsub.f32 %v12259_v29, %v18905_v63  ;;  %v12324_v44 = vsub.f32 %v12260_v34, %v18906_v42  ;;  %v18919_v29 = vld [vmem:[#allocation68_spill] sm:$0xff]  ;;  %v18920_v34 = vld [vmem:[#allocation69_spill] sm:$0xff] }
 0x3a5   : > { %v11362_v45 = vpop.f32.mrf.mxu0  ;;  %v11417_v18 = vpop.f32.mrf.mxu1 }
 0x3a6   : > { %12387 = vst.msk [vmem:[%s18197_s23 + $0x64] sm:$0x3] %vm12144_vm2, %v12323_v8  ;;  %12388 = vst.msk [vmem:[%s18197_s23 + $0x66] sm:$0x3] %vm12144_vm2, %v12324_v44  ;;  %v18921_v8 = vld [vmem:[#allocation25_spill] sm:$0xff]  ;;  %v18922_v44 = vld [vmem:[#allocation26_spill] sm:$0xff] }
 0x3a7   : > { %v15149_v46 = vpop.f32.mrf.mxu0  ;;  %v15157_v33 = vpop.f32.mrf.mxu1 }
 0x3a9   : > { %v11469_v61 = vpop.f32.mrf.mxu0  ;;  %v11524_v6 = vpop.f32.mrf.mxu1 }
 0x3aa   : > { %v12261_v48 = vsub.f32 %v11469_v61, %v18907_v60  ;;  %v12262_v13 = vsub.f32 %v11524_v6, %v18908_v3 }
 0x3ab   : > { %v15164_v24 = vpop.f32.mrf.mxu0  ;;  %v15172_v28 = vpop.f32.mrf.mxu1 }
 0x3ac   : > { %v12325_v12 = vsub.f32 %v12261_v48, %v18909_v51  ;;  %v12326_v15 = vsub.f32 %v12262_v13, %v18910_v30  ;;  %v18923_v48 = vld [vmem:[#allocation70_spill] sm:$0xff]  ;;  %v18924_v13 = vld [vmem:[#allocation71_spill] sm:$0xff] }
 0x3ad   : > { %v11472_v1 = vpop.f32.mrf.mxu0  ;;  %v11527_v0 = vpop.f32.mrf.mxu1 }
 0x3ae   : > { %12389 = vst.msk [vmem:[%s18197_s23 + $0x68] sm:$0x3] %vm12144_vm2, %v12325_v12  ;;  %12390 = vst.msk [vmem:[%s18197_s23 + $0x6a] sm:$0x3] %vm12144_vm2, %v12326_v15  ;;  %v18925_v12 = vld [vmem:[#allocation27_spill] sm:$0xff]  ;;  %v18926_v15 = vld [vmem:[#allocation28_spill] sm:$0xff] }
 0x3af   : > { %v15165_v38 = vpop.f32.mrf.mxu0  ;;  %v15173_v11 = vpop.f32.mrf.mxu1 }
 0x3b1   : > { %v11579_v23 = vpop.f32.mrf.mxu0  ;;  %v11634_v54 = vpop.f32.mrf.mxu1 }
 0x3b2   : > { %v12263_v49 = vsub.f32 %v11579_v23, %v18911_v56  ;;  %v12264_v22 = vsub.f32 %v11634_v54, %v18912_v27  ;;  %v18927_v27 = vld [vmem:[#allocation73_spill] sm:$0xff] }
 0x3b3   : > { %v15180_v4 = vpop.f32.mrf.mxu0  ;;  %v15188_v2 = vpop.f32.mrf.mxu1 }
 0x3b4   : > { %v12327_v43 = vsub.f32 %v12263_v49, %v18913_v39  ;;  %v12328_v20 = vsub.f32 %v12264_v22, %v18914_v57  ;;  %v18928_v39 = vld [vmem:[#allocation29_spill] sm:$0xff]  ;;  %v18929_v57 = vld [vmem:[#allocation30_spill] sm:$0xff] }
 0x3b5   : > { %v11582_v36 = vpop.f32.mrf.mxu0  ;;  %v11637_v50 = vpop.f32.mrf.mxu1 }
 0x3b6   : > { %12391 = vst.msk [vmem:[%s18197_s23 + $0x6c] sm:$0x3] %vm12144_vm2, %v12327_v43  ;;  %12392 = vst.msk [vmem:[%s18197_s23 + $0x6e] sm:$0x3] %vm12144_vm2, %v12328_v20 }
 0x3b7   : > { %v15181_v14 = vpop.f32.mrf.mxu0  ;;  %v15189_v35 = vpop.f32.mrf.mxu1 }
 0x3b9   : > { %v11689_v21 = vpop.f32.mrf.mxu0  ;;  %v11744_v55 = vpop.f32.mrf.mxu1 }
 0x3ba   : > { %v12265_v37 = vsub.f32 %v11689_v21, %v18915_v25  ;;  %v12266_v31 = vsub.f32 %v11744_v55, %v18916_v32 }
 0x3bb   : > { %v15196_v40 = vpop.f32.mrf.mxu0  ;;  %v15204_v47 = vpop.f32.mrf.mxu1 }
 0x3bc   : > { %v12329_v19 = vsub.f32 %v12265_v37, %v18917_v5  ;;  %v12330_v53 = vsub.f32 %v12266_v31, %v18918_v16 }
 0x3bd   : > { %v11692_v26 = vpop.f32.mrf.mxu0  ;;  %v11747_v62 = vpop.f32.mrf.mxu1 }
 0x3be   : > { %12393 = vst.msk [vmem:[%s18197_s23 + $0x70] sm:$0x3] %vm12144_vm2, %v12329_v19  ;;  %12394 = vst.msk [vmem:[%s18197_s23 + $0x72] sm:$0x3] %vm12144_vm2, %v12330_v53 }
 0x3bf   : > { %v15197_v7 = vpop.f32.mrf.mxu0  ;;  %v15205_v59 = vpop.f32.mrf.mxu1 }
 0x3c1   : > { %v11799_v9 = vpop.f32.mrf.mxu0  ;;  %v11854_v58 = vpop.f32.mrf.mxu1 }
 0x3c2   : > { %v12267_v17 = vsub.f32 %v11799_v9, %v18919_v29  ;;  %v12268_v10 = vsub.f32 %v11854_v58, %v18920_v34 }
 0x3c3   : > { %v15212_v63 = vpop.f32.mrf.mxu0  ;;  %v15220_v42 = vpop.f32.mrf.mxu1 }
 0x3c4   : > { %v12331_v41 = vsub.f32 %v12267_v17, %v18921_v8  ;;  %v12332_v45 = vsub.f32 %v12268_v10, %v18922_v44 }
 0x3c5   : > { %v11802_v18 = vpop.f32.mrf.mxu0  ;;  %v11857_v46 = vpop.f32.mrf.mxu1 }
 0x3c6   : > { %12395 = vst.msk [vmem:[%s18197_s23 + $0x74] sm:$0x3] %vm12144_vm2, %v12331_v41  ;;  %12396 = vst.msk [vmem:[%s18197_s23 + $0x76] sm:$0x3] %vm12144_vm2, %v12332_v45 }
 0x3c7   : > { %v15213_v33 = vpop.f32.mrf.mxu0  ;;  %v15221_v61 = vpop.f32.mrf.mxu1 }
 0x3c9   : > { %v11909_v60 = vpop.f32.mrf.mxu0  ;;  %v11964_v3 = vpop.f32.mrf.mxu1 }
 0x3ca   : > { %v12269_v6 = vsub.f32 %v11909_v60, %v18923_v48  ;;  %v12270_v24 = vsub.f32 %v11964_v3, %v18924_v13 }
 0x3cb   : > { %v15228_v51 = vpop.f32.mrf.mxu0  ;;  %v15236_v30 = vpop.f32.mrf.mxu1 }
 0x3cc   : > { %v12333_v28 = vsub.f32 %v12269_v6, %v18925_v12  ;;  %v12334_v1 = vsub.f32 %v12270_v24, %v18926_v15 }
 0x3cd   : > { %v11912_v0 = vpop.f32.mrf.mxu0  ;;  %v11967_v38 = vpop.f32.mrf.mxu1 }
 0x3ce   : > { %12397 = vst.msk [vmem:[%s18197_s23 + $0x78] sm:$0x3] %vm12144_vm2, %v12333_v28  ;;  %12398 = vst.msk [vmem:[%s18197_s23 + $0x7a] sm:$0x3] %vm12144_vm2, %v12334_v1 }
 0x3cf   : > { %v15229_v11 = vpop.f32.mrf.mxu0  ;;  %v15237_v23 = vpop.f32.mrf.mxu1 }
 0x3d1   : > { %v12019_v56 = vpop.f32.mrf.mxu0  ;;  %v12074_v54 = vpop.f32.mrf.mxu1 }
 0x3d2   : > { %v12271_v49 = vsub.f32 %v12019_v56, %v18842_v52  ;;  %v12272_v22 = vsub.f32 %v12074_v54, %v18927_v27 }
 0x3d3   : > { %v15244_v4 = vpop.f32.mrf.mxu0  ;;  %v15252_v2 = vpop.f32.mrf.mxu1 }
 0x3d4   : > { %v12335_v43 = vsub.f32 %v12271_v49, %v18928_v39  ;;  %v12336_v20 = vsub.f32 %v12272_v22, %v18929_v57 }
 0x3d5   : > { %v12022_v36 = vpop.f32.mrf.mxu0  ;;  %v12077_v50 = vpop.f32.mrf.mxu1 }
 0x3d6   : > { %12399 = vst.msk [vmem:[%s18197_s23 + $0x7c] sm:$0x3] %vm12144_vm2, %v12335_v43  ;;  %12400 = vst.msk [vmem:[%s18197_s23 + $0x7e] sm:$0x3] %vm12144_vm2, %v12336_v20 }
 0x3d7   : > { %v15245_v14 = vpop.f32.mrf.mxu0  ;;  %v15253_v35 = vpop.f32.mrf.mxu1 }
 0x3d8 PF: > { %s17_s21 = sadd.s32 1, %s15726_s21  }
 0x3d9   : > { %p14_p4 = scmp.ge.s32.totalorder %s17_s21, 4  }
 0x3db   :  { %16 = sbr.rel (!%p14_p4) target bundleno = 1 (0x1), region = 94 }

</bundles_post_ra>
